<compile_context>
chip_gen: v7x
topology: tpu7x:2x2x1
jax: 0.10.0
libtpu: 0.0.40
codegen_flags: <defaults>
</compile_context>

<pallas_src>
import functools

import numpy as np
import jax
import jax.numpy as jnp
from jax.experimental import pallas as pl
from jax.experimental.pallas import tpu as pltpu

EPS = 1e-5
_TAPS = [(dh, dw) for dh in (-1, 0, 1) for dw in (-1, 0, 1)]


# --------------------------- in-kernel helpers -----------------------------

def _shift_flat(x, s):
    """y[:, p] = x[:, p + s] with zero fill, along the flattened spatial axis."""
    c, n = x.shape
    if s == 0:
        return x
    if abs(s) >= n:
        return jnp.zeros_like(x)
    pad = jnp.zeros((c, abs(s)), x.dtype)
    if s > 0:
        return jnp.concatenate([x[:, s:], pad], axis=1)
    return jnp.concatenate([pad, x[:, :n + s]], axis=1)


def _im2col(x, H, W):
    """x: (C, H*W) f32 -> (9*C, H*W) patch for a 3x3 conv, stride 1, pad 1."""
    _, hw = x.shape
    widx = jax.lax.broadcasted_iota(jnp.int32, (1, hw), 1) % W
    taps = []
    for dh, dw in _TAPS:
        t = _shift_flat(x, dh * W + dw)
        if dw == 1:
            t = jnp.where(widx < W - 1, t, 0.0)   # w + 1 must be < W
        elif dw == -1:
            t = jnp.where(widx >= 1, t, 0.0)      # w - 1 must be >= 0
        taps.append(t)
    return jnp.concatenate(taps, axis=0)          # rows: tap-major, channel-minor


# ------------------------------ fused kernel -------------------------------

def _decoder_kernel(meta, *refs):
    o_ref = refs[-1]
    it = iter(refs[:-1])

    # fc: (C0, fc_in) @ (fc_in, 1) + b  -> column vector of channels.
    x = next(it)[0]                                        # (fc_in, 1) f32
    fw = next(it)[...]                                     # (C0, fc_in) bf16
    fb = next(it)[...]                                     # (C0, 1) f32
    h = jnp.dot(fw, x.astype(jnp.bfloat16),
                preferred_element_type=jnp.float32) + fb   # (C0, 1)

    # nn.Upsample(size=first_size) on a 1x1 input == nearest broadcast.
    H = W = meta["first_size"]
    act = jnp.broadcast_to(h, (h.shape[0], H * W))         # (C0, H*W) f32

    for blk in meta["blocks"]:
        s = blk["stride"]
        if s != 1:
            # nearest-neighbor upsample as a matmul with a 0/1 matrix.
            U = next(it)[...]                              # (HW, s*s*HW) bf16
            act = jnp.dot(act.astype(jnp.bfloat16), U,
                          preferred_element_type=jnp.float32)
            H *= s
            W *= s

        # conv1 + BN + ReLU
        w1 = next(it)[...]
        s1 = next(it)[...]
        b1 = next(it)[...]
        p1 = _im2col(act, H, W).astype(jnp.bfloat16)       # (9*Cin, HW)
        y = jnp.dot(w1, p1, preferred_element_type=jnp.float32) * s1 + b1
        y = jnp.maximum(y, 0.0)

        # shortcut (1x1 conv + BN projection, or identity)
        if blk["has_proj"]:
            wsc = next(it)[...]
            ssc = next(it)[...]
            bsc = next(it)[...]
            sc = jnp.dot(wsc, act.astype(jnp.bfloat16),
                         preferred_element_type=jnp.float32) * ssc + bsc
        else:
            sc = act

        # conv2 + BN + residual add + ReLU
        w2 = next(it)[...]
        s2 = next(it)[...]
        b2 = next(it)[...]
        p2 = _im2col(y, H, W).astype(jnp.bfloat16)         # (9*Cout, HW)
        z = jnp.dot(w2, p2, preferred_element_type=jnp.float32) * s2 + b2
        act = jnp.maximum(z + sc, 0.0)

    # convout: 3x3 conv (Cout=1, no bias) + tanh
    wout = next(it)[...]                                   # (1, 9*C_last) bf16
    pout = _im2col(act, H, W).astype(jnp.bfloat16)
    o = jnp.tanh(jnp.dot(wout, pout, preferred_element_type=jnp.float32))
    o_ref[...] = o.reshape(1, 1, H * W)


# --------------------------- parameter building ----------------------------

class _KeyGen:
    def __init__(self, key):
        self.key = key

    def __call__(self):
        self.key, sub = jax.random.split(self.key)
        return sub


def _bn_fold(kg, c):
    """Random eval-mode BatchNorm, folded to per-channel (scale, shift)."""
    gamma = 1.0 + 0.1 * jax.random.normal(kg(), (c,), jnp.float32)
    beta = 0.1 * jax.random.normal(kg(), (c,), jnp.float32)
    mean = 0.1 * jax.random.normal(kg(), (c,), jnp.float32)
    var = 1.0 + 0.1 * jnp.abs(jax.random.normal(kg(), (c,), jnp.float32))
    scale = gamma / jnp.sqrt(var + EPS)
    shift = beta - mean * scale
    return scale.reshape(c, 1), shift.reshape(c, 1)


def _conv_mat(kg, cin, cout):
    """3x3 conv weight in matmul-ready (Cout, 9*Cin) bf16 layout.

    Column order = tap-major ((dh+1)*3 + (dw+1)), channel-minor -- matches the
    row order produced by _im2col.
    """
    w = 0.1 * jax.random.normal(kg(), (3, 3, cin, cout), jnp.float32)
    return jnp.transpose(w, (3, 0, 1, 2)).reshape(cout, 9 * cin).astype(
        jnp.bfloat16)


def _upsample_matrix(H, W, s):
    """0/1 matrix mapping flat (H*W) -> flat (sH*sW) nearest-neighbor upsample."""
    hw_in = H * W
    hw_out = (s * H) * (s * W)
    U = np.zeros((hw_in, hw_out), np.float32)
    for h in range(H):
        for w in range(W):
            for r in range(s):
                for c in range(s):
                    U[h * W + w, (s * h + r) * (s * W) + (s * w + c)] = 1.0
    return jnp.asarray(U, dtype=jnp.bfloat16)


def init_decoder(key, channel_list, num_block, fc_in, first_size, last_channel):
    kg = _KeyGen(key)
    expansion = 1  # BasicBlock assumption (see TODO above)
    c0 = channel_list[0] * expansion
    outs = [channel_list[1] * expansion, channel_list[2] * expansion,
            channel_list[3] * expansion, last_channel]

    meta = {"first_size": first_size, "fc_in": fc_in, "c0": c0, "blocks": []}
    params = {"blocks": []}

    assert fc_in > 0, "only the fc_in > 0 path is implemented"
    params["fc_w"] = (0.1 * jax.random.normal(kg(), (c0, fc_in), jnp.float32)
                      ).astype(jnp.bfloat16)
    params["fc_b"] = 0.1 * jax.random.normal(kg(), (c0, 1), jnp.float32)

    H = first_size
    for li in range(4):
        cin = channel_list[li] * expansion
        # intra-layer blocks: stride 1, same channels, identity shortcut
        for _ in range(num_block[li] - 1):
            bp = {"w1": _conv_mat(kg, cin, cin)}
            bp["s1"], bp["b1"] = _bn_fold(kg, cin)
            bp["w2"] = _conv_mat(kg, cin, cin)
            bp["s2"], bp["b2"] = _bn_fold(kg, cin)
            params["blocks"].append(bp)
            meta["blocks"].append({"stride": 1, "has_proj": False})
        # layer-final block: stride 2 (nearest x2 upsample) + projection
        cout = outs[li]
        bp = {"U": _upsample_matrix(H, H, 2)}
        H *= 2
        bp["w1"] = _conv_mat(kg, cin, cout)
        bp["s1"], bp["b1"] = _bn_fold(kg, cout)
        bp["wsc"] = (0.1 * jax.random.normal(kg(), (cout, cin), jnp.float32)
                     ).astype(jnp.bfloat16)
        bp["ssc"], bp["bsc"] = _bn_fold(kg, cout)
        bp["w2"] = _conv_mat(kg, cout, cout)
        bp["s2"], bp["b2"] = _bn_fold(kg, cout)
        params["blocks"].append(bp)
        meta["blocks"].append({"stride": 2, "has_proj": True})

    # convout: Conv2d(last_channel, 1, 3, padding=1, bias=False) + Tanh
    params["convout_w"] = _conv_mat(kg, last_channel, 1)
    meta["out_hw"] = H
    return params, meta


# -------------------------------- forward ----------------------------------

def decoder_forward(params, meta, x):
    B = x.shape[0]
    args, specs = [], []

    def add_const(arr):
        nd = arr.ndim
        args.append(arr)
        specs.append(pl.BlockSpec(arr.shape, lambda b, _nd=nd: (0,) * _nd))

    # input as (B, fc_in, 1): one column per batch element (channel-major).
    x3 = x.reshape(B, meta["fc_in"], 1).astype(jnp.float32)
    args.append(x3)
    specs.append(pl.BlockSpec((1, meta["fc_in"], 1), lambda b: (b, 0, 0)))
    add_const(params["fc_w"])
    add_const(params["fc_b"])

    for bmeta, bp in zip(meta["blocks"], params["blocks"]):
        if bmeta["stride"] != 1:
            add_const(bp["U"])
        add_const(bp["w1"]); add_const(bp["s1"]); add_const(bp["b1"])
        if bmeta["has_proj"]:
            add_const(bp["wsc"]); add_const(bp["ssc"]); add_const(bp["bsc"])
        add_const(bp["w2"]); add_const(bp["s2"]); add_const(bp["b2"])
    add_const(params["convout_w"])

    out_hw = meta["out_hw"]
    hw = out_hw * out_hw
    kernel = functools.partial(_decoder_kernel, meta)
    out = pl.pallas_call(
        kernel,
        out_shape=jax.ShapeDtypeStruct((B, 1, hw), jnp.float32),
        grid=(B,),
        in_specs=specs,
        out_specs=pl.BlockSpec((1, 1, hw), lambda b: (b, 0, 0)),
        compiler_params=pltpu.CompilerParams(
            dimension_semantics=("parallel",)),
    )(*args)
    # channel-major output: (B, 1, H*W) -> NCHW is a free reshape.
    return out.reshape(B, 1, out_hw, out_hw)


# ---------------------------------- main ------------------------------------

if __name__ == "__main__":
    key = jax.random.PRNGKey(0)
    pkey, xkey = jax.random.split(key)

    # small synthetic config (block.expansion = 1)
    channel_list = [32, 16, 8, 8]
    num_block = [2, 1, 1, 1]
    fc_in = 16
    first_size = 2
    last_channel = 8
    B = 2

    params, meta = init_decoder(pkey, channel_list, num_block, fc_in,
                                first_size, last_channel)
    x = jax.random.normal(xkey, (B, fc_in), jnp.float32)

    out = decoder_forward(params, meta, x)
    out = jax.block_until_ready(out)

    expected_hw = first_size * (2 ** 4)   # 4 stride-2 decoder stages
    assert out.shape == (B, 1, expected_hw, expected_hw), out.shape
    assert bool(jnp.all(jnp.isfinite(out)))
    print("KERNEL_OK")
</pallas_src>

<mosaic_0001>
module attributes {stable_mosaic.version = 11 : i64} {
  func.func @_decoder_kernel(%arg0: i32, %arg1: memref<1x16x1xf32, #tpu.memory_space<vmem>>, %arg2: memref<32x16xbf16, #tpu.memory_space<vmem>>, %arg3: memref<32x1xf32, #tpu.memory_space<vmem>>, %arg4: memref<32x288xbf16, #tpu.memory_space<vmem>>, %arg5: memref<32x1xf32, #tpu.memory_space<vmem>>, %arg6: memref<32x1xf32, #tpu.memory_space<vmem>>, %arg7: memref<32x288xbf16, #tpu.memory_space<vmem>>, %arg8: memref<32x1xf32, #tpu.memory_space<vmem>>, %arg9: memref<32x1xf32, #tpu.memory_space<vmem>>, %arg10: memref<4x16xbf16, #tpu.memory_space<vmem>>, %arg11: memref<16x288xbf16, #tpu.memory_space<vmem>>, %arg12: memref<16x1xf32, #tpu.memory_space<vmem>>, %arg13: memref<16x1xf32, #tpu.memory_space<vmem>>, %arg14: memref<16x32xbf16, #tpu.memory_space<vmem>>, %arg15: memref<16x1xf32, #tpu.memory_space<vmem>>, %arg16: memref<16x1xf32, #tpu.memory_space<vmem>>, %arg17: memref<16x144xbf16, #tpu.memory_space<vmem>>, %arg18: memref<16x1xf32, #tpu.memory_space<vmem>>, %arg19: memref<16x1xf32, #tpu.memory_space<vmem>>, %arg20: memref<16x64xbf16, #tpu.memory_space<vmem>>, %arg21: memref<8x144xbf16, #tpu.memory_space<vmem>>, %arg22: memref<8x1xf32, #tpu.memory_space<vmem>>, %arg23: memref<8x1xf32, #tpu.memory_space<vmem>>, %arg24: memref<8x16xbf16, #tpu.memory_space<vmem>>, %arg25: memref<8x1xf32, #tpu.memory_space<vmem>>, %arg26: memref<8x1xf32, #tpu.memory_space<vmem>>, %arg27: memref<8x72xbf16, #tpu.memory_space<vmem>>, %arg28: memref<8x1xf32, #tpu.memory_space<vmem>>, %arg29: memref<8x1xf32, #tpu.memory_space<vmem>>, %arg30: memref<64x256xbf16, #tpu.memory_space<vmem>>, %arg31: memref<8x72xbf16, #tpu.memory_space<vmem>>, %arg32: memref<8x1xf32, #tpu.memory_space<vmem>>, %arg33: memref<8x1xf32, #tpu.memory_space<vmem>>, %arg34: memref<8x8xbf16, #tpu.memory_space<vmem>>, %arg35: memref<8x1xf32, #tpu.memory_space<vmem>>, %arg36: memref<8x1xf32, #tpu.memory_space<vmem>>, %arg37: memref<8x72xbf16, #tpu.memory_space<vmem>>, %arg38: memref<8x1xf32, #tpu.memory_space<vmem>>, %arg39: memref<8x1xf32, #tpu.memory_space<vmem>>, %arg40: memref<256x1024xbf16, #tpu.memory_space<vmem>>, %arg41: memref<8x72xbf16, #tpu.memory_space<vmem>>, %arg42: memref<8x1xf32, #tpu.memory_space<vmem>>, %arg43: memref<8x1xf32, #tpu.memory_space<vmem>>, %arg44: memref<8x8xbf16, #tpu.memory_space<vmem>>, %arg45: memref<8x1xf32, #tpu.memory_space<vmem>>, %arg46: memref<8x1xf32, #tpu.memory_space<vmem>>, %arg47: memref<8x72xbf16, #tpu.memory_space<vmem>>, %arg48: memref<8x1xf32, #tpu.memory_space<vmem>>, %arg49: memref<8x1xf32, #tpu.memory_space<vmem>>, %arg50: memref<1x72xbf16, #tpu.memory_space<vmem>>, %arg51: memref<1x1x1024xf32, #tpu.memory_space<vmem>>) attributes {dimension_semantics = [#tpu.dimension_semantics<parallel>], iteration_bounds = array<i64: 2>, scalar_prefetch = 0 : i64, scratch_operands = 0 : i64, tpu.core_type = #tpu.core_type<tc>, window_params = [{transform_indices = @transform_0, window_bounds = array<i64: 1, 16, 1>}, {pipeline_mode = #tpu.pipeline_mode<synchronous>, transform_indices = @transform_1, window_bounds = array<i64: 32, 16>}, {pipeline_mode = #tpu.pipeline_mode<synchronous>, transform_indices = @transform_2, window_bounds = array<i64: 32, 1>}, {pipeline_mode = #tpu.pipeline_mode<synchronous>, transform_indices = @transform_3, window_bounds = array<i64: 32, 288>}, {pipeline_mode = #tpu.pipeline_mode<synchronous>, transform_indices = @transform_4, window_bounds = array<i64: 32, 1>}, {pipeline_mode = #tpu.pipeline_mode<synchronous>, transform_indices = @transform_5, window_bounds = array<i64: 32, 1>}, {pipeline_mode = #tpu.pipeline_mode<synchronous>, transform_indices = @transform_6, window_bounds = array<i64: 32, 288>}, {pipeline_mode = #tpu.pipeline_mode<synchronous>, transform_indices = @transform_7, window_bounds = array<i64: 32, 1>}, {pipeline_mode = #tpu.pipeline_mode<synchronous>, transform_indices = @transform_8, window_bounds = array<i64: 32, 1>}, {pipeline_mode = #tpu.pipeline_mode<synchronous>, transform_indices = @transform_9, window_bounds = array<i64: 4, 16>}, {pipeline_mode = #tpu.pipeline_mode<synchronous>, transform_indices = @transform_10, window_bounds = array<i64: 16, 288>}, {pipeline_mode = #tpu.pipeline_mode<synchronous>, transform_indices = @transform_11, window_bounds = array<i64: 16, 1>}, {pipeline_mode = #tpu.pipeline_mode<synchronous>, transform_indices = @transform_12, window_bounds = array<i64: 16, 1>}, {pipeline_mode = #tpu.pipeline_mode<synchronous>, transform_indices = @transform_13, window_bounds = array<i64: 16, 32>}, {pipeline_mode = #tpu.pipeline_mode<synchronous>, transform_indices = @transform_14, window_bounds = array<i64: 16, 1>}, {pipeline_mode = #tpu.pipeline_mode<synchronous>, transform_indices = @transform_15, window_bounds = array<i64: 16, 1>}, {pipeline_mode = #tpu.pipeline_mode<synchronous>, transform_indices = @transform_16, window_bounds = array<i64: 16, 144>}, {pipeline_mode = #tpu.pipeline_mode<synchronous>, transform_indices = @transform_17, window_bounds = array<i64: 16, 1>}, {pipeline_mode = #tpu.pipeline_mode<synchronous>, transform_indices = @transform_18, window_bounds = array<i64: 16, 1>}, {pipeline_mode = #tpu.pipeline_mode<synchronous>, transform_indices = @transform_19, window_bounds = array<i64: 16, 64>}, {pipeline_mode = #tpu.pipeline_mode<synchronous>, transform_indices = @transform_20, window_bounds = array<i64: 8, 144>}, {pipeline_mode = #tpu.pipeline_mode<synchronous>, transform_indices = @transform_21, window_bounds = array<i64: 8, 1>}, {pipeline_mode = #tpu.pipeline_mode<synchronous>, transform_indices = @transform_22, window_bounds = array<i64: 8, 1>}, {pipeline_mode = #tpu.pipeline_mode<synchronous>, transform_indices = @transform_23, window_bounds = array<i64: 8, 16>}, {pipeline_mode = #tpu.pipeline_mode<synchronous>, transform_indices = @transform_24, window_bounds = array<i64: 8, 1>}, {pipeline_mode = #tpu.pipeline_mode<synchronous>, transform_indices = @transform_25, window_bounds = array<i64: 8, 1>}, {pipeline_mode = #tpu.pipeline_mode<synchronous>, transform_indices = @transform_26, window_bounds = array<i64: 8, 72>}, {pipeline_mode = #tpu.pipeline_mode<synchronous>, transform_indices = @transform_27, window_bounds = array<i64: 8, 1>}, {pipeline_mode = #tpu.pipeline_mode<synchronous>, transform_indices = @transform_28, window_bounds = array<i64: 8, 1>}, {pipeline_mode = #tpu.pipeline_mode<synchronous>, transform_indices = @transform_29, window_bounds = array<i64: 64, 256>}, {pipeline_mode = #tpu.pipeline_mode<synchronous>, transform_indices = @transform_30, window_bounds = array<i64: 8, 72>}, {pipeline_mode = #tpu.pipeline_mode<synchronous>, transform_indices = @transform_31, window_bounds = array<i64: 8, 1>}, {pipeline_mode = #tpu.pipeline_mode<synchronous>, transform_indices = @transform_32, window_bounds = array<i64: 8, 1>}, {pipeline_mode = #tpu.pipeline_mode<synchronous>, transform_indices = @transform_33, window_bounds = array<i64: 8, 8>}, {pipeline_mode = #tpu.pipeline_mode<synchronous>, transform_indices = @transform_34, window_bounds = array<i64: 8, 1>}, {pipeline_mode = #tpu.pipeline_mode<synchronous>, transform_indices = @transform_35, window_bounds = array<i64: 8, 1>}, {pipeline_mode = #tpu.pipeline_mode<synchronous>, transform_indices = @transform_36, window_bounds = array<i64: 8, 72>}, {pipeline_mode = #tpu.pipeline_mode<synchronous>, transform_indices = @transform_37, window_bounds = array<i64: 8, 1>}, {pipeline_mode = #tpu.pipeline_mode<synchronous>, transform_indices = @transform_38, window_bounds = array<i64: 8, 1>}, {pipeline_mode = #tpu.pipeline_mode<synchronous>, transform_indices = @transform_39, window_bounds = array<i64: 256, 1024>}, {pipeline_mode = #tpu.pipeline_mode<synchronous>, transform_indices = @transform_40, window_bounds = array<i64: 8, 72>}, {pipeline_mode = #tpu.pipeline_mode<synchronous>, transform_indices = @transform_41, window_bounds = array<i64: 8, 1>}, {pipeline_mode = #tpu.pipeline_mode<synchronous>, transform_indices = @transform_42, window_bounds = array<i64: 8, 1>}, {pipeline_mode = #tpu.pipeline_mode<synchronous>, transform_indices = @transform_43, window_bounds = array<i64: 8, 8>}, {pipeline_mode = #tpu.pipeline_mode<synchronous>, transform_indices = @transform_44, window_bounds = array<i64: 8, 1>}, {pipeline_mode = #tpu.pipeline_mode<synchronous>, transform_indices = @transform_45, window_bounds = array<i64: 8, 1>}, {pipeline_mode = #tpu.pipeline_mode<synchronous>, transform_indices = @transform_46, window_bounds = array<i64: 8, 72>}, {pipeline_mode = #tpu.pipeline_mode<synchronous>, transform_indices = @transform_47, window_bounds = array<i64: 8, 1>}, {pipeline_mode = #tpu.pipeline_mode<synchronous>, transform_indices = @transform_48, window_bounds = array<i64: 8, 1>}, {pipeline_mode = #tpu.pipeline_mode<synchronous>, transform_indices = @transform_49, window_bounds = array<i64: 1, 72>}, {transform_indices = @transform_50, window_bounds = array<i64: 1, 1, 1024>}]} {
    %c0 = arith.constant 0 : index
    %c0_0 = arith.constant 0 : index
    %c0_1 = arith.constant 0 : index
    %0 = vector.load %arg1[%c0, %c0_0, %c0_1] : memref<1x16x1xf32, #tpu.memory_space<vmem>>, vector<1x16x1xf32>
    %1 = vector.shape_cast %0 : vector<1x16x1xf32> to vector<16x1xf32>
    %c0_2 = arith.constant 0 : index
    %c0_3 = arith.constant 0 : index
    %2 = vector.load %arg2[%c0_2, %c0_3] : memref<32x16xbf16, #tpu.memory_space<vmem>>, vector<32x16xbf16>
    %c0_4 = arith.constant 0 : index
    %c0_5 = arith.constant 0 : index
    %3 = vector.load %arg3[%c0_4, %c0_5] : memref<32x1xf32, #tpu.memory_space<vmem>>, vector<32x1xf32>
    %4 = arith.truncf %1 : vector<16x1xf32> to vector<16x1xbf16>
    %cst = arith.constant dense<0.000000e+00> : vector<32x1xf32>
    %5 = tpu.matmul %2, %4, %cst {dimension_numbers = #tpu.dot_dimension_numbers<[1], [0], [0], [1], [0, 0, 1, 1], [], []>} : vector<32x16xbf16>, vector<16x1xbf16>, vector<32x1xf32> -> vector<32x1xf32>
    %6 = arith.addf %5, %3 : vector<32x1xf32>
    %7 = vector.shape_cast %6 : vector<32x1xf32> to vector<32x1xf32>
    %8 = vector.broadcast %7 : vector<32x1xf32> to vector<32x4xf32>
    %c0_6 = arith.constant 0 : index
    %c0_7 = arith.constant 0 : index
    %9 = vector.load %arg4[%c0_6, %c0_7] : memref<32x288xbf16, #tpu.memory_space<vmem>>, vector<32x288xbf16>
    %c0_8 = arith.constant 0 : index
    %c0_9 = arith.constant 0 : index
    %10 = vector.load %arg5[%c0_8, %c0_9] : memref<32x1xf32, #tpu.memory_space<vmem>>, vector<32x1xf32>
    %c0_10 = arith.constant 0 : index
    %c0_11 = arith.constant 0 : index
    %11 = vector.load %arg6[%c0_10, %c0_11] : memref<32x1xf32, #tpu.memory_space<vmem>>, vector<32x1xf32>
    %12 = tpu.iota {dimensions = array<i32: 1>} : vector<1x4xi32>
    %c2_i32 = arith.constant 2 : i32
    %c0_i32 = arith.constant 0 : i32
    %13 = arith.cmpi eq, %c2_i32, %c0_i32 : i32
    %c1_i32 = arith.constant 1 : i32
    %14 = arith.select %13, %c1_i32, %c2_i32 : i32
    %15 = vector.broadcast %14 : i32 to vector<1x4xi32>
    %16 = arith.remsi %12, %15 : vector<1x4xi32>
    %c0_i32_12 = arith.constant 0 : i32
    %17 = vector.broadcast %c0_i32_12 : i32 to vector<1x4xi32>
    %18 = arith.cmpi ne, %16, %17 : vector<1x4xi32>
    %c0_i32_13 = arith.constant 0 : i32
    %19 = vector.broadcast %c0_i32_13 : i32 to vector<1x4xi32>
    %20 = arith.cmpi slt, %16, %19 : vector<1x4xi32>
    %c0_i32_14 = arith.constant 0 : i32
    %21 = arith.cmpi slt, %14, %c0_i32_14 : i32
    %22 = vector.broadcast %21 : i1 to vector<1x4xi1>
    %23 = vector.broadcast %22 : vector<1x4xi1> to vector<1x4xi1>
    %24 = arith.xori %20, %23 : vector<1x4xi1>
    %25 = arith.andi %24, %18 : vector<1x4xi1>
    %26 = vector.broadcast %14 : i32 to vector<1x4xi32>
    %27 = arith.addi %16, %26 : vector<1x4xi32>
    %28 = arith.select %25, %27, %16 : vector<1x4xi1>, vector<1x4xi32>
    %cst_15 = arith.constant 0.000000e+00 : f32
    %29 = vector.broadcast %cst_15 : f32 to vector<32x3xf32>
    %30 = vector.extract_strided_slice %8 {offsets = [0, 0], sizes = [32, 1], strides = [1, 1]} : vector<32x4xf32> to vector<32x1xf32>
    %31 = tpu.concatenate %29, %30 in 1 : vector<32x3xf32>, vector<32x1xf32> -> vector<32x4xf32>
    %c1_i32_16 = arith.constant 1 : i32
    %32 = vector.broadcast %c1_i32_16 : i32 to vector<1x4xi32>
    %33 = arith.cmpi sge, %28, %32 : vector<1x4xi32>
    %cst_17 = arith.constant 0.000000e+00 : f32
    %34 = vector.shape_cast %33 : vector<1x4xi1> to vector<1x4xi1>
    %35 = vector.broadcast %34 : vector<1x4xi1> to vector<32x4xi1>
    %36 = vector.broadcast %cst_17 : f32 to vector<32x4xf32>
    %37 = arith.select %35, %31, %36 : vector<32x4xi1>, vector<32x4xf32>
    %cst_18 = arith.constant 0.000000e+00 : f32
    %38 = vector.broadcast %cst_18 : f32 to vector<32x2xf32>
    %39 = vector.extract_strided_slice %8 {offsets = [0, 0], sizes = [32, 2], strides = [1, 1]} : vector<32x4xf32> to vector<32x2xf32>
    %40 = tpu.concatenate %38, %39 in 1 : vector<32x2xf32>, vector<32x2xf32> -> vector<32x4xf32>
    %cst_19 = arith.constant 0.000000e+00 : f32
    %41 = vector.broadcast %cst_19 : f32 to vector<32x1xf32>
    %42 = vector.extract_strided_slice %8 {offsets = [0, 0], sizes = [32, 3], strides = [1, 1]} : vector<32x4xf32> to vector<32x3xf32>
    %43 = tpu.concatenate %41, %42 in 1 : vector<32x1xf32>, vector<32x3xf32> -> vector<32x4xf32>
    %c1_i32_20 = arith.constant 1 : i32
    %44 = vector.broadcast %c1_i32_20 : i32 to vector<1x4xi32>
    %45 = arith.cmpi slt, %28, %44 : vector<1x4xi32>
    %cst_21 = arith.constant 0.000000e+00 : f32
    %46 = vector.shape_cast %45 : vector<1x4xi1> to vector<1x4xi1>
    %47 = vector.broadcast %46 : vector<1x4xi1> to vector<32x4xi1>
    %48 = vector.broadcast %cst_21 : f32 to vector<32x4xf32>
    %49 = arith.select %47, %43, %48 : vector<32x4xi1>, vector<32x4xf32>
    %cst_22 = arith.constant 0.000000e+00 : f32
    %50 = vector.broadcast %cst_22 : f32 to vector<32x1xf32>
    %51 = vector.extract_strided_slice %8 {offsets = [0, 0], sizes = [32, 3], strides = [1, 1]} : vector<32x4xf32> to vector<32x3xf32>
    %52 = tpu.concatenate %50, %51 in 1 : vector<32x1xf32>, vector<32x3xf32> -> vector<32x4xf32>
    %c1_i32_23 = arith.constant 1 : i32
    %53 = vector.broadcast %c1_i32_23 : i32 to vector<1x4xi32>
    %54 = arith.cmpi sge, %28, %53 : vector<1x4xi32>
    %cst_24 = arith.constant 0.000000e+00 : f32
    %55 = vector.shape_cast %54 : vector<1x4xi1> to vector<1x4xi1>
    %56 = vector.broadcast %55 : vector<1x4xi1> to vector<32x4xi1>
    %57 = vector.broadcast %cst_24 : f32 to vector<32x4xf32>
    %58 = arith.select %56, %52, %57 : vector<32x4xi1>, vector<32x4xf32>
    %cst_25 = arith.constant 0.000000e+00 : f32
    %59 = vector.broadcast %cst_25 : f32 to vector<32x1xf32>
    %60 = vector.extract_strided_slice %8 {offsets = [0, 1], sizes = [32, 3], strides = [1, 1]} : vector<32x4xf32> to vector<32x3xf32>
    %61 = tpu.concatenate %60, %59 in 1 : vector<32x3xf32>, vector<32x1xf32> -> vector<32x4xf32>
    %c1_i32_26 = arith.constant 1 : i32
    %62 = vector.broadcast %c1_i32_26 : i32 to vector<1x4xi32>
    %63 = arith.cmpi slt, %28, %62 : vector<1x4xi32>
    %cst_27 = arith.constant 0.000000e+00 : f32
    %64 = vector.shape_cast %63 : vector<1x4xi1> to vector<1x4xi1>
    %65 = vector.broadcast %64 : vector<1x4xi1> to vector<32x4xi1>
    %66 = vector.broadcast %cst_27 : f32 to vector<32x4xf32>
    %67 = arith.select %65, %61, %66 : vector<32x4xi1>, vector<32x4xf32>
    %cst_28 = arith.constant 0.000000e+00 : f32
    %68 = vector.broadcast %cst_28 : f32 to vector<32x1xf32>
    %69 = vector.extract_strided_slice %8 {offsets = [0, 1], sizes = [32, 3], strides = [1, 1]} : vector<32x4xf32> to vector<32x3xf32>
    %70 = tpu.concatenate %69, %68 in 1 : vector<32x3xf32>, vector<32x1xf32> -> vector<32x4xf32>
    %c1_i32_29 = arith.constant 1 : i32
    %71 = vector.broadcast %c1_i32_29 : i32 to vector<1x4xi32>
    %72 = arith.cmpi sge, %28, %71 : vector<1x4xi32>
    %cst_30 = arith.constant 0.000000e+00 : f32
    %73 = vector.shape_cast %72 : vector<1x4xi1> to vector<1x4xi1>
    %74 = vector.broadcast %73 : vector<1x4xi1> to vector<32x4xi1>
    %75 = vector.broadcast %cst_30 : f32 to vector<32x4xf32>
    %76 = arith.select %74, %70, %75 : vector<32x4xi1>, vector<32x4xf32>
    %cst_31 = arith.constant 0.000000e+00 : f32
    %77 = vector.broadcast %cst_31 : f32 to vector<32x2xf32>
    %78 = vector.extract_strided_slice %8 {offsets = [0, 2], sizes = [32, 2], strides = [1, 1]} : vector<32x4xf32> to vector<32x2xf32>
    %79 = tpu.concatenate %78, %77 in 1 : vector<32x2xf32>, vector<32x2xf32> -> vector<32x4xf32>
    %cst_32 = arith.constant 0.000000e+00 : f32
    %80 = vector.broadcast %cst_32 : f32 to vector<32x3xf32>
    %81 = vector.extract_strided_slice %8 {offsets = [0, 3], sizes = [32, 1], strides = [1, 1]} : vector<32x4xf32> to vector<32x1xf32>
    %82 = tpu.concatenate %81, %80 in 1 : vector<32x1xf32>, vector<32x3xf32> -> vector<32x4xf32>
    %c1_i32_33 = arith.constant 1 : i32
    %83 = vector.broadcast %c1_i32_33 : i32 to vector<1x4xi32>
    %84 = arith.cmpi slt, %28, %83 : vector<1x4xi32>
    %cst_34 = arith.constant 0.000000e+00 : f32
    %85 = vector.shape_cast %84 : vector<1x4xi1> to vector<1x4xi1>
    %86 = vector.broadcast %85 : vector<1x4xi1> to vector<32x4xi1>
    %87 = vector.broadcast %cst_34 : f32 to vector<32x4xf32>
    %88 = arith.select %86, %82, %87 : vector<32x4xi1>, vector<32x4xf32>
    %89 = tpu.concatenate %37, %40, %49, %58, %8, %67, %76, %79, %88 in 0 : vector<32x4xf32>, vector<32x4xf32>, vector<32x4xf32>, vector<32x4xf32>, vector<32x4xf32>, vector<32x4xf32>, vector<32x4xf32>, vector<32x4xf32>, vector<32x4xf32> -> vector<288x4xf32>
    %90 = arith.truncf %89 : vector<288x4xf32> to vector<288x4xbf16>
    %cst_35 = arith.constant dense<0.000000e+00> : vector<32x4xf32>
    %91 = tpu.matmul %9, %90, %cst_35 {dimension_numbers = #tpu.dot_dimension_numbers<[1], [0], [0], [1], [0, 0, 1, 1], [], []>} : vector<32x288xbf16>, vector<288x4xbf16>, vector<32x4xf32> -> vector<32x4xf32>
    %92 = vector.broadcast %10 : vector<32x1xf32> to vector<32x4xf32>
    %93 = arith.mulf %91, %92 : vector<32x4xf32>
    %94 = vector.broadcast %11 : vector<32x1xf32> to vector<32x4xf32>
    %95 = arith.addf %93, %94 : vector<32x4xf32>
    %cst_36 = arith.constant 0.000000e+00 : f32
    %96 = vector.broadcast %cst_36 : f32 to vector<32x4xf32>
    %97 = arith.maximumf %95, %96 : vector<32x4xf32>
    %c0_37 = arith.constant 0 : index
    %c0_38 = arith.constant 0 : index
    %98 = vector.load %arg7[%c0_37, %c0_38] : memref<32x288xbf16, #tpu.memory_space<vmem>>, vector<32x288xbf16>
    %c0_39 = arith.constant 0 : index
    %c0_40 = arith.constant 0 : index
    %99 = vector.load %arg8[%c0_39, %c0_40] : memref<32x1xf32, #tpu.memory_space<vmem>>, vector<32x1xf32>
    %c0_41 = arith.constant 0 : index
    %c0_42 = arith.constant 0 : index
    %100 = vector.load %arg9[%c0_41, %c0_42] : memref<32x1xf32, #tpu.memory_space<vmem>>, vector<32x1xf32>
    %101 = tpu.iota {dimensions = array<i32: 1>} : vector<1x4xi32>
    %c2_i32_43 = arith.constant 2 : i32
    %c0_i32_44 = arith.constant 0 : i32
    %102 = arith.cmpi eq, %c2_i32_43, %c0_i32_44 : i32
    %c1_i32_45 = arith.constant 1 : i32
    %103 = arith.select %102, %c1_i32_45, %c2_i32_43 : i32
    %104 = vector.broadcast %103 : i32 to vector<1x4xi32>
    %105 = arith.remsi %101, %104 : vector<1x4xi32>
    %c0_i32_46 = arith.constant 0 : i32
    %106 = vector.broadcast %c0_i32_46 : i32 to vector<1x4xi32>
    %107 = arith.cmpi ne, %105, %106 : vector<1x4xi32>
    %c0_i32_47 = arith.constant 0 : i32
    %108 = vector.broadcast %c0_i32_47 : i32 to vector<1x4xi32>
    %109 = arith.cmpi slt, %105, %108 : vector<1x4xi32>
    %c0_i32_48 = arith.constant 0 : i32
    %110 = arith.cmpi slt, %103, %c0_i32_48 : i32
    %111 = vector.broadcast %110 : i1 to vector<1x4xi1>
    %112 = vector.broadcast %111 : vector<1x4xi1> to vector<1x4xi1>
    %113 = arith.xori %109, %112 : vector<1x4xi1>
    %114 = arith.andi %113, %107 : vector<1x4xi1>
    %115 = vector.broadcast %103 : i32 to vector<1x4xi32>
    %116 = arith.addi %105, %115 : vector<1x4xi32>
    %117 = arith.select %114, %116, %105 : vector<1x4xi1>, vector<1x4xi32>
    %cst_49 = arith.constant 0.000000e+00 : f32
    %118 = vector.broadcast %cst_49 : f32 to vector<32x3xf32>
    %119 = vector.extract_strided_slice %97 {offsets = [0, 0], sizes = [32, 1], strides = [1, 1]} : vector<32x4xf32> to vector<32x1xf32>
    %120 = tpu.concatenate %118, %119 in 1 : vector<32x3xf32>, vector<32x1xf32> -> vector<32x4xf32>
    %c1_i32_50 = arith.constant 1 : i32
    %121 = vector.broadcast %c1_i32_50 : i32 to vector<1x4xi32>
    %122 = arith.cmpi sge, %117, %121 : vector<1x4xi32>
    %cst_51 = arith.constant 0.000000e+00 : f32
    %123 = vector.shape_cast %122 : vector<1x4xi1> to vector<1x4xi1>
    %124 = vector.broadcast %123 : vector<1x4xi1> to vector<32x4xi1>
    %125 = vector.broadcast %cst_51 : f32 to vector<32x4xf32>
    %126 = arith.select %124, %120, %125 : vector<32x4xi1>, vector<32x4xf32>
    %cst_52 = arith.constant 0.000000e+00 : f32
    %127 = vector.broadcast %cst_52 : f32 to vector<32x2xf32>
    %128 = vector.extract_strided_slice %97 {offsets = [0, 0], sizes = [32, 2], strides = [1, 1]} : vector<32x4xf32> to vector<32x2xf32>
    %129 = tpu.concatenate %127, %128 in 1 : vector<32x2xf32>, vector<32x2xf32> -> vector<32x4xf32>
    %cst_53 = arith.constant 0.000000e+00 : f32
    %130 = vector.broadcast %cst_53 : f32 to vector<32x1xf32>
    %131 = vector.extract_strided_slice %97 {offsets = [0, 0], sizes = [32, 3], strides = [1, 1]} : vector<32x4xf32> to vector<32x3xf32>
    %132 = tpu.concatenate %130, %131 in 1 : vector<32x1xf32>, vector<32x3xf32> -> vector<32x4xf32>
    %c1_i32_54 = arith.constant 1 : i32
    %133 = vector.broadcast %c1_i32_54 : i32 to vector<1x4xi32>
    %134 = arith.cmpi slt, %117, %133 : vector<1x4xi32>
    %cst_55 = arith.constant 0.000000e+00 : f32
    %135 = vector.shape_cast %134 : vector<1x4xi1> to vector<1x4xi1>
    %136 = vector.broadcast %135 : vector<1x4xi1> to vector<32x4xi1>
    %137 = vector.broadcast %cst_55 : f32 to vector<32x4xf32>
    %138 = arith.select %136, %132, %137 : vector<32x4xi1>, vector<32x4xf32>
    %cst_56 = arith.constant 0.000000e+00 : f32
    %139 = vector.broadcast %cst_56 : f32 to vector<32x1xf32>
    %140 = vector.extract_strided_slice %97 {offsets = [0, 0], sizes = [32, 3], strides = [1, 1]} : vector<32x4xf32> to vector<32x3xf32>
    %141 = tpu.concatenate %139, %140 in 1 : vector<32x1xf32>, vector<32x3xf32> -> vector<32x4xf32>
    %c1_i32_57 = arith.constant 1 : i32
    %142 = vector.broadcast %c1_i32_57 : i32 to vector<1x4xi32>
    %143 = arith.cmpi sge, %117, %142 : vector<1x4xi32>
    %cst_58 = arith.constant 0.000000e+00 : f32
    %144 = vector.shape_cast %143 : vector<1x4xi1> to vector<1x4xi1>
    %145 = vector.broadcast %144 : vector<1x4xi1> to vector<32x4xi1>
    %146 = vector.broadcast %cst_58 : f32 to vector<32x4xf32>
    %147 = arith.select %145, %141, %146 : vector<32x4xi1>, vector<32x4xf32>
    %cst_59 = arith.constant 0.000000e+00 : f32
    %148 = vector.broadcast %cst_59 : f32 to vector<32x1xf32>
    %149 = vector.extract_strided_slice %97 {offsets = [0, 1], sizes = [32, 3], strides = [1, 1]} : vector<32x4xf32> to vector<32x3xf32>
    %150 = tpu.concatenate %149, %148 in 1 : vector<32x3xf32>, vector<32x1xf32> -> vector<32x4xf32>
    %c1_i32_60 = arith.constant 1 : i32
    %151 = vector.broadcast %c1_i32_60 : i32 to vector<1x4xi32>
    %152 = arith.cmpi slt, %117, %151 : vector<1x4xi32>
    %cst_61 = arith.constant 0.000000e+00 : f32
    %153 = vector.shape_cast %152 : vector<1x4xi1> to vector<1x4xi1>
    %154 = vector.broadcast %153 : vector<1x4xi1> to vector<32x4xi1>
    %155 = vector.broadcast %cst_61 : f32 to vector<32x4xf32>
    %156 = arith.select %154, %150, %155 : vector<32x4xi1>, vector<32x4xf32>
    %cst_62 = arith.constant 0.000000e+00 : f32
    %157 = vector.broadcast %cst_62 : f32 to vector<32x1xf32>
    %158 = vector.extract_strided_slice %97 {offsets = [0, 1], sizes = [32, 3], strides = [1, 1]} : vector<32x4xf32> to vector<32x3xf32>
    %159 = tpu.concatenate %158, %157 in 1 : vector<32x3xf32>, vector<32x1xf32> -> vector<32x4xf32>
    %c1_i32_63 = arith.constant 1 : i32
    %160 = vector.broadcast %c1_i32_63 : i32 to vector<1x4xi32>
    %161 = arith.cmpi sge, %117, %160 : vector<1x4xi32>
    %cst_64 = arith.constant 0.000000e+00 : f32
    %162 = vector.shape_cast %161 : vector<1x4xi1> to vector<1x4xi1>
    %163 = vector.broadcast %162 : vector<1x4xi1> to vector<32x4xi1>
    %164 = vector.broadcast %cst_64 : f32 to vector<32x4xf32>
    %165 = arith.select %163, %159, %164 : vector<32x4xi1>, vector<32x4xf32>
    %cst_65 = arith.constant 0.000000e+00 : f32
    %166 = vector.broadcast %cst_65 : f32 to vector<32x2xf32>
    %167 = vector.extract_strided_slice %97 {offsets = [0, 2], sizes = [32, 2], strides = [1, 1]} : vector<32x4xf32> to vector<32x2xf32>
    %168 = tpu.concatenate %167, %166 in 1 : vector<32x2xf32>, vector<32x2xf32> -> vector<32x4xf32>
    %cst_66 = arith.constant 0.000000e+00 : f32
    %169 = vector.broadcast %cst_66 : f32 to vector<32x3xf32>
    %170 = vector.extract_strided_slice %97 {offsets = [0, 3], sizes = [32, 1], strides = [1, 1]} : vector<32x4xf32> to vector<32x1xf32>
    %171 = tpu.concatenate %170, %169 in 1 : vector<32x1xf32>, vector<32x3xf32> -> vector<32x4xf32>
    %c1_i32_67 = arith.constant 1 : i32
    %172 = vector.broadcast %c1_i32_67 : i32 to vector<1x4xi32>
    %173 = arith.cmpi slt, %117, %172 : vector<1x4xi32>
    %cst_68 = arith.constant 0.000000e+00 : f32
    %174 = vector.shape_cast %173 : vector<1x4xi1> to vector<1x4xi1>
    %175 = vector.broadcast %174 : vector<1x4xi1> to vector<32x4xi1>
    %176 = vector.broadcast %cst_68 : f32 to vector<32x4xf32>
    %177 = arith.select %175, %171, %176 : vector<32x4xi1>, vector<32x4xf32>
    %178 = tpu.concatenate %126, %129, %138, %147, %97, %156, %165, %168, %177 in 0 : vector<32x4xf32>, vector<32x4xf32>, vector<32x4xf32>, vector<32x4xf32>, vector<32x4xf32>, vector<32x4xf32>, vector<32x4xf32>, vector<32x4xf32>, vector<32x4xf32> -> vector<288x4xf32>
    %179 = arith.truncf %178 : vector<288x4xf32> to vector<288x4xbf16>
    %cst_69 = arith.constant dense<0.000000e+00> : vector<32x4xf32>
    %180 = tpu.matmul %98, %179, %cst_69 {dimension_numbers = #tpu.dot_dimension_numbers<[1], [0], [0], [1], [0, 0, 1, 1], [], []>} : vector<32x288xbf16>, vector<288x4xbf16>, vector<32x4xf32> -> vector<32x4xf32>
    %181 = vector.broadcast %99 : vector<32x1xf32> to vector<32x4xf32>
    %182 = arith.mulf %180, %181 : vector<32x4xf32>
    %183 = vector.broadcast %100 : vector<32x1xf32> to vector<32x4xf32>
    %184 = arith.addf %182, %183 : vector<32x4xf32>
    %185 = arith.addf %184, %8 : vector<32x4xf32>
    %cst_70 = arith.constant 0.000000e+00 : f32
    %186 = vector.broadcast %cst_70 : f32 to vector<32x4xf32>
    %187 = arith.maximumf %185, %186 : vector<32x4xf32>
    %c0_71 = arith.constant 0 : index
    %c0_72 = arith.constant 0 : index
    %188 = vector.load %arg10[%c0_71, %c0_72] : memref<4x16xbf16, #tpu.memory_space<vmem>>, vector<4x16xbf16>
    %189 = arith.truncf %187 : vector<32x4xf32> to vector<32x4xbf16>
    %cst_73 = arith.constant dense<0.000000e+00> : vector<32x16xf32>
    %190 = tpu.matmul %189, %188, %cst_73 {dimension_numbers = #tpu.dot_dimension_numbers<[1], [0], [0], [1], [0, 0, 1, 1], [], []>} : vector<32x4xbf16>, vector<4x16xbf16>, vector<32x16xf32> -> vector<32x16xf32>
    %c0_74 = arith.constant 0 : index
    %c0_75 = arith.constant 0 : index
    %191 = vector.load %arg11[%c0_74, %c0_75] : memref<16x288xbf16, #tpu.memory_space<vmem>>, vector<16x288xbf16>
    %c0_76 = arith.constant 0 : index
    %c0_77 = arith.constant 0 : index
    %192 = vector.load %arg12[%c0_76, %c0_77] : memref<16x1xf32, #tpu.memory_space<vmem>>, vector<16x1xf32>
    %c0_78 = arith.constant 0 : index
    %c0_79 = arith.constant 0 : index
    %193 = vector.load %arg13[%c0_78, %c0_79] : memref<16x1xf32, #tpu.memory_space<vmem>>, vector<16x1xf32>
    %194 = tpu.iota {dimensions = array<i32: 1>} : vector<1x16xi32>
    %c4_i32 = arith.constant 4 : i32
    %c0_i32_80 = arith.constant 0 : i32
    %195 = arith.cmpi eq, %c4_i32, %c0_i32_80 : i32
    %c1_i32_81 = arith.constant 1 : i32
    %196 = arith.select %195, %c1_i32_81, %c4_i32 : i32
    %197 = vector.broadcast %196 : i32 to vector<1x16xi32>
    %198 = arith.remsi %194, %197 : vector<1x16xi32>
    %c0_i32_82 = arith.constant 0 : i32
    %199 = vector.broadcast %c0_i32_82 : i32 to vector<1x16xi32>
    %200 = arith.cmpi ne, %198, %199 : vector<1x16xi32>
    %c0_i32_83 = arith.constant 0 : i32
    %201 = vector.broadcast %c0_i32_83 : i32 to vector<1x16xi32>
    %202 = arith.cmpi slt, %198, %201 : vector<1x16xi32>
    %c0_i32_84 = arith.constant 0 : i32
    %203 = arith.cmpi slt, %196, %c0_i32_84 : i32
    %204 = vector.broadcast %203 : i1 to vector<1x16xi1>
    %205 = vector.broadcast %204 : vector<1x16xi1> to vector<1x16xi1>
    %206 = arith.xori %202, %205 : vector<1x16xi1>
    %207 = arith.andi %206, %200 : vector<1x16xi1>
    %208 = vector.broadcast %196 : i32 to vector<1x16xi32>
    %209 = arith.addi %198, %208 : vector<1x16xi32>
    %210 = arith.select %207, %209, %198 : vector<1x16xi1>, vector<1x16xi32>
    %cst_85 = arith.constant 0.000000e+00 : f32
    %211 = vector.broadcast %cst_85 : f32 to vector<32x5xf32>
    %212 = vector.extract_strided_slice %190 {offsets = [0, 0], sizes = [32, 11], strides = [1, 1]} : vector<32x16xf32> to vector<32x11xf32>
    %213 = tpu.concatenate %211, %212 in 1 : vector<32x5xf32>, vector<32x11xf32> -> vector<32x16xf32>
    %c1_i32_86 = arith.constant 1 : i32
    %214 = vector.broadcast %c1_i32_86 : i32 to vector<1x16xi32>
    %215 = arith.cmpi sge, %210, %214 : vector<1x16xi32>
    %cst_87 = arith.constant 0.000000e+00 : f32
    %216 = vector.shape_cast %215 : vector<1x16xi1> to vector<1x16xi1>
    %217 = vector.broadcast %216 : vector<1x16xi1> to vector<32x16xi1>
    %218 = vector.broadcast %cst_87 : f32 to vector<32x16xf32>
    %219 = arith.select %217, %213, %218 : vector<32x16xi1>, vector<32x16xf32>
    %cst_88 = arith.constant 0.000000e+00 : f32
    %220 = vector.broadcast %cst_88 : f32 to vector<32x4xf32>
    %221 = vector.extract_strided_slice %190 {offsets = [0, 0], sizes = [32, 12], strides = [1, 1]} : vector<32x16xf32> to vector<32x12xf32>
    %222 = tpu.concatenate %220, %221 in 1 : vector<32x4xf32>, vector<32x12xf32> -> vector<32x16xf32>
    %cst_89 = arith.constant 0.000000e+00 : f32
    %223 = vector.broadcast %cst_89 : f32 to vector<32x3xf32>
    %224 = vector.extract_strided_slice %190 {offsets = [0, 0], sizes = [32, 13], strides = [1, 1]} : vector<32x16xf32> to vector<32x13xf32>
    %225 = tpu.concatenate %223, %224 in 1 : vector<32x3xf32>, vector<32x13xf32> -> vector<32x16xf32>
    %c3_i32 = arith.constant 3 : i32
    %226 = vector.broadcast %c3_i32 : i32 to vector<1x16xi32>
    %227 = arith.cmpi slt, %210, %226 : vector<1x16xi32>
    %cst_90 = arith.constant 0.000000e+00 : f32
    %228 = vector.shape_cast %227 : vector<1x16xi1> to vector<1x16xi1>
    %229 = vector.broadcast %228 : vector<1x16xi1> to vector<32x16xi1>
    %230 = vector.broadcast %cst_90 : f32 to vector<32x16xf32>
    %231 = arith.select %229, %225, %230 : vector<32x16xi1>, vector<32x16xf32>
    %cst_91 = arith.constant 0.000000e+00 : f32
    %232 = vector.broadcast %cst_91 : f32 to vector<32x1xf32>
    %233 = vector.extract_strided_slice %190 {offsets = [0, 0], sizes = [32, 15], strides = [1, 1]} : vector<32x16xf32> to vector<32x15xf32>
    %234 = tpu.concatenate %232, %233 in 1 : vector<32x1xf32>, vector<32x15xf32> -> vector<32x16xf32>
    %c1_i32_92 = arith.constant 1 : i32
    %235 = vector.broadcast %c1_i32_92 : i32 to vector<1x16xi32>
    %236 = arith.cmpi sge, %210, %235 : vector<1x16xi32>
    %cst_93 = arith.constant 0.000000e+00 : f32
    %237 = vector.shape_cast %236 : vector<1x16xi1> to vector<1x16xi1>
    %238 = vector.broadcast %237 : vector<1x16xi1> to vector<32x16xi1>
    %239 = vector.broadcast %cst_93 : f32 to vector<32x16xf32>
    %240 = arith.select %238, %234, %239 : vector<32x16xi1>, vector<32x16xf32>
    %cst_94 = arith.constant 0.000000e+00 : f32
    %241 = vector.broadcast %cst_94 : f32 to vector<32x1xf32>
    %242 = vector.extract_strided_slice %190 {offsets = [0, 1], sizes = [32, 15], strides = [1, 1]} : vector<32x16xf32> to vector<32x15xf32>
    %243 = tpu.concatenate %242, %241 in 1 : vector<32x15xf32>, vector<32x1xf32> -> vector<32x16xf32>
    %c3_i32_95 = arith.constant 3 : i32
    %244 = vector.broadcast %c3_i32_95 : i32 to vector<1x16xi32>
    %245 = arith.cmpi slt, %210, %244 : vector<1x16xi32>
    %cst_96 = arith.constant 0.000000e+00 : f32
    %246 = vector.shape_cast %245 : vector<1x16xi1> to vector<1x16xi1>
    %247 = vector.broadcast %246 : vector<1x16xi1> to vector<32x16xi1>
    %248 = vector.broadcast %cst_96 : f32 to vector<32x16xf32>
    %249 = arith.select %247, %243, %248 : vector<32x16xi1>, vector<32x16xf32>
    %cst_97 = arith.constant 0.000000e+00 : f32
    %250 = vector.broadcast %cst_97 : f32 to vector<32x3xf32>
    %251 = vector.extract_strided_slice %190 {offsets = [0, 3], sizes = [32, 13], strides = [1, 1]} : vector<32x16xf32> to vector<32x13xf32>
    %252 = tpu.concatenate %251, %250 in 1 : vector<32x13xf32>, vector<32x3xf32> -> vector<32x16xf32>
    %c1_i32_98 = arith.constant 1 : i32
    %253 = vector.broadcast %c1_i32_98 : i32 to vector<1x16xi32>
    %254 = arith.cmpi sge, %210, %253 : vector<1x16xi32>
    %cst_99 = arith.constant 0.000000e+00 : f32
    %255 = vector.shape_cast %254 : vector<1x16xi1> to vector<1x16xi1>
    %256 = vector.broadcast %255 : vector<1x16xi1> to vector<32x16xi1>
    %257 = vector.broadcast %cst_99 : f32 to vector<32x16xf32>
    %258 = arith.select %256, %252, %257 : vector<32x16xi1>, vector<32x16xf32>
    %cst_100 = arith.constant 0.000000e+00 : f32
    %259 = vector.broadcast %cst_100 : f32 to vector<32x4xf32>
    %260 = vector.extract_strided_slice %190 {offsets = [0, 4], sizes = [32, 12], strides = [1, 1]} : vector<32x16xf32> to vector<32x12xf32>
    %261 = tpu.concatenate %260, %259 in 1 : vector<32x12xf32>, vector<32x4xf32> -> vector<32x16xf32>
    %cst_101 = arith.constant 0.000000e+00 : f32
    %262 = vector.broadcast %cst_101 : f32 to vector<32x5xf32>
    %263 = vector.extract_strided_slice %190 {offsets = [0, 5], sizes = [32, 11], strides = [1, 1]} : vector<32x16xf32> to vector<32x11xf32>
    %264 = tpu.concatenate %263, %262 in 1 : vector<32x11xf32>, vector<32x5xf32> -> vector<32x16xf32>
    %c3_i32_102 = arith.constant 3 : i32
    %265 = vector.broadcast %c3_i32_102 : i32 to vector<1x16xi32>
    %266 = arith.cmpi slt, %210, %265 : vector<1x16xi32>
    %cst_103 = arith.constant 0.000000e+00 : f32
    %267 = vector.shape_cast %266 : vector<1x16xi1> to vector<1x16xi1>
    %268 = vector.broadcast %267 : vector<1x16xi1> to vector<32x16xi1>
    %269 = vector.broadcast %cst_103 : f32 to vector<32x16xf32>
    %270 = arith.select %268, %264, %269 : vector<32x16xi1>, vector<32x16xf32>
    %271 = tpu.concatenate %219, %222, %231, %240, %190, %249, %258, %261, %270 in 0 : vector<32x16xf32>, vector<32x16xf32>, vector<32x16xf32>, vector<32x16xf32>, vector<32x16xf32>, vector<32x16xf32>, vector<32x16xf32>, vector<32x16xf32>, vector<32x16xf32> -> vector<288x16xf32>
    %272 = arith.truncf %271 : vector<288x16xf32> to vector<288x16xbf16>
    %cst_104 = arith.constant dense<0.000000e+00> : vector<16x16xf32>
    %273 = tpu.matmul %191, %272, %cst_104 {dimension_numbers = #tpu.dot_dimension_numbers<[1], [0], [0], [1], [0, 0, 1, 1], [], []>} : vector<16x288xbf16>, vector<288x16xbf16>, vector<16x16xf32> -> vector<16x16xf32>
    %274 = vector.broadcast %192 : vector<16x1xf32> to vector<16x16xf32>
    %275 = arith.mulf %273, %274 : vector<16x16xf32>
    %276 = vector.broadcast %193 : vector<16x1xf32> to vector<16x16xf32>
    %277 = arith.addf %275, %276 : vector<16x16xf32>
    %cst_105 = arith.constant 0.000000e+00 : f32
    %278 = vector.broadcast %cst_105 : f32 to vector<16x16xf32>
    %279 = arith.maximumf %277, %278 : vector<16x16xf32>
    %c0_106 = arith.constant 0 : index
    %c0_107 = arith.constant 0 : index
    %280 = vector.load %arg14[%c0_106, %c0_107] : memref<16x32xbf16, #tpu.memory_space<vmem>>, vector<16x32xbf16>
    %c0_108 = arith.constant 0 : index
    %c0_109 = arith.constant 0 : index
    %281 = vector.load %arg15[%c0_108, %c0_109] : memref<16x1xf32, #tpu.memory_space<vmem>>, vector<16x1xf32>
    %c0_110 = arith.constant 0 : index
    %c0_111 = arith.constant 0 : index
    %282 = vector.load %arg16[%c0_110, %c0_111] : memref<16x1xf32, #tpu.memory_space<vmem>>, vector<16x1xf32>
    %283 = arith.truncf %190 : vector<32x16xf32> to vector<32x16xbf16>
    %cst_112 = arith.constant dense<0.000000e+00> : vector<16x16xf32>
    %284 = tpu.matmul %280, %283, %cst_112 {dimension_numbers = #tpu.dot_dimension_numbers<[1], [0], [0], [1], [0, 0, 1, 1], [], []>} : vector<16x32xbf16>, vector<32x16xbf16>, vector<16x16xf32> -> vector<16x16xf32>
    %285 = vector.broadcast %281 : vector<16x1xf32> to vector<16x16xf32>
    %286 = arith.mulf %284, %285 : vector<16x16xf32>
    %287 = vector.broadcast %282 : vector<16x1xf32> to vector<16x16xf32>
    %288 = arith.addf %286, %287 : vector<16x16xf32>
    %c0_113 = arith.constant 0 : index
    %c0_114 = arith.constant 0 : index
    %289 = vector.load %arg17[%c0_113, %c0_114] : memref<16x144xbf16, #tpu.memory_space<vmem>>, vector<16x144xbf16>
    %c0_115 = arith.constant 0 : index
    %c0_116 = arith.constant 0 : index
    %290 = vector.load %arg18[%c0_115, %c0_116] : memref<16x1xf32, #tpu.memory_space<vmem>>, vector<16x1xf32>
    %c0_117 = arith.constant 0 : index
    %c0_118 = arith.constant 0 : index
    %291 = vector.load %arg19[%c0_117, %c0_118] : memref<16x1xf32, #tpu.memory_space<vmem>>, vector<16x1xf32>
    %292 = tpu.iota {dimensions = array<i32: 1>} : vector<1x16xi32>
    %c4_i32_119 = arith.constant 4 : i32
    %c0_i32_120 = arith.constant 0 : i32
    %293 = arith.cmpi eq, %c4_i32_119, %c0_i32_120 : i32
    %c1_i32_121 = arith.constant 1 : i32
    %294 = arith.select %293, %c1_i32_121, %c4_i32_119 : i32
    %295 = vector.broadcast %294 : i32 to vector<1x16xi32>
    %296 = arith.remsi %292, %295 : vector<1x16xi32>
    %c0_i32_122 = arith.constant 0 : i32
    %297 = vector.broadcast %c0_i32_122 : i32 to vector<1x16xi32>
    %298 = arith.cmpi ne, %296, %297 : vector<1x16xi32>
    %c0_i32_123 = arith.constant 0 : i32
    %299 = vector.broadcast %c0_i32_123 : i32 to vector<1x16xi32>
    %300 = arith.cmpi slt, %296, %299 : vector<1x16xi32>
    %c0_i32_124 = arith.constant 0 : i32
    %301 = arith.cmpi slt, %294, %c0_i32_124 : i32
    %302 = vector.broadcast %301 : i1 to vector<1x16xi1>
    %303 = vector.broadcast %302 : vector<1x16xi1> to vector<1x16xi1>
    %304 = arith.xori %300, %303 : vector<1x16xi1>
    %305 = arith.andi %304, %298 : vector<1x16xi1>
    %306 = vector.broadcast %294 : i32 to vector<1x16xi32>
    %307 = arith.addi %296, %306 : vector<1x16xi32>
    %308 = arith.select %305, %307, %296 : vector<1x16xi1>, vector<1x16xi32>
    %cst_125 = arith.constant 0.000000e+00 : f32
    %309 = vector.broadcast %cst_125 : f32 to vector<16x5xf32>
    %310 = vector.extract_strided_slice %279 {offsets = [0, 0], sizes = [16, 11], strides = [1, 1]} : vector<16x16xf32> to vector<16x11xf32>
    %311 = tpu.concatenate %309, %310 in 1 : vector<16x5xf32>, vector<16x11xf32> -> vector<16x16xf32>
    %c1_i32_126 = arith.constant 1 : i32
    %312 = vector.broadcast %c1_i32_126 : i32 to vector<1x16xi32>
    %313 = arith.cmpi sge, %308, %312 : vector<1x16xi32>
    %cst_127 = arith.constant 0.000000e+00 : f32
    %314 = vector.shape_cast %313 : vector<1x16xi1> to vector<1x16xi1>
    %315 = vector.broadcast %314 : vector<1x16xi1> to vector<16x16xi1>
    %316 = vector.broadcast %cst_127 : f32 to vector<16x16xf32>
    %317 = arith.select %315, %311, %316 : vector<16x16xi1>, vector<16x16xf32>
    %cst_128 = arith.constant 0.000000e+00 : f32
    %318 = vector.broadcast %cst_128 : f32 to vector<16x4xf32>
    %319 = vector.extract_strided_slice %279 {offsets = [0, 0], sizes = [16, 12], strides = [1, 1]} : vector<16x16xf32> to vector<16x12xf32>
    %320 = tpu.concatenate %318, %319 in 1 : vector<16x4xf32>, vector<16x12xf32> -> vector<16x16xf32>
    %cst_129 = arith.constant 0.000000e+00 : f32
    %321 = vector.broadcast %cst_129 : f32 to vector<16x3xf32>
    %322 = vector.extract_strided_slice %279 {offsets = [0, 0], sizes = [16, 13], strides = [1, 1]} : vector<16x16xf32> to vector<16x13xf32>
    %323 = tpu.concatenate %321, %322 in 1 : vector<16x3xf32>, vector<16x13xf32> -> vector<16x16xf32>
    %c3_i32_130 = arith.constant 3 : i32
    %324 = vector.broadcast %c3_i32_130 : i32 to vector<1x16xi32>
    %325 = arith.cmpi slt, %308, %324 : vector<1x16xi32>
    %cst_131 = arith.constant 0.000000e+00 : f32
    %326 = vector.shape_cast %325 : vector<1x16xi1> to vector<1x16xi1>
    %327 = vector.broadcast %326 : vector<1x16xi1> to vector<16x16xi1>
    %328 = vector.broadcast %cst_131 : f32 to vector<16x16xf32>
    %329 = arith.select %327, %323, %328 : vector<16x16xi1>, vector<16x16xf32>
    %cst_132 = arith.constant 0.000000e+00 : f32
    %330 = vector.broadcast %cst_132 : f32 to vector<16x1xf32>
    %331 = vector.extract_strided_slice %279 {offsets = [0, 0], sizes = [16, 15], strides = [1, 1]} : vector<16x16xf32> to vector<16x15xf32>
    %332 = tpu.concatenate %330, %331 in 1 : vector<16x1xf32>, vector<16x15xf32> -> vector<16x16xf32>
    %c1_i32_133 = arith.constant 1 : i32
    %333 = vector.broadcast %c1_i32_133 : i32 to vector<1x16xi32>
    %334 = arith.cmpi sge, %308, %333 : vector<1x16xi32>
    %cst_134 = arith.constant 0.000000e+00 : f32
    %335 = vector.shape_cast %334 : vector<1x16xi1> to vector<1x16xi1>
    %336 = vector.broadcast %335 : vector<1x16xi1> to vector<16x16xi1>
    %337 = vector.broadcast %cst_134 : f32 to vector<16x16xf32>
    %338 = arith.select %336, %332, %337 : vector<16x16xi1>, vector<16x16xf32>
    %cst_135 = arith.constant 0.000000e+00 : f32
    %339 = vector.broadcast %cst_135 : f32 to vector<16x1xf32>
    %340 = vector.extract_strided_slice %279 {offsets = [0, 1], sizes = [16, 15], strides = [1, 1]} : vector<16x16xf32> to vector<16x15xf32>
    %341 = tpu.concatenate %340, %339 in 1 : vector<16x15xf32>, vector<16x1xf32> -> vector<16x16xf32>
    %c3_i32_136 = arith.constant 3 : i32
    %342 = vector.broadcast %c3_i32_136 : i32 to vector<1x16xi32>
    %343 = arith.cmpi slt, %308, %342 : vector<1x16xi32>
    %cst_137 = arith.constant 0.000000e+00 : f32
    %344 = vector.shape_cast %343 : vector<1x16xi1> to vector<1x16xi1>
    %345 = vector.broadcast %344 : vector<1x16xi1> to vector<16x16xi1>
    %346 = vector.broadcast %cst_137 : f32 to vector<16x16xf32>
    %347 = arith.select %345, %341, %346 : vector<16x16xi1>, vector<16x16xf32>
    %cst_138 = arith.constant 0.000000e+00 : f32
    %348 = vector.broadcast %cst_138 : f32 to vector<16x3xf32>
    %349 = vector.extract_strided_slice %279 {offsets = [0, 3], sizes = [16, 13], strides = [1, 1]} : vector<16x16xf32> to vector<16x13xf32>
    %350 = tpu.concatenate %349, %348 in 1 : vector<16x13xf32>, vector<16x3xf32> -> vector<16x16xf32>
    %c1_i32_139 = arith.constant 1 : i32
    %351 = vector.broadcast %c1_i32_139 : i32 to vector<1x16xi32>
    %352 = arith.cmpi sge, %308, %351 : vector<1x16xi32>
    %cst_140 = arith.constant 0.000000e+00 : f32
    %353 = vector.shape_cast %352 : vector<1x16xi1> to vector<1x16xi1>
    %354 = vector.broadcast %353 : vector<1x16xi1> to vector<16x16xi1>
    %355 = vector.broadcast %cst_140 : f32 to vector<16x16xf32>
    %356 = arith.select %354, %350, %355 : vector<16x16xi1>, vector<16x16xf32>
    %cst_141 = arith.constant 0.000000e+00 : f32
    %357 = vector.broadcast %cst_141 : f32 to vector<16x4xf32>
    %358 = vector.extract_strided_slice %279 {offsets = [0, 4], sizes = [16, 12], strides = [1, 1]} : vector<16x16xf32> to vector<16x12xf32>
    %359 = tpu.concatenate %358, %357 in 1 : vector<16x12xf32>, vector<16x4xf32> -> vector<16x16xf32>
    %cst_142 = arith.constant 0.000000e+00 : f32
    %360 = vector.broadcast %cst_142 : f32 to vector<16x5xf32>
    %361 = vector.extract_strided_slice %279 {offsets = [0, 5], sizes = [16, 11], strides = [1, 1]} : vector<16x16xf32> to vector<16x11xf32>
    %362 = tpu.concatenate %361, %360 in 1 : vector<16x11xf32>, vector<16x5xf32> -> vector<16x16xf32>
    %c3_i32_143 = arith.constant 3 : i32
    %363 = vector.broadcast %c3_i32_143 : i32 to vector<1x16xi32>
    %364 = arith.cmpi slt, %308, %363 : vector<1x16xi32>
    %cst_144 = arith.constant 0.000000e+00 : f32
    %365 = vector.shape_cast %364 : vector<1x16xi1> to vector<1x16xi1>
    %366 = vector.broadcast %365 : vector<1x16xi1> to vector<16x16xi1>
    %367 = vector.broadcast %cst_144 : f32 to vector<16x16xf32>
    %368 = arith.select %366, %362, %367 : vector<16x16xi1>, vector<16x16xf32>
    %369 = tpu.concatenate %317, %320, %329, %338, %279, %347, %356, %359, %368 in 0 : vector<16x16xf32>, vector<16x16xf32>, vector<16x16xf32>, vector<16x16xf32>, vector<16x16xf32>, vector<16x16xf32>, vector<16x16xf32>, vector<16x16xf32>, vector<16x16xf32> -> vector<144x16xf32>
    %370 = arith.truncf %369 : vector<144x16xf32> to vector<144x16xbf16>
    %cst_145 = arith.constant dense<0.000000e+00> : vector<16x16xf32>
    %371 = tpu.matmul %289, %370, %cst_145 {dimension_numbers = #tpu.dot_dimension_numbers<[1], [0], [0], [1], [0, 0, 1, 1], [], []>} : vector<16x144xbf16>, vector<144x16xbf16>, vector<16x16xf32> -> vector<16x16xf32>
    %372 = vector.broadcast %290 : vector<16x1xf32> to vector<16x16xf32>
    %373 = arith.mulf %371, %372 : vector<16x16xf32>
    %374 = vector.broadcast %291 : vector<16x1xf32> to vector<16x16xf32>
    %375 = arith.addf %373, %374 : vector<16x16xf32>
    %376 = arith.addf %375, %288 : vector<16x16xf32>
    %cst_146 = arith.constant 0.000000e+00 : f32
    %377 = vector.broadcast %cst_146 : f32 to vector<16x16xf32>
    %378 = arith.maximumf %376, %377 : vector<16x16xf32>
    %c0_147 = arith.constant 0 : index
    %c0_148 = arith.constant 0 : index
    %379 = vector.load %arg20[%c0_147, %c0_148] : memref<16x64xbf16, #tpu.memory_space<vmem>>, vector<16x64xbf16>
    %380 = arith.truncf %378 : vector<16x16xf32> to vector<16x16xbf16>
    %cst_149 = arith.constant dense<0.000000e+00> : vector<16x64xf32>
    %381 = tpu.matmul %380, %379, %cst_149 {dimension_numbers = #tpu.dot_dimension_numbers<[1], [0], [0], [1], [0, 0, 1, 1], [], []>} : vector<16x16xbf16>, vector<16x64xbf16>, vector<16x64xf32> -> vector<16x64xf32>
    %c0_150 = arith.constant 0 : index
    %c0_151 = arith.constant 0 : index
    %382 = vector.load %arg21[%c0_150, %c0_151] : memref<8x144xbf16, #tpu.memory_space<vmem>>, vector<8x144xbf16>
    %c0_152 = arith.constant 0 : index
    %c0_153 = arith.constant 0 : index
    %383 = vector.load %arg22[%c0_152, %c0_153] : memref<8x1xf32, #tpu.memory_space<vmem>>, vector<8x1xf32>
    %c0_154 = arith.constant 0 : index
    %c0_155 = arith.constant 0 : index
    %384 = vector.load %arg23[%c0_154, %c0_155] : memref<8x1xf32, #tpu.memory_space<vmem>>, vector<8x1xf32>
    %385 = tpu.iota {dimensions = array<i32: 1>} : vector<1x64xi32>
    %c8_i32 = arith.constant 8 : i32
    %c0_i32_156 = arith.constant 0 : i32
    %386 = arith.cmpi eq, %c8_i32, %c0_i32_156 : i32
    %c1_i32_157 = arith.constant 1 : i32
    %387 = arith.select %386, %c1_i32_157, %c8_i32 : i32
    %388 = vector.broadcast %387 : i32 to vector<1x64xi32>
    %389 = arith.remsi %385, %388 : vector<1x64xi32>
    %c0_i32_158 = arith.constant 0 : i32
    %390 = vector.broadcast %c0_i32_158 : i32 to vector<1x64xi32>
    %391 = arith.cmpi ne, %389, %390 : vector<1x64xi32>
    %c0_i32_159 = arith.constant 0 : i32
    %392 = vector.broadcast %c0_i32_159 : i32 to vector<1x64xi32>
    %393 = arith.cmpi slt, %389, %392 : vector<1x64xi32>
    %c0_i32_160 = arith.constant 0 : i32
    %394 = arith.cmpi slt, %387, %c0_i32_160 : i32
    %395 = vector.broadcast %394 : i1 to vector<1x64xi1>
    %396 = vector.broadcast %395 : vector<1x64xi1> to vector<1x64xi1>
    %397 = arith.xori %393, %396 : vector<1x64xi1>
    %398 = arith.andi %397, %391 : vector<1x64xi1>
    %399 = vector.broadcast %387 : i32 to vector<1x64xi32>
    %400 = arith.addi %389, %399 : vector<1x64xi32>
    %401 = arith.select %398, %400, %389 : vector<1x64xi1>, vector<1x64xi32>
    %cst_161 = arith.constant 0.000000e+00 : f32
    %402 = vector.broadcast %cst_161 : f32 to vector<16x9xf32>
    %403 = vector.extract_strided_slice %381 {offsets = [0, 0], sizes = [16, 55], strides = [1, 1]} : vector<16x64xf32> to vector<16x55xf32>
    %404 = tpu.concatenate %402, %403 in 1 : vector<16x9xf32>, vector<16x55xf32> -> vector<16x64xf32>
    %c1_i32_162 = arith.constant 1 : i32
    %405 = vector.broadcast %c1_i32_162 : i32 to vector<1x64xi32>
    %406 = arith.cmpi sge, %401, %405 : vector<1x64xi32>
    %cst_163 = arith.constant 0.000000e+00 : f32
    %407 = vector.shape_cast %406 : vector<1x64xi1> to vector<1x64xi1>
    %408 = vector.broadcast %407 : vector<1x64xi1> to vector<16x64xi1>
    %409 = vector.broadcast %cst_163 : f32 to vector<16x64xf32>
    %410 = arith.select %408, %404, %409 : vector<16x64xi1>, vector<16x64xf32>
    %cst_164 = arith.constant 0.000000e+00 : f32
    %411 = vector.broadcast %cst_164 : f32 to vector<16x8xf32>
    %412 = vector.extract_strided_slice %381 {offsets = [0, 0], sizes = [16, 56], strides = [1, 1]} : vector<16x64xf32> to vector<16x56xf32>
    %413 = tpu.concatenate %411, %412 in 1 : vector<16x8xf32>, vector<16x56xf32> -> vector<16x64xf32>
    %cst_165 = arith.constant 0.000000e+00 : f32
    %414 = vector.broadcast %cst_165 : f32 to vector<16x7xf32>
    %415 = vector.extract_strided_slice %381 {offsets = [0, 0], sizes = [16, 57], strides = [1, 1]} : vector<16x64xf32> to vector<16x57xf32>
    %416 = tpu.concatenate %414, %415 in 1 : vector<16x7xf32>, vector<16x57xf32> -> vector<16x64xf32>
    %c7_i32 = arith.constant 7 : i32
    %417 = vector.broadcast %c7_i32 : i32 to vector<1x64xi32>
    %418 = arith.cmpi slt, %401, %417 : vector<1x64xi32>
    %cst_166 = arith.constant 0.000000e+00 : f32
    %419 = vector.shape_cast %418 : vector<1x64xi1> to vector<1x64xi1>
    %420 = vector.broadcast %419 : vector<1x64xi1> to vector<16x64xi1>
    %421 = vector.broadcast %cst_166 : f32 to vector<16x64xf32>
    %422 = arith.select %420, %416, %421 : vector<16x64xi1>, vector<16x64xf32>
    %cst_167 = arith.constant 0.000000e+00 : f32
    %423 = vector.broadcast %cst_167 : f32 to vector<16x1xf32>
    %424 = vector.extract_strided_slice %381 {offsets = [0, 0], sizes = [16, 63], strides = [1, 1]} : vector<16x64xf32> to vector<16x63xf32>
    %425 = tpu.concatenate %423, %424 in 1 : vector<16x1xf32>, vector<16x63xf32> -> vector<16x64xf32>
    %c1_i32_168 = arith.constant 1 : i32
    %426 = vector.broadcast %c1_i32_168 : i32 to vector<1x64xi32>
    %427 = arith.cmpi sge, %401, %426 : vector<1x64xi32>
    %cst_169 = arith.constant 0.000000e+00 : f32
    %428 = vector.shape_cast %427 : vector<1x64xi1> to vector<1x64xi1>
    %429 = vector.broadcast %428 : vector<1x64xi1> to vector<16x64xi1>
    %430 = vector.broadcast %cst_169 : f32 to vector<16x64xf32>
    %431 = arith.select %429, %425, %430 : vector<16x64xi1>, vector<16x64xf32>
    %cst_170 = arith.constant 0.000000e+00 : f32
    %432 = vector.broadcast %cst_170 : f32 to vector<16x1xf32>
    %433 = vector.extract_strided_slice %381 {offsets = [0, 1], sizes = [16, 63], strides = [1, 1]} : vector<16x64xf32> to vector<16x63xf32>
    %434 = tpu.concatenate %433, %432 in 1 : vector<16x63xf32>, vector<16x1xf32> -> vector<16x64xf32>
    %c7_i32_171 = arith.constant 7 : i32
    %435 = vector.broadcast %c7_i32_171 : i32 to vector<1x64xi32>
    %436 = arith.cmpi slt, %401, %435 : vector<1x64xi32>
    %cst_172 = arith.constant 0.000000e+00 : f32
    %437 = vector.shape_cast %436 : vector<1x64xi1> to vector<1x64xi1>
    %438 = vector.broadcast %437 : vector<1x64xi1> to vector<16x64xi1>
    %439 = vector.broadcast %cst_172 : f32 to vector<16x64xf32>
    %440 = arith.select %438, %434, %439 : vector<16x64xi1>, vector<16x64xf32>
    %cst_173 = arith.constant 0.000000e+00 : f32
    %441 = vector.broadcast %cst_173 : f32 to vector<16x7xf32>
    %442 = vector.extract_strided_slice %381 {offsets = [0, 7], sizes = [16, 57], strides = [1, 1]} : vector<16x64xf32> to vector<16x57xf32>
    %443 = tpu.concatenate %442, %441 in 1 : vector<16x57xf32>, vector<16x7xf32> -> vector<16x64xf32>
    %c1_i32_174 = arith.constant 1 : i32
    %444 = vector.broadcast %c1_i32_174 : i32 to vector<1x64xi32>
    %445 = arith.cmpi sge, %401, %444 : vector<1x64xi32>
    %cst_175 = arith.constant 0.000000e+00 : f32
    %446 = vector.shape_cast %445 : vector<1x64xi1> to vector<1x64xi1>
    %447 = vector.broadcast %446 : vector<1x64xi1> to vector<16x64xi1>
    %448 = vector.broadcast %cst_175 : f32 to vector<16x64xf32>
    %449 = arith.select %447, %443, %448 : vector<16x64xi1>, vector<16x64xf32>
    %cst_176 = arith.constant 0.000000e+00 : f32
    %450 = vector.broadcast %cst_176 : f32 to vector<16x8xf32>
    %451 = vector.extract_strided_slice %381 {offsets = [0, 8], sizes = [16, 56], strides = [1, 1]} : vector<16x64xf32> to vector<16x56xf32>
    %452 = tpu.concatenate %451, %450 in 1 : vector<16x56xf32>, vector<16x8xf32> -> vector<16x64xf32>
    %cst_177 = arith.constant 0.000000e+00 : f32
    %453 = vector.broadcast %cst_177 : f32 to vector<16x9xf32>
    %454 = vector.extract_strided_slice %381 {offsets = [0, 9], sizes = [16, 55], strides = [1, 1]} : vector<16x64xf32> to vector<16x55xf32>
    %455 = tpu.concatenate %454, %453 in 1 : vector<16x55xf32>, vector<16x9xf32> -> vector<16x64xf32>
    %c7_i32_178 = arith.constant 7 : i32
    %456 = vector.broadcast %c7_i32_178 : i32 to vector<1x64xi32>
    %457 = arith.cmpi slt, %401, %456 : vector<1x64xi32>
    %cst_179 = arith.constant 0.000000e+00 : f32
    %458 = vector.shape_cast %457 : vector<1x64xi1> to vector<1x64xi1>
    %459 = vector.broadcast %458 : vector<1x64xi1> to vector<16x64xi1>
    %460 = vector.broadcast %cst_179 : f32 to vector<16x64xf32>
    %461 = arith.select %459, %455, %460 : vector<16x64xi1>, vector<16x64xf32>
    %462 = tpu.concatenate %410, %413, %422, %431, %381, %440, %449, %452, %461 in 0 : vector<16x64xf32>, vector<16x64xf32>, vector<16x64xf32>, vector<16x64xf32>, vector<16x64xf32>, vector<16x64xf32>, vector<16x64xf32>, vector<16x64xf32>, vector<16x64xf32> -> vector<144x64xf32>
    %463 = arith.truncf %462 : vector<144x64xf32> to vector<144x64xbf16>
    %cst_180 = arith.constant dense<0.000000e+00> : vector<8x64xf32>
    %464 = tpu.matmul %382, %463, %cst_180 {dimension_numbers = #tpu.dot_dimension_numbers<[1], [0], [0], [1], [0, 0, 1, 1], [], []>} : vector<8x144xbf16>, vector<144x64xbf16>, vector<8x64xf32> -> vector<8x64xf32>
    %465 = vector.broadcast %383 : vector<8x1xf32> to vector<8x64xf32>
    %466 = arith.mulf %464, %465 : vector<8x64xf32>
    %467 = vector.broadcast %384 : vector<8x1xf32> to vector<8x64xf32>
    %468 = arith.addf %466, %467 : vector<8x64xf32>
    %cst_181 = arith.constant 0.000000e+00 : f32
    %469 = vector.broadcast %cst_181 : f32 to vector<8x64xf32>
    %470 = arith.maximumf %468, %469 : vector<8x64xf32>
    %c0_182 = arith.constant 0 : index
    %c0_183 = arith.constant 0 : index
    %471 = vector.load %arg24[%c0_182, %c0_183] : memref<8x16xbf16, #tpu.memory_space<vmem>>, vector<8x16xbf16>
    %c0_184 = arith.constant 0 : index
    %c0_185 = arith.constant 0 : index
    %472 = vector.load %arg25[%c0_184, %c0_185] : memref<8x1xf32, #tpu.memory_space<vmem>>, vector<8x1xf32>
    %c0_186 = arith.constant 0 : index
    %c0_187 = arith.constant 0 : index
    %473 = vector.load %arg26[%c0_186, %c0_187] : memref<8x1xf32, #tpu.memory_space<vmem>>, vector<8x1xf32>
    %474 = arith.truncf %381 : vector<16x64xf32> to vector<16x64xbf16>
    %cst_188 = arith.constant dense<0.000000e+00> : vector<8x64xf32>
    %475 = tpu.matmul %471, %474, %cst_188 {dimension_numbers = #tpu.dot_dimension_numbers<[1], [0], [0], [1], [0, 0, 1, 1], [], []>} : vector<8x16xbf16>, vector<16x64xbf16>, vector<8x64xf32> -> vector<8x64xf32>
    %476 = vector.broadcast %472 : vector<8x1xf32> to vector<8x64xf32>
    %477 = arith.mulf %475, %476 : vector<8x64xf32>
    %478 = vector.broadcast %473 : vector<8x1xf32> to vector<8x64xf32>
    %479 = arith.addf %477, %478 : vector<8x64xf32>
    %c0_189 = arith.constant 0 : index
    %c0_190 = arith.constant 0 : index
    %480 = vector.load %arg27[%c0_189, %c0_190] : memref<8x72xbf16, #tpu.memory_space<vmem>>, vector<8x72xbf16>
    %c0_191 = arith.constant 0 : index
    %c0_192 = arith.constant 0 : index
    %481 = vector.load %arg28[%c0_191, %c0_192] : memref<8x1xf32, #tpu.memory_space<vmem>>, vector<8x1xf32>
    %c0_193 = arith.constant 0 : index
    %c0_194 = arith.constant 0 : index
    %482 = vector.load %arg29[%c0_193, %c0_194] : memref<8x1xf32, #tpu.memory_space<vmem>>, vector<8x1xf32>
    %483 = tpu.iota {dimensions = array<i32: 1>} : vector<1x64xi32>
    %c8_i32_195 = arith.constant 8 : i32
    %c0_i32_196 = arith.constant 0 : i32
    %484 = arith.cmpi eq, %c8_i32_195, %c0_i32_196 : i32
    %c1_i32_197 = arith.constant 1 : i32
    %485 = arith.select %484, %c1_i32_197, %c8_i32_195 : i32
    %486 = vector.broadcast %485 : i32 to vector<1x64xi32>
    %487 = arith.remsi %483, %486 : vector<1x64xi32>
    %c0_i32_198 = arith.constant 0 : i32
    %488 = vector.broadcast %c0_i32_198 : i32 to vector<1x64xi32>
    %489 = arith.cmpi ne, %487, %488 : vector<1x64xi32>
    %c0_i32_199 = arith.constant 0 : i32
    %490 = vector.broadcast %c0_i32_199 : i32 to vector<1x64xi32>
    %491 = arith.cmpi slt, %487, %490 : vector<1x64xi32>
    %c0_i32_200 = arith.constant 0 : i32
    %492 = arith.cmpi slt, %485, %c0_i32_200 : i32
    %493 = vector.broadcast %492 : i1 to vector<1x64xi1>
    %494 = vector.broadcast %493 : vector<1x64xi1> to vector<1x64xi1>
    %495 = arith.xori %491, %494 : vector<1x64xi1>
    %496 = arith.andi %495, %489 : vector<1x64xi1>
    %497 = vector.broadcast %485 : i32 to vector<1x64xi32>
    %498 = arith.addi %487, %497 : vector<1x64xi32>
    %499 = arith.select %496, %498, %487 : vector<1x64xi1>, vector<1x64xi32>
    %cst_201 = arith.constant 0.000000e+00 : f32
    %500 = vector.broadcast %cst_201 : f32 to vector<8x9xf32>
    %501 = vector.extract_strided_slice %470 {offsets = [0, 0], sizes = [8, 55], strides = [1, 1]} : vector<8x64xf32> to vector<8x55xf32>
    %502 = tpu.concatenate %500, %501 in 1 : vector<8x9xf32>, vector<8x55xf32> -> vector<8x64xf32>
    %c1_i32_202 = arith.constant 1 : i32
    %503 = vector.broadcast %c1_i32_202 : i32 to vector<1x64xi32>
    %504 = arith.cmpi sge, %499, %503 : vector<1x64xi32>
    %cst_203 = arith.constant 0.000000e+00 : f32
    %505 = vector.shape_cast %504 : vector<1x64xi1> to vector<1x64xi1>
    %506 = vector.broadcast %505 : vector<1x64xi1> to vector<8x64xi1>
    %507 = vector.broadcast %cst_203 : f32 to vector<8x64xf32>
    %508 = arith.select %506, %502, %507 : vector<8x64xi1>, vector<8x64xf32>
    %cst_204 = arith.constant 0.000000e+00 : f32
    %509 = vector.broadcast %cst_204 : f32 to vector<8x8xf32>
    %510 = vector.extract_strided_slice %470 {offsets = [0, 0], sizes = [8, 56], strides = [1, 1]} : vector<8x64xf32> to vector<8x56xf32>
    %511 = tpu.concatenate %509, %510 in 1 : vector<8x8xf32>, vector<8x56xf32> -> vector<8x64xf32>
    %cst_205 = arith.constant 0.000000e+00 : f32
    %512 = vector.broadcast %cst_205 : f32 to vector<8x7xf32>
    %513 = vector.extract_strided_slice %470 {offsets = [0, 0], sizes = [8, 57], strides = [1, 1]} : vector<8x64xf32> to vector<8x57xf32>
    %514 = tpu.concatenate %512, %513 in 1 : vector<8x7xf32>, vector<8x57xf32> -> vector<8x64xf32>
    %c7_i32_206 = arith.constant 7 : i32
    %515 = vector.broadcast %c7_i32_206 : i32 to vector<1x64xi32>
    %516 = arith.cmpi slt, %499, %515 : vector<1x64xi32>
    %cst_207 = arith.constant 0.000000e+00 : f32
    %517 = vector.shape_cast %516 : vector<1x64xi1> to vector<1x64xi1>
    %518 = vector.broadcast %517 : vector<1x64xi1> to vector<8x64xi1>
    %519 = vector.broadcast %cst_207 : f32 to vector<8x64xf32>
    %520 = arith.select %518, %514, %519 : vector<8x64xi1>, vector<8x64xf32>
    %cst_208 = arith.constant 0.000000e+00 : f32
    %521 = vector.broadcast %cst_208 : f32 to vector<8x1xf32>
    %522 = vector.extract_strided_slice %470 {offsets = [0, 0], sizes = [8, 63], strides = [1, 1]} : vector<8x64xf32> to vector<8x63xf32>
    %523 = tpu.concatenate %521, %522 in 1 : vector<8x1xf32>, vector<8x63xf32> -> vector<8x64xf32>
    %c1_i32_209 = arith.constant 1 : i32
    %524 = vector.broadcast %c1_i32_209 : i32 to vector<1x64xi32>
    %525 = arith.cmpi sge, %499, %524 : vector<1x64xi32>
    %cst_210 = arith.constant 0.000000e+00 : f32
    %526 = vector.shape_cast %525 : vector<1x64xi1> to vector<1x64xi1>
    %527 = vector.broadcast %526 : vector<1x64xi1> to vector<8x64xi1>
    %528 = vector.broadcast %cst_210 : f32 to vector<8x64xf32>
    %529 = arith.select %527, %523, %528 : vector<8x64xi1>, vector<8x64xf32>
    %cst_211 = arith.constant 0.000000e+00 : f32
    %530 = vector.broadcast %cst_211 : f32 to vector<8x1xf32>
    %531 = vector.extract_strided_slice %470 {offsets = [0, 1], sizes = [8, 63], strides = [1, 1]} : vector<8x64xf32> to vector<8x63xf32>
    %532 = tpu.concatenate %531, %530 in 1 : vector<8x63xf32>, vector<8x1xf32> -> vector<8x64xf32>
    %c7_i32_212 = arith.constant 7 : i32
    %533 = vector.broadcast %c7_i32_212 : i32 to vector<1x64xi32>
    %534 = arith.cmpi slt, %499, %533 : vector<1x64xi32>
    %cst_213 = arith.constant 0.000000e+00 : f32
    %535 = vector.shape_cast %534 : vector<1x64xi1> to vector<1x64xi1>
    %536 = vector.broadcast %535 : vector<1x64xi1> to vector<8x64xi1>
    %537 = vector.broadcast %cst_213 : f32 to vector<8x64xf32>
    %538 = arith.select %536, %532, %537 : vector<8x64xi1>, vector<8x64xf32>
    %cst_214 = arith.constant 0.000000e+00 : f32
    %539 = vector.broadcast %cst_214 : f32 to vector<8x7xf32>
    %540 = vector.extract_strided_slice %470 {offsets = [0, 7], sizes = [8, 57], strides = [1, 1]} : vector<8x64xf32> to vector<8x57xf32>
    %541 = tpu.concatenate %540, %539 in 1 : vector<8x57xf32>, vector<8x7xf32> -> vector<8x64xf32>
    %c1_i32_215 = arith.constant 1 : i32
    %542 = vector.broadcast %c1_i32_215 : i32 to vector<1x64xi32>
    %543 = arith.cmpi sge, %499, %542 : vector<1x64xi32>
    %cst_216 = arith.constant 0.000000e+00 : f32
    %544 = vector.shape_cast %543 : vector<1x64xi1> to vector<1x64xi1>
    %545 = vector.broadcast %544 : vector<1x64xi1> to vector<8x64xi1>
    %546 = vector.broadcast %cst_216 : f32 to vector<8x64xf32>
    %547 = arith.select %545, %541, %546 : vector<8x64xi1>, vector<8x64xf32>
    %cst_217 = arith.constant 0.000000e+00 : f32
    %548 = vector.broadcast %cst_217 : f32 to vector<8x8xf32>
    %549 = vector.extract_strided_slice %470 {offsets = [0, 8], sizes = [8, 56], strides = [1, 1]} : vector<8x64xf32> to vector<8x56xf32>
    %550 = tpu.concatenate %549, %548 in 1 : vector<8x56xf32>, vector<8x8xf32> -> vector<8x64xf32>
    %cst_218 = arith.constant 0.000000e+00 : f32
    %551 = vector.broadcast %cst_218 : f32 to vector<8x9xf32>
    %552 = vector.extract_strided_slice %470 {offsets = [0, 9], sizes = [8, 55], strides = [1, 1]} : vector<8x64xf32> to vector<8x55xf32>
    %553 = tpu.concatenate %552, %551 in 1 : vector<8x55xf32>, vector<8x9xf32> -> vector<8x64xf32>
    %c7_i32_219 = arith.constant 7 : i32
    %554 = vector.broadcast %c7_i32_219 : i32 to vector<1x64xi32>
    %555 = arith.cmpi slt, %499, %554 : vector<1x64xi32>
    %cst_220 = arith.constant 0.000000e+00 : f32
    %556 = vector.shape_cast %555 : vector<1x64xi1> to vector<1x64xi1>
    %557 = vector.broadcast %556 : vector<1x64xi1> to vector<8x64xi1>
    %558 = vector.broadcast %cst_220 : f32 to vector<8x64xf32>
    %559 = arith.select %557, %553, %558 : vector<8x64xi1>, vector<8x64xf32>
    %560 = tpu.concatenate %508, %511, %520, %529, %470, %538, %547, %550, %559 in 0 : vector<8x64xf32>, vector<8x64xf32>, vector<8x64xf32>, vector<8x64xf32>, vector<8x64xf32>, vector<8x64xf32>, vector<8x64xf32>, vector<8x64xf32>, vector<8x64xf32> -> vector<72x64xf32>
    %561 = arith.truncf %560 : vector<72x64xf32> to vector<72x64xbf16>
    %cst_221 = arith.constant dense<0.000000e+00> : vector<8x64xf32>
    %562 = tpu.matmul %480, %561, %cst_221 {dimension_numbers = #tpu.dot_dimension_numbers<[1], [0], [0], [1], [0, 0, 1, 1], [], []>} : vector<8x72xbf16>, vector<72x64xbf16>, vector<8x64xf32> -> vector<8x64xf32>
    %563 = vector.broadcast %481 : vector<8x1xf32> to vector<8x64xf32>
    %564 = arith.mulf %562, %563 : vector<8x64xf32>
    %565 = vector.broadcast %482 : vector<8x1xf32> to vector<8x64xf32>
    %566 = arith.addf %564, %565 : vector<8x64xf32>
    %567 = arith.addf %566, %479 : vector<8x64xf32>
    %cst_222 = arith.constant 0.000000e+00 : f32
    %568 = vector.broadcast %cst_222 : f32 to vector<8x64xf32>
    %569 = arith.maximumf %567, %568 : vector<8x64xf32>
    %c0_223 = arith.constant 0 : index
    %c0_224 = arith.constant 0 : index
    %570 = vector.load %arg30[%c0_223, %c0_224] : memref<64x256xbf16, #tpu.memory_space<vmem>>, vector<64x256xbf16>
    %571 = arith.truncf %569 : vector<8x64xf32> to vector<8x64xbf16>
    %cst_225 = arith.constant dense<0.000000e+00> : vector<8x256xf32>
    %572 = tpu.matmul %571, %570, %cst_225 {dimension_numbers = #tpu.dot_dimension_numbers<[1], [0], [0], [1], [0, 0, 1, 1], [], []>} : vector<8x64xbf16>, vector<64x256xbf16>, vector<8x256xf32> -> vector<8x256xf32>
    %c0_226 = arith.constant 0 : index
    %c0_227 = arith.constant 0 : index
    %573 = vector.load %arg31[%c0_226, %c0_227] : memref<8x72xbf16, #tpu.memory_space<vmem>>, vector<8x72xbf16>
    %c0_228 = arith.constant 0 : index
    %c0_229 = arith.constant 0 : index
    %574 = vector.load %arg32[%c0_228, %c0_229] : memref<8x1xf32, #tpu.memory_space<vmem>>, vector<8x1xf32>
    %c0_230 = arith.constant 0 : index
    %c0_231 = arith.constant 0 : index
    %575 = vector.load %arg33[%c0_230, %c0_231] : memref<8x1xf32, #tpu.memory_space<vmem>>, vector<8x1xf32>
    %576 = tpu.iota {dimensions = array<i32: 1>} : vector<1x256xi32>
    %c16_i32 = arith.constant 16 : i32
    %c0_i32_232 = arith.constant 0 : i32
    %577 = arith.cmpi eq, %c16_i32, %c0_i32_232 : i32
    %c1_i32_233 = arith.constant 1 : i32
    %578 = arith.select %577, %c1_i32_233, %c16_i32 : i32
    %579 = vector.broadcast %578 : i32 to vector<1x256xi32>
    %580 = arith.remsi %576, %579 : vector<1x256xi32>
    %c0_i32_234 = arith.constant 0 : i32
    %581 = vector.broadcast %c0_i32_234 : i32 to vector<1x256xi32>
    %582 = arith.cmpi ne, %580, %581 : vector<1x256xi32>
    %c0_i32_235 = arith.constant 0 : i32
    %583 = vector.broadcast %c0_i32_235 : i32 to vector<1x256xi32>
    %584 = arith.cmpi slt, %580, %583 : vector<1x256xi32>
    %c0_i32_236 = arith.constant 0 : i32
    %585 = arith.cmpi slt, %578, %c0_i32_236 : i32
    %586 = vector.broadcast %585 : i1 to vector<1x256xi1>
    %587 = vector.broadcast %586 : vector<1x256xi1> to vector<1x256xi1>
    %588 = arith.xori %584, %587 : vector<1x256xi1>
    %589 = arith.andi %588, %582 : vector<1x256xi1>
    %590 = vector.broadcast %578 : i32 to vector<1x256xi32>
    %591 = arith.addi %580, %590 : vector<1x256xi32>
    %592 = arith.select %589, %591, %580 : vector<1x256xi1>, vector<1x256xi32>
    %cst_237 = arith.constant 0.000000e+00 : f32
    %593 = vector.broadcast %cst_237 : f32 to vector<8x17xf32>
    %594 = vector.extract_strided_slice %572 {offsets = [0, 0], sizes = [8, 239], strides = [1, 1]} : vector<8x256xf32> to vector<8x239xf32>
    %595 = tpu.concatenate %593, %594 in 1 : vector<8x17xf32>, vector<8x239xf32> -> vector<8x256xf32>
    %c1_i32_238 = arith.constant 1 : i32
    %596 = vector.broadcast %c1_i32_238 : i32 to vector<1x256xi32>
    %597 = arith.cmpi sge, %592, %596 : vector<1x256xi32>
    %cst_239 = arith.constant 0.000000e+00 : f32
    %598 = vector.shape_cast %597 : vector<1x256xi1> to vector<1x256xi1>
    %599 = vector.broadcast %598 : vector<1x256xi1> to vector<8x256xi1>
    %600 = vector.broadcast %cst_239 : f32 to vector<8x256xf32>
    %601 = arith.select %599, %595, %600 : vector<8x256xi1>, vector<8x256xf32>
    %cst_240 = arith.constant 0.000000e+00 : f32
    %602 = vector.broadcast %cst_240 : f32 to vector<8x16xf32>
    %603 = vector.extract_strided_slice %572 {offsets = [0, 0], sizes = [8, 240], strides = [1, 1]} : vector<8x256xf32> to vector<8x240xf32>
    %604 = tpu.concatenate %602, %603 in 1 : vector<8x16xf32>, vector<8x240xf32> -> vector<8x256xf32>
    %cst_241 = arith.constant 0.000000e+00 : f32
    %605 = vector.broadcast %cst_241 : f32 to vector<8x15xf32>
    %606 = vector.extract_strided_slice %572 {offsets = [0, 0], sizes = [8, 241], strides = [1, 1]} : vector<8x256xf32> to vector<8x241xf32>
    %607 = tpu.concatenate %605, %606 in 1 : vector<8x15xf32>, vector<8x241xf32> -> vector<8x256xf32>
    %c15_i32 = arith.constant 15 : i32
    %608 = vector.broadcast %c15_i32 : i32 to vector<1x256xi32>
    %609 = arith.cmpi slt, %592, %608 : vector<1x256xi32>
    %cst_242 = arith.constant 0.000000e+00 : f32
    %610 = vector.shape_cast %609 : vector<1x256xi1> to vector<1x256xi1>
    %611 = vector.broadcast %610 : vector<1x256xi1> to vector<8x256xi1>
    %612 = vector.broadcast %cst_242 : f32 to vector<8x256xf32>
    %613 = arith.select %611, %607, %612 : vector<8x256xi1>, vector<8x256xf32>
    %cst_243 = arith.constant 0.000000e+00 : f32
    %614 = vector.broadcast %cst_243 : f32 to vector<8x1xf32>
    %615 = vector.extract_strided_slice %572 {offsets = [0, 0], sizes = [8, 255], strides = [1, 1]} : vector<8x256xf32> to vector<8x255xf32>
    %616 = tpu.concatenate %614, %615 in 1 : vector<8x1xf32>, vector<8x255xf32> -> vector<8x256xf32>
    %c1_i32_244 = arith.constant 1 : i32
    %617 = vector.broadcast %c1_i32_244 : i32 to vector<1x256xi32>
    %618 = arith.cmpi sge, %592, %617 : vector<1x256xi32>
    %cst_245 = arith.constant 0.000000e+00 : f32
    %619 = vector.shape_cast %618 : vector<1x256xi1> to vector<1x256xi1>
    %620 = vector.broadcast %619 : vector<1x256xi1> to vector<8x256xi1>
    %621 = vector.broadcast %cst_245 : f32 to vector<8x256xf32>
    %622 = arith.select %620, %616, %621 : vector<8x256xi1>, vector<8x256xf32>
    %cst_246 = arith.constant 0.000000e+00 : f32
    %623 = vector.broadcast %cst_246 : f32 to vector<8x1xf32>
    %624 = vector.extract_strided_slice %572 {offsets = [0, 1], sizes = [8, 255], strides = [1, 1]} : vector<8x256xf32> to vector<8x255xf32>
    %625 = tpu.concatenate %624, %623 in 1 : vector<8x255xf32>, vector<8x1xf32> -> vector<8x256xf32>
    %c15_i32_247 = arith.constant 15 : i32
    %626 = vector.broadcast %c15_i32_247 : i32 to vector<1x256xi32>
    %627 = arith.cmpi slt, %592, %626 : vector<1x256xi32>
    %cst_248 = arith.constant 0.000000e+00 : f32
    %628 = vector.shape_cast %627 : vector<1x256xi1> to vector<1x256xi1>
    %629 = vector.broadcast %628 : vector<1x256xi1> to vector<8x256xi1>
    %630 = vector.broadcast %cst_248 : f32 to vector<8x256xf32>
    %631 = arith.select %629, %625, %630 : vector<8x256xi1>, vector<8x256xf32>
    %cst_249 = arith.constant 0.000000e+00 : f32
    %632 = vector.broadcast %cst_249 : f32 to vector<8x15xf32>
    %633 = vector.extract_strided_slice %572 {offsets = [0, 15], sizes = [8, 241], strides = [1, 1]} : vector<8x256xf32> to vector<8x241xf32>
    %634 = tpu.concatenate %633, %632 in 1 : vector<8x241xf32>, vector<8x15xf32> -> vector<8x256xf32>
    %c1_i32_250 = arith.constant 1 : i32
    %635 = vector.broadcast %c1_i32_250 : i32 to vector<1x256xi32>
    %636 = arith.cmpi sge, %592, %635 : vector<1x256xi32>
    %cst_251 = arith.constant 0.000000e+00 : f32
    %637 = vector.shape_cast %636 : vector<1x256xi1> to vector<1x256xi1>
    %638 = vector.broadcast %637 : vector<1x256xi1> to vector<8x256xi1>
    %639 = vector.broadcast %cst_251 : f32 to vector<8x256xf32>
    %640 = arith.select %638, %634, %639 : vector<8x256xi1>, vector<8x256xf32>
    %cst_252 = arith.constant 0.000000e+00 : f32
    %641 = vector.broadcast %cst_252 : f32 to vector<8x16xf32>
    %642 = vector.extract_strided_slice %572 {offsets = [0, 16], sizes = [8, 240], strides = [1, 1]} : vector<8x256xf32> to vector<8x240xf32>
    %643 = tpu.concatenate %642, %641 in 1 : vector<8x240xf32>, vector<8x16xf32> -> vector<8x256xf32>
    %cst_253 = arith.constant 0.000000e+00 : f32
    %644 = vector.broadcast %cst_253 : f32 to vector<8x17xf32>
    %645 = vector.extract_strided_slice %572 {offsets = [0, 17], sizes = [8, 239], strides = [1, 1]} : vector<8x256xf32> to vector<8x239xf32>
    %646 = tpu.concatenate %645, %644 in 1 : vector<8x239xf32>, vector<8x17xf32> -> vector<8x256xf32>
    %c15_i32_254 = arith.constant 15 : i32
    %647 = vector.broadcast %c15_i32_254 : i32 to vector<1x256xi32>
    %648 = arith.cmpi slt, %592, %647 : vector<1x256xi32>
    %cst_255 = arith.constant 0.000000e+00 : f32
    %649 = vector.shape_cast %648 : vector<1x256xi1> to vector<1x256xi1>
    %650 = vector.broadcast %649 : vector<1x256xi1> to vector<8x256xi1>
    %651 = vector.broadcast %cst_255 : f32 to vector<8x256xf32>
    %652 = arith.select %650, %646, %651 : vector<8x256xi1>, vector<8x256xf32>
    %653 = tpu.concatenate %601, %604, %613, %622, %572, %631, %640, %643, %652 in 0 : vector<8x256xf32>, vector<8x256xf32>, vector<8x256xf32>, vector<8x256xf32>, vector<8x256xf32>, vector<8x256xf32>, vector<8x256xf32>, vector<8x256xf32>, vector<8x256xf32> -> vector<72x256xf32>
    %654 = arith.truncf %653 : vector<72x256xf32> to vector<72x256xbf16>
    %cst_256 = arith.constant dense<0.000000e+00> : vector<8x256xf32>
    %655 = tpu.matmul %573, %654, %cst_256 {dimension_numbers = #tpu.dot_dimension_numbers<[1], [0], [0], [1], [0, 0, 1, 1], [], []>} : vector<8x72xbf16>, vector<72x256xbf16>, vector<8x256xf32> -> vector<8x256xf32>
    %656 = vector.broadcast %574 : vector<8x1xf32> to vector<8x256xf32>
    %657 = arith.mulf %655, %656 : vector<8x256xf32>
    %658 = vector.broadcast %575 : vector<8x1xf32> to vector<8x256xf32>
    %659 = arith.addf %657, %658 : vector<8x256xf32>
    %cst_257 = arith.constant 0.000000e+00 : f32
    %660 = vector.broadcast %cst_257 : f32 to vector<8x256xf32>
    %661 = arith.maximumf %659, %660 : vector<8x256xf32>
    %c0_258 = arith.constant 0 : index
    %c0_259 = arith.constant 0 : index
    %662 = vector.load %arg34[%c0_258, %c0_259] : memref<8x8xbf16, #tpu.memory_space<vmem>>, vector<8x8xbf16>
    %c0_260 = arith.constant 0 : index
    %c0_261 = arith.constant 0 : index
    %663 = vector.load %arg35[%c0_260, %c0_261] : memref<8x1xf32, #tpu.memory_space<vmem>>, vector<8x1xf32>
    %c0_262 = arith.constant 0 : index
    %c0_263 = arith.constant 0 : index
    %664 = vector.load %arg36[%c0_262, %c0_263] : memref<8x1xf32, #tpu.memory_space<vmem>>, vector<8x1xf32>
    %665 = arith.truncf %572 : vector<8x256xf32> to vector<8x256xbf16>
    %cst_264 = arith.constant dense<0.000000e+00> : vector<8x256xf32>
    %666 = tpu.matmul %662, %665, %cst_264 {dimension_numbers = #tpu.dot_dimension_numbers<[1], [0], [0], [1], [0, 0, 1, 1], [], []>} : vector<8x8xbf16>, vector<8x256xbf16>, vector<8x256xf32> -> vector<8x256xf32>
    %667 = vector.broadcast %663 : vector<8x1xf32> to vector<8x256xf32>
    %668 = arith.mulf %666, %667 : vector<8x256xf32>
    %669 = vector.broadcast %664 : vector<8x1xf32> to vector<8x256xf32>
    %670 = arith.addf %668, %669 : vector<8x256xf32>
    %c0_265 = arith.constant 0 : index
    %c0_266 = arith.constant 0 : index
    %671 = vector.load %arg37[%c0_265, %c0_266] : memref<8x72xbf16, #tpu.memory_space<vmem>>, vector<8x72xbf16>
    %c0_267 = arith.constant 0 : index
    %c0_268 = arith.constant 0 : index
    %672 = vector.load %arg38[%c0_267, %c0_268] : memref<8x1xf32, #tpu.memory_space<vmem>>, vector<8x1xf32>
    %c0_269 = arith.constant 0 : index
    %c0_270 = arith.constant 0 : index
    %673 = vector.load %arg39[%c0_269, %c0_270] : memref<8x1xf32, #tpu.memory_space<vmem>>, vector<8x1xf32>
    %674 = tpu.iota {dimensions = array<i32: 1>} : vector<1x256xi32>
    %c16_i32_271 = arith.constant 16 : i32
    %c0_i32_272 = arith.constant 0 : i32
    %675 = arith.cmpi eq, %c16_i32_271, %c0_i32_272 : i32
    %c1_i32_273 = arith.constant 1 : i32
    %676 = arith.select %675, %c1_i32_273, %c16_i32_271 : i32
    %677 = vector.broadcast %676 : i32 to vector<1x256xi32>
    %678 = arith.remsi %674, %677 : vector<1x256xi32>
    %c0_i32_274 = arith.constant 0 : i32
    %679 = vector.broadcast %c0_i32_274 : i32 to vector<1x256xi32>
    %680 = arith.cmpi ne, %678, %679 : vector<1x256xi32>
    %c0_i32_275 = arith.constant 0 : i32
    %681 = vector.broadcast %c0_i32_275 : i32 to vector<1x256xi32>
    %682 = arith.cmpi slt, %678, %681 : vector<1x256xi32>
    %c0_i32_276 = arith.constant 0 : i32
    %683 = arith.cmpi slt, %676, %c0_i32_276 : i32
    %684 = vector.broadcast %683 : i1 to vector<1x256xi1>
    %685 = vector.broadcast %684 : vector<1x256xi1> to vector<1x256xi1>
    %686 = arith.xori %682, %685 : vector<1x256xi1>
    %687 = arith.andi %686, %680 : vector<1x256xi1>
    %688 = vector.broadcast %676 : i32 to vector<1x256xi32>
    %689 = arith.addi %678, %688 : vector<1x256xi32>
    %690 = arith.select %687, %689, %678 : vector<1x256xi1>, vector<1x256xi32>
    %cst_277 = arith.constant 0.000000e+00 : f32
    %691 = vector.broadcast %cst_277 : f32 to vector<8x17xf32>
    %692 = vector.extract_strided_slice %661 {offsets = [0, 0], sizes = [8, 239], strides = [1, 1]} : vector<8x256xf32> to vector<8x239xf32>
    %693 = tpu.concatenate %691, %692 in 1 : vector<8x17xf32>, vector<8x239xf32> -> vector<8x256xf32>
    %c1_i32_278 = arith.constant 1 : i32
    %694 = vector.broadcast %c1_i32_278 : i32 to vector<1x256xi32>
    %695 = arith.cmpi sge, %690, %694 : vector<1x256xi32>
    %cst_279 = arith.constant 0.000000e+00 : f32
    %696 = vector.shape_cast %695 : vector<1x256xi1> to vector<1x256xi1>
    %697 = vector.broadcast %696 : vector<1x256xi1> to vector<8x256xi1>
    %698 = vector.broadcast %cst_279 : f32 to vector<8x256xf32>
    %699 = arith.select %697, %693, %698 : vector<8x256xi1>, vector<8x256xf32>
    %cst_280 = arith.constant 0.000000e+00 : f32
    %700 = vector.broadcast %cst_280 : f32 to vector<8x16xf32>
    %701 = vector.extract_strided_slice %661 {offsets = [0, 0], sizes = [8, 240], strides = [1, 1]} : vector<8x256xf32> to vector<8x240xf32>
    %702 = tpu.concatenate %700, %701 in 1 : vector<8x16xf32>, vector<8x240xf32> -> vector<8x256xf32>
    %cst_281 = arith.constant 0.000000e+00 : f32
    %703 = vector.broadcast %cst_281 : f32 to vector<8x15xf32>
    %704 = vector.extract_strided_slice %661 {offsets = [0, 0], sizes = [8, 241], strides = [1, 1]} : vector<8x256xf32> to vector<8x241xf32>
    %705 = tpu.concatenate %703, %704 in 1 : vector<8x15xf32>, vector<8x241xf32> -> vector<8x256xf32>
    %c15_i32_282 = arith.constant 15 : i32
    %706 = vector.broadcast %c15_i32_282 : i32 to vector<1x256xi32>
    %707 = arith.cmpi slt, %690, %706 : vector<1x256xi32>
    %cst_283 = arith.constant 0.000000e+00 : f32
    %708 = vector.shape_cast %707 : vector<1x256xi1> to vector<1x256xi1>
    %709 = vector.broadcast %708 : vector<1x256xi1> to vector<8x256xi1>
    %710 = vector.broadcast %cst_283 : f32 to vector<8x256xf32>
    %711 = arith.select %709, %705, %710 : vector<8x256xi1>, vector<8x256xf32>
    %cst_284 = arith.constant 0.000000e+00 : f32
    %712 = vector.broadcast %cst_284 : f32 to vector<8x1xf32>
    %713 = vector.extract_strided_slice %661 {offsets = [0, 0], sizes = [8, 255], strides = [1, 1]} : vector<8x256xf32> to vector<8x255xf32>
    %714 = tpu.concatenate %712, %713 in 1 : vector<8x1xf32>, vector<8x255xf32> -> vector<8x256xf32>
    %c1_i32_285 = arith.constant 1 : i32
    %715 = vector.broadcast %c1_i32_285 : i32 to vector<1x256xi32>
    %716 = arith.cmpi sge, %690, %715 : vector<1x256xi32>
    %cst_286 = arith.constant 0.000000e+00 : f32
    %717 = vector.shape_cast %716 : vector<1x256xi1> to vector<1x256xi1>
    %718 = vector.broadcast %717 : vector<1x256xi1> to vector<8x256xi1>
    %719 = vector.broadcast %cst_286 : f32 to vector<8x256xf32>
    %720 = arith.select %718, %714, %719 : vector<8x256xi1>, vector<8x256xf32>
    %cst_287 = arith.constant 0.000000e+00 : f32
    %721 = vector.broadcast %cst_287 : f32 to vector<8x1xf32>
    %722 = vector.extract_strided_slice %661 {offsets = [0, 1], sizes = [8, 255], strides = [1, 1]} : vector<8x256xf32> to vector<8x255xf32>
    %723 = tpu.concatenate %722, %721 in 1 : vector<8x255xf32>, vector<8x1xf32> -> vector<8x256xf32>
    %c15_i32_288 = arith.constant 15 : i32
    %724 = vector.broadcast %c15_i32_288 : i32 to vector<1x256xi32>
    %725 = arith.cmpi slt, %690, %724 : vector<1x256xi32>
    %cst_289 = arith.constant 0.000000e+00 : f32
    %726 = vector.shape_cast %725 : vector<1x256xi1> to vector<1x256xi1>
    %727 = vector.broadcast %726 : vector<1x256xi1> to vector<8x256xi1>
    %728 = vector.broadcast %cst_289 : f32 to vector<8x256xf32>
    %729 = arith.select %727, %723, %728 : vector<8x256xi1>, vector<8x256xf32>
    %cst_290 = arith.constant 0.000000e+00 : f32
    %730 = vector.broadcast %cst_290 : f32 to vector<8x15xf32>
    %731 = vector.extract_strided_slice %661 {offsets = [0, 15], sizes = [8, 241], strides = [1, 1]} : vector<8x256xf32> to vector<8x241xf32>
    %732 = tpu.concatenate %731, %730 in 1 : vector<8x241xf32>, vector<8x15xf32> -> vector<8x256xf32>
    %c1_i32_291 = arith.constant 1 : i32
    %733 = vector.broadcast %c1_i32_291 : i32 to vector<1x256xi32>
    %734 = arith.cmpi sge, %690, %733 : vector<1x256xi32>
    %cst_292 = arith.constant 0.000000e+00 : f32
    %735 = vector.shape_cast %734 : vector<1x256xi1> to vector<1x256xi1>
    %736 = vector.broadcast %735 : vector<1x256xi1> to vector<8x256xi1>
    %737 = vector.broadcast %cst_292 : f32 to vector<8x256xf32>
    %738 = arith.select %736, %732, %737 : vector<8x256xi1>, vector<8x256xf32>
    %cst_293 = arith.constant 0.000000e+00 : f32
    %739 = vector.broadcast %cst_293 : f32 to vector<8x16xf32>
    %740 = vector.extract_strided_slice %661 {offsets = [0, 16], sizes = [8, 240], strides = [1, 1]} : vector<8x256xf32> to vector<8x240xf32>
    %741 = tpu.concatenate %740, %739 in 1 : vector<8x240xf32>, vector<8x16xf32> -> vector<8x256xf32>
    %cst_294 = arith.constant 0.000000e+00 : f32
    %742 = vector.broadcast %cst_294 : f32 to vector<8x17xf32>
    %743 = vector.extract_strided_slice %661 {offsets = [0, 17], sizes = [8, 239], strides = [1, 1]} : vector<8x256xf32> to vector<8x239xf32>
    %744 = tpu.concatenate %743, %742 in 1 : vector<8x239xf32>, vector<8x17xf32> -> vector<8x256xf32>
    %c15_i32_295 = arith.constant 15 : i32
    %745 = vector.broadcast %c15_i32_295 : i32 to vector<1x256xi32>
    %746 = arith.cmpi slt, %690, %745 : vector<1x256xi32>
    %cst_296 = arith.constant 0.000000e+00 : f32
    %747 = vector.shape_cast %746 : vector<1x256xi1> to vector<1x256xi1>
    %748 = vector.broadcast %747 : vector<1x256xi1> to vector<8x256xi1>
    %749 = vector.broadcast %cst_296 : f32 to vector<8x256xf32>
    %750 = arith.select %748, %744, %749 : vector<8x256xi1>, vector<8x256xf32>
    %751 = tpu.concatenate %699, %702, %711, %720, %661, %729, %738, %741, %750 in 0 : vector<8x256xf32>, vector<8x256xf32>, vector<8x256xf32>, vector<8x256xf32>, vector<8x256xf32>, vector<8x256xf32>, vector<8x256xf32>, vector<8x256xf32>, vector<8x256xf32> -> vector<72x256xf32>
    %752 = arith.truncf %751 : vector<72x256xf32> to vector<72x256xbf16>
    %cst_297 = arith.constant dense<0.000000e+00> : vector<8x256xf32>
    %753 = tpu.matmul %671, %752, %cst_297 {dimension_numbers = #tpu.dot_dimension_numbers<[1], [0], [0], [1], [0, 0, 1, 1], [], []>} : vector<8x72xbf16>, vector<72x256xbf16>, vector<8x256xf32> -> vector<8x256xf32>
    %754 = vector.broadcast %672 : vector<8x1xf32> to vector<8x256xf32>
    %755 = arith.mulf %753, %754 : vector<8x256xf32>
    %756 = vector.broadcast %673 : vector<8x1xf32> to vector<8x256xf32>
    %757 = arith.addf %755, %756 : vector<8x256xf32>
    %758 = arith.addf %757, %670 : vector<8x256xf32>
    %cst_298 = arith.constant 0.000000e+00 : f32
    %759 = vector.broadcast %cst_298 : f32 to vector<8x256xf32>
    %760 = arith.maximumf %758, %759 : vector<8x256xf32>
    %c0_299 = arith.constant 0 : index
    %c0_300 = arith.constant 0 : index
    %761 = vector.load %arg40[%c0_299, %c0_300] : memref<256x1024xbf16, #tpu.memory_space<vmem>>, vector<256x1024xbf16>
    %762 = arith.truncf %760 : vector<8x256xf32> to vector<8x256xbf16>
    %cst_301 = arith.constant dense<0.000000e+00> : vector<8x1024xf32>
    %763 = tpu.matmul %762, %761, %cst_301 {dimension_numbers = #tpu.dot_dimension_numbers<[1], [0], [0], [1], [0, 0, 1, 1], [], []>} : vector<8x256xbf16>, vector<256x1024xbf16>, vector<8x1024xf32> -> vector<8x1024xf32>
    %c0_302 = arith.constant 0 : index
    %c0_303 = arith.constant 0 : index
    %764 = vector.load %arg41[%c0_302, %c0_303] : memref<8x72xbf16, #tpu.memory_space<vmem>>, vector<8x72xbf16>
    %c0_304 = arith.constant 0 : index
    %c0_305 = arith.constant 0 : index
    %765 = vector.load %arg42[%c0_304, %c0_305] : memref<8x1xf32, #tpu.memory_space<vmem>>, vector<8x1xf32>
    %c0_306 = arith.constant 0 : index
    %c0_307 = arith.constant 0 : index
    %766 = vector.load %arg43[%c0_306, %c0_307] : memref<8x1xf32, #tpu.memory_space<vmem>>, vector<8x1xf32>
    %767 = tpu.iota {dimensions = array<i32: 1>} : vector<1x1024xi32>
    %c32_i32 = arith.constant 32 : i32
    %c0_i32_308 = arith.constant 0 : i32
    %768 = arith.cmpi eq, %c32_i32, %c0_i32_308 : i32
    %c1_i32_309 = arith.constant 1 : i32
    %769 = arith.select %768, %c1_i32_309, %c32_i32 : i32
    %770 = vector.broadcast %769 : i32 to vector<1x1024xi32>
    %771 = arith.remsi %767, %770 : vector<1x1024xi32>
    %c0_i32_310 = arith.constant 0 : i32
    %772 = vector.broadcast %c0_i32_310 : i32 to vector<1x1024xi32>
    %773 = arith.cmpi ne, %771, %772 : vector<1x1024xi32>
    %c0_i32_311 = arith.constant 0 : i32
    %774 = vector.broadcast %c0_i32_311 : i32 to vector<1x1024xi32>
    %775 = arith.cmpi slt, %771, %774 : vector<1x1024xi32>
    %c0_i32_312 = arith.constant 0 : i32
    %776 = arith.cmpi slt, %769, %c0_i32_312 : i32
    %777 = vector.broadcast %776 : i1 to vector<1x1024xi1>
    %778 = vector.broadcast %777 : vector<1x1024xi1> to vector<1x1024xi1>
    %779 = arith.xori %775, %778 : vector<1x1024xi1>
    %780 = arith.andi %779, %773 : vector<1x1024xi1>
    %781 = vector.broadcast %769 : i32 to vector<1x1024xi32>
    %782 = arith.addi %771, %781 : vector<1x1024xi32>
    %783 = arith.select %780, %782, %771 : vector<1x1024xi1>, vector<1x1024xi32>
    %cst_313 = arith.constant 0.000000e+00 : f32
    %784 = vector.broadcast %cst_313 : f32 to vector<8x33xf32>
    %785 = vector.extract_strided_slice %763 {offsets = [0, 0], sizes = [8, 991], strides = [1, 1]} : vector<8x1024xf32> to vector<8x991xf32>
    %786 = tpu.concatenate %784, %785 in 1 : vector<8x33xf32>, vector<8x991xf32> -> vector<8x1024xf32>
    %c1_i32_314 = arith.constant 1 : i32
    %787 = vector.broadcast %c1_i32_314 : i32 to vector<1x1024xi32>
    %788 = arith.cmpi sge, %783, %787 : vector<1x1024xi32>
    %cst_315 = arith.constant 0.000000e+00 : f32
    %789 = vector.shape_cast %788 : vector<1x1024xi1> to vector<1x1024xi1>
    %790 = vector.broadcast %789 : vector<1x1024xi1> to vector<8x1024xi1>
    %791 = vector.broadcast %cst_315 : f32 to vector<8x1024xf32>
    %792 = arith.select %790, %786, %791 : vector<8x1024xi1>, vector<8x1024xf32>
    %cst_316 = arith.constant 0.000000e+00 : f32
    %793 = vector.broadcast %cst_316 : f32 to vector<8x32xf32>
    %794 = vector.extract_strided_slice %763 {offsets = [0, 0], sizes = [8, 992], strides = [1, 1]} : vector<8x1024xf32> to vector<8x992xf32>
    %795 = tpu.concatenate %793, %794 in 1 : vector<8x32xf32>, vector<8x992xf32> -> vector<8x1024xf32>
    %cst_317 = arith.constant 0.000000e+00 : f32
    %796 = vector.broadcast %cst_317 : f32 to vector<8x31xf32>
    %797 = vector.extract_strided_slice %763 {offsets = [0, 0], sizes = [8, 993], strides = [1, 1]} : vector<8x1024xf32> to vector<8x993xf32>
    %798 = tpu.concatenate %796, %797 in 1 : vector<8x31xf32>, vector<8x993xf32> -> vector<8x1024xf32>
    %c31_i32 = arith.constant 31 : i32
    %799 = vector.broadcast %c31_i32 : i32 to vector<1x1024xi32>
    %800 = arith.cmpi slt, %783, %799 : vector<1x1024xi32>
    %cst_318 = arith.constant 0.000000e+00 : f32
    %801 = vector.shape_cast %800 : vector<1x1024xi1> to vector<1x1024xi1>
    %802 = vector.broadcast %801 : vector<1x1024xi1> to vector<8x1024xi1>
    %803 = vector.broadcast %cst_318 : f32 to vector<8x1024xf32>
    %804 = arith.select %802, %798, %803 : vector<8x1024xi1>, vector<8x1024xf32>
    %cst_319 = arith.constant 0.000000e+00 : f32
    %805 = vector.broadcast %cst_319 : f32 to vector<8x1xf32>
    %806 = vector.extract_strided_slice %763 {offsets = [0, 0], sizes = [8, 1023], strides = [1, 1]} : vector<8x1024xf32> to vector<8x1023xf32>
    %807 = tpu.concatenate %805, %806 in 1 : vector<8x1xf32>, vector<8x1023xf32> -> vector<8x1024xf32>
    %c1_i32_320 = arith.constant 1 : i32
    %808 = vector.broadcast %c1_i32_320 : i32 to vector<1x1024xi32>
    %809 = arith.cmpi sge, %783, %808 : vector<1x1024xi32>
    %cst_321 = arith.constant 0.000000e+00 : f32
    %810 = vector.shape_cast %809 : vector<1x1024xi1> to vector<1x1024xi1>
    %811 = vector.broadcast %810 : vector<1x1024xi1> to vector<8x1024xi1>
    %812 = vector.broadcast %cst_321 : f32 to vector<8x1024xf32>
    %813 = arith.select %811, %807, %812 : vector<8x1024xi1>, vector<8x1024xf32>
    %cst_322 = arith.constant 0.000000e+00 : f32
    %814 = vector.broadcast %cst_322 : f32 to vector<8x1xf32>
    %815 = vector.extract_strided_slice %763 {offsets = [0, 1], sizes = [8, 1023], strides = [1, 1]} : vector<8x1024xf32> to vector<8x1023xf32>
    %816 = tpu.concatenate %815, %814 in 1 : vector<8x1023xf32>, vector<8x1xf32> -> vector<8x1024xf32>
    %c31_i32_323 = arith.constant 31 : i32
    %817 = vector.broadcast %c31_i32_323 : i32 to vector<1x1024xi32>
    %818 = arith.cmpi slt, %783, %817 : vector<1x1024xi32>
    %cst_324 = arith.constant 0.000000e+00 : f32
    %819 = vector.shape_cast %818 : vector<1x1024xi1> to vector<1x1024xi1>
    %820 = vector.broadcast %819 : vector<1x1024xi1> to vector<8x1024xi1>
    %821 = vector.broadcast %cst_324 : f32 to vector<8x1024xf32>
    %822 = arith.select %820, %816, %821 : vector<8x1024xi1>, vector<8x1024xf32>
    %cst_325 = arith.constant 0.000000e+00 : f32
    %823 = vector.broadcast %cst_325 : f32 to vector<8x31xf32>
    %824 = vector.extract_strided_slice %763 {offsets = [0, 31], sizes = [8, 993], strides = [1, 1]} : vector<8x1024xf32> to vector<8x993xf32>
    %825 = tpu.concatenate %824, %823 in 1 : vector<8x993xf32>, vector<8x31xf32> -> vector<8x1024xf32>
    %c1_i32_326 = arith.constant 1 : i32
    %826 = vector.broadcast %c1_i32_326 : i32 to vector<1x1024xi32>
    %827 = arith.cmpi sge, %783, %826 : vector<1x1024xi32>
    %cst_327 = arith.constant 0.000000e+00 : f32
    %828 = vector.shape_cast %827 : vector<1x1024xi1> to vector<1x1024xi1>
    %829 = vector.broadcast %828 : vector<1x1024xi1> to vector<8x1024xi1>
    %830 = vector.broadcast %cst_327 : f32 to vector<8x1024xf32>
    %831 = arith.select %829, %825, %830 : vector<8x1024xi1>, vector<8x1024xf32>
    %cst_328 = arith.constant 0.000000e+00 : f32
    %832 = vector.broadcast %cst_328 : f32 to vector<8x32xf32>
    %833 = vector.extract_strided_slice %763 {offsets = [0, 32], sizes = [8, 992], strides = [1, 1]} : vector<8x1024xf32> to vector<8x992xf32>
    %834 = tpu.concatenate %833, %832 in 1 : vector<8x992xf32>, vector<8x32xf32> -> vector<8x1024xf32>
    %cst_329 = arith.constant 0.000000e+00 : f32
    %835 = vector.broadcast %cst_329 : f32 to vector<8x33xf32>
    %836 = vector.extract_strided_slice %763 {offsets = [0, 33], sizes = [8, 991], strides = [1, 1]} : vector<8x1024xf32> to vector<8x991xf32>
    %837 = tpu.concatenate %836, %835 in 1 : vector<8x991xf32>, vector<8x33xf32> -> vector<8x1024xf32>
    %c31_i32_330 = arith.constant 31 : i32
    %838 = vector.broadcast %c31_i32_330 : i32 to vector<1x1024xi32>
    %839 = arith.cmpi slt, %783, %838 : vector<1x1024xi32>
    %cst_331 = arith.constant 0.000000e+00 : f32
    %840 = vector.shape_cast %839 : vector<1x1024xi1> to vector<1x1024xi1>
    %841 = vector.broadcast %840 : vector<1x1024xi1> to vector<8x1024xi1>
    %842 = vector.broadcast %cst_331 : f32 to vector<8x1024xf32>
    %843 = arith.select %841, %837, %842 : vector<8x1024xi1>, vector<8x1024xf32>
    %844 = tpu.concatenate %792, %795, %804, %813, %763, %822, %831, %834, %843 in 0 : vector<8x1024xf32>, vector<8x1024xf32>, vector<8x1024xf32>, vector<8x1024xf32>, vector<8x1024xf32>, vector<8x1024xf32>, vector<8x1024xf32>, vector<8x1024xf32>, vector<8x1024xf32> -> vector<72x1024xf32>
    %845 = arith.truncf %844 : vector<72x1024xf32> to vector<72x1024xbf16>
    %cst_332 = arith.constant dense<0.000000e+00> : vector<8x1024xf32>
    %846 = tpu.matmul %764, %845, %cst_332 {dimension_numbers = #tpu.dot_dimension_numbers<[1], [0], [0], [1], [0, 0, 1, 1], [], []>} : vector<8x72xbf16>, vector<72x1024xbf16>, vector<8x1024xf32> -> vector<8x1024xf32>
    %847 = vector.broadcast %765 : vector<8x1xf32> to vector<8x1024xf32>
    %848 = arith.mulf %846, %847 : vector<8x1024xf32>
    %849 = vector.broadcast %766 : vector<8x1xf32> to vector<8x1024xf32>
    %850 = arith.addf %848, %849 : vector<8x1024xf32>
    %cst_333 = arith.constant 0.000000e+00 : f32
    %851 = vector.broadcast %cst_333 : f32 to vector<8x1024xf32>
    %852 = arith.maximumf %850, %851 : vector<8x1024xf32>
    %c0_334 = arith.constant 0 : index
    %c0_335 = arith.constant 0 : index
    %853 = vector.load %arg44[%c0_334, %c0_335] : memref<8x8xbf16, #tpu.memory_space<vmem>>, vector<8x8xbf16>
    %c0_336 = arith.constant 0 : index
    %c0_337 = arith.constant 0 : index
    %854 = vector.load %arg45[%c0_336, %c0_337] : memref<8x1xf32, #tpu.memory_space<vmem>>, vector<8x1xf32>
    %c0_338 = arith.constant 0 : index
    %c0_339 = arith.constant 0 : index
    %855 = vector.load %arg46[%c0_338, %c0_339] : memref<8x1xf32, #tpu.memory_space<vmem>>, vector<8x1xf32>
    %856 = arith.truncf %763 : vector<8x1024xf32> to vector<8x1024xbf16>
    %cst_340 = arith.constant dense<0.000000e+00> : vector<8x1024xf32>
    %857 = tpu.matmul %853, %856, %cst_340 {dimension_numbers = #tpu.dot_dimension_numbers<[1], [0], [0], [1], [0, 0, 1, 1], [], []>} : vector<8x8xbf16>, vector<8x1024xbf16>, vector<8x1024xf32> -> vector<8x1024xf32>
    %858 = vector.broadcast %854 : vector<8x1xf32> to vector<8x1024xf32>
    %859 = arith.mulf %857, %858 : vector<8x1024xf32>
    %860 = vector.broadcast %855 : vector<8x1xf32> to vector<8x1024xf32>
    %861 = arith.addf %859, %860 : vector<8x1024xf32>
    %c0_341 = arith.constant 0 : index
    %c0_342 = arith.constant 0 : index
    %862 = vector.load %arg47[%c0_341, %c0_342] : memref<8x72xbf16, #tpu.memory_space<vmem>>, vector<8x72xbf16>
    %c0_343 = arith.constant 0 : index
    %c0_344 = arith.constant 0 : index
    %863 = vector.load %arg48[%c0_343, %c0_344] : memref<8x1xf32, #tpu.memory_space<vmem>>, vector<8x1xf32>
    %c0_345 = arith.constant 0 : index
    %c0_346 = arith.constant 0 : index
    %864 = vector.load %arg49[%c0_345, %c0_346] : memref<8x1xf32, #tpu.memory_space<vmem>>, vector<8x1xf32>
    %865 = tpu.iota {dimensions = array<i32: 1>} : vector<1x1024xi32>
    %c32_i32_347 = arith.constant 32 : i32
    %c0_i32_348 = arith.constant 0 : i32
    %866 = arith.cmpi eq, %c32_i32_347, %c0_i32_348 : i32
    %c1_i32_349 = arith.constant 1 : i32
    %867 = arith.select %866, %c1_i32_349, %c32_i32_347 : i32
    %868 = vector.broadcast %867 : i32 to vector<1x1024xi32>
    %869 = arith.remsi %865, %868 : vector<1x1024xi32>
    %c0_i32_350 = arith.constant 0 : i32
    %870 = vector.broadcast %c0_i32_350 : i32 to vector<1x1024xi32>
    %871 = arith.cmpi ne, %869, %870 : vector<1x1024xi32>
    %c0_i32_351 = arith.constant 0 : i32
    %872 = vector.broadcast %c0_i32_351 : i32 to vector<1x1024xi32>
    %873 = arith.cmpi slt, %869, %872 : vector<1x1024xi32>
    %c0_i32_352 = arith.constant 0 : i32
    %874 = arith.cmpi slt, %867, %c0_i32_352 : i32
    %875 = vector.broadcast %874 : i1 to vector<1x1024xi1>
    %876 = vector.broadcast %875 : vector<1x1024xi1> to vector<1x1024xi1>
    %877 = arith.xori %873, %876 : vector<1x1024xi1>
    %878 = arith.andi %877, %871 : vector<1x1024xi1>
    %879 = vector.broadcast %867 : i32 to vector<1x1024xi32>
    %880 = arith.addi %869, %879 : vector<1x1024xi32>
    %881 = arith.select %878, %880, %869 : vector<1x1024xi1>, vector<1x1024xi32>
    %cst_353 = arith.constant 0.000000e+00 : f32
    %882 = vector.broadcast %cst_353 : f32 to vector<8x33xf32>
    %883 = vector.extract_strided_slice %852 {offsets = [0, 0], sizes = [8, 991], strides = [1, 1]} : vector<8x1024xf32> to vector<8x991xf32>
    %884 = tpu.concatenate %882, %883 in 1 : vector<8x33xf32>, vector<8x991xf32> -> vector<8x1024xf32>
    %c1_i32_354 = arith.constant 1 : i32
    %885 = vector.broadcast %c1_i32_354 : i32 to vector<1x1024xi32>
    %886 = arith.cmpi sge, %881, %885 : vector<1x1024xi32>
    %cst_355 = arith.constant 0.000000e+00 : f32
    %887 = vector.shape_cast %886 : vector<1x1024xi1> to vector<1x1024xi1>
    %888 = vector.broadcast %887 : vector<1x1024xi1> to vector<8x1024xi1>
    %889 = vector.broadcast %cst_355 : f32 to vector<8x1024xf32>
    %890 = arith.select %888, %884, %889 : vector<8x1024xi1>, vector<8x1024xf32>
    %cst_356 = arith.constant 0.000000e+00 : f32
    %891 = vector.broadcast %cst_356 : f32 to vector<8x32xf32>
    %892 = vector.extract_strided_slice %852 {offsets = [0, 0], sizes = [8, 992], strides = [1, 1]} : vector<8x1024xf32> to vector<8x992xf32>
    %893 = tpu.concatenate %891, %892 in 1 : vector<8x32xf32>, vector<8x992xf32> -> vector<8x1024xf32>
    %cst_357 = arith.constant 0.000000e+00 : f32
    %894 = vector.broadcast %cst_357 : f32 to vector<8x31xf32>
    %895 = vector.extract_strided_slice %852 {offsets = [0, 0], sizes = [8, 993], strides = [1, 1]} : vector<8x1024xf32> to vector<8x993xf32>
    %896 = tpu.concatenate %894, %895 in 1 : vector<8x31xf32>, vector<8x993xf32> -> vector<8x1024xf32>
    %c31_i32_358 = arith.constant 31 : i32
    %897 = vector.broadcast %c31_i32_358 : i32 to vector<1x1024xi32>
    %898 = arith.cmpi slt, %881, %897 : vector<1x1024xi32>
    %cst_359 = arith.constant 0.000000e+00 : f32
    %899 = vector.shape_cast %898 : vector<1x1024xi1> to vector<1x1024xi1>
    %900 = vector.broadcast %899 : vector<1x1024xi1> to vector<8x1024xi1>
    %901 = vector.broadcast %cst_359 : f32 to vector<8x1024xf32>
    %902 = arith.select %900, %896, %901 : vector<8x1024xi1>, vector<8x1024xf32>
    %cst_360 = arith.constant 0.000000e+00 : f32
    %903 = vector.broadcast %cst_360 : f32 to vector<8x1xf32>
    %904 = vector.extract_strided_slice %852 {offsets = [0, 0], sizes = [8, 1023], strides = [1, 1]} : vector<8x1024xf32> to vector<8x1023xf32>
    %905 = tpu.concatenate %903, %904 in 1 : vector<8x1xf32>, vector<8x1023xf32> -> vector<8x1024xf32>
    %c1_i32_361 = arith.constant 1 : i32
    %906 = vector.broadcast %c1_i32_361 : i32 to vector<1x1024xi32>
    %907 = arith.cmpi sge, %881, %906 : vector<1x1024xi32>
    %cst_362 = arith.constant 0.000000e+00 : f32
    %908 = vector.shape_cast %907 : vector<1x1024xi1> to vector<1x1024xi1>
    %909 = vector.broadcast %908 : vector<1x1024xi1> to vector<8x1024xi1>
    %910 = vector.broadcast %cst_362 : f32 to vector<8x1024xf32>
    %911 = arith.select %909, %905, %910 : vector<8x1024xi1>, vector<8x1024xf32>
    %cst_363 = arith.constant 0.000000e+00 : f32
    %912 = vector.broadcast %cst_363 : f32 to vector<8x1xf32>
    %913 = vector.extract_strided_slice %852 {offsets = [0, 1], sizes = [8, 1023], strides = [1, 1]} : vector<8x1024xf32> to vector<8x1023xf32>
    %914 = tpu.concatenate %913, %912 in 1 : vector<8x1023xf32>, vector<8x1xf32> -> vector<8x1024xf32>
    %c31_i32_364 = arith.constant 31 : i32
    %915 = vector.broadcast %c31_i32_364 : i32 to vector<1x1024xi32>
    %916 = arith.cmpi slt, %881, %915 : vector<1x1024xi32>
    %cst_365 = arith.constant 0.000000e+00 : f32
    %917 = vector.shape_cast %916 : vector<1x1024xi1> to vector<1x1024xi1>
    %918 = vector.broadcast %917 : vector<1x1024xi1> to vector<8x1024xi1>
    %919 = vector.broadcast %cst_365 : f32 to vector<8x1024xf32>
    %920 = arith.select %918, %914, %919 : vector<8x1024xi1>, vector<8x1024xf32>
    %cst_366 = arith.constant 0.000000e+00 : f32
    %921 = vector.broadcast %cst_366 : f32 to vector<8x31xf32>
    %922 = vector.extract_strided_slice %852 {offsets = [0, 31], sizes = [8, 993], strides = [1, 1]} : vector<8x1024xf32> to vector<8x993xf32>
    %923 = tpu.concatenate %922, %921 in 1 : vector<8x993xf32>, vector<8x31xf32> -> vector<8x1024xf32>
    %c1_i32_367 = arith.constant 1 : i32
    %924 = vector.broadcast %c1_i32_367 : i32 to vector<1x1024xi32>
    %925 = arith.cmpi sge, %881, %924 : vector<1x1024xi32>
    %cst_368 = arith.constant 0.000000e+00 : f32
    %926 = vector.shape_cast %925 : vector<1x1024xi1> to vector<1x1024xi1>
    %927 = vector.broadcast %926 : vector<1x1024xi1> to vector<8x1024xi1>
    %928 = vector.broadcast %cst_368 : f32 to vector<8x1024xf32>
    %929 = arith.select %927, %923, %928 : vector<8x1024xi1>, vector<8x1024xf32>
    %cst_369 = arith.constant 0.000000e+00 : f32
    %930 = vector.broadcast %cst_369 : f32 to vector<8x32xf32>
    %931 = vector.extract_strided_slice %852 {offsets = [0, 32], sizes = [8, 992], strides = [1, 1]} : vector<8x1024xf32> to vector<8x992xf32>
    %932 = tpu.concatenate %931, %930 in 1 : vector<8x992xf32>, vector<8x32xf32> -> vector<8x1024xf32>
    %cst_370 = arith.constant 0.000000e+00 : f32
    %933 = vector.broadcast %cst_370 : f32 to vector<8x33xf32>
    %934 = vector.extract_strided_slice %852 {offsets = [0, 33], sizes = [8, 991], strides = [1, 1]} : vector<8x1024xf32> to vector<8x991xf32>
    %935 = tpu.concatenate %934, %933 in 1 : vector<8x991xf32>, vector<8x33xf32> -> vector<8x1024xf32>
    %c31_i32_371 = arith.constant 31 : i32
    %936 = vector.broadcast %c31_i32_371 : i32 to vector<1x1024xi32>
    %937 = arith.cmpi slt, %881, %936 : vector<1x1024xi32>
    %cst_372 = arith.constant 0.000000e+00 : f32
    %938 = vector.shape_cast %937 : vector<1x1024xi1> to vector<1x1024xi1>
    %939 = vector.broadcast %938 : vector<1x1024xi1> to vector<8x1024xi1>
    %940 = vector.broadcast %cst_372 : f32 to vector<8x1024xf32>
    %941 = arith.select %939, %935, %940 : vector<8x1024xi1>, vector<8x1024xf32>
    %942 = tpu.concatenate %890, %893, %902, %911, %852, %920, %929, %932, %941 in 0 : vector<8x1024xf32>, vector<8x1024xf32>, vector<8x1024xf32>, vector<8x1024xf32>, vector<8x1024xf32>, vector<8x1024xf32>, vector<8x1024xf32>, vector<8x1024xf32>, vector<8x1024xf32> -> vector<72x1024xf32>
    %943 = arith.truncf %942 : vector<72x1024xf32> to vector<72x1024xbf16>
    %cst_373 = arith.constant dense<0.000000e+00> : vector<8x1024xf32>
    %944 = tpu.matmul %862, %943, %cst_373 {dimension_numbers = #tpu.dot_dimension_numbers<[1], [0], [0], [1], [0, 0, 1, 1], [], []>} : vector<8x72xbf16>, vector<72x1024xbf16>, vector<8x1024xf32> -> vector<8x1024xf32>
    %945 = vector.broadcast %863 : vector<8x1xf32> to vector<8x1024xf32>
    %946 = arith.mulf %944, %945 : vector<8x1024xf32>
    %947 = vector.broadcast %864 : vector<8x1xf32> to vector<8x1024xf32>
    %948 = arith.addf %946, %947 : vector<8x1024xf32>
    %949 = arith.addf %948, %861 : vector<8x1024xf32>
    %cst_374 = arith.constant 0.000000e+00 : f32
    %950 = vector.broadcast %cst_374 : f32 to vector<8x1024xf32>
    %951 = arith.maximumf %949, %950 : vector<8x1024xf32>
    %c0_375 = arith.constant 0 : index
    %c0_376 = arith.constant 0 : index
    %952 = vector.load %arg50[%c0_375, %c0_376] : memref<1x72xbf16, #tpu.memory_space<vmem>>, vector<1x72xbf16>
    %953 = tpu.iota {dimensions = array<i32: 1>} : vector<1x1024xi32>
    %c32_i32_377 = arith.constant 32 : i32
    %c0_i32_378 = arith.constant 0 : i32
    %954 = arith.cmpi eq, %c32_i32_377, %c0_i32_378 : i32
    %c1_i32_379 = arith.constant 1 : i32
    %955 = arith.select %954, %c1_i32_379, %c32_i32_377 : i32
    %956 = vector.broadcast %955 : i32 to vector<1x1024xi32>
    %957 = arith.remsi %953, %956 : vector<1x1024xi32>
    %c0_i32_380 = arith.constant 0 : i32
    %958 = vector.broadcast %c0_i32_380 : i32 to vector<1x1024xi32>
    %959 = arith.cmpi ne, %957, %958 : vector<1x1024xi32>
    %c0_i32_381 = arith.constant 0 : i32
    %960 = vector.broadcast %c0_i32_381 : i32 to vector<1x1024xi32>
    %961 = arith.cmpi slt, %957, %960 : vector<1x1024xi32>
    %c0_i32_382 = arith.constant 0 : i32
    %962 = arith.cmpi slt, %955, %c0_i32_382 : i32
    %963 = vector.broadcast %962 : i1 to vector<1x1024xi1>
    %964 = vector.broadcast %963 : vector<1x1024xi1> to vector<1x1024xi1>
    %965 = arith.xori %961, %964 : vector<1x1024xi1>
    %966 = arith.andi %965, %959 : vector<1x1024xi1>
    %967 = vector.broadcast %955 : i32 to vector<1x1024xi32>
    %968 = arith.addi %957, %967 : vector<1x1024xi32>
    %969 = arith.select %966, %968, %957 : vector<1x1024xi1>, vector<1x1024xi32>
    %cst_383 = arith.constant 0.000000e+00 : f32
    %970 = vector.broadcast %cst_383 : f32 to vector<8x33xf32>
    %971 = vector.extract_strided_slice %951 {offsets = [0, 0], sizes = [8, 991], strides = [1, 1]} : vector<8x1024xf32> to vector<8x991xf32>
    %972 = tpu.concatenate %970, %971 in 1 : vector<8x33xf32>, vector<8x991xf32> -> vector<8x1024xf32>
    %c1_i32_384 = arith.constant 1 : i32
    %973 = vector.broadcast %c1_i32_384 : i32 to vector<1x1024xi32>
    %974 = arith.cmpi sge, %969, %973 : vector<1x1024xi32>
    %cst_385 = arith.constant 0.000000e+00 : f32
    %975 = vector.shape_cast %974 : vector<1x1024xi1> to vector<1x1024xi1>
    %976 = vector.broadcast %975 : vector<1x1024xi1> to vector<8x1024xi1>
    %977 = vector.broadcast %cst_385 : f32 to vector<8x1024xf32>
    %978 = arith.select %976, %972, %977 : vector<8x1024xi1>, vector<8x1024xf32>
    %cst_386 = arith.constant 0.000000e+00 : f32
    %979 = vector.broadcast %cst_386 : f32 to vector<8x32xf32>
    %980 = vector.extract_strided_slice %951 {offsets = [0, 0], sizes = [8, 992], strides = [1, 1]} : vector<8x1024xf32> to vector<8x992xf32>
    %981 = tpu.concatenate %979, %980 in 1 : vector<8x32xf32>, vector<8x992xf32> -> vector<8x1024xf32>
    %cst_387 = arith.constant 0.000000e+00 : f32
    %982 = vector.broadcast %cst_387 : f32 to vector<8x31xf32>
    %983 = vector.extract_strided_slice %951 {offsets = [0, 0], sizes = [8, 993], strides = [1, 1]} : vector<8x1024xf32> to vector<8x993xf32>
    %984 = tpu.concatenate %982, %983 in 1 : vector<8x31xf32>, vector<8x993xf32> -> vector<8x1024xf32>
    %c31_i32_388 = arith.constant 31 : i32
    %985 = vector.broadcast %c31_i32_388 : i32 to vector<1x1024xi32>
    %986 = arith.cmpi slt, %969, %985 : vector<1x1024xi32>
    %cst_389 = arith.constant 0.000000e+00 : f32
    %987 = vector.shape_cast %986 : vector<1x1024xi1> to vector<1x1024xi1>
    %988 = vector.broadcast %987 : vector<1x1024xi1> to vector<8x1024xi1>
    %989 = vector.broadcast %cst_389 : f32 to vector<8x1024xf32>
    %990 = arith.select %988, %984, %989 : vector<8x1024xi1>, vector<8x1024xf32>
    %cst_390 = arith.constant 0.000000e+00 : f32
    %991 = vector.broadcast %cst_390 : f32 to vector<8x1xf32>
    %992 = vector.extract_strided_slice %951 {offsets = [0, 0], sizes = [8, 1023], strides = [1, 1]} : vector<8x1024xf32> to vector<8x1023xf32>
    %993 = tpu.concatenate %991, %992 in 1 : vector<8x1xf32>, vector<8x1023xf32> -> vector<8x1024xf32>
    %c1_i32_391 = arith.constant 1 : i32
    %994 = vector.broadcast %c1_i32_391 : i32 to vector<1x1024xi32>
    %995 = arith.cmpi sge, %969, %994 : vector<1x1024xi32>
    %cst_392 = arith.constant 0.000000e+00 : f32
    %996 = vector.shape_cast %995 : vector<1x1024xi1> to vector<1x1024xi1>
    %997 = vector.broadcast %996 : vector<1x1024xi1> to vector<8x1024xi1>
    %998 = vector.broadcast %cst_392 : f32 to vector<8x1024xf32>
    %999 = arith.select %997, %993, %998 : vector<8x1024xi1>, vector<8x1024xf32>
    %cst_393 = arith.constant 0.000000e+00 : f32
    %1000 = vector.broadcast %cst_393 : f32 to vector<8x1xf32>
    %1001 = vector.extract_strided_slice %951 {offsets = [0, 1], sizes = [8, 1023], strides = [1, 1]} : vector<8x1024xf32> to vector<8x1023xf32>
    %1002 = tpu.concatenate %1001, %1000 in 1 : vector<8x1023xf32>, vector<8x1xf32> -> vector<8x1024xf32>
    %c31_i32_394 = arith.constant 31 : i32
    %1003 = vector.broadcast %c31_i32_394 : i32 to vector<1x1024xi32>
    %1004 = arith.cmpi slt, %969, %1003 : vector<1x1024xi32>
    %cst_395 = arith.constant 0.000000e+00 : f32
    %1005 = vector.shape_cast %1004 : vector<1x1024xi1> to vector<1x1024xi1>
    %1006 = vector.broadcast %1005 : vector<1x1024xi1> to vector<8x1024xi1>
    %1007 = vector.broadcast %cst_395 : f32 to vector<8x1024xf32>
    %1008 = arith.select %1006, %1002, %1007 : vector<8x1024xi1>, vector<8x1024xf32>
    %cst_396 = arith.constant 0.000000e+00 : f32
    %1009 = vector.broadcast %cst_396 : f32 to vector<8x31xf32>
    %1010 = vector.extract_strided_slice %951 {offsets = [0, 31], sizes = [8, 993], strides = [1, 1]} : vector<8x1024xf32> to vector<8x993xf32>
    %1011 = tpu.concatenate %1010, %1009 in 1 : vector<8x993xf32>, vector<8x31xf32> -> vector<8x1024xf32>
    %c1_i32_397 = arith.constant 1 : i32
    %1012 = vector.broadcast %c1_i32_397 : i32 to vector<1x1024xi32>
    %1013 = arith.cmpi sge, %969, %1012 : vector<1x1024xi32>
    %cst_398 = arith.constant 0.000000e+00 : f32
    %1014 = vector.shape_cast %1013 : vector<1x1024xi1> to vector<1x1024xi1>
    %1015 = vector.broadcast %1014 : vector<1x1024xi1> to vector<8x1024xi1>
    %1016 = vector.broadcast %cst_398 : f32 to vector<8x1024xf32>
    %1017 = arith.select %1015, %1011, %1016 : vector<8x1024xi1>, vector<8x1024xf32>
    %cst_399 = arith.constant 0.000000e+00 : f32
    %1018 = vector.broadcast %cst_399 : f32 to vector<8x32xf32>
    %1019 = vector.extract_strided_slice %951 {offsets = [0, 32], sizes = [8, 992], strides = [1, 1]} : vector<8x1024xf32> to vector<8x992xf32>
    %1020 = tpu.concatenate %1019, %1018 in 1 : vector<8x992xf32>, vector<8x32xf32> -> vector<8x1024xf32>
    %cst_400 = arith.constant 0.000000e+00 : f32
    %1021 = vector.broadcast %cst_400 : f32 to vector<8x33xf32>
    %1022 = vector.extract_strided_slice %951 {offsets = [0, 33], sizes = [8, 991], strides = [1, 1]} : vector<8x1024xf32> to vector<8x991xf32>
    %1023 = tpu.concatenate %1022, %1021 in 1 : vector<8x991xf32>, vector<8x33xf32> -> vector<8x1024xf32>
    %c31_i32_401 = arith.constant 31 : i32
    %1024 = vector.broadcast %c31_i32_401 : i32 to vector<1x1024xi32>
    %1025 = arith.cmpi slt, %969, %1024 : vector<1x1024xi32>
    %cst_402 = arith.constant 0.000000e+00 : f32
    %1026 = vector.shape_cast %1025 : vector<1x1024xi1> to vector<1x1024xi1>
    %1027 = vector.broadcast %1026 : vector<1x1024xi1> to vector<8x1024xi1>
    %1028 = vector.broadcast %cst_402 : f32 to vector<8x1024xf32>
    %1029 = arith.select %1027, %1023, %1028 : vector<8x1024xi1>, vector<8x1024xf32>
    %1030 = tpu.concatenate %978, %981, %990, %999, %951, %1008, %1017, %1020, %1029 in 0 : vector<8x1024xf32>, vector<8x1024xf32>, vector<8x1024xf32>, vector<8x1024xf32>, vector<8x1024xf32>, vector<8x1024xf32>, vector<8x1024xf32>, vector<8x1024xf32>, vector<8x1024xf32> -> vector<72x1024xf32>
    %1031 = arith.truncf %1030 : vector<72x1024xf32> to vector<72x1024xbf16>
    %cst_403 = arith.constant dense<0.000000e+00> : vector<1x1024xf32>
    %1032 = tpu.matmul %952, %1031, %cst_403 {dimension_numbers = #tpu.dot_dimension_numbers<[1], [0], [0], [1], [0, 0, 1, 1], [], []>} : vector<1x72xbf16>, vector<72x1024xbf16>, vector<1x1024xf32> -> vector<1x1024xf32>
    %1033 = math.tanh %1032 : vector<1x1024xf32>
    %1034 = vector.shape_cast %1033 : vector<1x1024xf32> to vector<1x1x1024xf32>
    %c0_404 = arith.constant 0 : index
    %c0_405 = arith.constant 0 : index
    %c0_406 = arith.constant 0 : index
    %1035 = vector.load %arg51[%c0_404, %c0_405, %c0_406] : memref<1x1x1024xf32, #tpu.memory_space<vmem>>, vector<1x1x1024xf32>
    tpu.vector_store %arg51[%c0_404, %c0_405, %c0_406], %1034 {strides = array<i32>} : memref<1x1x1024xf32, #tpu.memory_space<vmem>>, vector<1x1x1024xf32>,
    return
  }
  func.func @transform_0(%arg0: i32) -> (i32, i32, i32) {
    %c0_i32 = arith.constant 0 : i32
    %c0_i32_0 = arith.constant 0 : i32
    %c0_i32_1 = arith.constant 0 : i32
    return %arg0, %c0_i32, %c0_i32_0 : i32, i32, i32
  }
  func.func @transform_1(%arg0: i32) -> (i32, i32) {
    %c0_i32 = arith.constant 0 : i32
    %c0_i32_0 = arith.constant 0 : i32
    %c0_i32_1 = arith.constant 0 : i32
    return %c0_i32, %c0_i32_0 : i32, i32
  }
  func.func @transform_2(%arg0: i32) -> (i32, i32) {
    %c0_i32 = arith.constant 0 : i32
    %c0_i32_0 = arith.constant 0 : i32
    %c0_i32_1 = arith.constant 0 : i32
    return %c0_i32, %c0_i32_0 : i32, i32
  }
  func.func @transform_3(%arg0: i32) -> (i32, i32) {
    %c0_i32 = arith.constant 0 : i32
    %c0_i32_0 = arith.constant 0 : i32
    %c0_i32_1 = arith.constant 0 : i32
    return %c0_i32, %c0_i32_0 : i32, i32
  }
  func.func @transform_4(%arg0: i32) -> (i32, i32) {
    %c0_i32 = arith.constant 0 : i32
    %c0_i32_0 = arith.constant 0 : i32
    %c0_i32_1 = arith.constant 0 : i32
    return %c0_i32, %c0_i32_0 : i32, i32
  }
  func.func @transform_5(%arg0: i32) -> (i32, i32) {
    %c0_i32 = arith.constant 0 : i32
    %c0_i32_0 = arith.constant 0 : i32
    %c0_i32_1 = arith.constant 0 : i32
    return %c0_i32, %c0_i32_0 : i32, i32
  }
  func.func @transform_6(%arg0: i32) -> (i32, i32) {
    %c0_i32 = arith.constant 0 : i32
    %c0_i32_0 = arith.constant 0 : i32
    %c0_i32_1 = arith.constant 0 : i32
    return %c0_i32, %c0_i32_0 : i32, i32
  }
  func.func @transform_7(%arg0: i32) -> (i32, i32) {
    %c0_i32 = arith.constant 0 : i32
    %c0_i32_0 = arith.constant 0 : i32
    %c0_i32_1 = arith.constant 0 : i32
    return %c0_i32, %c0_i32_0 : i32, i32
  }
  func.func @transform_8(%arg0: i32) -> (i32, i32) {
    %c0_i32 = arith.constant 0 : i32
    %c0_i32_0 = arith.constant 0 : i32
    %c0_i32_1 = arith.constant 0 : i32
    return %c0_i32, %c0_i32_0 : i32, i32
  }
  func.func @transform_9(%arg0: i32) -> (i32, i32) {
    %c0_i32 = arith.constant 0 : i32
    %c0_i32_0 = arith.constant 0 : i32
    %c0_i32_1 = arith.constant 0 : i32
    return %c0_i32, %c0_i32_0 : i32, i32
  }
  func.func @transform_10(%arg0: i32) -> (i32, i32) {
    %c0_i32 = arith.constant 0 : i32
    %c0_i32_0 = arith.constant 0 : i32
    %c0_i32_1 = arith.constant 0 : i32
    return %c0_i32, %c0_i32_0 : i32, i32
  }
  func.func @transform_11(%arg0: i32) -> (i32, i32) {
    %c0_i32 = arith.constant 0 : i32
    %c0_i32_0 = arith.constant 0 : i32
    %c0_i32_1 = arith.constant 0 : i32
    return %c0_i32, %c0_i32_0 : i32, i32
  }
  func.func @transform_12(%arg0: i32) -> (i32, i32) {
    %c0_i32 = arith.constant 0 : i32
    %c0_i32_0 = arith.constant 0 : i32
    %c0_i32_1 = arith.constant 0 : i32
    return %c0_i32, %c0_i32_0 : i32, i32
  }
  func.func @transform_13(%arg0: i32) -> (i32, i32) {
    %c0_i32 = arith.constant 0 : i32
    %c0_i32_0 = arith.constant 0 : i32
    %c0_i32_1 = arith.constant 0 : i32
    return %c0_i32, %c0_i32_0 : i32, i32
  }
  func.func @transform_14(%arg0: i32) -> (i32, i32) {
    %c0_i32 = arith.constant 0 : i32
    %c0_i32_0 = arith.constant 0 : i32
    %c0_i32_1 = arith.constant 0 : i32
    return %c0_i32, %c0_i32_0 : i32, i32
  }
  func.func @transform_15(%arg0: i32) -> (i32, i32) {
    %c0_i32 = arith.constant 0 : i32
    %c0_i32_0 = arith.constant 0 : i32
    %c0_i32_1 = arith.constant 0 : i32
    return %c0_i32, %c0_i32_0 : i32, i32
  }
  func.func @transform_16(%arg0: i32) -> (i32, i32) {
    %c0_i32 = arith.constant 0 : i32
    %c0_i32_0 = arith.constant 0 : i32
    %c0_i32_1 = arith.constant 0 : i32
    return %c0_i32, %c0_i32_0 : i32, i32
  }
  func.func @transform_17(%arg0: i32) -> (i32, i32) {
    %c0_i32 = arith.constant 0 : i32
    %c0_i32_0 = arith.constant 0 : i32
    %c0_i32_1 = arith.constant 0 : i32
    return %c0_i32, %c0_i32_0 : i32, i32
  }
  func.func @transform_18(%arg0: i32) -> (i32, i32) {
    %c0_i32 = arith.constant 0 : i32
    %c0_i32_0 = arith.constant 0 : i32
    %c0_i32_1 = arith.constant 0 : i32
    return %c0_i32, %c0_i32_0 : i32, i32
  }
  func.func @transform_19(%arg0: i32) -> (i32, i32) {
    %c0_i32 = arith.constant 0 : i32
    %c0_i32_0 = arith.constant 0 : i32
    %c0_i32_1 = arith.constant 0 : i32
    return %c0_i32, %c0_i32_0 : i32, i32
  }
  func.func @transform_20(%arg0: i32) -> (i32, i32) {
    %c0_i32 = arith.constant 0 : i32
    %c0_i32_0 = arith.constant 0 : i32
    %c0_i32_1 = arith.constant 0 : i32
    return %c0_i32, %c0_i32_0 : i32, i32
  }
  func.func @transform_21(%arg0: i32) -> (i32, i32) {
    %c0_i32 = arith.constant 0 : i32
    %c0_i32_0 = arith.constant 0 : i32
    %c0_i32_1 = arith.constant 0 : i32
    return %c0_i32, %c0_i32_0 : i32, i32
  }
  func.func @transform_22(%arg0: i32) -> (i32, i32) {
    %c0_i32 = arith.constant 0 : i32
    %c0_i32_0 = arith.constant 0 : i32
    %c0_i32_1 = arith.constant 0 : i32
    return %c0_i32, %c0_i32_0 : i32, i32
  }
  func.func @transform_23(%arg0: i32) -> (i32, i32) {
    %c0_i32 = arith.constant 0 : i32
    %c0_i32_0 = arith.constant 0 : i32
    %c0_i32_1 = arith.constant 0 : i32
    return %c0_i32, %c0_i32_0 : i32, i32
  }
  func.func @transform_24(%arg0: i32) -> (i32, i32) {
    %c0_i32 = arith.constant 0 : i32
    %c0_i32_0 = arith.constant 0 : i32
    %c0_i32_1 = arith.constant 0 : i32
    return %c0_i32, %c0_i32_0 : i32, i32
  }
  func.func @transform_25(%arg0: i32) -> (i32, i32) {
    %c0_i32 = arith.constant 0 : i32
    %c0_i32_0 = arith.constant 0 : i32
    %c0_i32_1 = arith.constant 0 : i32
    return %c0_i32, %c0_i32_0 : i32, i32
  }
  func.func @transform_26(%arg0: i32) -> (i32, i32) {
    %c0_i32 = arith.constant 0 : i32
    %c0_i32_0 = arith.constant 0 : i32
    %c0_i32_1 = arith.constant 0 : i32
    return %c0_i32, %c0_i32_0 : i32, i32
  }
  func.func @transform_27(%arg0: i32) -> (i32, i32) {
    %c0_i32 = arith.constant 0 : i32
    %c0_i32_0 = arith.constant 0 : i32
    %c0_i32_1 = arith.constant 0 : i32
    return %c0_i32, %c0_i32_0 : i32, i32
  }
  func.func @transform_28(%arg0: i32) -> (i32, i32) {
    %c0_i32 = arith.constant 0 : i32
    %c0_i32_0 = arith.constant 0 : i32
    %c0_i32_1 = arith.constant 0 : i32
    return %c0_i32, %c0_i32_0 : i32, i32
  }
  func.func @transform_29(%arg0: i32) -> (i32, i32) {
    %c0_i32 = arith.constant 0 : i32
    %c0_i32_0 = arith.constant 0 : i32
    %c0_i32_1 = arith.constant 0 : i32
    return %c0_i32, %c0_i32_0 : i32, i32
  }
  func.func @transform_30(%arg0: i32) -> (i32, i32) {
    %c0_i32 = arith.constant 0 : i32
    %c0_i32_0 = arith.constant 0 : i32
    %c0_i32_1 = arith.constant 0 : i32
    return %c0_i32, %c0_i32_0 : i32, i32
  }
  func.func @transform_31(%arg0: i32) -> (i32, i32) {
    %c0_i32 = arith.constant 0 : i32
    %c0_i32_0 = arith.constant 0 : i32
    %c0_i32_1 = arith.constant 0 : i32
    return %c0_i32, %c0_i32_0 : i32, i32
  }
  func.func @transform_32(%arg0: i32) -> (i32, i32) {
    %c0_i32 = arith.constant 0 : i32
    %c0_i32_0 = arith.constant 0 : i32
    %c0_i32_1 = arith.constant 0 : i32
    return %c0_i32, %c0_i32_0 : i32, i32
  }
  func.func @transform_33(%arg0: i32) -> (i32, i32) {
    %c0_i32 = arith.constant 0 : i32
    %c0_i32_0 = arith.constant 0 : i32
    %c0_i32_1 = arith.constant 0 : i32
    return %c0_i32, %c0_i32_0 : i32, i32
  }
  func.func @transform_34(%arg0: i32) -> (i32, i32) {
    %c0_i32 = arith.constant 0 : i32
    %c0_i32_0 = arith.constant 0 : i32
    %c0_i32_1 = arith.constant 0 : i32
    return %c0_i32, %c0_i32_0 : i32, i32
  }
  func.func @transform_35(%arg0: i32) -> (i32, i32) {
    %c0_i32 = arith.constant 0 : i32
    %c0_i32_0 = arith.constant 0 : i32
    %c0_i32_1 = arith.constant 0 : i32
    return %c0_i32, %c0_i32_0 : i32, i32
  }
  func.func @transform_36(%arg0: i32) -> (i32, i32) {
    %c0_i32 = arith.constant 0 : i32
    %c0_i32_0 = arith.constant 0 : i32
    %c0_i32_1 = arith.constant 0 : i32
    return %c0_i32, %c0_i32_0 : i32, i32
  }
  func.func @transform_37(%arg0: i32) -> (i32, i32) {
    %c0_i32 = arith.constant 0 : i32
    %c0_i32_0 = arith.constant 0 : i32
    %c0_i32_1 = arith.constant 0 : i32
    return %c0_i32, %c0_i32_0 : i32, i32
  }
  func.func @transform_38(%arg0: i32) -> (i32, i32) {
    %c0_i32 = arith.constant 0 : i32
    %c0_i32_0 = arith.constant 0 : i32
    %c0_i32_1 = arith.constant 0 : i32
    return %c0_i32, %c0_i32_0 : i32, i32
  }
  func.func @transform_39(%arg0: i32) -> (i32, i32) {
    %c0_i32 = arith.constant 0 : i32
    %c0_i32_0 = arith.constant 0 : i32
    %c0_i32_1 = arith.constant 0 : i32
    return %c0_i32, %c0_i32_0 : i32, i32
  }
  func.func @transform_40(%arg0: i32) -> (i32, i32) {
    %c0_i32 = arith.constant 0 : i32
    %c0_i32_0 = arith.constant 0 : i32
    %c0_i32_1 = arith.constant 0 : i32
    return %c0_i32, %c0_i32_0 : i32, i32
  }
  func.func @transform_41(%arg0: i32) -> (i32, i32) {
    %c0_i32 = arith.constant 0 : i32
    %c0_i32_0 = arith.constant 0 : i32
    %c0_i32_1 = arith.constant 0 : i32
    return %c0_i32, %c0_i32_0 : i32, i32
  }
  func.func @transform_42(%arg0: i32) -> (i32, i32) {
    %c0_i32 = arith.constant 0 : i32
    %c0_i32_0 = arith.constant 0 : i32
    %c0_i32_1 = arith.constant 0 : i32
    return %c0_i32, %c0_i32_0 : i32, i32
  }
  func.func @transform_43(%arg0: i32) -> (i32, i32) {
    %c0_i32 = arith.constant 0 : i32
    %c0_i32_0 = arith.constant 0 : i32
    %c0_i32_1 = arith.constant 0 : i32
    return %c0_i32, %c0_i32_0 : i32, i32
  }
  func.func @transform_44(%arg0: i32) -> (i32, i32) {
    %c0_i32 = arith.constant 0 : i32
    %c0_i32_0 = arith.constant 0 : i32
    %c0_i32_1 = arith.constant 0 : i32
    return %c0_i32, %c0_i32_0 : i32, i32
  }
  func.func @transform_45(%arg0: i32) -> (i32, i32) {
    %c0_i32 = arith.constant 0 : i32
    %c0_i32_0 = arith.constant 0 : i32
    %c0_i32_1 = arith.constant 0 : i32
    return %c0_i32, %c0_i32_0 : i32, i32
  }
  func.func @transform_46(%arg0: i32) -> (i32, i32) {
    %c0_i32 = arith.constant 0 : i32
    %c0_i32_0 = arith.constant 0 : i32
    %c0_i32_1 = arith.constant 0 : i32
    return %c0_i32, %c0_i32_0 : i32, i32
  }
  func.func @transform_47(%arg0: i32) -> (i32, i32) {
    %c0_i32 = arith.constant 0 : i32
    %c0_i32_0 = arith.constant 0 : i32
    %c0_i32_1 = arith.constant 0 : i32
    return %c0_i32, %c0_i32_0 : i32, i32
  }
  func.func @transform_48(%arg0: i32) -> (i32, i32) {
    %c0_i32 = arith.constant 0 : i32
    %c0_i32_0 = arith.constant 0 : i32
    %c0_i32_1 = arith.constant 0 : i32
    return %c0_i32, %c0_i32_0 : i32, i32
  }
  func.func @transform_49(%arg0: i32) -> (i32, i32) {
    %c0_i32 = arith.constant 0 : i32
    %c0_i32_0 = arith.constant 0 : i32
    %c0_i32_1 = arith.constant 0 : i32
    return %c0_i32, %c0_i32_0 : i32, i32
  }
  func.func @transform_50(%arg0: i32) -> (i32, i32, i32) {
    %c0_i32 = arith.constant 0 : i32
    %c0_i32_0 = arith.constant 0 : i32
    %c0_i32_1 = arith.constant 0 : i32
    return %arg0, %c0_i32, %c0_i32_0 : i32, i32, i32
  }
}

</mosaic_0001>

<bundles_post_ra>
// kernel: tpu_custom_call.1
= control target key start
LH: loop header
LB: loop body
LE: loop exit
PB: predicated region body
PF: predicated region fallthrough
CT: control target
= control target key end

     0   :  { %s9041_s6 = smov 1   ;;  %s9042_s10 = smov 2   ;;  %s11839_s0 = inlined_call_operand.smem [shape: u32[51], index: -1, kind: input, shape index: {}] }
   0x1   :  { %s9136_s5 = sld [smem:[%s11839_s0]]   ;;  %s9043_s14 = smov 3  }
   0x2   :  { %s9141_s9 = sld [smem:[%s11839_s0 + %s9041_s6]]   ;;  %s9044_s18 = smov 4  }
   0x3   :  { %s9146_s13 = sld [smem:[%s11839_s0 + %s9042_s10]]   ;;  %s9045_s22 = smov 5  }
   0x4   :  { %s9151_s17 = sld [smem:[%s11839_s0 + %s9043_s14]]   ;;  %s9046_s26 = smov 6  }
   0x5   :  { %s9156_s21 = sld [smem:[%s11839_s0 + %s9044_s18]]   ;;  %s9047_s30 = smov 7  }
   0x6   :  { %s9161_s25 = sld [smem:[%s11839_s0 + %s9045_s22]]   ;;  %s9048_s4 = smov 8  }
   0x7   :  { %11982 = sst [smem:[#allocation8_spill]] %s9136_s5  ;;  %s9049_s10 = smov 9  }
   0x8   :  { %11983 = sst [smem:[#allocation9_spill]] %s9141_s9  ;;  %s9050_s15 = smov 10  }
   0x9   :  { %11984 = sst [smem:[#allocation10_spill]] %s9146_s13  ;;  %s9051_s20 = smov 11  }
   0xa   :  { %s9166_s29 = sld [smem:[%s11839_s0 + %s9046_s26]]   ;;  %s9052_s26 = smov 12  }
   0xb   :  { %s9171_s3 = sld [smem:[%s11839_s0 + %s9047_s30]]   ;;  %s9053_s1 = smov 13  }
   0xc   :  { %s9176_s8 = sld [smem:[%s11839_s0 + %s9048_s4]]   ;;  %s9054_s7 = smov 14  }
   0xd   :  { %s9181_s14 = sld [smem:[%s11839_s0 + %s9049_s10]]   ;;  %s9056_s22 = smov 16  }
   0xe   :  { %s9186_s19 = sld [smem:[%s11839_s0 + %s9050_s15]]   ;;  %s9055_s15 = smov 15  }
   0xf   :  { %s9191_s24 = sld [smem:[%s11839_s0 + %s9051_s20]]   ;;  %s9057_s28 = smov 17  }
  0x10   :  { %s9196_s30 = sld [smem:[%s11839_s0 + %s9052_s26]]  }
  0x11   :  { %11985 = sst [smem:[#allocation11_spill]] %s9171_s3 }
  0x12   :  { %11986 = sst [smem:[#allocation12_spill]] %s9176_s8 }
  0x13   :  { %s9201_s6 = sld [smem:[%s11839_s0 + %s9053_s1]]  }
  0x14   :  { %s9206_s12 = sld [smem:[%s11839_s0 + %s9054_s7]]   ;;  %s9058_s7 = smov 18  }
  0x15   :  { %s9211_s20 = sld [smem:[%s11839_s0 + %s9055_s15]]   ;;  %s9059_s15 = smov 19  }
  0x16   :  { %s9216_s27 = sld [smem:[%s11839_s0 + %s9056_s22]]   ;;  %s9060_s22 = smov 20  }
  0x17   :  { %s9221_s4 = sld [smem:[%s11839_s0 + %s9057_s28]]   ;;  %s9061_s28 = smov 21  }
  0x19   :  { %11987 = sst [smem:[#allocation13_spill]] %s9201_s6 }
  0x1a   :  { %11988 = sst [smem:[#allocation14_spill]] %s9206_s12 }
  0x1b   :  { %11989 = sst [smem:[#allocation15_spill]] %s9211_s20 }
  0x1c   :  { %11990 = sst [smem:[#allocation16_spill]] %s9216_s27 }
  0x1d   :  { %11991 = sst [smem:[#allocation17_spill]] %s9221_s4 }
  0x1e   :  { %s9226_s12 = sld [smem:[%s11839_s0 + %s9058_s7]]   ;;  %s9062_s7 = smov 22  }
  0x1f   :  { %s9231_s20 = sld [smem:[%s11839_s0 + %s9059_s15]]   ;;  %s9063_s15 = smov 23  }
  0x20   :  { %s9236_s27 = sld [smem:[%s11839_s0 + %s9060_s22]]   ;;  %s9064_s22 = smov 24  }
  0x21   :  { %s9241_s4 = sld [smem:[%s11839_s0 + %s9061_s28]]   ;;  %s9065_s28 = smov 25  }
  0x24   :  { %11992 = sst [smem:[#allocation18_spill]] %s9226_s12 }
  0x25   :  { %11993 = sst [smem:[#allocation19_spill]] %s9231_s20 }
  0x26   :  { %11994 = sst [smem:[#allocation20_spill]] %s9236_s27 }
  0x27   :  { %11995 = sst [smem:[#allocation21_spill]] %s9241_s4 }
  0x28   :  { %s9246_s12 = sld [smem:[%s11839_s0 + %s9062_s7]]   ;;  %s9066_s7 = smov 26  }
  0x29   :  { %s9251_s20 = sld [smem:[%s11839_s0 + %s9063_s15]]   ;;  %s9067_s15 = smov 27  }
  0x2a   :  { %s9256_s27 = sld [smem:[%s11839_s0 + %s9064_s22]]   ;;  %s9068_s22 = smov 28  }
  0x2b   :  { %s9261_s4 = sld [smem:[%s11839_s0 + %s9065_s28]]   ;;  %s9069_s28 = smov 29  }
  0x2e   :  { %11996 = sst [smem:[#allocation22_spill]] %s9246_s12 }
  0x2f   :  { %11997 = sst [smem:[#allocation23_spill]] %s9251_s20 }
  0x30   :  { %11998 = sst [smem:[#allocation24_spill]] %s9256_s27 }
  0x31   :  { %11999 = sst [smem:[#allocation25_spill]] %s9261_s4 }
  0x32   :  { %s9266_s12 = sld [smem:[%s11839_s0 + %s9066_s7]]   ;;  %s9070_s7 = smov 30  }
  0x33   :  { %s9271_s20 = sld [smem:[%s11839_s0 + %s9067_s15]]   ;;  %s9071_s15 = smov 31  }
  0x34   :  { %s9276_s27 = sld [smem:[%s11839_s0 + %s9068_s22]]   ;;  %s9072_s22 = smov 32  }
  0x35   :  { %s9281_s4 = sld [smem:[%s11839_s0 + %s9069_s28]]   ;;  %s9073_s28 = smov 33  }
  0x38   :  { %12000 = sst [smem:[#allocation26_spill]] %s9266_s12 }
  0x39   :  { %12001 = sst [smem:[#allocation27_spill]] %s9271_s20 }
  0x3a   :  { %12002 = sst [smem:[#allocation28_spill]] %s9276_s27 }
  0x3b   :  { %12003 = sst [smem:[#allocation29_spill]] %s9281_s4 }
  0x3c   :  { %s9286_s12 = sld [smem:[%s11839_s0 + %s9070_s7]]   ;;  %s9074_s7 = smov 34  }
  0x3d   :  { %s9291_s20 = sld [smem:[%s11839_s0 + %s9071_s15]]   ;;  %s9075_s15 = smov 35  }
  0x3e   :  { %s9296_s27 = sld [smem:[%s11839_s0 + %s9072_s22]]   ;;  %s9076_s22 = smov 36  }
  0x3f   :  { %s9301_s4 = sld [smem:[%s11839_s0 + %s9073_s28]]   ;;  %s9077_s28 = smov 37  }
  0x42   :  { %12004 = sst [smem:[#allocation30_spill]] %s9286_s12 }
  0x43   :  { %12005 = sst [smem:[#allocation31_spill]] %s9291_s20 }
  0x44   :  { %12006 = sst [smem:[#allocation32_spill]] %s9296_s27 }
  0x45   :  { %12007 = sst [smem:[#allocation33_spill]] %s9301_s4 }
  0x46   :  { %s9306_s12 = sld [smem:[%s11839_s0 + %s9074_s7]]   ;;  %s9078_s7 = smov 38  }
  0x47   :  { %s9311_s20 = sld [smem:[%s11839_s0 + %s9075_s15]]   ;;  %s9079_s15 = smov 39  }
  0x48   :  { %s9316_s27 = sld [smem:[%s11839_s0 + %s9076_s22]]   ;;  %s9080_s22 = smov 40  }
  0x49   :  { %s9321_s4 = sld [smem:[%s11839_s0 + %s9077_s28]]   ;;  %s9081_s28 = smov 41  }
  0x4c   :  { %12008 = sst [smem:[#allocation34_spill]] %s9306_s12 }
  0x4d   :  { %12009 = sst [smem:[#allocation35_spill]] %s9311_s20 }
  0x4e   :  { %12010 = sst [smem:[#allocation36_spill]] %s9316_s27 }
  0x4f   :  { %12011 = sst [smem:[#allocation37_spill]] %s9321_s4 }
  0x50   :  { %s9326_s12 = sld [smem:[%s11839_s0 + %s9078_s7]]   ;;  %s9082_s7 = smov 42  }
  0x51   :  { %s9331_s20 = sld [smem:[%s11839_s0 + %s9079_s15]]   ;;  %s9083_s15 = smov 43  }
  0x52   :  { %s9336_s27 = sld [smem:[%s11839_s0 + %s9080_s22]]   ;;  %s9084_s22 = smov 44  }
  0x53   :  { %s9341_s4 = sld [smem:[%s11839_s0 + %s9081_s28]]   ;;  %s9085_s28 = smov 45  }
  0x54   :  { %s9351_s6 = sld [smem:[%s11839_s0 + %s9083_s15]]   ;;  %s9087_s15 = smov 47  }
  0x56   :  { %12012 = sst [smem:[#allocation38_spill]] %s9326_s12 }
  0x57   :  { %s9346_s12 = sld [smem:[%s11839_s0 + %s9082_s7]]   ;;  %s9086_s7 = smov 46  }
  0x58   :  { %12013 = sst [smem:[#allocation39_spill]] %s9336_s27 }
  0x59   :  { %12014 = sst [smem:[#allocation40_spill]] %s9341_s4 }
  0x5a   :  { %12016 = sst [smem:[#allocation42_spill]] %s9351_s6 }
  0x5b   :  { %s9356_s27 = sld [smem:[%s11839_s0 + %s9084_s22]]   ;;  %s9088_s22 = smov 48  }
  0x5c   :  { %s9361_s4 = sld [smem:[%s11839_s0 + %s9085_s28]]   ;;  %s9089_s28 = smov 49  }
  0x5d   :  { %12015 = sst [smem:[#allocation41_spill]] %s9346_s12 }
  0x5e   :  { %s9366_s12 = sld [smem:[%s11839_s0 + %s9086_s7]]   ;;  %s9090_s7 = smov 50  }
  0x5f   :  { %s9371_s6 = sld [smem:[%s11839_s0 + %s9087_s15]]  }
  0x61   :  { %12017 = sst [smem:[#allocation43_spill]] %s9356_s27 }
  0x62   :  { %12018 = sst [smem:[#allocation44_spill]] %s9361_s4 }
  0x63   :  { %s9376_s27 = sld [smem:[%s11839_s0 + %s9088_s22]]  }
  0x64   :  { %12019 = sst [smem:[#allocation45_spill]] %s9366_s12 }
  0x65   :  { %s9381_s4 = sld [smem:[%s11839_s0 + %s9089_s28]]  }
  0x66   :  { %s9386_s12 = sld [smem:[%s11839_s0 + %s9090_s7]]  }
  0x67   :  { %106 = vsyncpa [#allocation3], 0 }
  0x68   :  { %107 = vsyncpa [#allocation4], 0 }
  0x69   :  { %109 = vsyncpa [#allocation4 + $0x1], 0  ;;  %s9388_s15 = smov 0   ;;  %s9390_s16 = smov 0  }
  0x6a   :  { %s9392_s18 = smov 0   ;;  %s9394_s22 = smov 0  }
  0x6b LB: > { %s12020_s13 = sld [smem:[#allocation10_spill]]  ;;  %s12021_s9 = sld [smem:[#allocation9_spill]]  ;;  %s9039_s22 = sphi %s9394_s22, %s12565_s22   ;;  %s9035_s18 = sphi %s9392_s18, %s12567_s18   ;;  %s9031_s16 = sphi %s9390_s16, %s12569_s16   ;;  %s9027_s15 = sphi %s9388_s15, %s12568_s15  }
  0x6c   : > { %s12022_s8 = sld [smem:[#allocation12_spill]]  ;;  %s12023_s3 = sld [smem:[#allocation11_spill]] }
  0x6d   : > { %12024 = sst [smem:[#allocation46_spill]] %s9035_s18  ;;  %s9409_s0 = sadd.s32 4294967295, %s9039_s22  }
  0x6e   : > { %s7051_s23 = sadd.s32 4294967294, %s9039_s22   ;;  %s9413_s26 = sadd.s32 1, %s9039_s22  }
  0x6f   : > { %12025 = sst [smem:[#allocation47_spill]] %s9413_s26  ;;  %s1177_s28 = sadd.s32 1, %s9035_s18 }
  0x70   : > { %s1174_s1 = ssub.s32 %s9039_s22, %s9413_s26  ;;  %p1187_p0 = scmp.ne.s32.totalorder %s9035_s18, %s9031_s16 }
  0x71   : > { %p1175_p1 = scmp.eq.s32.totalorder %s1174_s1, 0  ;;  %p1188_p2 = scmp.eq.s32.totalorder %s9409_s0, 1 }
  0x72   : > { %p1193_p3 = scmp.ne.s32.totalorder %s9031_s16, %s9027_s15  ;;  %p1194_p4 = scmp.eq.s32.totalorder %s7051_s23, 1 }
  0x73   : > { %s9424_s2 = scalar_select %p1175_p1, %s9035_s18, %s1177_s28  }
  0x74   : > { %p9426_p5 = por %p1188_p2, %p1187_p0  ;;  %p9430_p6 = por %p1194_p4, %p1193_p3 }
  0x75   : > { %12026 = sst [smem:[#allocation48_spill]] %s9424_s2  ;;  %p7052_p7 = scmp.ge.s32.totalorder %s9039_s22, 1 }
  0x76   : > { %s12027_s7 = scalar_select %p9426_p5, 1, 0 }
  0x77   : > { %s12028_s10 = scalar_select %p9430_p6, 1, 0 }
  0x78   : > { %p1201_p8 = scmp.lt.s32.totalorder %s9039_s22, 3  ;;  %p11849_p9 = scmp.eq.s32.totalorder %s9409_s0, 0 }
  0x79   : > { %12029 = sst [smem:[#allocation49_spill]] %s12028_s10  ;;  %s9091_s23 = smov [#allocation2]  }
  0x7a   : > { %p9437_p10 = pnand %p7052_p7, %p1201_p8  ;;  %s1327_s28 = sshll.u32 %s9091_s23, 4  ;;  %s1328_s28 = int_to_ptr.vmem [resolvable:$true] %s1327_s28 }
  0x7b   : > { %s8945_s2 = scalar_lea.hbm %s9331_s20, 16384 }
  0x7c   : > { %s12030_s11 = scalar_select %p9437_p10, 1, 0 }
  0x7d   : > { %p8027_p11 = pneg %p9437_p10  ;;  %p8946_p13 = scmp.ne.s32.totalorder %s9331_s20, %s8945_s2 }
  0x7e   : > { %p8952_p3 = scmp.lt.u32.totalorder %s8945_s2, %s9331_s20 }
  0x7f   : > { %p9445_p12 = pnand %p11849_p9, %p8027_p11 }
  0x81   : > { %p8947_p0 = pneg %p9445_p12 }
  0x83   : > { %p8948_p1 = pnand %p8947_p0, %p8946_p13 }
  0x85   : > { %p8949_p2 = pneg %p8948_p1 }
  0x87   : > { %p8954_p4 = pnand %p8952_p3, %p8949_p2 }
  0x89   : > { %8957 = shalt.err (!%p8954_p4)
}
  0x8a   : > { %s8958_s18 = scalar_lea.vmem %s1328_s28, 16384  ;;  %p8966_p5 = scmp.lt.s32.totalorder %s1328_s28, %s1328_s28 }
  0x8b   : > { %p8959_p7 = scmp.ne.s32.totalorder %s1328_s28, %s8958_s18  ;;  %p8967_p10 = scmp.lt.s32.totalorder %s8958_s18, %s8958_s18 }
  0x8d   : > { %p8961_p8 = pnand %p8959_p7, %p8947_p0  ;;  %p8968_p11 = por %p8967_p10, %p8966_p5 }
  0x8f   : > { %p8962_p6 = pneg %p8961_p8 }
  0x91   : > { %p8969_p9 = pnand %p8968_p11, %p8962_p6 }
  0x93   : > { %8972 = shalt.err (!%p8969_p9)
}
  0x94   : > { %s9092_s23 = smov 512   ;;  %s9093_s26 = smov 32  }
  0x95   : > { %8030 = dma.hbm_to_vmem [thread:$0]  (!%p9445_p12), %s9331_s20, 16384, %s1328_s28, [#allocation3], %s9092_s23, %s9092_s23, %s9093_s26  }
  0x96   : > { %p12032_p13 = scmp.ne.s32.totalorder %s12030_s11, 0 }
  0x98   : > { %1381 = sbr.rel (%p12032_p13) target bundleno = 5499 (0x157b), region = 220 }
  0x9f   : > { %p12033_p1 = scmp.eq.s32.totalorder %s9409_s0, 0 }
  0xa1   : > { %9018 = dma.done.wait (%p12033_p1), [#allocation3], 16384   ;;  %p12034_p0 = pmov %p12033_p1 }
  0xa2   : > { %s12035_s5 = sld [smem:[#allocation8_spill]]  ;;  %p1499_p5 = scmp.lt.s32.totalorder %s9409_s0, 1  ;;  %vm1526_vm0 = vcmask 130048   ;;  %v8888_v3 = vld [vmem:[%s12021_s9] sm:$0xff]   ;;  %v8889_v4 = vld [vmem:[%s12021_s9 + $0x8] sm:$0xff]   ;;  %v11906_v5 = vmov 0   ;;  %v11903_v6 = vlaneseq }
  0xa3   : > { %9020 = vsyncadd (%p12034_p0), [#allocation3], 4294950912  ;;  %7952 = vmatprep.mubr.msk.bf16.mxu1 %vm1526_vm0, %v8888_v3  ;;  %8157 = vset.pattern.permute.xlu1 %v11906_v5  ;;  %v1513_v8 = vld [vmem:[%s12020_s13 + $0x10] sm:$0xff]  ;;  %v1511_v9 = vld [vmem:[%s12020_s13] sm:$0xff]  ;;  %vm11874_vm1 = vcmask 7168   ;;  %s9095_s26 = smov 3  }
  0xa4   : > { %s1500_s18 = scalar_select %p1499_p5, %s9409_s0, 1  ;;  %8156 = vset.pattern.permute.xlu0 %v11906_v5  ;;  %v9473_v7 = vand.u32 127, %v11903_v6  ;;  %v1514_v12 = vld [vmem:[%s12020_s13 + $0x18] sm:$0xff]  ;;  %v1512_v15 = vld [vmem:[%s12020_s13 + $0x8] sm:$0xff]  ;;  %v1610_v31 = vld [vmem:[%s9156_s21] sm:$0xff]  ;;  %vm11865_vm4 = vcmask 261120  }
  0xa5   : > { %v1611_v30 = vld [vmem:[%s9156_s21 + $0x8] sm:$0xff]  ;;  %v1614_v33 = vld [vmem:[%s9161_s25] sm:$0xff]  ;;  %v1613_v34 = vld [vmem:[%s9156_s21 + $0x18] sm:$0xff]  ;;  %vm1644_vm6 = vcmask 23552   ;;  %vm1656_vm8 = vcmask 15360   ;;  %s9097_s11 = smov 2  }
  0xa6   : > { %s7840_s2 = sshll.u32 %s1500_s18, 4  ;;  %v1624_v10 = vand.u32 1, %v9473_v7  ;;  %v1615_v32 = vld [vmem:[%s9161_s25 + $0x8] sm:$0xff]  ;;  %v1612_v35 = vld [vmem:[%s9156_s21 + $0x10] sm:$0xff]  ;;  %v1617_v36 = vld [vmem:[%s9161_s25 + $0x18] sm:$0xff]  ;;  %s9098_s28 = smov 1  }
  0xa7   : > { %v1616_v37 = vld [vmem:[%s9161_s25 + $0x10] sm:$0xff]  ;;  %v8894_v40 = vld [vmem:[%s9151_s17 + $0x20] ss:$12 sps:$4 sm:$0xff]   ;;  %vm7076_vm9 = vmneg %vm1656_vm8  ;;  %s9099_s1 = smov 126   ;;  %s9100_s23 = smov 125   ;;  %vm2264_vm12 = vcmask 1041408  }
  0xa8   : > { %s1503_s10 = scalar_lea.vmem %s12035_s5, %s7840_s2  ;;  %vm1666_vm2 = vcmp.lt.s32.totalorder %v1624_v10, 1  ;;  %v8892_v38 = vld [vmem:[%s9151_s17 + $0x4] ss:$12 sps:$4 sm:$0xff]   ;;  %v8893_v39 = vld [vmem:[%s9151_s17 + $0x8] ss:$12 sps:$4 sm:$0xff]   ;;  %vm1649_vm5 = vcmp.ge.s32.totalorder %v1624_v10, 1  ;;  %vm9548_vm10 = vmpackc.low %vm7076_vm9, %vm7076_vm9 }
  0xa9   : > { %v1505_v0 = vld [vmem:[%s1503_s10] sm:$0xff]  ;;  %v1506_v1 = vld [vmem:[%s1503_s10 + $0x8] sm:$0xff]  ;;  %vm9486_vm3 = vmpackc.low %vm1666_vm2, %vm1666_vm2  ;;  %7960 = vmatprep.mubr.msk.bf16.mxu0 %vm11865_vm4, %v8893_v39  ;;  %s11858_s10 = smov 127   ;;  %vm2257_vm13 = vcmask 31744   ;;  %s9101_s18 = smov 5   ;;  %vm9105_vm14 = vmmov 0  }
  0xaa   : > { %v1515_v2 = vpack.c.bf16 %v1506_v1, %v1505_v0  ;;  %vm9527_vm7 = vmpackc.low %vm1649_vm5, %vm1649_vm5  ;;  %s9102_s2 = smov 4   ;;  %vm2353_vm15 = vcmask 39936   ;;  %vm11872_vm5 = vcmask 121856   ;;  %s12060_s5 = smov 123  }
  0xab   : > { %vm9576_vm11 = vmpackc.low %vm1656_vm8, %vm1656_vm8  ;;  %s12064_s9 = sld [smem:[#allocation18_spill]]  ;;  %s12089_s13 = smov 120  }
  0xac   : > { %7950 = vmatprep.subr.bf16.mxu1 %v1515_v2  ;;  %vm9721_vm8 = vmneg %vm2257_vm13  ;;  %p12562_p9 = scmp.ne.s32.totalorder %s12027_s7, 0 }
  0xad   : > { %7951 = vmatpush3.bf16.msra.mxu1 %v1515_v2 }
  0xb0   : > { %7953 = vmatmul.mubr.msk.bf16.vlgmr.msra.gmra.mrb[0].mxu1 %vm1526_vm0, %v8889_v4 }
  0xb1   : > { %1788 = vmatprep.mubr.bf16.mxu1 %v8892_v38 }
 0x183   : > { %v7954_v11 = vpop.f32.mrb[0].mxu1 }
 0x184   : > { %v1576_v13 = vadd.f32 %v7954_v11, %v1513_v8  ;;  %v1567_v14 = vpop.f32.mrb[1].mxu1 }
 0x185   : > { %v1568_v16 = vadd.f32 %v1567_v14, %v1511_v9  ;;  %v7955_v17 = vpop.f32.mrb[2].mxu1  ;;  %v8895_v14 = vld [vmem:[%s9151_s17 + $0x1c] ss:$12 sps:$4 sm:$0xff]  }
 0x186   : > { %v1579_v18 = vadd.f32 %v7955_v17, %v1514_v12  ;;  %1594 = vperm.xlu1 %8157, %v1576_v13   ;;  %v1570_v19 = vpop.f32.mrb[3].mxu1  ;;  %v1695_v21 = vsel %vm11874_vm1, %v1576_v13, 0.0 }
 0x187   : > { %v1571_v20 = vadd.f32 %v1570_v19, %v1512_v15  ;;  %1584 = vperm.xlu0 %8156, %v1568_v16   ;;  %v1693_v25 = vsel %vm11874_vm1, %v1568_v16, 0.0  ;;  %v8897_v15 = vld [vmem:[%s9151_s17 + $0x18] ss:$12 sps:$4 sm:$0xff]  }
 0x188   : > { %v1696_v22 = vsel %vm11874_vm1, %v1579_v18, 0.0  ;;  %v8163_v23 = vpack.i.bf16 %v1579_v18, %v1576_v13  ;;  %v8890_v13 = vld [vmem:[%s9151_s17] ss:$12 sps:$4 sm:$0xff]  }
 0x189   : > { %v7120_v24 = vpack.c.bf16 %v1696_v22, %v1695_v21  ;;  %v1694_v26 = vsel %vm11874_vm1, %v1571_v20, 0.0  ;;  %v8158_v28 = vpack.i.bf16 %v1571_v20, %v1568_v16 }
 0x18a   : > { %1599 = vperm.xlu1 %8157, %v1579_v18   ;;  %v7117_v29 = vpack.c.bf16 %v1694_v26, %v1693_v25 }
 0x18b   : > { %1589 = vperm.xlu0 %8156, %v1571_v20  }
 0x18c   : > { %7956 = vmatprep.subr.msk.bf16.mxu0 %vm9486_vm3, %v7117_v29 }
 0x18d   : > { %7957 = vmatpush3.bf16.msk.msra.mxu0 %vm9486_vm3, %v7117_v29 }
 0x18e   : > { %8164 = vrot.lane.b32.xlu1 %v8163_v23, %s9095_s26  ;;  %7958 = vmatprep.subr.msk.bf16.mxu0 %vm9486_vm3, %v7120_v24 }
 0x18f   : > { %8159 = vrot.lane.b32.xlu0 %v8158_v28, %s9095_s26 }
 0x191   : > { %7959 = vmatpush3.bf16.msk.msra.mxu0 %vm9486_vm3, %v7120_v24 }
 0x192   : > { %1861 = vperm.xlu1 %8157, %v1611_v30  }
 0x193   : > { %1856 = vperm.xlu0 %8156, %v1610_v31  }
 0x194   : > { %7961 = vmatmul.mubr.msk.bf16.vlgmr.msra.gmra.mrb[0].mxu0 %vm11865_vm4, %v8894_v40 }
 0x196   : > { %1885 = vperm.xlu1 %8157, %v1615_v32  }
 0x197   : > { %1880 = vperm.xlu0 %8156, %v1614_v33  }
 0x19a   : > { %1871 = vperm.xlu1 %8157, %v1613_v34  }
 0x19b   : > { %1866 = vperm.xlu0 %8156, %v1612_v35  }
 0x19e   : > { %1895 = vperm.xlu1 %8157, %v1617_v36  }
 0x19f   : > { %1890 = vperm.xlu0 %8156, %v1616_v37  }
 0x205   : > { %v9513_v41 = vpop.permute.xlu1 %1594 }
 0x206   : > { %v9515_v42 = vpop.permute.xlu0 %1584  ;;  %v1679_v1 = vsel %vm1644_vm6, %v9513_v41, 0.0  ;;  %v1664_v10 = vsel %vm11874_vm1, 0.0, %v9513_v41 }
 0x207   : > { %v1677_v61 = vsel %vm1644_vm6, %v9515_v42, 0.0  ;;  %v1662_v4 = vsel %vm11874_vm1, 0.0, %v9515_v42 }
 0x209   : > { %v9517_v43 = vpop.permute.xlu1 %1599 }
 0x20a   : > { %v9519_v44 = vpop.permute.xlu0 %1589  ;;  %v1710_v58 = vpack.c.bf16 %v9517_v43, %v9513_v41  ;;  %v1680_v63 = vsel %vm1644_vm6, %v9517_v43, 0.0  ;;  %v1665_v9 = vsel %vm11874_vm1, 0.0, %v9517_v43 }
 0x20b   : > { %v1709_v45 = vpack.c.bf16 %v9519_v44, %v9515_v42  ;;  %v1678_v59 = vsel %vm1644_vm6, %v9519_v44, 0.0  ;;  %v7102_v2 = vpack.c.bf16 %v1680_v63, %v1679_v1  ;;  %v1663_v3 = vsel %vm11874_vm1, 0.0, %v9519_v44 }
 0x20c   : > { %v7099_v62 = vpack.c.bf16 %v1678_v59, %v1677_v61  ;;  %v7087_v8 = vpack.c.bf16 %v1663_v3, %v1662_v4  ;;  %v7090_v11 = vpack.c.bf16 %v1665_v9, %v1664_v10  ;;  %v1914_v3 = vld [vmem:[%s12023_s3] sm:$0xff]  ;;  %v8901_v9 = vld [vmem:[%s9166_s29 + $0x8] ss:$12 sps:$4 sm:$0xff]  }
 0x20d   : > { %v8165_v46 = vpop.permute.xlu1 %8164  ;;  %7845 = vmatprep.subr.bf16.mxu1 %v1709_v45  ;;  %v8900_v4 = vld [vmem:[%s9166_s29 + $0x4] ss:$12 sps:$4 sm:$0xff]   ;;  %v1915_v10 = vld [vmem:[%s12023_s3 + $0x8] sm:$0xff] }
 0x20e   : > { %v8160_v47 = vpop.permute.xlu0 %8159  ;;  %v8167_v48 = vunpack.i.h.bf16 %v8165_v46  ;;  %v8166_v49 = vunpack.i.l.bf16 %v8165_v46  ;;  %2132 = vmatprep.mubr.bf16.mxu0 %v8900_v4 }
 0x20f   : > { %v8162_v50 = vunpack.i.h.bf16 %v8160_v47  ;;  %v8161_v51 = vunpack.i.l.bf16 %v8160_v47 }
 0x210   : > { %v1648_v56 = vsel %vm1644_vm6, 0.0, %v8167_v48  ;;  %v1647_v57 = vsel %vm1644_vm6, 0.0, %v8166_v49 }
 0x211   : > { %v1646_v52 = vsel %vm1644_vm6, 0.0, %v8162_v50  ;;  %v1645_v53 = vsel %vm1644_vm6, 0.0, %v8161_v51  ;;  %v7074_v60 = vpack.c.bf16 %v1648_v56, %v1647_v57  ;;  %v1862_v21 = vpop.permute.xlu1 %1861 }
 0x212   : > { %v7071_v55 = vpack.c.bf16 %v1646_v52, %v1645_v53  ;;  %v1857_v20 = vpop.permute.xlu0 %1856 }
 0x214   : > { %7846 = vmatpush3.bf16.msk.msra.mxu1 %vm9527_vm7, %v7071_v55 }
 0x215   : > { %7847 = vmatprep.subr.bf16.mxu1 %v1710_v58  ;;  %v1886_v31 = vpop.permute.xlu1 %1885 }
 0x216   : > { %v1881_v26 = vpop.permute.xlu0 %1880 }
 0x218   : > { %7848 = vmatpush3.bf16.msk.msra.mxu1 %vm9527_vm7, %v7074_v60 }
 0x219   : > { %7849 = vmatprep.subr.msk.bf16.mxu1 %vm9486_vm3, %v7099_v62  ;;  %v1872_v46 = vpop.permute.xlu1 %1871 }
 0x21a   : > { %v1867_v37 = vpop.permute.xlu0 %1866 }
 0x21c   : > { %7850 = vmatpush3.bf16.msk.msra.mxu1 %vm9548_vm10, %v1709_v45 }
 0x21d   : > { %7851 = vmatprep.subr.msk.bf16.mxu1 %vm9486_vm3, %v7102_v2  ;;  %v1896_v60 = vpop.permute.xlu1 %1895 }
 0x21e   : > { %v1891_v57 = vpop.permute.xlu0 %1890 }
 0x220   : > { %7852 = vmatpush3.bf16.msk.msra.mxu1 %vm9548_vm10, %v1710_v58 }
 0x221   : > { %7853 = vmatprep.subr.msk.bf16.mxu1 %vm9527_vm7, %v7099_v62 }
 0x224   : > { %7854 = vmatpush3.bf16.msk.msra.mxu1 %vm9486_vm3, %v7087_v8 }
 0x225   : > { %7855 = vmatprep.subr.msk.bf16.mxu1 %vm9527_vm7, %v7102_v2 }
 0x228   : > { %7856 = vmatpush3.bf16.msk.msra.mxu1 %vm9486_vm3, %v7090_v11 }
 0x229   : > { %7857 = vmatprep.subr.msk.bf16.mxu1 %vm9576_vm11, %v1709_v45 }
 0x22c   : > { %7858 = vmatpush3.bf16.msk.msra.mxu1 %vm9527_vm7, %v7087_v8  ;;  %v1916_v8 = vld [vmem:[%s12023_s3 + $0x10] sm:$0xff] }
 0x22d   : > { %7859 = vmatprep.subr.msk.bf16.mxu1 %vm9576_vm11, %v1710_v58 }
 0x230   : > { %7860 = vmatpush3.bf16.msk.msra.mxu1 %vm9527_vm7, %v7090_v11  ;;  %v1918_v11 = vld [vmem:[%s12022_s8] sm:$0xff] }
 0x233   : > { %1789 = vmatmul.mubr.bf16.vlgmr.msra.gmra.mrb[4].mxu1 %v8890_v13  ;;  %v1917_v13 = vld [vmem:[%s12023_s3 + $0x18] sm:$0xff]  ;;  %s12059_s3 = sld [smem:[#allocation15_spill]] }
 0x234   : > { %1796 = vmatprep.mubr.bf16.mxu1 %v8895_v14  ;;  %v1920_v14 = vld [vmem:[%s12022_s8 + $0x10] sm:$0xff] }
 0x23b   : > { %1797 = vmatmul.mubr.bf16.gmra.mrb[8].mxu1 %v8897_v15  ;;  %v1919_v15 = vld [vmem:[%s12022_s8 + $0x8] sm:$0xff] }
 0x23c   : > { %7968 = vmatprep.mubr.msk.bf16.mxu1 %vm11865_vm4, %v8901_v9 }
 0x267   : > { %v7962_v16 = vpop.f32.mrb[0].mxu0 }
 0x268   : > { %v1839_v17 = vpop.f32.mrb[1].mxu0 }
 0x269   : > { %v7963_v18 = vpop.f32.mrb[2].mxu0 }
 0x26a   : > { %v1842_v19 = vpop.f32.mrb[3].mxu0 }
 0x306   : > { %v7861_v22 = vpop.f32.mrb[4].mxu1 }
 0x307   : > { %v7862_v23 = vpop.f32.mrb[5].mxu1 }
 0x308   : > { %v7863_v24 = vadd.f32 %v7862_v23, %v7861_v22  ;;  %v7864_v25 = vpop.f32.mrb[6].mxu1 }
 0x309   : > { %v7865_v28 = vpop.f32.mrb[7].mxu1 }
 0x30a   : > { %v7866_v29 = vadd.f32 %v7865_v28, %v7864_v25  ;;  %v1840_v30 = vadd.f32 %v7863_v24, %v1839_v17 }
 0x30c   : > { %v1874_v32 = vmul.f32 %v1857_v20, %v1840_v30  ;;  %v1843_v33 = vadd.f32 %v7866_v29, %v1842_v19 }
 0x30e   : > { %v1898_v34 = vadd.f32 %v1881_v26, %v1874_v32  ;;  %v1875_v35 = vmul.f32 %v1862_v21, %v1843_v33  ;;  %v7867_v36 = vpop.f32.mrb[8].mxu1 }
 0x30f   : > { %v7868_v38 = vpop.f32.mrb[9].mxu1 }
 0x310   : > { %v1899_v39 = vadd.f32 %v1886_v31, %v1875_v35  ;;  %v7869_v40 = vadd.f32 %v7868_v38, %v7867_v36  ;;  %v7870_v45 = vpop.f32.mrb[10].mxu1  ;;  %v1902_v48 = vmax.f32 %v1898_v34, 0.0 }
 0x311   : > { %v7871_v47 = vpop.f32.mrb[11].mxu1 }
 0x312   : > { %v1903_v49 = vmax.f32 %v1899_v39, 0.0  ;;  %v1848_v50 = vadd.f32 %v7962_v16, %v7869_v40  ;;  %v7872_v51 = vadd.f32 %v7871_v47, %v7870_v45  ;;  %v1921_v16 = vld [vmem:[%s12022_s8 + $0x18] sm:$0xff]  ;;  %s12061_s8 = smov 124  }
 0x314   : > { %v1876_v52 = vmul.f32 %v1867_v37, %v1848_v50  ;;  %v1851_v53 = vadd.f32 %v7963_v18, %v7872_v51  ;;  %v8168_v55 = vpack.i.bf16 %v1903_v49, %v1902_v48  ;;  %v2054_v56 = vpack.c.bf16 %v1903_v49, %v1902_v48 }
 0x316   : > { %v1900_v58 = vadd.f32 %v1891_v57, %v1876_v52  ;;  %v1877_v59 = vmul.f32 %v1872_v46, %v1851_v53  ;;  %8169 = vrot.lane.b32.xlu0 %v8168_v55, %s9095_s26  ;;  %7877 = vmatprep.subr.bf16.mxu0 %v2054_v56 }
 0x318   : > { %v1901_v61 = vadd.f32 %v1896_v60, %v1877_v59  ;;  %v1904_v62 = vmax.f32 %v1900_v58, 0.0 }
 0x31a   : > { %v1905_v63 = vmax.f32 %v1901_v61, 0.0  ;;  %8179 = vrot.lane.b32.xlu0 %v8168_v55, %s11858_s10 }
 0x31c   : > { %v8173_v1 = vpack.i.bf16 %v1905_v63, %v1904_v62  ;;  %v2055_v2 = vpack.c.bf16 %v1905_v63, %v1904_v62 }
 0x31e   : > { %8174 = vrot.lane.b32.xlu1 %v8173_v1, %s9095_s26  ;;  %8189 = vrot.lane.b32.xlu0 %v8173_v1, %s11858_s10 }
 0x322   : > { %8184 = vrot.lane.b32.xlu1 %v8168_v55, %s9097_s11  ;;  %8199 = vrot.lane.b32.xlu0 %v8168_v55, %s9098_s28 }
 0x326   : > { %8194 = vrot.lane.b32.xlu1 %v8173_v1, %s9097_s11  ;;  %8209 = vrot.lane.b32.xlu0 %v8168_v55, %s9099_s1  ;;  %s11853_s11 = smov 124  }
 0x32a   : > { %8204 = vrot.lane.b32.xlu1 %v8173_v1, %s9098_s28  ;;  %8219 = vrot.lane.b32.xlu0 %v8168_v55, %s9100_s23 }
 0x32e   : > { %8214 = vrot.lane.b32.xlu1 %v8173_v1, %s9099_s1  ;;  %2200 = vperm.xlu0 %8156, %v1914_v3   ;;  %s11854_s1 = smov 123  }
 0x332   : > { %8224 = vrot.lane.b32.xlu1 %v8173_v1, %s9100_s23  ;;  %2210 = vperm.xlu0 %8156, %v1916_v8  }
 0x336   : > { %2205 = vperm.xlu1 %8157, %v1915_v10   ;;  %2224 = vperm.xlu0 %8156, %v1918_v11  }
 0x33a   : > { %2215 = vperm.xlu1 %8157, %v1917_v13   ;;  %2234 = vperm.xlu0 %8156, %v1920_v14  }
 0x33e   : > { %2229 = vperm.xlu1 %8157, %v1919_v15  }
 0x342   : > { %2239 = vperm.xlu1 %8157, %v1921_v16  }
 0x388   : > { %v8170_v17 = vpop.permute.xlu0 %8169 }
 0x389   : > { %v8172_v18 = vunpack.i.h.bf16 %v8170_v17  ;;  %v8171_v19 = vunpack.i.l.bf16 %v8170_v17 }
 0x38b   : > { %v1939_v20 = vsel %vm1644_vm6, 0.0, %v8172_v18  ;;  %v1938_v21 = vsel %vm1644_vm6, 0.0, %v8171_v19 }
 0x38c   : > { %v7131_v22 = vpack.c.bf16 %v1939_v20, %v1938_v21  ;;  %v8180_v23 = vpop.permute.xlu0 %8179 }
 0x38d   : > { %v8182_v24 = vunpack.i.h.bf16 %v8180_v23  ;;  %v8181_v25 = vunpack.i.l.bf16 %v8180_v23 }
 0x38e   : > { %7878 = vmatpush3.bf16.msk.msra.mxu0 %vm9527_vm7, %v7131_v22 }
 0x38f   : > { %7879 = vmatprep.subr.bf16.mxu0 %v2055_v2  ;;  %v1999_v31 = vsel %vm1644_vm6, %v8182_v24, 0.0  ;;  %v1998_v32 = vsel %vm1644_vm6, %v8181_v25, 0.0 }
 0x390   : > { %v8175_v26 = vpop.permute.xlu1 %8174  ;;  %v8190_v28 = vpop.permute.xlu0 %8189  ;;  %v7159_v40 = vpack.c.bf16 %v1999_v31, %v1998_v32  ;;  %v8905_v31 = vld [vmem:[%s9166_s29 + $0x18] ss:$12 sps:$4 sm:$0xff]   ;;  %v2254_v32 = vld [vmem:[%s9181_s14] sm:$0x3] }
 0x391   : > { %v8177_v29 = vunpack.i.h.bf16 %v8175_v26  ;;  %v8176_v30 = vunpack.i.l.bf16 %v8175_v26  ;;  %v8192_v33 = vunpack.i.h.bf16 %v8190_v28  ;;  %v8191_v34 = vunpack.i.l.bf16 %v8190_v28  ;;  %v8902_v28 = vld [vmem:[%s9166_s29 + $0x20] ss:$12 sps:$4 sm:$0xff]  }
 0x393   : > { %v1941_v35 = vsel %vm1644_vm6, 0.0, %v8177_v29  ;;  %v1940_v36 = vsel %vm1644_vm6, 0.0, %v8176_v30  ;;  %v2001_v47 = vsel %vm1644_vm6, %v8192_v33, 0.0  ;;  %v2000_v48 = vsel %vm1644_vm6, %v8191_v34, 0.0  ;;  %v8898_v29 = vld [vmem:[%s9166_s29] ss:$12 sps:$4 sm:$0xff]  }
 0x394   : > { %v7134_v37 = vpack.c.bf16 %v1941_v35, %v1940_v36  ;;  %v8185_v38 = vpop.permute.xlu1 %8184  ;;  %v8200_v39 = vpop.permute.xlu0 %8199  ;;  %v7162_v55 = vpack.c.bf16 %v2001_v47, %v2000_v48  ;;  %v8903_v30 = vld [vmem:[%s9166_s29 + $0x1c] ss:$12 sps:$4 sm:$0xff]   ;;  %v2266_v33 = vsel %vm2264_vm12, %v2254_v32, 0 }
 0x395   : > { %v8187_v45 = vunpack.i.h.bf16 %v8185_v38  ;;  %v8186_v46 = vunpack.i.l.bf16 %v8185_v38  ;;  %v8202_v50 = vunpack.i.h.bf16 %v8200_v39  ;;  %v8201_v51 = vunpack.i.l.bf16 %v8200_v39 }
 0x396   : > { %7880 = vmatpush3.bf16.msk.msra.mxu0 %vm9527_vm7, %v7134_v37 }
 0x397   : > { %v7139_v49 = vpack.c.bf16 %v8187_v45, %v8186_v46  ;;  %7881 = vmatprep.subr.msk.bf16.mxu0 %vm9486_vm3, %v7159_v40  ;;  %v1975_v59 = vsel %vm11874_vm1, 0.0, %v8202_v50  ;;  %v1974_v60 = vsel %vm11874_vm1, 0.0, %v8201_v51 }
 0x398   : > { %v8195_v52 = vpop.permute.xlu1 %8194  ;;  %v8210_v53 = vpop.permute.xlu0 %8209  ;;  %v7147_v9 = vpack.c.bf16 %v1975_v59, %v1974_v60 }
 0x399   : > { %v8197_v56 = vunpack.i.h.bf16 %v8195_v52  ;;  %v8196_v57 = vunpack.i.l.bf16 %v8195_v52  ;;  %v8212_v10 = vunpack.i.h.bf16 %v8210_v53  ;;  %v8211_v11 = vunpack.i.l.bf16 %v8210_v53 }
 0x39a   : > { %7882 = vmatpush3.bf16.msk.msra.mxu0 %vm9548_vm10, %v7139_v49 }
 0x39b   : > { %v7144_v58 = vpack.c.bf16 %v8197_v56, %v8196_v57  ;;  %7883 = vmatprep.subr.msk.bf16.mxu0 %vm9486_vm3, %v7162_v55  ;;  %v7171_v0 = vpack.c.bf16 %v8212_v10, %v8211_v11 }
 0x39c   : > { %v8205_v61 = vpop.permute.xlu1 %8204  ;;  %v8220_v62 = vpop.permute.xlu0 %8219 }
 0x39d   : > { %v8207_v63 = vunpack.i.h.bf16 %v8205_v61  ;;  %v8206_v1 = vunpack.i.l.bf16 %v8205_v61  ;;  %v8222_v2 = vunpack.i.h.bf16 %v8220_v62  ;;  %v8221_v3 = vunpack.i.l.bf16 %v8220_v62 }
 0x39e   : > { %7884 = vmatpush3.bf16.msk.msra.mxu0 %vm9548_vm10, %v7144_v58  ;;  %vm2457_vm10 = vcmask 105472  }
 0x39f   : > { %v2039_v4 = vsel %vm11874_vm1, %v8222_v2, 0.0  ;;  %v2038_v8 = vsel %vm11874_vm1, %v8221_v3, 0.0  ;;  %7885 = vmatprep.subr.msk.bf16.mxu0 %vm9527_vm7, %v7159_v40  ;;  %v1977_v15 = vsel %vm11874_vm1, 0.0, %v8207_v63  ;;  %v1976_v16 = vsel %vm11874_vm1, 0.0, %v8206_v1 }
 0x3a0   : > { %v7177_v13 = vpack.c.bf16 %v2039_v4, %v2038_v8  ;;  %v8215_v14 = vpop.permute.xlu1 %8214  ;;  %v7150_v17 = vpack.c.bf16 %v1977_v15, %v1976_v16 }
 0x3a1   : > { %v8217_v19 = vunpack.i.h.bf16 %v8215_v14  ;;  %v8216_v20 = vunpack.i.l.bf16 %v8215_v14 }
 0x3a2   : > { %7886 = vmatpush3.bf16.msk.msra.mxu0 %vm9486_vm3, %v7147_v9  ;;  %7964 = vmatprep.subr.msk.bf16.mxu1 %vm9486_vm3, %v7177_v13 }
 0x3a3   : > { %7887 = vmatprep.subr.msk.bf16.mxu0 %vm9527_vm7, %v7162_v55  ;;  %7965 = vmatpush3.bf16.msk.msra.mxu1 %vm9486_vm3, %v7177_v13  ;;  %v7174_v26 = vpack.c.bf16 %v8217_v19, %v8216_v20 }
 0x3a4   : > { %v8225_v18 = vpop.permute.xlu1 %8224 }
 0x3a5   : > { %v8227_v21 = vunpack.i.h.bf16 %v8225_v18  ;;  %v8226_v22 = vunpack.i.l.bf16 %v8225_v18 }
 0x3a6   : > { %7888 = vmatpush3.bf16.msk.msra.mxu0 %vm9486_vm3, %v7150_v17 }
 0x3a7   : > { %v2041_v23 = vsel %vm11874_vm1, %v8227_v21, 0.0  ;;  %v2040_v24 = vsel %vm11874_vm1, %v8226_v22, 0.0  ;;  %7889 = vmatprep.subr.msk.bf16.mxu0 %vm9576_vm11, %v7171_v0 }
 0x3a8   : > { %v7180_v25 = vpack.c.bf16 %v2041_v23, %v2040_v24 }
 0x3aa   : > { %7890 = vmatpush3.bf16.msk.msra.mxu0 %vm9527_vm7, %v7147_v9  ;;  %7966 = vmatprep.subr.msk.bf16.mxu1 %vm9486_vm3, %v7180_v25 }
 0x3ab   : > { %7891 = vmatprep.subr.msk.bf16.mxu0 %vm9576_vm11, %v7174_v26  ;;  %7967 = vmatpush3.bf16.msk.msra.mxu1 %vm9486_vm3, %v7180_v25  ;;  %vm9744_vm11 = vmpackc.low %vm9721_vm8, %vm9721_vm8  ;;  %vm3000_vm8 = vcmask 56320  }
 0x3ac   : > { %8020 = vmatprep.subr.msk.bf16.mxu1 %vm2264_vm12, %v2254_v32  ;;  %v2323_v32 = vld [vmem:[%s9196_s30] sm:$0xff]  ;;  %vm2478_vm12 = vcmask 97280  }
 0x3ad   : > { %v2201_v12 = vpop.permute.xlu0 %2200 }
 0x3ae   : > { %7892 = vmatpush3.bf16.msk.msra.mxu0 %vm9527_vm7, %v7150_v17  ;;  %7969 = vmatmul.mubr.msk.bf16.vlgmr.msra.gmra.mrb[12].mxu1 %vm11865_vm4, %v8902_v28  ;;  %v8908_v28 = vld [vmem:[%s9186_s19 + $0x4] ss:$12 sps:$4 sm:$0xff]  }
 0x3af   : > { %7973 = vmatpush3.bf16.msra.mxu1 %v2266_v33  ;;  %v2329_v33 = vand.u32 3, %v9473_v7 }
 0x3b1   : > { %2133 = vmatmul.mubr.bf16.vlgmr.msra.gmra.mrb[4].mxu0 %v8898_v29  ;;  %v2211_v38 = vpop.permute.xlu0 %2210  ;;  %v2322_v29 = vld [vmem:[%s9191_s24 + $0x8] sm:$0xff]  ;;  %vm2358_vm2 = vcmp.ge.s32.totalorder %v2329_v33, 1  ;;  %vm9712_vm7 = vcmp.lt.s32.totalorder %v2329_v33, 3 }
 0x3b2   : > { %2140 = vmatprep.mubr.bf16.mxu0 %v8903_v30  ;;  %v2321_v30 = vld [vmem:[%s9191_s24] sm:$0xff]  ;;  %vm9708_vm3 = vmpackc.low %vm2358_vm2, %vm2358_vm2 }
 0x3b3   : > { %vm9731_vm9 = vmpackc.low %vm9712_vm7, %vm9712_vm7 }
 0x3b4   : > { %vm9772_vm2 = vmpackc.low %vm2478_vm12, %vm2478_vm12  ;;  %vm3024_vm12 = vcmask 515072  }
 0x3b5   : > { %v2206_v34 = vpop.permute.xlu1 %2205  ;;  %v2225_v52 = vpop.permute.xlu0 %2224 }
 0x3b9   : > { %2141 = vmatmul.mubr.bf16.gmra.mrb[8].mxu0 %v8905_v31  ;;  %v2216_v46 = vpop.permute.xlu1 %2215  ;;  %v2235_v11 = vpop.permute.xlu0 %2234  ;;  %v2324_v31 = vld [vmem:[%s9196_s30 + $0x8] sm:$0xff] }
 0x3ba   : > { %2572 = vmatprep.mubr.bf16.mxu0 %v8908_v28 }
 0x3bd   : > { %v2230_v57 = vpop.permute.xlu1 %2229 }
 0x3c1   : > { %v2240_v16 = vpop.permute.xlu1 %2239 }
 0x481   : > { %v7970_v27 = vpop.f32.mrb[12].mxu1 }
 0x482   : > { %v2183_v35 = vpop.f32.mrb[13].mxu1 }
 0x483   : > { %v7971_v36 = vpop.f32.mrb[14].mxu1 }
 0x484   : > { %v7893_v37 = vpop.f32.mrb[4].mxu0  ;;  %v2186_v54 = vpop.f32.mrb[15].mxu1 }
 0x485   : > { %v7894_v39 = vpop.f32.mrb[5].mxu0 }
 0x486   : > { %v7895_v40 = vadd.f32 %v7894_v39, %v7893_v37  ;;  %v7896_v45 = vpop.f32.mrb[6].mxu0 }
 0x487   : > { %v7897_v47 = vpop.f32.mrb[7].mxu0 }
 0x488   : > { %v7898_v48 = vadd.f32 %v7897_v47, %v7896_v45  ;;  %v2184_v49 = vadd.f32 %v7895_v40, %v2183_v35 }
 0x48a   : > { %v2218_v50 = vmul.f32 %v2201_v12, %v2184_v49  ;;  %v2187_v51 = vadd.f32 %v7898_v48, %v2186_v54 }
 0x48c   : > { %v2242_v53 = vadd.f32 %v2225_v52, %v2218_v50  ;;  %v2219_v55 = vmul.f32 %v2206_v34, %v2187_v51  ;;  %v7899_v56 = vpop.f32.mrb[8].mxu0 }
 0x48d   : > { %v7900_v58 = vpop.f32.mrb[9].mxu0 }
 0x48e   : > { %v2246_v59 = vadd.f32 %v2242_v53, %v9515_v42  ;;  %v2243_v60 = vadd.f32 %v2230_v57, %v2219_v55  ;;  %v7901_v61 = vadd.f32 %v7900_v58, %v7899_v56  ;;  %v7902_v62 = vpop.f32.mrb[10].mxu0 }
 0x48f   : > { %v7903_v63 = vpop.f32.mrb[11].mxu0 }
 0x490   : > { %v2247_v1 = vadd.f32 %v2243_v60, %v9519_v44  ;;  %v2192_v2 = vadd.f32 %v7970_v27, %v7901_v61  ;;  %v7904_v3 = vadd.f32 %v7903_v63, %v7902_v62  ;;  %v2250_v4 = vmax.f32 %v2246_v59, 0.0 }
 0x492   : > { %v2251_v8 = vmax.f32 %v2247_v1, 0.0  ;;  %v2220_v9 = vmul.f32 %v2211_v38, %v2192_v2  ;;  %v2195_v10 = vadd.f32 %v7971_v36, %v7904_v3 }
 0x494   : > { %v2244_v13 = vadd.f32 %v2235_v11, %v2220_v9  ;;  %v2221_v14 = vmul.f32 %v2216_v46, %v2195_v10  ;;  %v2255_v15 = vpack.c.bf16 %v2251_v8, %v2250_v4 }
 0x496   : > { %v2248_v42 = vadd.f32 %v2244_v13, %v9513_v41  ;;  %v2245_v0 = vadd.f32 %v2240_v16, %v2221_v14  ;;  %7974 = vmatprep.mubr.msk.bf16.mxu1 %vm2257_vm13, %v2255_v15 }
 0x498   : > { %v2249_v17 = vadd.f32 %v2245_v0, %v9517_v43  ;;  %v2252_v44 = vmax.f32 %v2248_v42, 0.0  ;;  %v9103_v43 = vmov 0.0  }
 0x499   : > { %7978 = vmatprep.subr.bf16.mxu1 %v9103_v43 }
 0x49a   : > { %v2253_v18 = vmax.f32 %v2249_v17, 0.0 }
 0x49c   : > { %v2256_v19 = vpack.c.bf16 %v2253_v18, %v2252_v44 }
 0x49e   : > { %7975 = vmatmul.mubr.msk.bf16.vlgmr.msra.gmra.mrb[16].mxu1 %vm2257_vm13, %v2256_v19  ;;  %vm2495_vm13 = vcmask 89088  }
 0x49f   : > { %7982 = vmatprep.mubr.msk.bf16.mxu1 %vm9105_vm14, %v9103_v43 }
 0x571   : > { %v7976_v20 = vpop.f32.mrb[16].mxu1 }
 0x572   : > { %v2302_v21 = vpop.f32.mrb[17].mxu1 }
 0x573   : > { %v7977_v22 = vpop.f32.mrb[18].mxu1 }
 0x574   : > { %v2305_v23 = vpop.f32.mrb[19].mxu1  ;;  %v8228_v24 = vpack.i.bf16 %v7977_v22, %v7976_v20  ;;  %v9681_v41 = vpack.c.bf16 %v7977_v22, %v7976_v20 }
 0x575   : > { %v8233_v25 = vpack.i.bf16 %v2305_v23, %v2302_v21  ;;  %v9676_v26 = vpack.c.bf16 %v2305_v23, %v2302_v21 }
 0x576   : > { %8229 = vrot.lane.b32.xlu1 %v8228_v24, %s9101_s18 }
 0x577   : > { %8234 = vrot.lane.b32.xlu0 %v8233_v25, %s9101_s18  ;;  %7912 = vmatprep.subr.bf16.mxu0 %v9676_v26 }
 0x57a   : > { %8249 = vrot.lane.b32.xlu1 %v8233_v25, %s9102_s2 }
 0x57b   : > { %8239 = vrot.lane.b32.xlu0 %v8233_v25, %s11858_s10 }
 0x57e   : > { %8254 = vrot.lane.b32.xlu1 %v8228_v24, %s9102_s2 }
 0x57f   : > { %8244 = vrot.lane.b32.xlu0 %v8228_v24, %s11858_s10 }
 0x582   : > { %8269 = vrot.lane.b32.xlu1 %v8233_v25, %s9095_s26 }
 0x583   : > { %8259 = vrot.lane.b32.xlu0 %v8233_v25, %s9100_s23 }
 0x586   : > { %8274 = vrot.lane.b32.xlu1 %v8228_v24, %s9095_s26 }
 0x587   : > { %8264 = vrot.lane.b32.xlu0 %v8228_v24, %s9100_s23 }
 0x58a   : > { %8284 = vrot.lane.b32.xlu1 %v8233_v25, %s11853_s11 }
 0x58b   : > { %8279 = vrot.lane.b32.xlu0 %v8233_v25, %s9098_s28 }
 0x58e   : > { %8289 = vrot.lane.b32.xlu1 %v8228_v24, %s9098_s28 }
 0x58f   : > { %8294 = vrot.lane.b32.xlu0 %v8233_v25, %s11854_s1 }
 0x592   : > { %8304 = vrot.lane.b32.xlu1 %v8228_v24, %s11854_s1  ;;  %s12058_s1 = sld [smem:[#allocation17_spill]] }
 0x593   : > { %8299 = vrot.lane.b32.xlu0 %v8228_v24, %s11853_s11  ;;  %s12056_s11 = sld [smem:[#allocation13_spill]] }
 0x596   : > { %2629 = vperm.xlu1 %8157, %v2322_v29  }
 0x597   : > { %2624 = vperm.xlu0 %8156, %v2321_v30  }
 0x59a   : > { %2641 = vperm.xlu1 %8157, %v2324_v31  }
 0x59b   : > { %2636 = vperm.xlu0 %8156, %v2323_v32  }
 0x5e8   : > { %v8230_v12 = vpop.permute.xlu1 %8229 }
 0x5e9   : > { %v8235_v34 = vpop.permute.xlu0 %8234  ;;  %v8232_v27 = vunpack.i.h.bf16 %v8230_v12  ;;  %v8231_v35 = vunpack.i.l.bf16 %v8230_v12 }
 0x5ea   : > { %v8237_v36 = vunpack.i.h.bf16 %v8235_v34  ;;  %v8236_v37 = vunpack.i.l.bf16 %v8235_v34 }
 0x5eb   : > { %v2357_v48 = vsel %vm2353_vm15, 0.0, %v8232_v27  ;;  %v2356_v49 = vsel %vm2353_vm15, 0.0, %v8231_v35 }
 0x5ec   : > { %v2355_v54 = vsel %vm2353_vm15, 0.0, %v8237_v36  ;;  %v2354_v38 = vsel %vm2353_vm15, 0.0, %v8236_v37  ;;  %v8250_v39 = vpop.permute.xlu1 %8249  ;;  %v7193_v59 = vpack.c.bf16 %v2357_v48, %v2356_v49 }
 0x5ed   : > { %v7190_v45 = vpack.c.bf16 %v2355_v54, %v2354_v38  ;;  %v8240_v46 = vpop.permute.xlu0 %8239  ;;  %v8252_v53 = vunpack.i.h.bf16 %v8250_v39  ;;  %v8251_v55 = vunpack.i.l.bf16 %v8250_v39 }
 0x5ee   : > { %v8242_v50 = vunpack.i.h.bf16 %v8240_v46  ;;  %v8241_v51 = vunpack.i.l.bf16 %v8240_v46 }
 0x5ef   : > { %7913 = vmatpush3.bf16.msk.msra.mxu0 %vm9708_vm3, %v7190_v45  ;;  %v7198_v2 = vpack.c.bf16 %v8252_v53, %v8251_v55 }
 0x5f0   : > { %v2438_v56 = vsel %vm11872_vm5, %v8242_v50, 0.0  ;;  %v2437_v57 = vsel %vm11872_vm5, %v8241_v51, 0.0  ;;  %v8255_v58 = vpop.permute.xlu1 %8254  ;;  %7914 = vmatprep.subr.bf16.mxu0 %v9681_v41 }
 0x5f1   : > { %v7218_v60 = vpack.c.bf16 %v2438_v56, %v2437_v57  ;;  %v8245_v61 = vpop.permute.xlu0 %8244  ;;  %v8257_v3 = vunpack.i.h.bf16 %v8255_v58  ;;  %v8256_v11 = vunpack.i.l.bf16 %v8255_v58 }
 0x5f2   : > { %v8247_v63 = vunpack.i.h.bf16 %v8245_v61  ;;  %v8246_v1 = vunpack.i.l.bf16 %v8245_v61 }
 0x5f3   : > { %7915 = vmatpush3.bf16.msk.msra.mxu0 %vm9708_vm3, %v7193_v59  ;;  %v7203_v19 = vpack.c.bf16 %v8257_v3, %v8256_v11 }
 0x5f4   : > { %v2440_v4 = vsel %vm11872_vm5, %v8247_v63, 0.0  ;;  %v2439_v8 = vsel %vm11872_vm5, %v8246_v1, 0.0  ;;  %v8270_v9 = vpop.permute.xlu1 %8269  ;;  %7916 = vmatprep.subr.msk.bf16.mxu0 %vm9731_vm9, %v7218_v60 }
 0x5f5   : > { %v7221_v13 = vpack.c.bf16 %v2440_v4, %v2439_v8  ;;  %v8272_v14 = vunpack.i.h.bf16 %v8270_v9  ;;  %v8271_v15 = vunpack.i.l.bf16 %v8270_v9  ;;  %v8260_v16 = vpop.permute.xlu0 %8259 }
 0x5f6   : > { %v8262_v42 = vunpack.i.h.bf16 %v8260_v16  ;;  %v8261_v0 = vunpack.i.l.bf16 %v8260_v16  ;;  %v8906_v16 = vld [vmem:[%s9186_s19] ss:$12 sps:$4 sm:$0xff]  }
 0x5f7   : > { %7917 = vmatpush3.bf16.msk.msra.mxu0 %vm9744_vm11, %v7198_v2  ;;  %v2394_v20 = vsel %vm1644_vm6, 0.0, %v8272_v14  ;;  %v2393_v21 = vsel %vm1644_vm6, 0.0, %v8271_v15 }
 0x5f8   : > { %v2459_v17 = vsel %vm2457_vm10, %v8262_v42, 0.0  ;;  %v2458_v44 = vsel %vm2457_vm10, %v8261_v0, 0.0  ;;  %v8275_v18 = vpop.permute.xlu1 %8274  ;;  %7918 = vmatprep.subr.msk.bf16.mxu0 %vm9731_vm9, %v7221_v13  ;;  %v7206_v33 = vpack.c.bf16 %v2394_v20, %v2393_v21  ;;  %v8909_v42 = vld [vmem:[%s9186_s19 + $0x8] ss:$12 sps:$4 sm:$0xff]   ;;  %v8910_v0 = vld [vmem:[%s12056_s11] sm:$0xff]   ;;  %s12057_s11 = sld [smem:[#allocation14_spill]] }
 0x5f9   : > { %v7224_v22 = vpack.c.bf16 %v2459_v17, %v2458_v44  ;;  %v8265_v23 = vpop.permute.xlu0 %8264  ;;  %v8277_v24 = vunpack.i.h.bf16 %v8275_v18  ;;  %v8276_v25 = vunpack.i.l.bf16 %v8275_v18 }
 0x5fa   : > { %v8267_v28 = vunpack.i.h.bf16 %v8265_v23  ;;  %v8266_v29 = vunpack.i.l.bf16 %v8265_v23 }
 0x5fb   : > { %7919 = vmatpush3.bf16.msk.msra.mxu0 %vm9744_vm11, %v7203_v19  ;;  %v2396_v36 = vsel %vm1644_vm6, 0.0, %v8277_v24  ;;  %v2395_v37 = vsel %vm1644_vm6, 0.0, %v8276_v25 }
 0x5fc   : > { %v2461_v30 = vsel %vm2457_vm10, %v8267_v28, 0.0  ;;  %v2460_v31 = vsel %vm2457_vm10, %v8266_v29, 0.0  ;;  %v8285_v32 = vpop.permute.xlu1 %8284  ;;  %7920 = vmatprep.subr.msk.bf16.mxu0 %vm9708_vm3, %v7224_v22  ;;  %v7209_v45 = vpack.c.bf16 %v2396_v36, %v2395_v37 }
 0x5fd   : > { %v7227_v12 = vpack.c.bf16 %v2461_v30, %v2460_v31  ;;  %v8287_v34 = vunpack.i.h.bf16 %v8285_v32  ;;  %v8286_v27 = vunpack.i.l.bf16 %v8285_v32  ;;  %v8280_v35 = vpop.permute.xlu0 %8279 }
 0x5fe   : > { %v8282_v54 = vunpack.i.h.bf16 %v8280_v35  ;;  %v8281_v38 = vunpack.i.l.bf16 %v8280_v35 }
 0x5ff   : > { %7921 = vmatpush3.bf16.msk.msra.mxu0 %vm9731_vm9, %v7206_v33  ;;  %v7230_v46 = vpack.c.bf16 %v8287_v34, %v8286_v27 }
 0x600   : > { %v8290_v39 = vpop.permute.xlu1 %8289  ;;  %7922 = vmatprep.subr.msk.bf16.mxu0 %vm9708_vm3, %v7227_v12  ;;  %v2417_v47 = vsel %vm11874_vm1, 0.0, %v8282_v54  ;;  %v2416_v48 = vsel %vm11874_vm1, 0.0, %v8281_v38  ;;  %v2651_v38 = vld [vmem:[%s12057_s11 + $0x8] sm:$0xff] }
 0x601   : > { %v8295_v49 = vpop.permute.xlu0 %8294  ;;  %v8292_v51 = vunpack.i.h.bf16 %v8290_v39  ;;  %v8291_v52 = vunpack.i.l.bf16 %v8290_v39  ;;  %v7212_v59 = vpack.c.bf16 %v2417_v47, %v2416_v48  ;;  %v2650_v39 = vld [vmem:[%s12057_s11] sm:$0xff]  ;;  %v2730_v48 = vld [vmem:[%s12058_s1 + $0x8] sm:$0xff]  ;;  %s12088_s11 = smov 119  }
 0x602   : > { %v8297_v53 = vunpack.i.h.bf16 %v8295_v49  ;;  %v8296_v55 = vunpack.i.l.bf16 %v8295_v49  ;;  %v2729_v49 = vld [vmem:[%s12058_s1] sm:$0xff]  ;;  %s12069_s1 = sld [smem:[#allocation23_spill]] }
 0x603   : > { %7923 = vmatpush3.bf16.msk.msra.mxu0 %vm9731_vm9, %v7209_v45  ;;  %v2419_v2 = vsel %vm11874_vm1, 0.0, %v8292_v51  ;;  %v2418_v3 = vsel %vm11874_vm1, 0.0, %v8291_v52  ;;  %v2653_v51 = vld [vmem:[%s12059_s3 + $0x8] sm:$0xff]  ;;  %v2652_v52 = vld [vmem:[%s12059_s3] sm:$0xff]  ;;  %s12070_s3 = smov 127  }
 0x604   : > { %v2497_v56 = vsel %vm2495_vm13, %v8297_v53, 0.0  ;;  %v2496_v57 = vsel %vm2495_vm13, %v8296_v55, 0.0  ;;  %v8305_v58 = vpop.permute.xlu1 %8304  ;;  %7924 = vmatprep.subr.msk.bf16.mxu0 %vm9772_vm2, %v7230_v46  ;;  %v7215_v15 = vpack.c.bf16 %v2419_v2, %v2418_v3  ;;  %v2732_v55 = vld [vmem:[%s12064_s9 + $0x8] sm:$0xff] }
 0x605   : > { %v7236_v60 = vpack.c.bf16 %v2497_v56, %v2496_v57  ;;  %v8307_v61 = vunpack.i.h.bf16 %v8305_v58  ;;  %v8306_v63 = vunpack.i.l.bf16 %v8305_v58  ;;  %v8300_v1 = vpop.permute.xlu0 %8299  ;;  %v2731_v56 = vld [vmem:[%s12064_s9] sm:$0xff]  ;;  %s12087_s9 = sld [smem:[#allocation29_spill]] }
 0x606   : > { %v8302_v4 = vunpack.i.h.bf16 %v8300_v1  ;;  %v8301_v8 = vunpack.i.l.bf16 %v8300_v1 }
 0x607   : > { %v2499_v9 = vsel %vm2495_vm13, %v8307_v61, 0.0  ;;  %v2498_v11 = vsel %vm2495_vm13, %v8306_v63, 0.0  ;;  %7925 = vmatpush3.bf16.msk.msra.mxu0 %vm9708_vm3, %v7212_v59  ;;  %7979 = vmatpush3.bf16.msk.msra.mxu1 %vm9731_vm9, %v7236_v60 }
 0x608   : > { %v7239_v13 = vpack.c.bf16 %v2499_v9, %v2498_v11  ;;  %v7233_v14 = vpack.c.bf16 %v8302_v4, %v8301_v8  ;;  %7980 = vmatprep.subr.bf16.mxu1 %v9103_v43 }
 0x60a   : > { %7926 = vmatprep.subr.msk.bf16.mxu0 %vm9772_vm2, %v7233_v14 }
 0x60b   : > { %7927 = vmatpush3.bf16.msk.msra.mxu0 %vm9708_vm3, %v7215_v15  ;;  %7981 = vmatpush3.bf16.msk.msra.mxu1 %vm9731_vm9, %v7239_v13 }
 0x60c   : > { %7986 = vmatprep.subr.bf16.mxu1 %v9103_v43  ;;  %7994 = vmatprep.subr.bf16.mxu0 %v9103_v43 }
 0x60e   : > { %2573 = vmatmul.mubr.bf16.vlgmr.msra.gmra.mrb[12].mxu0 %v8906_v16  ;;  %7983 = vmatmul.mubr.msk.bf16.vlgmr.msra.gmra.mrb[20].mxu1 %vm11865_vm4, %v8909_v42 }
 0x60f   : > { %7987 = vmatpush3.bf16.msra.mxu1 %v9676_v26  ;;  %7990 = vmatprep.mubr.msk.bf16.mxu1 %vm9105_vm14, %v9103_v43 }
 0x610   : > { %7988 = vmatprep.subr.bf16.mxu1 %v9103_v43  ;;  %7996 = vmatprep.mubr.msk.bf16.mxu0 %vm9105_vm14, %v9103_v43 }
 0x613   : > { %7989 = vmatpush3.bf16.msra.mxu1 %v9681_v41 }
 0x614   : > { %2832 = vmatprep.subr.bf16.mxu1 %v11906_v5 }
 0x615   : > { %v2630_v17 = vpop.permute.xlu1 %2629 }
 0x616   : > { %7991 = vmatmul.mubr.msk.bf16.vlgmr.msra.gmra.mrb[24].mxu1 %vm11865_vm4, %v8910_v0  ;;  %v2625_v44 = vpop.permute.xlu0 %2624 }
 0x619   : > { %v2642_v12 = vpop.permute.xlu1 %2641 }
 0x61a   : > { %v2637_v41 = vpop.permute.xlu0 %2636 }
 0x6e1   : > { %v7928_v18 = vpop.f32.mrb[12].mxu0  ;;  %v2615_v19 = vpop.f32.mrb[20].mxu1 }
 0x6e2   : > { %v7929_v26 = vpop.f32.mrb[13].mxu0  ;;  %v7984_v20 = vpop.f32.mrb[21].mxu1 }
 0x6e3   : > { %v7930_v21 = vadd.f32 %v7929_v26, %v7928_v18  ;;  %v7931_v22 = vpop.f32.mrb[14].mxu0  ;;  %v2618_v23 = vpop.f32.mrb[22].mxu1 }
 0x6e4   : > { %v7932_v24 = vpop.f32.mrb[15].mxu0  ;;  %v7985_v25 = vpop.f32.mrb[23].mxu1 }
 0x6e5   : > { %v2616_v28 = vadd.f32 %v7930_v21, %v2615_v19  ;;  %v7933_v29 = vadd.f32 %v7932_v24, %v7931_v22 }
 0x6e7   : > { %v2632_v30 = vmul.f32 %v2625_v44, %v2616_v28  ;;  %v2619_v31 = vadd.f32 %v7933_v29, %v2618_v23 }
 0x6e9   : > { %v2644_v32 = vadd.f32 %v2637_v41, %v2632_v30  ;;  %v2633_v33 = vmul.f32 %v2630_v17, %v2619_v31  ;;  %v9822_v54 = vpop.f32.mrb[24].mxu1 }
 0x6ea   : > { %v7992_v45 = vpop.f32.mrb[25].mxu1 }
 0x6eb   : > { %v2645_v34 = vadd.f32 %v2642_v12, %v2633_v33  ;;  %v2646_v27 = vmax.f32 %v2644_v32, 0.0  ;;  %v9826_v46 = vpop.f32.mrb[26].mxu1 }
 0x6ec   : > { %v7993_v47 = vpop.f32.mrb[27].mxu1 }
 0x6ed   : > { %v2647_v35 = vmax.f32 %v2645_v34, 0.0 }
 0x6ef   : > { %v8313_v36 = vpack.i.bf16 %v2647_v35, %v2646_v27  ;;  %v9814_v37 = vpack.c.bf16 %v2647_v35, %v2646_v27 }
 0x6f1   : > { %8314 = vrot.lane.b32.xlu1 %v8313_v36, %s9102_s2  ;;  %8309 = vrot.lane.b32.xlu0 %v8313_v36, %s9101_s18  ;;  %s12062_s18 = sld [smem:[#allocation16_spill]] }
 0x6f5   : > { %8324 = vrot.lane.b32.xlu1 %v8313_v36, %s9098_s28  ;;  %8319 = vrot.lane.b32.xlu0 %v8313_v36, %s9095_s26  ;;  %s12066_s26 = sld [smem:[#allocation22_spill]] }
 0x6f7   : > { %s12063_s2 = smov %s12062_s18  ;;  %v8911_v53 = vld [vmem:[%s12062_s18 + $0x4] ss:$8 sps:$4 sm:$0xff]   ;;  %s11864_s18 = smov 9  }
 0x6f8   : > { %7272 = vmatprep.mubr.msk.bf16.mxu1 %vm1526_vm0, %v8911_v53 }
 0x6f9   : > { %8334 = vrot.lane.b32.xlu1 %v8313_v36, %s9100_s23  ;;  %8329 = vrot.lane.b32.xlu0 %v8313_v36, %s11858_s10  ;;  %s12067_s23 = sld [smem:[#allocation21_spill]]  ;;  %s9109_s10 = smov 7  }
 0x6fd   : > { %8344 = vrot.lane.b32.xlu1 %v8313_v36, %s12060_s5  ;;  %8339 = vrot.lane.b32.xlu0 %v8313_v36, %s12061_s8  ;;  %s12065_s5 = sld [smem:[#allocation19_spill]]  ;;  %s11863_s8 = smov 8  }
 0x701   : > { %2710 = vperm.xlu1 %8157, %v2651_v38   ;;  %2705 = vperm.xlu0 %8156, %v2650_v39   ;;  %v8913_v38 = vld [vmem:[%s12063_s2] ss:$8 sps:$4 sm:$0xff]   ;;  %s9110_s2 = smov 121  }
 0x703   : > { %v8914_v40 = vld [vmem:[%s12065_s5] sm:$0xff]   ;;  %s12068_s5 = sld [smem:[#allocation20_spill]] }
 0x704   : > { %7995 = vmatpush3.bf16.msra.mxu0 %v8914_v40 }
 0x705   : > { %2880 = vperm.xlu1 %8157, %v2730_v48   ;;  %2875 = vperm.xlu0 %8156, %v2729_v49  }
 0x706   : > { %3078 = vmatprep.subr.bf16.mxu0 %v11906_v5 }
 0x709   : > { %2722 = vperm.xlu1 %8157, %v2653_v51   ;;  %2717 = vperm.xlu0 %8156, %v2652_v52  }
 0x70d   : > { %2892 = vperm.xlu1 %8157, %v2732_v55   ;;  %2887 = vperm.xlu0 %8156, %v2731_v56  }
 0x763   : > { %v8315_v57 = vpop.permute.xlu1 %8314  ;;  %v8310_v58 = vpop.permute.xlu0 %8309 }
 0x764   : > { %v8312_v59 = vunpack.i.h.bf16 %v8310_v58  ;;  %v8311_v60 = vunpack.i.l.bf16 %v8310_v58  ;;  %v8317_v1 = vunpack.i.h.bf16 %v8315_v57  ;;  %v8316_v2 = vunpack.i.l.bf16 %v8315_v57 }
 0x766   : > { %v2742_v61 = vsel %vm2353_vm15, 0.0, %v8312_v59  ;;  %v2741_v63 = vsel %vm2353_vm15, 0.0, %v8311_v60  ;;  %v7252_v13 = vpack.c.bf16 %v8317_v1, %v8316_v2 }
 0x767   : > { %v7247_v3 = vpack.c.bf16 %v2742_v61, %v2741_v63  ;;  %v8320_v4 = vpop.permute.xlu0 %8319  ;;  %v8325_v11 = vpop.permute.xlu1 %8324 }
 0x768   : > { %v8322_v8 = vunpack.i.h.bf16 %v8320_v4  ;;  %v8321_v9 = vunpack.i.l.bf16 %v8320_v4  ;;  %v8327_v14 = vunpack.i.h.bf16 %v8325_v11  ;;  %v8326_v15 = vunpack.i.l.bf16 %v8325_v11 }
 0x769   : > { %7248 = vmatpush1.bf16.msk.msra.mxu1 %vm9708_vm3, %v7247_v3 }
 0x76a   : > { %2834 = vmatprep.subr.bf16.mxu1 %v11906_v5  ;;  %v2760_v16 = vsel %vm1644_vm6, 0.0, %v8322_v8  ;;  %v2759_v42 = vsel %vm1644_vm6, 0.0, %v8321_v9  ;;  %v2770_v17 = vsel %vm11874_vm1, 0.0, %v8327_v14  ;;  %v2769_v44 = vsel %vm11874_vm1, 0.0, %v8326_v15 }
 0x76b   : > { %v7255_v0 = vpack.c.bf16 %v2760_v16, %v2759_v42  ;;  %v8330_v18 = vpop.permute.xlu0 %8329  ;;  %v7258_v19 = vpack.c.bf16 %v2770_v17, %v2769_v44  ;;  %v8335_v21 = vpop.permute.xlu1 %8334  ;;  %v2956_v42 = vld [vmem:[%s12066_s26] sm:$0xff]  ;;  %vm2977_vm6 = vcmask 72704   ;;  %s12082_s26 = sld [smem:[#allocation24_spill]] }
 0x76c   : > { %v8332_v26 = vunpack.i.h.bf16 %v8330_v18  ;;  %v8331_v20 = vunpack.i.l.bf16 %v8330_v18  ;;  %v8337_v10 = vunpack.i.h.bf16 %v8335_v21  ;;  %v8336_v22 = vunpack.i.l.bf16 %v8335_v21  ;;  %v9897_v17 = vld [vmem:[%s12068_s5] sm:$0xff]  ;;  %s12084_s5 = smov 8  }
 0x76d   : > { %7253 = vmatpush1.bf16.msk.msra.mxu1 %vm9744_vm11, %v7252_v13  ;;  %v7276_v44 = vcombine.high %v9897_v17, %v9897_v17  ;;  %v3131_v18 = vld [vmem:[%s12069_s1] sm:$0xf]  ;;  %s12081_s1 = sld [smem:[#allocation27_spill]]  ;;  %v8925_v21 = vld [vmem:[%s12087_s9 + $0x24] ss:$8 sps:$4 sm:$0xff]  }
 0x76e   : > { %2836 = vmatprep.subr.bf16.mxu1 %v11906_v5  ;;  %v2780_v23 = vsel %vm11872_vm5, %v8332_v26, 0.0  ;;  %v2779_v24 = vsel %vm11872_vm5, %v8331_v20, 0.0  ;;  %v2790_v28 = vsel %vm2457_vm10, %v8337_v10, 0.0  ;;  %v2789_v29 = vsel %vm2457_vm10, %v8336_v22, 0.0 }
 0x76f   : > { %v7261_v25 = vpack.c.bf16 %v2780_v23, %v2779_v24  ;;  %v8340_v30 = vpop.permute.xlu0 %8339  ;;  %v8345_v31 = vpop.permute.xlu1 %8344  ;;  %v7264_v41 = vpack.c.bf16 %v2790_v28, %v2789_v29 }
 0x770   : > { %v8342_v32 = vunpack.i.h.bf16 %v8340_v30  ;;  %v8341_v33 = vunpack.i.l.bf16 %v8340_v30  ;;  %v8347_v12 = vunpack.i.h.bf16 %v8345_v31  ;;  %v8346_v34 = vunpack.i.l.bf16 %v8345_v31 }
 0x771   : > { %7256 = vmatpush1.bf16.msk.msra.mxu1 %vm9731_vm9, %v7255_v0  ;;  %v2955_v0 = vld [vmem:[%s12067_s23] sm:$0xff]  ;;  %s12083_s23 = sld [smem:[#allocation28_spill]] }
 0x772   : > { %2838 = vmatprep.subr.bf16.mxu1 %v11906_v5  ;;  %v7267_v27 = vpack.c.bf16 %v8342_v32, %v8341_v33  ;;  %v2808_v35 = vsel %vm2495_vm13, %v8347_v12, 0.0  ;;  %v2807_v36 = vsel %vm2495_vm13, %v8346_v34, 0.0  ;;  %vm3035_vm13 = vcmask 465920  }
 0x775   : > { %7259 = vmatpush1.bf16.msk.msra.mxu1 %vm9708_vm3, %v7258_v19  ;;  %v2961_v19 = vand.u32 7, %v9473_v7 }
 0x776   : > { %2840 = vmatprep.subr.bf16.mxu1 %v11906_v5 }
 0x777   : > { %vm9907_vm15 = vcmp.ge.s32.totalorder %v2961_v19, 1  ;;  %vm9931_vm10 = vcmp.lt.s32.totalorder %v2961_v19, 7 }
 0x778   : > { %vm9941_vm11 = vmpackc.low %vm9931_vm10, %vm9931_vm10 }
 0x779   : > { %2841 = vmatpush1.bf16.msra.mxu1 %v9814_v37  ;;  %v7270_v37 = vpack.c.bf16 %v2808_v35, %v2807_v36 }
 0x77a   : > { %2842 = vmatprep.subr.bf16.mxu1 %v11906_v5 }
 0x77d   : > { %7262 = vmatpush1.bf16.msk.msra.mxu1 %vm9731_vm9, %v7261_v25 }
 0x77e   : > { %2844 = vmatprep.subr.bf16.mxu1 %v11906_v5 }
 0x780   : > { %v2706_v39 = vpop.permute.xlu0 %2705  ;;  %v2711_v50 = vpop.permute.xlu1 %2710 }
 0x781   : > { %7265 = vmatpush1.bf16.msk.msra.mxu1 %vm9708_vm3, %v7264_v41  ;;  %v2713_v62 = vmul.f32 %v2706_v39, %v9822_v54  ;;  %v2714_v57 = vmul.f32 %v2711_v50, %v9826_v46  ;;  %vm11871_vm3 = vcmask 64512  }
 0x782   : > { %2846 = vmatprep.subr.bf16.mxu1 %v11906_v5  ;;  %vm9921_vm7 = vmneg %vm11871_vm3 }
 0x784   : > { %v2876_v45 = vpop.permute.xlu0 %2875  ;;  %v2881_v47 = vpop.permute.xlu1 %2880 }
 0x785   : > { %7268 = vmatpush1.bf16.msk.msra.mxu1 %vm9772_vm2, %v7267_v27  ;;  %vm3046_vm2 = vcmask 457728   ;;  %v8926_v27 = vld [vmem:[%s12087_s9 + $0x30] ss:$8 sps:$4 sm:$0xff]  }
 0x786   : > { %2848 = vmatprep.subr.bf16.mxu1 %v11906_v5  ;;  %vm7297_vm4 = vmpackc.low %vm3046_vm2, %vm3046_vm2 }
 0x788   : > { %v2718_v48 = vpop.permute.xlu0 %2717  ;;  %v2723_v49 = vpop.permute.xlu1 %2722 }
 0x789   : > { %7271 = vmatpush1.bf16.msk.msra.mxu1 %vm9731_vm9, %v7270_v37  ;;  %v2725_v58 = vadd.f32 %v2718_v48, %v2713_v62  ;;  %v2726_v1 = vadd.f32 %v2723_v49, %v2714_v57  ;;  %vm7282_vm9 = vmpackc.low %vm9921_vm7, %vm9921_vm7 }
 0x78a   : > { %8000 = vmatprep.subr.bf16.mxu1 %v9103_v43 }
 0x78c   : > { %2865 = vmatmul.mubr.bf16.vlgmr.msra.gmra.mrb[28].mxu1 %v8913_v38  ;;  %v2888_v55 = vpop.permute.xlu0 %2887  ;;  %v2893_v63 = vpop.permute.xlu1 %2892 }
 0x78d   : > { %8002 = vmatprep.mubr.msk.bf16.mxu1 %vm9105_vm14, %v9103_v43 }
 0x85f   : > { %v2866_v51 = vpop.f32.mrb[28].mxu1 }
 0x860   : > { %v2883_v52 = vmul.f32 %v2876_v45, %v2866_v51  ;;  %v2868_v53 = vpop.f32.mrb[29].mxu1 }
 0x861   : > { %v2869_v56 = vpop.f32.mrb[30].mxu1 }
 0x862   : > { %v2895_v59 = vadd.f32 %v2888_v55, %v2883_v52  ;;  %v2884_v60 = vmul.f32 %v2881_v47, %v2869_v56  ;;  %v2871_v61 = vpop.f32.mrb[31].mxu1 }
 0x864   : > { %v2897_v2 = vadd.f32 %v2895_v59, %v2725_v58  ;;  %v2896_v3 = vadd.f32 %v2893_v63, %v2884_v60 }
 0x866   : > { %v2898_v4 = vadd.f32 %v2896_v3, %v2726_v1  ;;  %v2899_v8 = vmax.f32 %v2897_v2, 0.0 }
 0x868   : > { %v2900_v9 = vmax.f32 %v2898_v4, 0.0 }
 0x86a   : > { %v2903_v11 = vpack.c.bf16 %v2900_v9, %v2899_v8 }
 0x86c   : > { %7997 = vmatmul.mubr.msk.bf16.vlgmr.msra.gmra.mrb[16].mxu0 %vm1526_vm0, %v2903_v11 }
 0x86d   : > { %7303 = vmatprep.mubr.msk.bf16.mxu0 %vm1526_vm0, %v7276_v44 }
 0x93f   : > { %v2947_v54 = vpop.f32.mrb[16].mxu0 }
 0x940   : > { %v7998_v13 = vpop.f32.mrb[17].mxu0 }
 0x941   : > { %v2950_v14 = vpop.f32.mrb[18].mxu0  ;;  %v7275_v13 = vcombine.low %v9897_v17, %v9897_v17  ;;  %v3190_v17 = vld [vmem:[%s12081_s1] sm:$0xff]  ;;  %s9116_s1 = smov 15  }
 0x942   : > { %v7999_v15 = vpop.f32.mrb[19].mxu0  ;;  %v8353_v16 = vpack.i.bf16 %v2950_v14, %v2947_v54  ;;  %v9882_v46 = vpack.c.bf16 %v2950_v14, %v2947_v54 }
 0x944   : > { %8354 = vrot.lane.b32.xlu1 %v8353_v16, %s11863_s8  ;;  %8349 = vrot.lane.b32.xlu0 %v8353_v16, %s11864_s18  ;;  %s11867_s8 = smov 119   ;;  %s11866_s18 = smov 120  }
 0x945   : > { %8001 = vmatpush3.bf16.msra.mxu1 %v9882_v46 }
 0x946   : > { %8006 = vmatprep.subr.bf16.mxu1 %v9103_v43 }
 0x948   : > { %8364 = vrot.lane.b32.xlu1 %v8353_v16, %s9098_s28  ;;  %8359 = vrot.lane.b32.xlu0 %v8353_v16, %s9109_s10 }
 0x949   : > { %8003 = vmatmul.mubr.msk.bf16.vlgmr.msra.gmra.mrb[32].mxu1 %vm1526_vm0, %v3131_v18 }
 0x94a   : > { %8016 = vmatprep.mubr.msk.bf16.mxu1 %vm9105_vm14, %v9103_v43  ;;  %vm9916_vm14 = vmpackc.low %vm9907_vm15, %vm9907_vm15 }
 0x94c   : > { %8374 = vrot.lane.b32.xlu1 %v8353_v16, %s9110_s2  ;;  %8369 = vrot.lane.b32.xlu0 %v8353_v16, %s12070_s3 }
 0x950   : > { %8384 = vrot.lane.b32.xlu1 %v8353_v16, %s11867_s8  ;;  %8379 = vrot.lane.b32.xlu0 %v8353_v16, %s11866_s18  ;;  %s12085_s18 = sld [smem:[#allocation25_spill]]  ;;  %s12086_s8 = smov 9  }
 0x954   : > { %3126 = vperm.xlu1 %8157, %v2956_v42   ;;  %3120 = vperm.xlu0 %8156, %v2955_v0  }
 0x9b6   : > { %v8355_v26 = vpop.permute.xlu1 %8354  ;;  %v8350_v20 = vpop.permute.xlu0 %8349 }
 0x9b7   : > { %v8352_v10 = vunpack.i.h.bf16 %v8350_v20  ;;  %v8351_v22 = vunpack.i.l.bf16 %v8350_v20  ;;  %v8357_v28 = vunpack.i.h.bf16 %v8355_v26  ;;  %v8356_v29 = vunpack.i.l.bf16 %v8355_v26  ;;  %v3132_v26 = vld [vmem:[%s12082_s26] sm:$0xff]  ;;  %s9117_s26 = smov 113  }
 0x9b9   : > { %v2979_v23 = vsel %vm2977_vm6, 0.0, %v8352_v10  ;;  %v2978_v24 = vsel %vm2977_vm6, 0.0, %v8351_v22  ;;  %v7283_v34 = vpack.c.bf16 %v8357_v28, %v8356_v29  ;;  %v3191_v22 = vld [vmem:[%s12083_s23] sm:$0xff]  ;;  %s9118_s23 = smov 111  }
 0x9ba   : > { %v7278_v30 = vpack.c.bf16 %v2979_v23, %v2978_v24  ;;  %v8360_v31 = vpop.permute.xlu0 %8359  ;;  %v8365_v12 = vpop.permute.xlu1 %8364  ;;  %v3133_v23 = vld [vmem:[%s12085_s18] sm:$0xff]  ;;  %s12093_s18 = sld [smem:[#allocation33_spill]] }
 0x9bb   : > { %v8362_v32 = vunpack.i.h.bf16 %v8360_v31  ;;  %v8361_v33 = vunpack.i.l.bf16 %v8360_v31  ;;  %v8367_v35 = vunpack.i.h.bf16 %v8365_v12  ;;  %v8366_v36 = vunpack.i.l.bf16 %v8365_v12  ;;  %v8917_v28 = vld [vmem:[%s12087_s9] ss:$8 sps:$4 sm:$0xff]   ;;  %v8919_v29 = vld [vmem:[%s12087_s9 + $0x4] ss:$8 sps:$4 sm:$0xff]   ;;  %v8920_v31 = vld [vmem:[%s12087_s9 + $0x10] ss:$8 sps:$4 sm:$0xff]  }
 0x9bc   : > { %7279 = vmatpush1.bf16.msk.msra.mxu0 %vm9916_vm14, %v7278_v30  ;;  %v8922_v30 = vld [vmem:[%s12087_s9 + $0x14] ss:$8 sps:$4 sm:$0xff]  }
 0x9bd   : > { %3080 = vmatprep.subr.bf16.mxu0 %v11906_v5  ;;  %v3002_v37 = vsel %vm3000_vm8, 0.0, %v8362_v32  ;;  %v3001_v38 = vsel %vm3000_vm8, 0.0, %v8361_v33  ;;  %v3015_v50 = vsel %vm11874_vm1, 0.0, %v8367_v35  ;;  %v3014_v45 = vsel %vm11874_vm1, 0.0, %v8366_v36 }
 0x9be   : > { %v7286_v39 = vpack.c.bf16 %v3002_v37, %v3001_v38  ;;  %v8370_v47 = vpop.permute.xlu0 %8369  ;;  %v7289_v48 = vpack.c.bf16 %v3015_v50, %v3014_v45  ;;  %v8375_v62 = vpop.permute.xlu1 %8374 }
 0x9bf   : > { %v8372_v49 = vunpack.i.h.bf16 %v8370_v47  ;;  %v8371_v51 = vunpack.i.l.bf16 %v8370_v47  ;;  %v8377_v52 = vunpack.i.h.bf16 %v8375_v62  ;;  %v8376_v53 = vunpack.i.l.bf16 %v8375_v62 }
 0x9c0   : > { %7284 = vmatpush1.bf16.msk.msra.mxu0 %vm7282_vm9, %v7283_v34  ;;  %vm3055_vm9 = vcmask 449536  }
 0x9c1   : > { %3082 = vmatprep.subr.bf16.mxu0 %v11906_v5  ;;  %v3026_v55 = vsel %vm3024_vm12, %v8372_v49, 0.0  ;;  %v3025_v56 = vsel %vm3024_vm12, %v8371_v51, 0.0  ;;  %v3037_v58 = vsel %vm3035_vm13, %v8377_v52, 0.0  ;;  %v3036_v59 = vsel %vm3035_vm13, %v8376_v53, 0.0 }
 0x9c2   : > { %v7292_v57 = vpack.c.bf16 %v3026_v55, %v3025_v56  ;;  %v8380_v60 = vpop.permute.xlu0 %8379  ;;  %v8385_v61 = vpop.permute.xlu1 %8384  ;;  %v7295_v63 = vpack.c.bf16 %v3037_v58, %v3036_v59  ;;  %v8928_v58 = vld [vmem:[%s12087_s9 + $0x34] ss:$8 sps:$4 sm:$0xff]  }
 0x9c3   : > { %v8382_v1 = vunpack.i.h.bf16 %v8380_v60  ;;  %v8381_v2 = vunpack.i.l.bf16 %v8380_v60  ;;  %v8387_v3 = vunpack.i.h.bf16 %v8385_v61  ;;  %v8386_v4 = vunpack.i.l.bf16 %v8385_v61 }
 0x9c4   : > { %7287 = vmatpush1.bf16.msk.msra.mxu0 %vm9941_vm11, %v7286_v39 }
 0x9c5   : > { %3084 = vmatprep.subr.bf16.mxu0 %v11906_v5  ;;  %v7298_v8 = vpack.c.bf16 %v8382_v1, %v8381_v2  ;;  %v3057_v9 = vsel %vm3055_vm9, %v8387_v3, 0.0  ;;  %v3056_v11 = vsel %vm3055_vm9, %v8386_v4, 0.0 }
 0x9c6   : > { %v7301_v54 = vpack.c.bf16 %v3057_v9, %v3056_v11 }
 0x9c8   : > { %7290 = vmatpush1.bf16.msk.msra.mxu0 %vm9916_vm14, %v7289_v48 }
 0x9c9   : > { %3086 = vmatprep.subr.bf16.mxu0 %v11906_v5 }
 0x9cc   : > { %3087 = vmatpush1.bf16.msra.mxu0 %v9882_v46 }
 0x9cd   : > { %3088 = vmatprep.subr.bf16.mxu0 %v11906_v5 }
 0x9d0   : > { %7293 = vmatpush1.bf16.msk.msra.mxu0 %vm9941_vm11, %v7292_v57  ;;  %v8923_v57 = vld [vmem:[%s12087_s9 + $0x20] ss:$8 sps:$4 sm:$0xff]  }
 0x9d1   : > { %3090 = vmatprep.subr.bf16.mxu0 %v11906_v5 }
 0x9d3   : > { %v3121_v14 = vpop.permute.xlu0 %3120  ;;  %v3127_v42 = vpop.permute.xlu1 %3126 }
 0x9d4   : > { %7296 = vmatpush1.bf16.msk.msra.mxu0 %vm9916_vm14, %v7295_v63  ;;  %vm11880_vm14 = vmmov 1  }
 0x9d5   : > { %3092 = vmatprep.subr.bf16.mxu0 %v11906_v5 }
 0x9d8   : > { %7299 = vmatpush1.bf16.msk.msra.mxu0 %vm7297_vm4, %v7298_v8  ;;  %vm7306_vm4 = vmpackc.low %vm9921_vm7, %vm9907_vm15 }
 0x9d9   : > { %3094 = vmatprep.subr.bf16.mxu0 %v11906_v5  ;;  %vm7312_vm7 = vmpackc.low %vm9931_vm10, %vm11880_vm14 }
 0x9dc   : > { %7302 = vmatpush1.bf16.msk.msra.mxu0 %vm9941_vm11, %v7301_v54  ;;  %vm11883_vm11 = vcmask 1043456  }
 0x9dd   : > { %3351 = vmatprep.subr.bf16.mxu0 %v8919_v29 }
 0x9df   : > { %3111 = vmatmul.mubr.bf16.vlgmr.msra.gmra.mrb[20].mxu0 %v7275_v13 }
 0x9e0   : > { %3383 = vmatprep.mubr.bf16.mxu0 %v11906_v5  ;;  %3352 = vmatpush1.bf16.msra.mxu0 %v8917_v28 }
 0x9e1   : > { %3353 = vmatprep.subr.bf16.mxu0 %v8922_v30 }
 0x9e4   : > { %3354 = vmatpush1.bf16.msra.mxu0 %v8920_v31 }
 0x9e5   : > { %3355 = vmatprep.subr.bf16.mxu0 %v8925_v21 }
 0x9e8   : > { %3356 = vmatpush1.bf16.msra.mxu0 %v8923_v57 }
 0x9e9   : > { %3357 = vmatprep.subr.bf16.mxu0 %v8928_v58 }
 0x9ec   : > { %3358 = vmatpush1.bf16.msra.mxu0 %v8926_v27 }
 0xa1c   : > { %v9985_v20 = vpop.f32.mrb[32].mxu1 }
 0xa1d   : > { %v8004_v10 = vpop.f32.mrb[33].mxu1 }
 0xa1e   : > { %v3174_v24 = vpop.f32.mrb[34].mxu1  ;;  %v3591_v10 = vld [vmem:[%s12093_s18] sm:$0xf]  ;;  %s12117_s18 = sld [smem:[#allocation38_spill]] }
 0xa1f   : > { %v8005_v25 = vpop.f32.mrb[35].mxu1  ;;  %v3400_v24 = vand.u32 15, %v9473_v7 }
 0xab2   : > { %v3112_v15 = vpop.f32.mrb[20].mxu0 }
 0xab3   : > { %v3123_v16 = vmul.f32 %v3121_v14, %v3112_v15  ;;  %v3114_v46 = vpop.f32.mrb[21].mxu0 }
 0xab4   : > { %v3115_v0 = vpop.f32.mrb[22].mxu0 }
 0xab5   : > { %v3129_v44 = vadd.f32 %v3127_v42, %v3123_v16  ;;  %v3116_v18 = vpop.f32.mrb[23].mxu0 }
 0xab7   : > { %v3130_v19 = vmax.f32 %v3129_v44, 0.0 }
 0xab9   : > { %3198 = vrot.lane.b32.xlu1 %v3130_v19, %s12084_s5  ;;  %3193 = vrot.lane.b32.xlu0 %v3130_v19, %s12086_s8  ;;  %s9115_s8 = smov 17   ;;  %s9119_s5 = smov 112  }
 0xabd   : > { %3207 = vrot.lane.b32.xlu1 %v3130_v19, %s9098_s28  ;;  %3202 = vrot.lane.b32.xlu0 %v3130_v19, %s9109_s10  ;;  %s9114_s10 = smov 16  }
 0xac1   : > { %3217 = vrot.lane.b32.xlu1 %v3130_v19, %s9110_s2  ;;  %3212 = vrot.lane.b32.xlu0 %v3130_v19, %s12070_s3  ;;  %s12092_s2 = sld [smem:[#allocation31_spill]] }
 0xac5   : > { %3226 = vrot.lane.b32.xlu1 %v3130_v19, %s12088_s11  ;;  %3222 = vrot.lane.b32.xlu0 %v3130_v19, %s12089_s13  ;;  %s12090_s13 = sld [smem:[#allocation26_spill]]  ;;  %s12091_s11 = sld [smem:[#allocation32_spill]] }
 0xac9   : > { %3286 = vperm.xlu1 %8157, %v3190_v17   ;;  %3179 = vperm.xlu0 %8156, %v3132_v26  }
 0xacb   : > { %v3189_v56 = vld [vmem:[%s12090_s13] sm:$0xf]  ;;  %s12112_s13 = sld [smem:[#allocation30_spill]] }
 0xacc   : > { %v3394_v26 = vld [vmem:[%s12091_s11] sm:$0xff]  ;;  %s12115_s11 = sld [smem:[#allocation37_spill]] }
 0xacd   : > { %3292 = vperm.xlu1 %8157, %v3191_v22   ;;  %3185 = vperm.xlu0 %8156, %v3133_v23   ;;  %v10057_v22 = vadd.s32 128, %v9473_v7 }
 0xacf   : > { %v3407_v23 = vand.u32 15, %v10057_v22 }
 0xb2b   : > { %v3199_v32 = vpop.permute.xlu1 %3198  ;;  %v3194_v33 = vpop.permute.xlu0 %3193 }
 0xb2c   : > { %v3196_v12 = vsel %vm2977_vm6, 0.0, %v3194_v33  ;;  %vm7309_vm6 = vmpackc.low %vm9907_vm15, %vm9931_vm10 }
 0xb2d   : > { %v7307_v34 = vpack.c.bf16 %v3199_v32, %v3196_v12 }
 0xb2f   : > { %v3208_v35 = vpop.permute.xlu1 %3207  ;;  %8007 = vmatpush3.bf16.msk.msra.mxu1 %vm7306_vm4, %v7307_v34  ;;  %v3203_v36 = vpop.permute.xlu0 %3202 }
 0xb30   : > { %v3210_v37 = vsel %vm11874_vm1, 0.0, %v3208_v35  ;;  %v3205_v38 = vsel %vm3000_vm8, 0.0, %v3203_v36  ;;  %8008 = vmatprep.subr.bf16.mxu1 %v9103_v43  ;;  %vm7315_vm8 = vmpackc.low %vm3046_vm2, %vm9907_vm15  ;;  %vm3347_vm15 = vcmask 523264   ;;  %vm10065_vm2 = vcmp.ge.s32.totalorder %v3400_v24, 1 }
 0xb31   : > { %v7310_v40 = vpack.c.bf16 %v3210_v37, %v3205_v38 }
 0xb33   : > { %v3218_v39 = vpop.permute.xlu1 %3217  ;;  %8009 = vmatpush3.bf16.msk.msra.mxu1 %vm7309_vm6, %v7310_v40  ;;  %v3213_v41 = vpop.permute.xlu0 %3212 }
 0xb34   : > { %v3215_v50 = vsel %vm3024_vm12, %v3213_v41, 0.0  ;;  %8010 = vmatprep.subr.bf16.mxu1 %v9103_v43  ;;  %v3220_v47 = vsel %vm3035_vm13, %v3218_v39, 0.0  ;;  %vm11882_vm12 = vcmask 588800   ;;  %vm10061_vm13 = vcmp.ge.s32.totalorder %v3407_v23, 1 }
 0xb35   : > { %v7313_v45 = vpack.c.bf16 %v3215_v50, %v3130_v19  ;;  %vm10080_vm4 = vmpackc.low %vm11880_vm14, %vm10061_vm13 }
 0xb37   : > { %v3227_v48 = vpop.permute.xlu1 %3226  ;;  %8011 = vmatpush3.bf16.msk.msra.mxu1 %vm7312_vm7, %v7313_v45  ;;  %v3223_v49 = vpop.permute.xlu0 %3222  ;;  %vm10088_vm7 = vcmp.lt.s32.totalorder %v3407_v23, 15  ;;  %v3828_v45 = vld [vmem:[#allocation2 + $0x48] sm:$0xff] }
 0xb38   : > { %v3229_v51 = vsel %vm3055_vm9, %v3227_v48, 0.0  ;;  %v7316_v62 = vpack.c.bf16 %v3223_v49, %v3220_v47  ;;  %8012 = vmatprep.subr.bf16.mxu1 %v9103_v43  ;;  %vm10070_vm9 = vmneg %vm1526_vm0 }
 0xb39   : > { %v3230_v52 = vsel %vm9931_vm10, %v3229_v51, 0.0  ;;  %vm11875_vm10 = vcmask 138240   ;;  %vm11873_vm6 = vmpackc.low %vm10070_vm9, %vm10065_vm2 }
 0xb3a   : > { %v3235_v53 = vpack.c.bf16 %v3230_v52, %v3230_v52 }
 0xb3b   : > { %8013 = vmatpush3.bf16.msk.msra.mxu1 %vm7315_vm8, %v7316_v62  ;;  %vm10092_vm8 = vcmp.lt.s32.totalorder %v3400_v24, 15 }
 0xb3c   : > { %8014 = vmatprep.subr.bf16.mxu1 %v9103_v43  ;;  %v3242_v55 = vsel %vm11883_vm11, %v3235_v53, 0 }
 0xb3f   : > { %8015 = vmatpush3.bf16.msra.mxu1 %v3242_v55 }
 0xb42   : > { %8017 = vmatmul.mubr.msk.bf16.vlgmr.msra.gmra.mrb[36].mxu1 %vm11882_vm12, %v3189_v56 }
 0xb43   : > { %3637 = vmatprep.mubr.bf16.mxu1 %v11906_v5 }
 0xb48   : > { %v3180_v59 = vpop.permute.xlu0 %3179  ;;  %v3287_v60 = vpop.permute.xlu1 %3286 }
 0xb49   : > { %v3182_v63 = vmul.f32 %v3180_v59, %v9985_v20  ;;  %v3393_v20 = vld [vmem:[%s12092_s2] sm:$0xff]  ;;  %s12116_s2 = sld [smem:[#allocation34_spill]] }
 0xb4c   : > { %v3186_v43 = vpop.permute.xlu0 %3185  ;;  %v3293_v3 = vpop.permute.xlu1 %3292 }
 0xb4d   : > { %v3188_v8 = vadd.f32 %v3186_v43, %v3182_v63 }
 0xc15   : > { %v3278_v61 = vpop.f32.mrb[36].mxu1 }
 0xc16   : > { %v3289_v1 = vmul.f32 %v3287_v60, %v3278_v61  ;;  %v8018_v2 = vpop.f32.mrb[37].mxu1 }
 0xc17   : > { %v3281_v4 = vpop.f32.mrb[38].mxu1 }
 0xc18   : > { %v3295_v9 = vadd.f32 %v3293_v3, %v3289_v1  ;;  %v8019_v11 = vpop.f32.mrb[39].mxu1 }
 0xc1a   : > { %v3296_v54 = vadd.f32 %v3295_v9, %v3188_v8 }
 0xc1c   : > { %v3297_v13 = vmax.f32 %v3296_v54, 0.0 }
 0xc1e   : > { %v3306_v14 = vpack.c.bf16 %v3297_v13, %v3297_v13 }
 0xc20   : > { %7327 = vmatmul.mubr.msk.bf16.vlgmr.msra.gmra.mrb[24].mxu0 %vm3347_vm15, %v3306_v14  ;;  %vm11876_vm15 = vmpackc.low %vm10061_vm13, %vm10088_vm7 }
 0xc21   : > { %3566 = vmatprep.mubr.bf16.mxu0 %v11906_v5 }
 0xcf3   : > { %v10029_v15 = vpop.f32.mrb[24].mxu0 }
 0xcf4   : > { %v10031_v16 = vpop.f32.mrb[25].mxu0  ;;  %v3594_v46 = vpack.c.bf16 %v10029_v15, %v10029_v15 }
 0xcf5   : > { %v3389_v42 = vpop.f32.mrb[26].mxu0  ;;  %v8393_v0 = vpack.i.bf16 %v10031_v16, %v10029_v15  ;;  %v3595_v44 = vpack.c.bf16 %v10031_v16, %v10031_v16  ;;  %v8413_v17 = vpack.i.bf16 %v10029_v15, %v10031_v16 }
 0xcf6   : > { %v3390_v18 = vpop.f32.mrb[27].mxu0  ;;  %v3600_v19 = vsel %vm11883_vm11, %v3594_v46, 0 }
 0xcf7   : > { %8394 = vrot.lane.b32.xlu1 %v8393_v0, %s9114_s10  ;;  %8389 = vrot.lane.b32.xlu0 %v8393_v0, %s9115_s8 }
 0xcf8   : > { %7355 = vmatprep.subr.msk.bf16.mxu1 %vm11883_vm11, %v3595_v44 }
 0xcf9   : > { %3606 = vmatpush1.bf16.msra.mxu1 %v3600_v19 }
 0xcfb   : > { %8404 = vrot.lane.b32.xlu1 %v8393_v0, %s9098_s28  ;;  %8399 = vrot.lane.b32.xlu0 %v8393_v0, %s9116_s1 }
 0xcfc   : > { %7356 = vmatmul.mubr.msk.bf16.vlgmr.msra.gmra.mrb[40].mxu1 %vm11871_vm3, %v3591_v10  ;;  %vm11877_vm3 = vcmask 1039360  }
 0xcfd   : > { %3792 = vmatprep.mubr.bf16.mxu1 %v11906_v5 }
 0xcff   : > { %8414 = vrot.lane.b32.xlu1 %v8413_v17, %s9117_s26  ;;  %8409 = vrot.lane.b32.xlu0 %v8413_v17, %s12070_s3 }
 0xd03   : > { %8424 = vrot.lane.b32.xlu1 %v8393_v0, %s9118_s23  ;;  %8419 = vrot.lane.b32.xlu0 %v8393_v0, %s9119_s5 }
 0xd07   : > { %3584 = vperm.xlu1 %8157, %v3394_v26   ;;  %3577 = vperm.xlu0 %8156, %v3393_v20  }
 0xd69   : > { %v8395_v25 = vpop.permute.xlu1 %8394  ;;  %v8390_v28 = vpop.permute.xlu0 %8389 }
 0xd6a   : > { %v8397_v31 = vunpack.i.h.bf16 %v8395_v25  ;;  %v8396_v32 = vunpack.i.l.bf16 %v8395_v25  ;;  %v8392_v33 = vunpack.i.h.bf16 %v8390_v28  ;;  %v8391_v12 = vunpack.i.l.bf16 %v8390_v28  ;;  %v3392_v28 = vld [vmem:[%s12112_s13] sm:$0xf]  ;;  %s12118_s13 = sld [smem:[#allocation35_spill]] }
 0xd6c   : > { %v3443_v35 = vsel %vm1526_vm0, %v8396_v32, %v8397_v31  ;;  %v3427_v36 = vsel %vm11875_vm10, %v8391_v12, %v8392_v33  ;;  %v3430_v37 = vsel %vm11875_vm10, 0.0, %v8391_v12  ;;  %vm11884_vm10 = vcmask 916480  }
 0xd6d   : > { %v7333_v40 = vpack.c.bf16 %v8396_v32, %v3430_v37  ;;  %v8405_v39 = vpop.permute.xlu1 %8404  ;;  %v8400_v41 = vpop.permute.xlu0 %8399  ;;  %v7329_v50 = vpack.c.bf16 %v3443_v35, %v3427_v36 }
 0xd6e   : > { %v8407_v48 = vunpack.i.h.bf16 %v8405_v39  ;;  %v8406_v49 = vunpack.i.l.bf16 %v8405_v39  ;;  %v8402_v51 = vunpack.i.h.bf16 %v8400_v41  ;;  %v8401_v62 = vunpack.i.l.bf16 %v8400_v41 }
 0xd6f   : > { %7330 = vmatprep.subr.msk.bf16.mxu0 %vm10080_vm4, %v7329_v50 }
 0xd70   : > { %v3467_v52 = vsel %vm11874_vm1, %v8406_v49, %v8407_v48  ;;  %v3470_v53 = vsel %vm11874_vm1, 0.0, %v8406_v49  ;;  %v3451_v55 = vsel %vm11872_vm5, %v8401_v62, %v8402_v51  ;;  %v3454_v56 = vsel %vm11872_vm5, 0.0, %v8401_v62  ;;  %7334 = vmatpush1.bf16.msk.msra.mxu0 %vm11873_vm6, %v7333_v40  ;;  %vm11878_vm5 = vmpackc.low %vm10065_vm2, %vm10092_vm8 }
 0xd71   : > { %v7339_v21 = vpack.c.bf16 %v3470_v53, %v3454_v56  ;;  %v8415_v57 = vpop.permute.xlu1 %8414  ;;  %v8410_v27 = vpop.permute.xlu0 %8409  ;;  %v7336_v58 = vpack.c.bf16 %v3467_v52, %v3451_v55  ;;  %vm11879_vm6 = vcmask 924672   ;;  %vm10130_vm1 = vmpackc.low %vm10088_vm7, %vm11880_vm14  ;;  %v3661_v52 = vld [vmem:[%s12115_s11] sm:$0xff]  ;;  %s9125_s11 = smov 95  }
 0xd72   : > { %v8412_v59 = vunpack.i.h.bf16 %v8410_v27  ;;  %v8411_v60 = vunpack.i.l.bf16 %v8410_v27  ;;  %v8417_v43 = vunpack.i.h.bf16 %v8415_v57  ;;  %v8416_v61 = vunpack.i.l.bf16 %v8415_v57  ;;  %v3592_v53 = vld [vmem:[%s12116_s2] sm:$0xff]  ;;  %s12137_s2 = sld [smem:[#allocation40_spill]] }
 0xd73   : > { %7337 = vmatprep.subr.msk.bf16.mxu0 %vm11876_vm15, %v7336_v58  ;;  %vm3508_vm15 = vcmask 908288   ;;  %v3662_v56 = vld [vmem:[%s12117_s18] sm:$0xff]  ;;  %s12138_s18 = sld [smem:[#allocation41_spill]] }
 0xd74   : > { %v3478_v63 = vsel %vm11877_vm3, %v8412_v59, %v8411_v60  ;;  %v3481_v1 = vsel %vm11877_vm3, %v8411_v60, 0.0  ;;  %7340 = vmatpush1.bf16.msk.msra.mxu0 %vm11878_vm5, %v7339_v21  ;;  %vm10139_vm3 = vmpackc.low %vm10092_vm8, %vm11880_vm14  ;;  %v3489_v42 = vsel %vm11879_vm6, %v8417_v43, %v8416_v61  ;;  %v3593_v21 = vld [vmem:[%s12118_s13] sm:$0xff]  ;;  %s12201_s13 = sld [smem:[#allocation39_spill]] }
 0xd75   : > { %v7342_v3 = vpack.c.bf16 %v3481_v1, %v10031_v16  ;;  %v7345_v4 = vpack.c.bf16 %v3478_v63, %v10029_v15  ;;  %v8425_v8 = vpop.permute.xlu1 %8424  ;;  %v8420_v9 = vpop.permute.xlu0 %8419  ;;  %v3492_v16 = vsel %vm11879_vm6, %v8416_v61, 0.0  ;;  %vm10150_vm5 = vmpackc.low %vm11884_vm10, %vm10061_vm13  ;;  %v3819_v58 = vld [vmem:[#allocation2] sm:$0xff]  ;;  %v3836_v15 = vld [vmem:[#allocation2 + $0x88] sm:$0xff] }
 0xd76   : > { %v8427_v54 = vunpack.i.h.bf16 %v8425_v8  ;;  %v8426_v13 = vunpack.i.l.bf16 %v8425_v8  ;;  %v8422_v14 = vunpack.i.h.bf16 %v8420_v9  ;;  %v8421_v46 = vunpack.i.l.bf16 %v8420_v9  ;;  %vm10164_vm6 = vmpackc.low %vm11880_vm14, %vm10065_vm2  ;;  %v3823_v59 = vld [vmem:[#allocation2 + $0x20] sm:$0xff] }
 0xd77   : > { %7343 = vmatprep.subr.msk.bf16.mxu0 %vm10130_vm1, %v7342_v3  ;;  %v7384_v60 = vcombine.low %v3819_v58, %v3823_v59  ;;  %v7385_v43 = vcombine.high %v3819_v58, %v3823_v59  ;;  %v3827_v61 = vld [vmem:[#allocation2 + $0x40] sm:$0xff]  ;;  %vm12119_vm14 = vcmask 138240  }
 0xd78   : > { %v3512_v0 = vsel %vm3508_vm15, %v8427_v54, 0.0  ;;  %v7348_v44 = vpack.c.bf16 %v8422_v14, %v3492_v16  ;;  %7346 = vmatpush1.bf16.msk.msra.mxu0 %vm10139_vm3, %v7345_v4  ;;  %v3500_v18 = vsel %vm11884_vm10, %v8421_v46, %v8422_v14  ;;  %v3509_v19 = vsel %vm3508_vm15, %v8426_v13, %v8427_v54  ;;  %v3831_v63 = vld [vmem:[#allocation2 + $0x60] sm:$0xff] }
 0xd79   : > { %v3514_v17 = vsel %vm10088_vm7, %v3512_v0, 0.0  ;;  %v7351_v26 = vpack.c.bf16 %v3500_v18, %v3489_v42  ;;  %v3513_v10 = vsel %vm10092_vm8, %v3509_v19, 0.0  ;;  %v7393_v1 = vcombine.high %v3827_v61, %v3831_v63  ;;  %v3835_v3 = vld [vmem:[#allocation2 + $0x80] sm:$0xff] }
 0xd7a   : > { %v3524_v23 = vpack.c.bf16 %v3514_v17, %v3514_v17  ;;  %7349 = vmatprep.subr.msk.bf16.mxu0 %vm10150_vm5, %v7348_v44  ;;  %v3523_v24 = vpack.c.bf16 %v3513_v10, %v3513_v10  ;;  %v3839_v4 = vld [vmem:[#allocation2 + $0xa0] sm:$0xff]  ;;  %v7392_v8 = vcombine.low %v3827_v61, %v3831_v63 }
 0xd7b   : > { %v7401_v9 = vcombine.high %v3835_v3, %v3839_v4  ;;  %v3843_v54 = vld [vmem:[#allocation2 + $0xc0] sm:$0xff]  ;;  %v7400_v14 = vcombine.low %v3835_v3, %v3839_v4 }
 0xd7c   : > { %7352 = vmatpush1.bf16.msk.msra.mxu0 %vm10164_vm6, %v7351_v26  ;;  %v3529_v25 = vsel %vm11883_vm11, %v3523_v24, 0  ;;  %v3847_v13 = vld [vmem:[#allocation2 + $0xe0] sm:$0xff] }
 0xd7d   : > { %7353 = vmatprep.subr.msk.bf16.mxu0 %vm11883_vm11, %v3524_v23  ;;  %v7409_v46 = vcombine.high %v3843_v54, %v3847_v13  ;;  %v3851_v42 = vld [vmem:[#allocation2 + $0x100] sm:$0xff]  ;;  %v7408_v0 = vcombine.low %v3843_v54, %v3847_v13  ;;  %vm12121_vm11 = vcmask 7168  }
 0xd7e   : > { %v3855_v16 = vld [vmem:[#allocation2 + $0x120] sm:$0xff]  ;;  %vm12122_vm10 = vmmov %vm12121_vm11 }
 0xd7f   : > { %v7417_v44 = vcombine.high %v3851_v42, %v3855_v16  ;;  %v3859_v18 = vld [vmem:[#allocation2 + $0x140] sm:$0xff]  ;;  %v7416_v17 = vcombine.low %v3851_v42, %v3855_v16 }
 0xd80   : > { %3543 = vmatpush1.bf16.msra.mxu0 %v3529_v25  ;;  %v3863_v19 = vld [vmem:[#allocation2 + $0x160] sm:$0xff] }
 0xd81   : > { %4589 = vmatprep.subr.bf16.mxu0 %v7385_v43  ;;  %v7425_v26 = vcombine.high %v3859_v18, %v3863_v19  ;;  %v3867_v10 = vld [vmem:[#allocation2 + $0x180] sm:$0xff]  ;;  %v7424_v24 = vcombine.low %v3859_v18, %v3863_v19 }
 0xd82   : > { %v3871_v23 = vld [vmem:[#allocation2 + $0x1a0] sm:$0xff] }
 0xd83   : > { %7354 = vmatmul.mubr.msk.bf16.vlgmr.msra.gmra.mrb[28].mxu0 %vm11882_vm12, %v3392_v28  ;;  %v7433_v25 = vcombine.high %v3867_v10, %v3871_v23  ;;  %v3875_v28 = vld [vmem:[#allocation2 + $0x1c0] sm:$0xff]  ;;  %vm12120_vm12 = vmmov %vm12119_vm14 }
 0xd84   : > { %4590 = vmatpush1.bf16.msra.mxu0 %v7384_v60  ;;  %v3915_v59 = vld [vmem:[#allocation2 + $0x300] sm:$0xff] }
 0xd85   : > { %4591 = vmatprep.subr.bf16.mxu0 %v7393_v1  ;;  %v3919_v60 = vld [vmem:[#allocation2 + $0x320] sm:$0xff] }
 0xd86   : > { %v3578_v31 = vpop.permute.xlu0 %3577  ;;  %v3585_v35 = vpop.permute.xlu1 %3584  ;;  %v7481_v61 = vcombine.high %v3915_v59, %v3919_v60  ;;  %v7480_v63 = vcombine.low %v3915_v59, %v3919_v60  ;;  %v3820_v60 = vld [vmem:[#allocation2 + $0x8] sm:$0xff] }
 0xd88   : > { %4592 = vmatpush1.bf16.msra.mxu0 %v7392_v8 }
 0xd89   : > { %4593 = vmatprep.subr.bf16.mxu0 %v7401_v9 }
 0xd8c   : > { %4594 = vmatpush1.bf16.msra.mxu0 %v7400_v14 }
 0xd8d   : > { %4595 = vmatprep.subr.bf16.mxu0 %v7409_v46 }
 0xd90   : > { %4596 = vmatpush1.bf16.msra.mxu0 %v7408_v0 }
 0xd91   : > { %4597 = vmatprep.subr.bf16.mxu0 %v7417_v44 }
 0xd94   : > { %4598 = vmatpush1.bf16.msra.mxu0 %v7416_v17 }
 0xd95   : > { %4599 = vmatprep.subr.bf16.mxu0 %v7425_v26 }
 0xd98   : > { %4600 = vmatpush1.bf16.msra.mxu0 %v7424_v24 }
 0xd99   : > { %4601 = vmatprep.subr.bf16.mxu0 %v7433_v25 }
 0xdcf   : > { %v10194_v62 = vpop.f32.mrb[40].mxu1 }
 0xdd0   : > { %v10198_v55 = vpop.f32.mrb[41].mxu1 }
 0xdd1   : > { %v3643_v57 = vpop.f32.mrb[42].mxu1 }
 0xdd2   : > { %v3644_v27 = vpop.f32.mrb[43].mxu1  ;;  %v3911_v57 = vld [vmem:[#allocation2 + $0x2e0] sm:$0xff] }
 0xe56   : > { %v3568_v32 = vpop.f32.mrb[28].mxu0 }
 0xe57   : > { %v3580_v33 = vmul.f32 %v3578_v31, %v3568_v32  ;;  %v3570_v12 = vpop.f32.mrb[29].mxu0  ;;  %v7432_v32 = vcombine.low %v3867_v10, %v3871_v23 }
 0xe58   : > { %v3581_v36 = vmul.f32 %v3578_v31, %v3570_v12  ;;  %v3572_v37 = vpop.f32.mrb[30].mxu0  ;;  %v3879_v31 = vld [vmem:[#allocation2 + $0x1e0] sm:$0xff] }
 0xe59   : > { %v3587_v40 = vadd.f32 %v3585_v35, %v3580_v33  ;;  %v3573_v39 = vpop.f32.mrb[31].mxu0  ;;  %v7441_v33 = vcombine.high %v3875_v28, %v3879_v31  ;;  %v3883_v12 = vld [vmem:[#allocation2 + $0x200] sm:$0xff]  ;;  %4602 = vmatpush1.bf16.msra.mxu0 %v7432_v32 }
 0xe5a   : > { %v3588_v41 = vadd.f32 %v3585_v35, %v3581_v36  ;;  %v3887_v35 = vld [vmem:[#allocation2 + $0x220] sm:$0xff]  ;;  %v7440_v36 = vcombine.low %v3875_v28, %v3879_v31 }
 0xe5b   : > { %v10178_v50 = vmax.f32 %v3587_v40, 0.0  ;;  %4603 = vmatprep.subr.bf16.mxu0 %v7441_v33  ;;  %v7449_v37 = vcombine.high %v3883_v12, %v3887_v35  ;;  %v3891_v40 = vld [vmem:[#allocation2 + $0x240] sm:$0xff] }
 0xe5c   : > { %v10180_v48 = vmax.f32 %v3588_v41, 0.0  ;;  %v3895_v39 = vld [vmem:[#allocation2 + $0x260] sm:$0xff]  ;;  %v7448_v41 = vcombine.low %v3883_v12, %v3887_v35 }
 0xe5d   : > { %4604 = vmatpush1.bf16.msra.mxu0 %v7440_v36 }
 0xe5e   : > { %v8433_v49 = vpack.i.bf16 %v10180_v48, %v10178_v50  ;;  %v8453_v51 = vpack.i.bf16 %v10178_v50, %v10180_v48  ;;  %4605 = vmatprep.subr.bf16.mxu0 %v7449_v37 }
 0xe60   : > { %8434 = vrot.lane.b32.xlu1 %v8433_v49, %s9114_s10  ;;  %8429 = vrot.lane.b32.xlu0 %v8433_v49, %s9115_s8  ;;  %s12133_s10 = sld [smem:[#allocation36_spill]]  ;;  %s9120_s8 = smov 32  }
 0xe61   : > { %4606 = vmatpush1.bf16.msra.mxu0 %v7448_v41 }
 0xe64   : > { %8444 = vrot.lane.b32.xlu1 %v8433_v49, %s9098_s28  ;;  %8439 = vrot.lane.b32.xlu0 %v8433_v49, %s9116_s1  ;;  %s9121_s1 = smov 33  }
 0xe66   : > { %v3660_v47 = vld [vmem:[%s12133_s10] sm:$0xf]  ;;  %s12304_s10 = sld [smem:[#allocation42_spill]] }
 0xe68   : > { %8454 = vrot.lane.b32.xlu1 %v8453_v51, %s9117_s26  ;;  %8449 = vrot.lane.b32.xlu0 %v8453_v51, %s12070_s3  ;;  %v3899_v51 = vld [vmem:[#allocation2 + $0x280] sm:$0xff]  ;;  %s9122_s26 = smov 31  }
 0xe6c   : > { %8464 = vrot.lane.b32.xlu1 %v8433_v49, %s9118_s23  ;;  %8459 = vrot.lane.b32.xlu0 %v8433_v49, %s9119_s5  ;;  %v7457_v49 = vcombine.high %v3891_v40, %v3895_v39  ;;  %s9123_s23 = smov 97   ;;  %s9124_s5 = smov 96  }
 0xe6e   : > { %4607 = vmatprep.subr.bf16.mxu0 %v7457_v49 }
 0xe70   : > { %3803 = vperm.xlu1 %8157, %v3661_v52   ;;  %3648 = vperm.xlu0 %8156, %v3592_v53   ;;  %v3903_v52 = vld [vmem:[#allocation2 + $0x2a0] sm:$0xff]  ;;  %v7456_v53 = vcombine.low %v3891_v40, %v3895_v39 }
 0xe71   : > { %v7464_v27 = vcombine.low %v3899_v51, %v3903_v52 }
 0xe72   : > { %4608 = vmatpush1.bf16.msra.mxu0 %v7456_v53 }
 0xe74   : > { %3810 = vperm.xlu1 %8157, %v3662_v56   ;;  %3655 = vperm.xlu0 %8156, %v3593_v21   ;;  %v7465_v56 = vcombine.high %v3899_v51, %v3903_v52  ;;  %v3907_v21 = vld [vmem:[#allocation2 + $0x2c0] sm:$0xff] }
 0xe75   : > { %v7473_v58 = vcombine.high %v3907_v21, %v3911_v57  ;;  %v7472_v43 = vcombine.low %v3907_v21, %v3911_v57 }
 0xe76   : > { %4609 = vmatprep.subr.bf16.mxu0 %v7465_v56 }
 0xe77   : > { %4610 = vmatpush1.bf16.msra.mxu0 %v7464_v27 }
 0xe78   : > { %4611 = vmatprep.subr.bf16.mxu0 %v7473_v58 }
 0xe7b   : > { %4612 = vmatpush1.bf16.msra.mxu0 %v7472_v43  ;;  %v3824_v43 = vld [vmem:[#allocation2 + $0x28] sm:$0xff] }
 0xe7c   : > { %4613 = vmatprep.subr.bf16.mxu0 %v7481_v61  ;;  %v7387_v11 = vcombine.high %v3820_v60, %v3824_v43 }
 0xe7f   : > { %4614 = vmatpush1.bf16.msra.mxu0 %v7480_v63  ;;  %v3832_v63 = vld [vmem:[#allocation2 + $0x68] sm:$0xff] }
 0xed2   : > { %v8435_v1 = vpop.permute.xlu1 %8434  ;;  %v8430_v3 = vpop.permute.xlu0 %8429 }
 0xed3   : > { %v8437_v4 = vunpack.i.h.bf16 %v8435_v1  ;;  %v8436_v8 = vunpack.i.l.bf16 %v8435_v1  ;;  %v8432_v9 = vunpack.i.h.bf16 %v8430_v3  ;;  %v8431_v54 = vunpack.i.l.bf16 %v8430_v3 }
 0xed4   : > { %v7386_v3 = vcombine.low %v3820_v60, %v3824_v43  ;;  %v3928_v43 = vld [vmem:[#allocation2 + $0x368] sm:$0xff] }
 0xed5   : > { %v3679_v13 = vsel %vm1526_vm0, %v8436_v8, %v8437_v4  ;;  %v3669_v14 = vsel %vm12119_vm14, %v8431_v54, %v8432_v9  ;;  %v3672_v46 = vsel %vm12120_vm12, 0.0, %v8431_v54  ;;  %vm12123_vm0 = vcmask 121856   ;;  %vm12125_vm12 = vmpackc.low %vm10070_vm9, %vm10065_vm2  ;;  %v3844_v54 = vld [vmem:[#allocation2 + $0xc8] sm:$0xff] }
 0xed6   : > { %v7362_v42 = vpack.c.bf16 %v8436_v8, %v3672_v46  ;;  %v8445_v16 = vpop.permute.xlu1 %8444  ;;  %v8440_v0 = vpop.permute.xlu0 %8439  ;;  %v7358_v44 = vpack.c.bf16 %v3679_v13, %v3669_v14  ;;  %vm12124_vm14 = vmmov %vm12123_vm0  ;;  %v7395_v4 = vcombine.high %v3828_v45, %v3832_v63  ;;  %v3840_v8 = vld [vmem:[#allocation2 + $0xa8] sm:$0xff]  ;;  %v7394_v9 = vcombine.low %v3828_v45, %v3832_v63  ;;  %v3931_v63 = vld [vmem:[#allocation2 + $0x380] sm:$0xff] }
 0xed7   : > { %v8447_v18 = vunpack.i.h.bf16 %v8445_v16  ;;  %v8446_v19 = vunpack.i.l.bf16 %v8445_v16  ;;  %v8442_v17 = vunpack.i.h.bf16 %v8440_v0  ;;  %v8441_v26 = vunpack.i.l.bf16 %v8440_v0  ;;  %vm12129_vm9 = vmpackc.low %vm10065_vm2, %vm10092_vm8  ;;  %v3848_v13 = vld [vmem:[#allocation2 + $0xe8] sm:$0xff] }
 0xed8   : > { %7359 = vmatprep.subr.msk.bf16.mxu1 %vm10080_vm4, %v7358_v44  ;;  %vm12132_vm2 = vcmask 916480   ;;  %v7403_v20 = vcombine.high %v3836_v15, %v3840_v8  ;;  %v7402_v14 = vcombine.low %v3836_v15, %v3840_v8  ;;  %v7411_v46 = vcombine.high %v3844_v54, %v3848_v13  ;;  %v3856_v16 = vld [vmem:[#allocation2 + $0x128] sm:$0xff] }
 0xed9   : > { %v3697_v10 = vsel %vm12121_vm11, %v8446_v19, %v8447_v18  ;;  %v3700_v23 = vsel %vm12122_vm10, 0.0, %v8446_v19  ;;  %v3687_v24 = vsel %vm12123_vm0, %v8441_v26, %v8442_v17  ;;  %v3690_v25 = vsel %vm12124_vm14, 0.0, %v8441_v26  ;;  %7363 = vmatpush1.bf16.msk.msra.mxu1 %vm12125_vm12, %v7362_v42  ;;  %vm12126_vm11 = vmpackc.low %vm10061_vm13, %vm10088_vm7  ;;  %v3852_v42 = vld [vmem:[#allocation2 + $0x108] sm:$0xff] }
 0xeda   : > { %v7368_v28 = vpack.c.bf16 %v3700_v23, %v3690_v25  ;;  %v8455_v31 = vpop.permute.xlu1 %8454  ;;  %v8450_v32 = vpop.permute.xlu0 %8449  ;;  %v7365_v33 = vpack.c.bf16 %v3697_v10, %v3687_v24  ;;  %vm12127_vm10 = vcmask 1039360   ;;  %vm12130_vm13 = vcmask 924672   ;;  %v3860_v18 = vld [vmem:[#allocation2 + $0x148] sm:$0xff] }
 0xedb   : > { %v8452_v38 = vunpack.i.h.bf16 %v8450_v32  ;;  %v8451_v12 = vunpack.i.l.bf16 %v8450_v32  ;;  %v8457_v35 = vunpack.i.h.bf16 %v8455_v31  ;;  %v8456_v36 = vunpack.i.l.bf16 %v8455_v31  ;;  %vm12128_vm4 = vmmov %vm12127_vm10  ;;  %v3864_v19 = vld [vmem:[#allocation2 + $0x168] sm:$0xff] }
 0xedc   : > { %7366 = vmatprep.subr.msk.bf16.mxu1 %vm12126_vm11, %v7365_v33  ;;  %vm12131_vm0 = vmmov %vm12130_vm13  ;;  %v7410_v0 = vcombine.low %v3844_v54, %v3848_v13  ;;  %v7419_v44 = vcombine.high %v3852_v42, %v3856_v16  ;;  %v7418_v17 = vcombine.low %v3852_v42, %v3856_v16  ;;  %v7427_v26 = vcombine.high %v3860_v18, %v3864_v19  ;;  %v3868_v10 = vld [vmem:[#allocation2 + $0x188] sm:$0xff]  ;;  %v3943_v54 = vld [vmem:[#allocation2 + $0x3e0] sm:$0xff] }
 0xedd   : > { %v3707_v34 = vsel %vm12127_vm10, %v8452_v38, %v8451_v12  ;;  %v3710_v37 = vsel %vm12128_vm4, %v8451_v12, 0.0  ;;  %7369 = vmatpush1.bf16.msk.msra.mxu1 %vm12129_vm9, %v7368_v28  ;;  %v3717_v56 = vsel %vm12130_vm13, %v8457_v35, %v8456_v36  ;;  %v3720_v21 = vsel %vm12131_vm0, %v8456_v36, 0.0  ;;  %v3872_v23 = vld [vmem:[#allocation2 + $0x1a8] sm:$0xff] }
 0xede   : > { %v7371_v40 = vpack.c.bf16 %v3710_v37, %v10180_v48  ;;  %v7374_v39 = vpack.c.bf16 %v3707_v34, %v10178_v50  ;;  %v8465_v41 = vpop.permute.xlu1 %8464  ;;  %v8460_v29 = vpop.permute.xlu0 %8459  ;;  %v7426_v24 = vcombine.low %v3860_v18, %v3864_v19  ;;  %v7435_v25 = vcombine.high %v3868_v10, %v3872_v23  ;;  %v3876_v28 = vld [vmem:[#allocation2 + $0x1c8] sm:$0xff]  ;;  %v3825_v18 = vld [vmem:[#allocation2 + $0x30] sm:$0xff]  ;;  %v3822_v19 = vld [vmem:[#allocation2 + $0x18] sm:$0xff] }
 0xedf   : > { %v8467_v49 = vunpack.i.h.bf16 %v8465_v41  ;;  %v8466_v51 = vunpack.i.l.bf16 %v8465_v41  ;;  %v8462_v52 = vunpack.i.h.bf16 %v8460_v29  ;;  %v8461_v53 = vunpack.i.l.bf16 %v8460_v29  ;;  %v3880_v31 = vld [vmem:[#allocation2 + $0x1e8] sm:$0xff] }
 0xee0   : > { %7372 = vmatprep.subr.msk.bf16.mxu1 %vm10130_vm1, %v7371_v40  ;;  %vm12134_vm1 = vcmask 1043456   ;;  %v7434_v32 = vcombine.low %v3868_v10, %v3872_v23  ;;  %v7443_v33 = vcombine.high %v3876_v28, %v3880_v31  ;;  %v3884_v38 = vld [vmem:[#allocation2 + $0x208] sm:$0xff]  ;;  %v7442_v35 = vcombine.low %v3876_v28, %v3880_v31  ;;  %v3826_v10 = vld [vmem:[#allocation2 + $0x38] sm:$0xff] }
 0xee1   : > { %v3738_v30 = vsel %vm3508_vm15, %v8467_v49, 0.0  ;;  %v7377_v57 = vpack.c.bf16 %v8462_v52, %v3720_v21  ;;  %v3727_v48 = vsel %vm12132_vm2, %v8461_v53, %v8462_v52  ;;  %7375 = vmatpush1.bf16.msk.msra.mxu1 %vm10139_vm3, %v7374_v39  ;;  %v3735_v50 = vsel %vm3508_vm15, %v8466_v51, %v8467_v49  ;;  %vm12135_vm3 = vmmov %vm12134_vm1  ;;  %v3888_v12 = vld [vmem:[#allocation2 + $0x228] sm:$0xff] }
 0xee2   : > { %v3740_v27 = vsel %vm10088_vm7, %v3738_v30, 0.0  ;;  %v7380_v58 = vpack.c.bf16 %v3727_v48, %v3717_v56  ;;  %v3739_v59 = vsel %vm10092_vm8, %v3735_v50, 0.0  ;;  %v7451_v36 = vcombine.high %v3884_v38, %v3888_v12  ;;  %v3892_v34 = vld [vmem:[#allocation2 + $0x248] sm:$0xff] }
 0xee3   : > { %v3750_v2 = vpack.c.bf16 %v3740_v27, %v3740_v27  ;;  %7378 = vmatprep.subr.msk.bf16.mxu1 %vm10150_vm5, %v7377_v57  ;;  %v3749_v61 = vpack.c.bf16 %v3739_v59, %v3739_v59  ;;  %vm12136_vm5 = vcmask 588800   ;;  %v3896_v37 = vld [vmem:[#allocation2 + $0x268] sm:$0xff]  ;;  %v7450_v40 = vcombine.low %v3884_v38, %v3888_v12  ;;  %v3927_v59 = vld [vmem:[#allocation2 + $0x360] sm:$0xff] }
 0xee4   : > { %v7459_v39 = vcombine.high %v3892_v34, %v3896_v37  ;;  %v3900_v41 = vld [vmem:[#allocation2 + $0x288] sm:$0xff]  ;;  %v7458_v49 = vcombine.low %v3892_v34, %v3896_v37  ;;  %v7390_v23 = vcombine.low %v3822_v19, %v3826_v10  ;;  %vm12143_vm15 = vcmask 261120  }
 0xee5   : > { %7381 = vmatpush1.bf16.msk.msra.mxu1 %vm10164_vm6, %v7380_v58  ;;  %v3755_v1 = vsel %vm12135_vm3, %v3749_v61, 0  ;;  %v3904_v29 = vld [vmem:[#allocation2 + $0x2a8] sm:$0xff]  ;;  %v3923_v58 = vld [vmem:[#allocation2 + $0x340] sm:$0xff]  ;;  %vm11888_vm6 = vcmask 269312   ;;  %vm7515_vm14 = vmneg %vm12143_vm15  ;;  %vm11885_vm12 = vcmask 252928   ;;  %vm12147_vm4 = vmmov 1  }
 0xee6   : > { %7382 = vmatprep.subr.msk.bf16.mxu1 %vm12134_vm1, %v3750_v2  ;;  %v7467_v51 = vcombine.high %v3900_v41, %v3904_v29  ;;  %v3908_v52 = vld [vmem:[#allocation2 + $0x2c8] sm:$0xff]  ;;  %v7466_v56 = vcombine.low %v3900_v41, %v3904_v29  ;;  %v7489_v60 = vcombine.high %v3923_v58, %v3927_v59  ;;  %v7488_v61 = vcombine.low %v3923_v58, %v3927_v59  ;;  %v3841_v59 = vld [vmem:[#allocation2 + $0xb0] sm:$0xff]  ;;  %vm12146_vm10 = vmmov %vm12143_vm15 }
 0xee7   : > { %v3912_v53 = vld [vmem:[#allocation2 + $0x2e8] sm:$0xff]  ;;  %vm12156_vm2 = vcmask 7168  }
 0xee8   : > { %v7475_v21 = vcombine.high %v3908_v52, %v3912_v53  ;;  %v3916_v30 = vld [vmem:[#allocation2 + $0x308] sm:$0xff]  ;;  %v7474_v48 = vcombine.low %v3908_v52, %v3912_v53  ;;  %4615 = vmatprep.subr.bf16.mxu0 %v7489_v60  ;;  %v3842_v60 = vld [vmem:[#allocation2 + $0xb8] sm:$0xff]  ;;  %vm12157_vm1 = vmmov %vm12156_vm2 }
 0xee9   : > { %3769 = vmatpush1.bf16.msra.mxu1 %v3755_v1  ;;  %v3920_v57 = vld [vmem:[#allocation2 + $0x328] sm:$0xff]  ;;  %4616 = vmatpush1.bf16.msra.mxu0 %v7488_v61  ;;  %v3935_v1 = vld [vmem:[#allocation2 + $0x3a0] sm:$0xff] }
 0xeea   : > { %4630 = vmatprep.subr.bf16.mxu1 %v7387_v11  ;;  %v7483_v50 = vcombine.high %v3916_v30, %v3920_v57  ;;  %v7482_v27 = vcombine.low %v3916_v30, %v3920_v57  ;;  %v3924_v2 = vld [vmem:[#allocation2 + $0x348] sm:$0xff]  ;;  %v7496_v15 = vcombine.low %v3931_v63, %v3935_v1  ;;  %v3833_v30 = vld [vmem:[#allocation2 + $0x70] sm:$0xff]  ;;  %v3830_v57 = vld [vmem:[#allocation2 + $0x58] sm:$0xff] }
 0xeeb   : > { %v7490_v11 = vcombine.low %v3924_v2, %v3928_v43  ;;  %v7491_v45 = vcombine.high %v3924_v2, %v3928_v43  ;;  %v3940_v13 = vld [vmem:[#allocation2 + $0x3c8] sm:$0xff]  ;;  %v3838_v2 = vld [vmem:[#allocation2 + $0x98] sm:$0xff] }
 0xeec   : > { %7383 = vmatmul.mubr.msk.bf16.vlgmr.msra.gmra.mrb[44].mxu1 %vm12136_vm5, %v3660_v47  ;;  %v3932_v47 = vld [vmem:[#allocation2 + $0x388] sm:$0xff] }
 0xeed   : > { %4631 = vmatpush1.bf16.msra.mxu1 %v7386_v3  ;;  %v7497_v3 = vcombine.high %v3931_v63, %v3935_v1  ;;  %v3944_v42 = vld [vmem:[#allocation2 + $0x3e8] sm:$0xff]  ;;  %v3845_v63 = vld [vmem:[#allocation2 + $0xd0] sm:$0xff] }
 0xeee   : > { %4632 = vmatprep.subr.bf16.mxu1 %v7395_v4  ;;  %v3936_v4 = vld [vmem:[#allocation2 + $0x3a8] sm:$0xff]  ;;  %v7506_v16 = vcombine.low %v3940_v13, %v3944_v42  ;;  %v3849_v1 = vld [vmem:[#allocation2 + $0xf0] sm:$0xff] }
 0xeef   : > { %v7498_v8 = vcombine.low %v3932_v47, %v3936_v4  ;;  %4617 = vmatprep.subr.bf16.mxu0 %v7497_v3  ;;  %v3804_v28 = vpop.permute.xlu1 %3803  ;;  %v3850_v3 = vld [vmem:[#allocation2 + $0xf8] sm:$0xff] }
 0xef0   : > { %4618 = vmatpush1.bf16.msra.mxu0 %v7496_v15  ;;  %v7406_v15 = vcombine.low %v3838_v2, %v3842_v60 }
 0xef1   : > { %4633 = vmatpush1.bf16.msra.mxu1 %v7394_v9  ;;  %v7499_v9 = vcombine.high %v3932_v47, %v3936_v4  ;;  %v3846_v47 = vld [vmem:[#allocation2 + $0xd8] sm:$0xff] }
 0xef2   : > { %4634 = vmatprep.subr.bf16.mxu1 %v7403_v20  ;;  %v3939_v20 = vld [vmem:[#allocation2 + $0x3c0] sm:$0xff] }
 0xef5   : > { %4635 = vmatpush1.bf16.msra.mxu1 %v7402_v14  ;;  %v7504_v14 = vcombine.low %v3939_v20, %v3943_v54 }
 0xef6   : > { %4636 = vmatprep.subr.bf16.mxu1 %v7411_v46  ;;  %v7505_v46 = vcombine.high %v3939_v20, %v3943_v54  ;;  %v3853_v20 = vld [vmem:[#allocation2 + $0x110] sm:$0xff] }
 0xef7   : > { %v3857_v54 = vld [vmem:[#allocation2 + $0x130] sm:$0xff] }
 0xef8   : > { %4619 = vmatprep.subr.bf16.mxu0 %v7505_v46  ;;  %v7412_v46 = vcombine.low %v3845_v63, %v3849_v1 }
 0xef9   : > { %4637 = vmatpush1.bf16.msra.mxu1 %v7410_v0  ;;  %v7507_v0 = vcombine.high %v3940_v13, %v3944_v42  ;;  %4620 = vmatpush1.bf16.msra.mxu0 %v7504_v14  ;;  %v3854_v13 = vld [vmem:[#allocation2 + $0x118] sm:$0xff]  ;;  %v7414_v42 = vcombine.low %v3846_v47, %v3850_v3 }
 0xefa   : > { %4638 = vmatprep.subr.bf16.mxu1 %v7419_v44  ;;  %v3821_v44 = vld [vmem:[#allocation2 + $0x10] sm:$0xff]  ;;  %v3858_v14 = vld [vmem:[#allocation2 + $0x138] sm:$0xff] }
 0xefd   : > { %4639 = vmatpush1.bf16.msra.mxu1 %v7418_v17  ;;  %v7388_v17 = vcombine.low %v3821_v44, %v3825_v18 }
 0xefe   : > { %4640 = vmatprep.subr.bf16.mxu1 %v7427_v26  ;;  %v7389_v26 = vcombine.high %v3821_v44, %v3825_v18  ;;  %v3861_v44 = vld [vmem:[#allocation2 + $0x150] sm:$0xff] }
 0xeff   : > { %v3865_v18 = vld [vmem:[#allocation2 + $0x170] sm:$0xff] }
 0xf00   : > { %4671 = vmatprep.subr.bf16.mxu0 %v7389_v26  ;;  %v7420_v26 = vcombine.low %v3853_v20, %v3857_v54 }
 0xf01   : > { %4641 = vmatpush1.bf16.msra.mxu1 %v7426_v24  ;;  %v7391_v24 = vcombine.high %v3822_v19, %v3826_v10  ;;  %v3862_v19 = vld [vmem:[#allocation2 + $0x158] sm:$0xff]  ;;  %v7422_v10 = vcombine.low %v3854_v13, %v3858_v14 }
 0xf02   : > { %4642 = vmatprep.subr.bf16.mxu1 %v7435_v25  ;;  %v3649_v25 = vpop.permute.xlu0 %3648 }
 0xf05   : > { %4643 = vmatpush1.bf16.msra.mxu1 %v7434_v32 }
 0xf06   : > { %4644 = vmatprep.subr.bf16.mxu1 %v7443_v33  ;;  %v3656_v31 = vpop.permute.xlu0 %3655  ;;  %v3651_v33 = vmul.f32 %v3649_v25, %v10194_v62  ;;  %v3834_v62 = vld [vmem:[#allocation2 + $0x78] sm:$0xff] }
 0xf07   : > { %v7399_v58 = vcombine.high %v3830_v57, %v3834_v62  ;;  %v7398_v61 = vcombine.low %v3830_v57, %v3834_v62 }
 0xf09   : > { %4645 = vmatpush1.bf16.msra.mxu1 %v7442_v35  ;;  %v3652_v35 = vmul.f32 %v3649_v25, %v10198_v55  ;;  %v3837_v55 = vld [vmem:[#allocation2 + $0x90] sm:$0xff] }
 0xf0a   : > { %4646 = vmatprep.subr.bf16.mxu1 %v7451_v36  ;;  %v3811_v36 = vpop.permute.xlu1 %3810  ;;  %v7404_v4 = vcombine.low %v3837_v55, %v3841_v59  ;;  %v3869_v25 = vld [vmem:[#allocation2 + $0x190] sm:$0xff] }
 0xf0b   : > { %v3659_v29 = vadd.f32 %v3656_v31, %v3652_v35 }
 0xf0d   : > { %4647 = vmatpush1.bf16.msra.mxu1 %v7450_v40  ;;  %v3658_v40 = vadd.f32 %v3656_v31, %v3651_v33  ;;  %v3870_v31 = vld [vmem:[#allocation2 + $0x198] sm:$0xff]  ;;  %v7428_v33 = vcombine.low %v3861_v44, %v3865_v18 }
 0xf0e   : > { %4648 = vmatprep.subr.bf16.mxu1 %v7459_v39 }
 0xf11   : > { %4649 = vmatpush1.bf16.msra.mxu1 %v7458_v49 }
 0xf12   : > { %4650 = vmatprep.subr.bf16.mxu1 %v7467_v51 }
 0xf15   : > { %4651 = vmatpush1.bf16.msra.mxu1 %v7466_v56 }
 0xf16   : > { %4652 = vmatprep.subr.bf16.mxu1 %v7475_v21  ;;  %v3829_v21 = vld [vmem:[#allocation2 + $0x50] sm:$0xff] }
 0xf17   : > { %v7396_v43 = vcombine.low %v3829_v21, %v3833_v30 }
 0xf19   : > { %4653 = vmatpush1.bf16.msra.mxu1 %v7474_v48 }
 0xf1a   : > { %4654 = vmatprep.subr.bf16.mxu1 %v7483_v50 }
 0xf1d   : > { %4655 = vmatpush1.bf16.msra.mxu1 %v7482_v27  ;;  %v7397_v27 = vcombine.high %v3829_v21, %v3833_v30 }
 0xf1e   : > { %4656 = vmatprep.subr.bf16.mxu1 %v7491_v45  ;;  %v7407_v45 = vcombine.high %v3838_v2, %v3842_v60 }
 0xf21   : > { %4657 = vmatpush1.bf16.msra.mxu1 %v7490_v11  ;;  %v7405_v11 = vcombine.high %v3837_v55, %v3841_v59  ;;  %v3897_v55 = vld [vmem:[#allocation2 + $0x270] sm:$0xff] }
 0xf22   : > { %4658 = vmatprep.subr.bf16.mxu1 %v7499_v9  ;;  %v7415_v9 = vcombine.high %v3846_v47, %v3850_v3 }
 0xf25   : > { %4659 = vmatpush1.bf16.msra.mxu1 %v7498_v8  ;;  %v7413_v8 = vcombine.high %v3845_v63, %v3849_v1  ;;  %v3906_v63 = vld [vmem:[#allocation2 + $0x2b8] sm:$0xff] }
 0xf26   : > { %4660 = vmatprep.subr.bf16.mxu1 %v7507_v0  ;;  %v7423_v0 = vcombine.high %v3854_v13, %v3858_v14 }
 0xf29   : > { %4661 = vmatpush1.bf16.msra.mxu1 %v7506_v16  ;;  %v7421_v16 = vcombine.high %v3853_v20, %v3857_v54  ;;  %v3914_v20 = vld [vmem:[#allocation2 + $0x2f8] sm:$0xff] }
 0xf2a   : > { %4712 = vmatprep.subr.bf16.mxu1 %v7391_v24 }
 0xfbf   : > { %v3794_v32 = vpop.f32.mrb[44].mxu1 }
 0xfc0   : > { %v3806_v38 = vmul.f32 %v3804_v28, %v3794_v32  ;;  %v3796_v12 = vpop.f32.mrb[45].mxu1  ;;  %v3874_v32 = vld [vmem:[#allocation2 + $0x1b8] sm:$0xff] }
 0xfc1   : > { %v3807_v34 = vmul.f32 %v3804_v28, %v3796_v12  ;;  %v3798_v37 = vpop.f32.mrb[46].mxu1  ;;  %v3873_v28 = vld [vmem:[#allocation2 + $0x1b0] sm:$0xff]  ;;  %v7439_v35 = vcombine.high %v3870_v31, %v3874_v32 }
 0xfc2   : > { %v3813_v39 = vadd.f32 %v3811_v36, %v3806_v38  ;;  %v3799_v41 = vpop.f32.mrb[47].mxu1  ;;  %v7437_v12 = vcombine.high %v3869_v25, %v3873_v28  ;;  %v3878_v37 = vld [vmem:[#allocation2 + $0x1d8] sm:$0xff] }
 0xfc3   : > { %v3814_v49 = vadd.f32 %v3811_v36, %v3807_v34  ;;  %v3877_v36 = vld [vmem:[#allocation2 + $0x1d0] sm:$0xff]  ;;  %v7438_v41 = vcombine.low %v3870_v31, %v3874_v32 }
 0xfc4   : > { %v3815_v51 = vadd.f32 %v3813_v39, %v3658_v40  ;;  %v3881_v34 = vld [vmem:[#allocation2 + $0x1f0] sm:$0xff]  ;;  %v3882_v40 = vld [vmem:[#allocation2 + $0x1f8] sm:$0xff]  ;;  %v7436_v39 = vcombine.low %v3869_v25, %v3873_v28 }
 0xfc5   : > { %v3816_v52 = vadd.f32 %v3814_v49, %v3659_v29  ;;  %v7445_v29 = vcombine.high %v3877_v36, %v3881_v34  ;;  %v7447_v49 = vcombine.high %v3878_v37, %v3882_v40  ;;  %v7444_v21 = vcombine.low %v3877_v36, %v3881_v34  ;;  %v3930_v25 = vld [vmem:[#allocation2 + $0x378] sm:$0xff] }
 0xfc6   : > { %v3817_v53 = vmax.f32 %v3815_v51, 0.0  ;;  %v3885_v51 = vld [vmem:[#allocation2 + $0x210] sm:$0xff]  ;;  %v7446_v30 = vcombine.low %v3878_v37, %v3882_v40  ;;  %v3938_v36 = vld [vmem:[#allocation2 + $0x3b8] sm:$0xff] }
 0xfc7   : > { %v3818_v56 = vmax.f32 %v3816_v52, 0.0  ;;  %v3889_v52 = vld [vmem:[#allocation2 + $0x230] sm:$0xff] }
 0xfc8   : > { %v10253_v50 = vpack.c.bf16 %v3817_v53, %v3817_v53  ;;  %v3886_v53 = vld [vmem:[#allocation2 + $0x218] sm:$0xff]  ;;  %v7453_v57 = vcombine.high %v3885_v51, %v3889_v52  ;;  %v7452_v59 = vcombine.low %v3885_v51, %v3889_v52 }
 0xfc9   : > { %v3948_v48 = vpack.c.bf16 %v3818_v56, %v3818_v56  ;;  %v3890_v56 = vld [vmem:[#allocation2 + $0x238] sm:$0xff] }
 0xfca   : > { %v7455_v62 = vcombine.high %v3886_v53, %v3890_v56  ;;  %v7454_v2 = vcombine.low %v3886_v53, %v3890_v56  ;;  %v3946_v51 = vld [vmem:[#allocation2 + $0x3f8] sm:$0xff] }
 0xfcb   : > { %4621 = vmatprep.mubr.bf16.mxu0 %v3948_v48  ;;  %4662 = vmatprep.mubr.bf16.mxu1 %v3948_v48 }
 0xfcc   : > { %4622 = vmatmul.mubr.bf16.vlgmr.msra.gmra.mrb[32].mxu0 %v10253_v50  ;;  %4663 = vmatmul.mubr.bf16.vlgmr.msra.gmra.mrb[48].mxu1 %v10253_v50 }
 0xfcd   : > { %4672 = vmatpush1.bf16.msra.mxu0 %v7388_v17  ;;  %4713 = vmatpush1.bf16.msra.mxu1 %v7390_v23  ;;  %v3866_v17 = vld [vmem:[#allocation2 + $0x178] sm:$0xff]  ;;  %v7429_v23 = vcombine.high %v3861_v44, %v3865_v18 }
 0xfce   : > { %4703 = vmatprep.mubr.bf16.mxu0 %v3948_v48  ;;  %4744 = vmatprep.mubr.bf16.mxu1 %v3948_v48  ;;  %v7431_v24 = vcombine.high %v3862_v19, %v3866_v17  ;;  %v7430_v38 = vcombine.low %v3862_v19, %v3866_v17  ;;  %v3893_v48 = vld [vmem:[#allocation2 + $0x250] sm:$0xff]  ;;  %v3922_v44 = vld [vmem:[#allocation2 + $0x338] sm:$0xff] }
 0xfcf   : > { %4673 = vmatprep.subr.bf16.mxu0 %v7397_v27  ;;  %4714 = vmatprep.subr.bf16.mxu1 %v7399_v58  ;;  %v3894_v27 = vld [vmem:[#allocation2 + $0x258] sm:$0xff]  ;;  %v7461_v60 = vcombine.high %v3893_v48, %v3897_v55  ;;  %v7460_v1 = vcombine.low %v3893_v48, %v3897_v55 }
 0xfd0   : > { %v3898_v58 = vld [vmem:[#allocation2 + $0x278] sm:$0xff] }
 0xfd1   : > { %4674 = vmatpush1.bf16.msra.mxu0 %v7396_v43  ;;  %4715 = vmatpush1.bf16.msra.mxu1 %v7398_v61  ;;  %v7463_v43 = vcombine.high %v3894_v27, %v3898_v58  ;;  %v3901_v61 = vld [vmem:[#allocation2 + $0x290] sm:$0xff]  ;;  %v7462_v47 = vcombine.low %v3894_v27, %v3898_v58 }
 0xfd2   : > { %4675 = vmatprep.subr.bf16.mxu0 %v7405_v11  ;;  %4716 = vmatprep.subr.bf16.mxu1 %v7407_v45  ;;  %v3905_v11 = vld [vmem:[#allocation2 + $0x2b0] sm:$0xff]  ;;  %v3902_v45 = vld [vmem:[#allocation2 + $0x298] sm:$0xff] }
 0xfd3   : > { %v7469_v3 = vcombine.high %v3901_v61, %v3905_v11  ;;  %v7468_v54 = vcombine.low %v3901_v61, %v3905_v11  ;;  %v7470_v13 = vcombine.low %v3902_v45, %v3906_v63 }
 0xfd5   : > { %4676 = vmatpush1.bf16.msra.mxu0 %v7404_v4  ;;  %4717 = vmatpush1.bf16.msra.mxu1 %v7406_v15  ;;  %v7471_v4 = vcombine.high %v3902_v45, %v3906_v63  ;;  %v3909_v15 = vld [vmem:[#allocation2 + $0x2d0] sm:$0xff] }
 0xfd6   : > { %4677 = vmatprep.subr.bf16.mxu0 %v7413_v8  ;;  %4718 = vmatprep.subr.bf16.mxu1 %v7415_v9  ;;  %v3913_v8 = vld [vmem:[#allocation2 + $0x2f0] sm:$0xff]  ;;  %v3910_v9 = vld [vmem:[#allocation2 + $0x2d8] sm:$0xff] }
 0xfd7   : > { %v7477_v14 = vcombine.high %v3909_v15, %v3913_v8  ;;  %v7476_v18 = vcombine.low %v3909_v15, %v3913_v8  ;;  %v7478_v19 = vcombine.low %v3910_v9, %v3914_v20 }
 0xfd9   : > { %4678 = vmatpush1.bf16.msra.mxu0 %v7412_v46  ;;  %4719 = vmatpush1.bf16.msra.mxu1 %v7414_v42  ;;  %v7479_v46 = vcombine.high %v3910_v9, %v3914_v20  ;;  %v3917_v42 = vld [vmem:[#allocation2 + $0x310] sm:$0xff] }
 0xfda   : > { %4679 = vmatprep.subr.bf16.mxu0 %v7421_v16  ;;  %4720 = vmatprep.subr.bf16.mxu1 %v7423_v0  ;;  %v3921_v16 = vld [vmem:[#allocation2 + $0x330] sm:$0xff]  ;;  %v3918_v0 = vld [vmem:[#allocation2 + $0x318] sm:$0xff] }
 0xfdb   : > { %v7485_v17 = vcombine.high %v3917_v42, %v3921_v16  ;;  %v7484_v28 = vcombine.low %v3917_v42, %v3921_v16  ;;  %v7486_v31 = vcombine.low %v3918_v0, %v3922_v44  ;;  %v4766_v42 = vand.u32 31, %v9473_v7 }
 0xfdd   : > { %4680 = vmatpush1.bf16.msra.mxu0 %v7420_v26  ;;  %4721 = vmatpush1.bf16.msra.mxu1 %v7422_v10  ;;  %v7487_v26 = vcombine.high %v3918_v0, %v3922_v44  ;;  %v3925_v10 = vld [vmem:[#allocation2 + $0x350] sm:$0xff]  ;;  %vm10345_vm8 = vcmp.ge.s32.totalorder %v4766_v42, 1  ;;  %vm10366_vm13 = vcmp.lt.s32.totalorder %v4766_v42, 31  ;;  %v12172_v42 = vmov 0 }
 0xfde   : > { %4681 = vmatprep.subr.bf16.mxu0 %v7429_v23  ;;  %4722 = vmatprep.subr.bf16.mxu1 %v7431_v24  ;;  %v3929_v23 = vld [vmem:[#allocation2 + $0x370] sm:$0xff]  ;;  %v3926_v24 = vld [vmem:[#allocation2 + $0x358] sm:$0xff]  ;;  %vm10376_vm0 = vmpackc.low %vm7515_vm14, %vm10345_vm8 }
 0xfdf   : > { %v7493_v32 = vcombine.high %v3925_v10, %v3929_v23  ;;  %v7492_v34 = vcombine.low %v3925_v10, %v3929_v23  ;;  %v7494_v37 = vcombine.low %v3926_v24, %v3930_v25  ;;  %v12144_v10 = vmov 0  ;;  %vm10418_vm5 = vmpackc.low %vm10345_vm8, %vm10366_vm13 }
 0xfe1   : > { %4682 = vmatpush1.bf16.msra.mxu0 %v7428_v33  ;;  %4723 = vmatpush1.bf16.msra.mxu1 %v7430_v38  ;;  %v7495_v33 = vcombine.high %v3926_v24, %v3930_v25  ;;  %v3933_v38 = vld [vmem:[#allocation2 + $0x390] sm:$0xff] }
 0xfe2   : > { %4683 = vmatprep.subr.bf16.mxu0 %v7437_v12  ;;  %4724 = vmatprep.subr.bf16.mxu1 %v7439_v35  ;;  %v3937_v12 = vld [vmem:[#allocation2 + $0x3b0] sm:$0xff]  ;;  %v3934_v35 = vld [vmem:[#allocation2 + $0x398] sm:$0xff] }
 0xfe3   : > { %v7501_v40 = vcombine.high %v3933_v38, %v3937_v12  ;;  %v7500_v52 = vcombine.low %v3933_v38, %v3937_v12  ;;  %v7502_v53 = vcombine.low %v3934_v35, %v3938_v36 }
 0xfe5   : > { %4684 = vmatpush1.bf16.msra.mxu0 %v7436_v39  ;;  %4725 = vmatpush1.bf16.msra.mxu1 %v7438_v41  ;;  %v7503_v39 = vcombine.high %v3934_v35, %v3938_v36  ;;  %v3941_v41 = vld [vmem:[#allocation2 + $0x3d0] sm:$0xff]  ;;  %v12153_v35 = vmov 0  ;;  %v10381_v36 = vadd.s32 384, %v9473_v7 }
 0xfe6   : > { %4685 = vmatprep.subr.bf16.mxu0 %v7445_v29  ;;  %4726 = vmatprep.subr.bf16.mxu1 %v7447_v49  ;;  %v3945_v29 = vld [vmem:[#allocation2 + $0x3f0] sm:$0xff]  ;;  %v3942_v49 = vld [vmem:[#allocation2 + $0x3d8] sm:$0xff]  ;;  %v12154_v35 = vsel %vm10376_vm0, 4294967295, %v12153_v35 }
 0xfe7   : > { %v7509_v56 = vcombine.high %v3941_v41, %v3945_v29  ;;  %12155 = vst [vmem:[#allocation51_spill] sm:$0xff] %v12154_v35 }
 0xfe9   : > { %4686 = vmatpush1.bf16.msra.mxu0 %v7444_v21  ;;  %4727 = vmatpush1.bf16.msra.mxu1 %v7446_v30  ;;  %v7511_v21 = vcombine.high %v3942_v49, %v3946_v51  ;;  %v7508_v30 = vcombine.low %v3941_v41, %v3945_v29 }
 0xfea   : > { %4687 = vmatprep.subr.bf16.mxu0 %v7453_v57  ;;  %4728 = vmatprep.subr.bf16.mxu1 %v7455_v62  ;;  %v7510_v57 = vcombine.low %v3942_v49, %v3946_v51 }
 0xfed   : > { %4688 = vmatpush1.bf16.msra.mxu0 %v7452_v59  ;;  %4729 = vmatpush1.bf16.msra.mxu1 %v7454_v2 }
 0xfee   : > { %4689 = vmatprep.subr.bf16.mxu0 %v7461_v60  ;;  %4730 = vmatprep.subr.bf16.mxu1 %v7463_v43 }
 0xff1   : > { %4690 = vmatpush1.bf16.msra.mxu0 %v7460_v1  ;;  %4731 = vmatpush1.bf16.msra.mxu1 %v7462_v47 }
 0xff2   : > { %4691 = vmatprep.subr.bf16.mxu0 %v7469_v3  ;;  %4732 = vmatprep.subr.bf16.mxu1 %v7471_v4 }
 0xff5   : > { %4692 = vmatpush1.bf16.msra.mxu0 %v7468_v54  ;;  %4733 = vmatpush1.bf16.msra.mxu1 %v7470_v13  ;;  %v4754_v13 = vld [vmem:[%s12137_s2] sm:$0xff]  ;;  %s12318_s2 = sld [smem:[#allocation43_spill]] }
 0xff6   : > { %4693 = vmatprep.subr.bf16.mxu0 %v7477_v14  ;;  %4734 = vmatprep.subr.bf16.mxu1 %v7479_v46  ;;  %v4755_v14 = vld [vmem:[%s12138_s18] sm:$0xff]  ;;  %v4773_v46 = vand.u32 31, %v10057_v22  ;;  %s12319_s18 = sld [smem:[#allocation44_spill]] }
 0xff8   : > { %vm10341_vm7 = vcmp.ge.s32.totalorder %v4773_v46, 1  ;;  %vm10352_vm11 = vcmp.lt.s32.totalorder %v4773_v46, 31 }
 0xff9   : > { %4694 = vmatpush1.bf16.msra.mxu0 %v7476_v18  ;;  %4735 = vmatpush1.bf16.msra.mxu1 %v7478_v19  ;;  %v12145_v10 = vsel %vm10352_vm11, 4294967295, %v12144_v10  ;;  %vm10362_vm9 = vmpackc.low %vm12147_vm4, %vm10341_vm7 }
 0xffa   : > { %4695 = vmatprep.subr.bf16.mxu0 %v7485_v17  ;;  %4736 = vmatprep.subr.bf16.mxu1 %v7487_v26  ;;  %vm10406_vm3 = vmpackc.low %vm10341_vm7, %vm10352_vm11  ;;  %vm12164_vm7 = vcmask 1039360  }
 0xffb   : > { %vm10438_vm15 = vmpackc.low %vm10352_vm11, %vm12147_vm4 }
 0xffd   : > { %4696 = vmatpush1.bf16.msra.mxu0 %v7484_v28  ;;  %4737 = vmatpush1.bf16.msra.mxu1 %v7486_v31  ;;  %v12148_v28 = vmov 0  ;;  %v12151_v31 = vmov 0 }
 0xffe   : > { %4697 = vmatprep.subr.bf16.mxu0 %v7493_v32  ;;  %4738 = vmatprep.subr.bf16.mxu1 %v7495_v33  ;;  %v12149_v28 = vsel %vm10362_vm9, 4294967295, %v12148_v28  ;;  %v12152_v31 = vsel %vm10366_vm13, 4294967295, %v12151_v31 }
 0xfff   : > { %12150 = vst [vmem:[#allocation50_spill] sm:$0xff] %v12149_v28 }
0x1001   : > { %4698 = vmatpush1.bf16.msra.mxu0 %v7492_v34  ;;  %4739 = vmatpush1.bf16.msra.mxu1 %v7494_v37  ;;  %v10384_v34 = vadd.s32 256, %v9473_v7 }
0x1002   : > { %4699 = vmatprep.subr.bf16.mxu0 %v7501_v40  ;;  %4740 = vmatprep.subr.bf16.mxu1 %v7503_v39 }
0x1005   : > { %4700 = vmatpush1.bf16.msra.mxu0 %v7500_v52  ;;  %4741 = vmatpush1.bf16.msra.mxu1 %v7502_v53  ;;  %v12158_v53 = vmov 0 }
0x1006   : > { %4701 = vmatprep.subr.bf16.mxu0 %v7509_v56  ;;  %4742 = vmatprep.subr.bf16.mxu1 %v7511_v21  ;;  %v12159_v53 = vsel %vm10406_vm3, 4294967295, %v12158_v53 }
0x1007   : > { %12160 = vst [vmem:[#allocation52_spill] sm:$0xff] %v12159_v53 }
0x1009   : > { %4702 = vmatpush1.bf16.msra.mxu0 %v7508_v30  ;;  %4743 = vmatpush1.bf16.msra.mxu1 %v7510_v57 }
0x100c   : > { %4704 = vmatmul.mubr.bf16.vlgmr.msra.gmra.mrb[36].mxu0 %v10253_v50  ;;  %4745 = vmatmul.mubr.bf16.vlgmr.msra.gmra.mrb[52].mxu1 %v10253_v50 }
0x100d   : > { %5322 = vmatprep.mubr.bf16.mxu0 %v11906_v5  ;;  %5363 = vmatprep.mubr.bf16.mxu1 %v11906_v5 }
0x109f   : > { %v10261_v62 = vpop.f32.mrb[32].mxu0  ;;  %v10263_v48 = vpop.f32.mrb[48].mxu1 }
0x10a0   : > { %v10265_v55 = vpop.f32.mrb[33].mxu0  ;;  %v10267_v27 = vpop.f32.mrb[49].mxu1 }
0x10a1   : > { %v4627_v58 = vpop.f32.mrb[34].mxu0  ;;  %v4668_v59 = vpop.f32.mrb[50].mxu1  ;;  %v8473_v2 = vpack.i.bf16 %v10265_v55, %v10261_v62  ;;  %v8488_v50 = vpack.i.bf16 %v10263_v48, %v10265_v55  ;;  %v8493_v61 = vpack.i.bf16 %v10267_v27, %v10263_v48  ;;  %v8503_v11 = vpack.i.bf16 %v10267_v27, %v10261_v62 }
0x10a2   : > { %v4628_v60 = vpop.f32.mrb[35].mxu0  ;;  %v4669_v43 = vpop.f32.mrb[51].mxu1  ;;  %v12161_v58 = vmov 0  ;;  %v4787_v59 = vand.u32 31, %v10381_v36 }
0x10a3   : > { %8474 = vrot.lane.b32.xlu1 %v8473_v2, %s9120_s8  ;;  %8469 = vrot.lane.b32.xlu0 %v8473_v2, %s9121_s1  ;;  %v12162_v58 = vsel %vm10418_vm5, 4294967295, %v12161_v58  ;;  %v4780_v43 = vand.u32 31, %v10384_v34 }
0x10a4   : > { %12163 = vst [vmem:[#allocation53_spill] sm:$0xff] %v12162_v58  ;;  %vm10447_vm14 = vcmp.ge.s32.totalorder %v4787_v59, 1 }
0x10a7   : > { %8484 = vrot.lane.b32.xlu1 %v8473_v2, %s9098_s28  ;;  %8479 = vrot.lane.b32.xlu0 %v8473_v2, %s9122_s26 }
0x10ab   : > { %8489 = vrot.lane.b32.xlu0 %v8488_v50, %s12070_s3  ;;  %8494 = vrot.lane.b32.xlu1 %v8493_v61, %s9121_s1 }
0x10af   : > { %8499 = vrot.lane.b32.xlu0 %v8493_v61, %s9120_s8  ;;  %8504 = vrot.lane.b32.xlu1 %v8503_v11, %s12070_s3 }
0x10b3   : > { %8509 = vrot.lane.b32.xlu0 %v8488_v50, %s9123_s23  ;;  %8514 = vrot.lane.b32.xlu1 %v8488_v50, %s9124_s5 }
0x10b7   : > { %8519 = vrot.lane.b32.xlu0 %v8493_v61, %s9122_s26  ;;  %8524 = vrot.lane.b32.xlu1 %v8493_v61, %s9098_s28 }
0x10bb   : > { %8529 = vrot.lane.b32.xlu0 %v8503_v11, %s9123_s23  ;;  %8534 = vrot.lane.b32.xlu1 %v8503_v11, %s9124_s5 }
0x10bf   : > { %8539 = vrot.lane.b32.xlu0 %v8473_v2, %s9125_s11  ;;  %8544 = vrot.lane.b32.xlu1 %v8493_v61, %s9125_s11 }
0x10df   : > { %v10293_v45 = vpop.f32.mrb[36].mxu0  ;;  %v10295_v63 = vpop.f32.mrb[52].mxu1 }
0x10e0   : > { %v10297_v1 = vpop.f32.mrb[37].mxu0  ;;  %5190 = vrot.lane.b32.xlu1 %v10293_v45, %s9125_s11  ;;  %5080 = vrot.lane.b32.xlu0 %v10295_v63, %s12070_s3  ;;  %v10303_v47 = vpop.f32.mrb[53].mxu1 }
0x10e1   : > { %v4709_v3 = vpop.f32.mrb[38].mxu0  ;;  %v4750_v4 = vpop.f32.mrb[54].mxu1  ;;  %v8548_v15 = vpack.i.bf16 %v10297_v1, %v10293_v45  ;;  %v8583_v20 = vpack.i.bf16 %v10303_v47, %v10295_v63  ;;  %v8603_v54 = vpack.i.bf16 %v10295_v63, %v10297_v1 }
0x10e2   : > { %v4710_v8 = vpop.f32.mrb[39].mxu0  ;;  %v4751_v9 = vpop.f32.mrb[55].mxu1  ;;  %v12165_v3 = vmov 0 }
0x10e3   : > { %v12166_v3 = vsel %vm10438_vm15, 4294967295, %v12165_v3 }
0x10e4   : > { %5120 = vrot.lane.b32.xlu1 %v10295_v63, %s9123_s23  ;;  %8549 = vrot.lane.b32.xlu0 %v8548_v15, %s12070_s3  ;;  %12167 = vst [vmem:[#allocation54_spill] sm:$0xff] %v12166_v3 }
0x10e8   : > { %8554 = vrot.lane.b32.xlu1 %v8548_v15, %s9121_s1  ;;  %8559 = vrot.lane.b32.xlu0 %v8548_v15, %s9120_s8 }
0x10ec   : > { %8564 = vrot.lane.b32.xlu1 %v8548_v15, %s9123_s23  ;;  %8569 = vrot.lane.b32.xlu0 %v8548_v15, %s9124_s5 }
0x10f0   : > { %8574 = vrot.lane.b32.xlu1 %v8548_v15, %s9122_s26  ;;  %8579 = vrot.lane.b32.xlu0 %v8548_v15, %s9098_s28 }
0x10f4   : > { %5161 = vrot.lane.b32.xlu0 %v10295_v63, %s9124_s5  ;;  %8584 = vrot.lane.b32.xlu1 %v8583_v20, %s9121_s1 }
0x10f8   : > { %8589 = vrot.lane.b32.xlu0 %v8583_v20, %s9120_s8  ;;  %8594 = vrot.lane.b32.xlu1 %v8583_v20, %s9122_s26 }
0x10fc   : > { %8599 = vrot.lane.b32.xlu0 %v8583_v20, %s9098_s28  ;;  %8604 = vrot.lane.b32.xlu1 %v8603_v54, %s9125_s11 }
0x1100   : > { %5082 = vrot.lane.b32.xlu0 %v10303_v47, %s12070_s3  ;;  %5122 = vrot.lane.b32.xlu1 %v10303_v47, %s9123_s23 }
0x1104   : > { %5163 = vrot.lane.b32.xlu0 %v10303_v47, %s9124_s5  ;;  %5196 = vrot.lane.b32.xlu1 %v10303_v47, %s9125_s11 }
0x1108   : > { %5456 = vperm.xlu0 %8156, %v4754_v13   ;;  %5469 = vperm.xlu1 %8157, %v4755_v14   ;;  %v12198_v14 = vmov 0 }
0x1115   : > { %v10339_v16 = vpop.permute.xlu1 %8474  ;;  %v8470_v0 = vpop.permute.xlu0 %8469 }
0x1116   : > { %v8477_v19 = vunpack.i.h.bf16 %v10339_v16  ;;  %v8476_v17 = vunpack.i.l.bf16 %v10339_v16  ;;  %v8472_v26 = vunpack.i.h.bf16 %v8470_v0  ;;  %v8471_v22 = vunpack.i.l.bf16 %v8470_v0 }
0x1118   : > { %v4947_v23 = vsel %vm12146_vm10, %v8476_v17, %v8477_v19  ;;  %v4883_v24 = vsel %vm11888_vm6, %v8471_v22, %v8472_v26  ;;  %v4898_v25 = vsel %vm11888_vm6, 0.0, %v8471_v22  ;;  %vm10454_vm10 = vcmp.ge.s32.totalorder %v4780_v43, 1 }
0x1119   : > { %v7517_v32 = vpack.c.bf16 %v8476_v17, %v4898_v25  ;;  %v10370_v33 = vpop.permute.xlu1 %8484  ;;  %v10372_v38 = vpop.permute.xlu0 %8479  ;;  %v7513_v12 = vpack.c.bf16 %v4947_v23, %v4883_v24 }
0x111a   : > { %v8487_v37 = vunpack.i.h.bf16 %v10370_v33  ;;  %v8486_v40 = vunpack.i.l.bf16 %v10370_v33  ;;  %v8482_v39 = vunpack.i.h.bf16 %v10372_v38  ;;  %v8481_v41 = vunpack.i.l.bf16 %v10372_v38 }
0x111b   : > { %7514 = vmatprep.subr.msk.bf16.mxu0 %vm10362_vm9, %v7513_v12  ;;  %v12192_v38 = vmov 0 }
0x111c   : > { %v5044_v29 = vsel %vm12156_vm2, %v8486_v40, %v8487_v37  ;;  %v5059_v49 = vsel %vm12157_vm1, 0.0, %v8486_v40  ;;  %v4980_v51 = vsel %vm11885_vm12, %v8481_v41, %v8482_v39  ;;  %v4995_v52 = vsel %vm11885_vm12, 0.0, %v8481_v41  ;;  %7518 = vmatpush1.bf16.msk.msra.mxu0 %vm10376_vm0, %v7517_v32  ;;  %vm10464_vm1 = vmpackc.low %vm10366_vm13, %vm12147_vm4 }
0x111d   : > { %v7523_v56 = vpack.c.bf16 %v5059_v49, %v4995_v52  ;;  %v10410_v21 = vpop.permute.xlu0 %8489  ;;  %v10412_v30 = vpop.permute.xlu1 %8494  ;;  %v7520_v57 = vpack.c.bf16 %v5044_v29, %v4980_v51  ;;  %v12173_v42 = vsel %vm10464_vm1, 4294967295, %v12172_v42  ;;  %vm10479_vm2 = vmpackc.low %vm12147_vm4, %vm10447_vm14  ;;  %v12180_v32 = vmov 0 }
0x111e   : > { %v8492_v2 = vunpack.i.h.bf16 %v10410_v21  ;;  %v8491_v60 = vunpack.i.l.bf16 %v10410_v21  ;;  %v8496_v50 = vunpack.i.l.bf16 %v10412_v30  ;;  %v8497_v11 = vunpack.i.h.bf16 %v10412_v30  ;;  %12174 = vst [vmem:[#allocation55_spill] sm:$0xff] %v12173_v42 }
0x111f   : > { %7521 = vmatprep.subr.msk.bf16.mxu0 %vm10406_vm3, %v7520_v57  ;;  %v12186_v57 = vmov 0  ;;  %v12220_v30 = vmov 0 }
0x1120   : > { %v5085_v61 = vsel %vm12164_vm7, %v8491_v60, %v8492_v2  ;;  %7524 = vmatpush1.bf16.msk.msra.mxu0 %vm10418_vm5, %v7523_v56  ;;  %v4884_v46 = vsel %vm11888_vm6, %v8472_v26, %v8496_v50  ;;  %v4885_v16 = vsel %vm11888_vm6, %v8496_v50, %v8497_v11  ;;  %vm12175_vm7 = vcmask 261120  }
0x1121   : > { %v10442_v4 = vpop.permute.xlu0 %8499  ;;  %v10444_v15 = vpop.permute.xlu1 %8504  ;;  %v7526_v8 = vpack.c.bf16 %v5085_v61, %v10265_v55  ;;  %vm12176_vm12 = vmmov %vm12175_vm7  ;;  %vm12177_vm5 = vcmask 1039360   ;;  %v12178_v26 = vmov 0  ;;  %vm11891_vm6 = vcmask 785408  }
0x1122   : > { %v8502_v20 = vunpack.i.h.bf16 %v10442_v4  ;;  %v8501_v54 = vunpack.i.l.bf16 %v10442_v4  ;;  %v8506_v13 = vunpack.i.l.bf16 %v10444_v15  ;;  %v12179_v26 = vsel %vm10479_vm2, 4294967295, %v12178_v26 }
0x1123   : > { %7527 = vmatprep.subr.msk.bf16.mxu0 %vm10438_vm15, %v7526_v8  ;;  %v12183_v56 = vmov 0  ;;  %vm12190_vm15 = vcmask 7168  }
0x1124   : > { %v4948_v0 = vsel %vm12175_vm7, %v8477_v19, %v8501_v54  ;;  %v4949_v44 = vsel %vm12176_vm12, %v8501_v54, %v8502_v20  ;;  %v5084_v17 = vsel %vm12177_vm5, %v8506_v13, %v8491_v60  ;;  %vm10491_vm12 = vmpackc.low %vm12147_vm4, %vm10454_vm10  ;;  %vm12182_vm5 = vcmask 793600  }
0x1125   : > { %v7543_v22 = vpack.c.bf16 %v4948_v0, %v4884_v46  ;;  %v7529_v23 = vpack.c.bf16 %v5084_v17, %v10261_v62  ;;  %v10484_v24 = vpop.permute.xlu0 %8509  ;;  %v10486_v19 = vpop.permute.xlu1 %8514  ;;  %v7540_v25 = vpack.c.bf16 %v4949_v44, %v4885_v16  ;;  %v12181_v32 = vsel %vm10491_vm12, 4294967295, %v12180_v32  ;;  %vm12191_vm3 = vmmov %vm12190_vm15 }
0x1126   : > { %v8512_v12 = vunpack.i.h.bf16 %v10484_v24  ;;  %v8511_v36 = vunpack.i.l.bf16 %v10484_v24  ;;  %v8517_v34 = vunpack.i.h.bf16 %v10486_v19  ;;  %v8516_v40 = vunpack.i.l.bf16 %v10486_v19 }
0x1127   : > { %7530 = vmatpush1.bf16.msk.msra.mxu0 %vm10464_vm1, %v7529_v23  ;;  %7541 = vmatprep.subr.msk.bf16.mxu1 %vm10479_vm2, %v7540_v25  ;;  %vm10515_vm7 = vcmp.lt.s32.totalorder %v4787_v59, 31  ;;  %vm10519_vm1 = vcmp.lt.s32.totalorder %v4780_v43, 31 }
0x1128   : > { %v5126_v41 = vsel %vm12182_vm5, %v8511_v36, %v8512_v12  ;;  %v5167_v29 = vsel %vm11891_vm6, %v8516_v40, %v8517_v34  ;;  %7544 = vmatpush1.bf16.msk.msra.mxu1 %vm10491_vm12, %v7543_v22  ;;  %v12184_v56 = vsel %vm10515_vm7, 4294967295, %v12183_v56  ;;  %v12187_v57 = vsel %vm10519_vm1, 4294967295, %v12186_v57  ;;  %vm10545_vm0 = vmpackc.low %vm10447_vm14, %vm10515_vm7 }
0x1129   : > { %v10511_v49 = vpop.permute.xlu0 %8519  ;;  %v10513_v51 = vpop.permute.xlu1 %8524  ;;  %v7532_v52 = vpack.c.bf16 %v5167_v29, %v5126_v41  ;;  %12185 = vst [vmem:[#allocation56_spill] sm:$0xff] %v12184_v56  ;;  %vm12188_vm5 = vcmask 252928   ;;  %v12193_v38 = vsel %vm10545_vm0, 4294967295, %v12192_v38  ;;  %vm10572_vm14 = vmpackc.low %vm12147_vm4, %vm10345_vm8  ;;  %vm12202_vm8 = vcmask 1043456  }
0x112a   : > { %v8522_v60 = vunpack.i.h.bf16 %v10511_v49  ;;  %v8521_v50 = vunpack.i.l.bf16 %v10511_v49  ;;  %v8527_v61 = vunpack.i.h.bf16 %v10513_v51  ;;  %v8526_v8 = vunpack.i.l.bf16 %v10513_v51  ;;  %vm12189_vm6 = vmmov %vm12188_vm5 }
0x112b   : > { %7533 = vmatprep.subr.msk.bf16.mxu0 %vm10362_vm9, %v7532_v52  ;;  %v12199_v14 = vsel %vm10572_vm14, 4294967295, %v12198_v14 }
0x112c   : > { %v4981_v59 = vsel %vm12188_vm5, %v8482_v39, %v8521_v50  ;;  %v4982_v43 = vsel %vm12189_vm6, %v8521_v50, %v8522_v60  ;;  %v5045_v54 = vsel %vm12190_vm15, %v8487_v37, %v8526_v8  ;;  %v5046_v13 = vsel %vm12191_vm3, %v8526_v8, %v8527_v61  ;;  %vm10557_vm6 = vmpackc.low %vm10454_vm10, %vm10519_vm1  ;;  %12200 = vst [vmem:[#allocation57_spill] sm:$0xff] %v12199_v14 }
0x112d   : > { %v7549_v39 = vpack.c.bf16 %v5045_v54, %v4981_v59  ;;  %v10549_v46 = vpop.permute.xlu0 %8529  ;;  %v10551_v16 = vpop.permute.xlu1 %8534  ;;  %v7546_v33 = vpack.c.bf16 %v5046_v13, %v4982_v43  ;;  %v12194_v37 = vmov 0  ;;  %vm12196_vm3 = vcmask 793600   ;;  %vm12203_vm5 = vmmov %vm12202_vm8  ;;  %v10587_v54 = vld [vmem:[%s12201_s13] sm:$0xf]  ;;  %s12366_s13 = sld [smem:[#allocation45_spill]] }
0x112e   : > { %v12195_v37 = vsel %vm10557_vm6, 4294967295, %v12194_v37  ;;  %v8531_v9 = vunpack.i.l.bf16 %v10549_v46  ;;  %v8536_v0 = vunpack.i.l.bf16 %v10551_v16  ;;  %vm12197_vm15 = vcmask 785408  }
0x112f   : > { %7547 = vmatprep.subr.msk.bf16.mxu1 %vm10545_vm0, %v7546_v33  ;;  %vm11898_vm10 = vcmask 777216   ;;  %v4759_v13 = vadd.s32 640, %v9473_v7  ;;  %v8507_v33 = vunpack.i.h.bf16 %v10444_v15 }
0x1130   : > { %v5125_v44 = vsel %vm12196_vm3, %v8531_v9, %v8511_v36  ;;  %v5166_v17 = vsel %vm12197_vm15, %v8536_v0, %v8516_v40  ;;  %7550 = vmatpush1.bf16.msk.msra.mxu1 %vm10557_vm6, %v7549_v39  ;;  %vm12204_vm3 = vcmask 588800   ;;  %v4758_v39 = vadd.s32 512, %v9473_v7 }
0x1131   : > { %v7535_v22 = vpack.c.bf16 %v5166_v17, %v5125_v44  ;;  %v8540_v23 = vpop.permute.xlu0 %8539  ;;  %v8545_v25 = vpop.permute.xlu1 %8544  ;;  %v4801_v44 = vand.u32 31, %v4759_v13  ;;  %vm12205_vm15 = vcmask 1039360   ;;  %vm12218_vm6 = vcmask 261120  }
0x1132   : > { %v8542_v41 = vunpack.i.h.bf16 %v8540_v23  ;;  %v8541_v29 = vunpack.i.l.bf16 %v8540_v23  ;;  %v8546_v36 = vunpack.i.l.bf16 %v8545_v25  ;;  %v4794_v17 = vand.u32 31, %v4758_v39  ;;  %vm12219_vm0 = vmmov %vm12218_vm6 }
0x1133   : > { %7536 = vmatpush1.bf16.msk.msra.mxu0 %vm10572_vm14, %v7535_v22  ;;  %v5086_v22 = vsel %vm12205_vm15, %v8492_v2, %v8507_v33  ;;  %v12213_v39 = vmov 0 }
0x1134   : > { %v5200_v40 = vsel %vm11898_vm10, %v8542_v41, %v8546_v36  ;;  %v5199_v18 = vsel %vm11898_vm10, %v8541_v29, %v8542_v41  ;;  %vm12216_vm10 = vcmask 269312  }
0x1135   : > { %v5216_v52 = vsel %vm10352_vm11, %v5200_v40, 0.0  ;;  %v5215_v50 = vsel %vm10366_vm13, %v5199_v18, 0.0  ;;  %v7555_v40 = vpack.c.bf16 %v5086_v22, %v10263_v48  ;;  %v12207_v18 = vmov 0  ;;  %vm12217_vm11 = vmmov %vm12216_vm10 }
0x1136   : > { %v5256_v8 = vpack.c.bf16 %v5216_v52, %v5216_v52  ;;  %v5255_v59 = vpack.c.bf16 %v5215_v50, %v5215_v50  ;;  %v8532_v52 = vunpack.i.h.bf16 %v10549_v46  ;;  %v8537_v50 = vunpack.i.h.bf16 %v10551_v16 }
0x1137   : > { %vm12261_vm13 = vcmask 269312  }
0x1138   : > { %7537 = vmatprep.subr.msk.bf16.mxu0 %vm12202_vm8, %v5256_v8  ;;  %v5267_v43 = vsel %vm12203_vm5, %v5255_v59, 0  ;;  %vm12206_vm8 = vmmov %vm12205_vm15  ;;  %vm10622_vm15 = vcmp.ge.s32.totalorder %v4794_v17, 1  ;;  %v8547_v8 = vunpack.i.h.bf16 %v8545_v25 }
0x1139   : > { %5299 = vmatpush1.bf16.msra.mxu0 %v5267_v43  ;;  %vm10614_vm5 = vmpackc.low %vm10515_vm7, %vm12147_vm4 }
0x113a   : > { %v12208_v18 = vsel %vm10614_vm5, 4294967295, %v12207_v18 }
0x113c   : > { %7538 = vmatmul.mubr.msk.bf16.vlgmr.msra.gmra.mrb[40].mxu0 %vm12204_vm3, %v10587_v54  ;;  %vm10618_vm3 = vcmp.ge.s32.totalorder %v4801_v44, 1 }
0x113d   : > { %5404 = vmatprep.mubr.bf16.mxu0 %v11906_v5 }
0x1152   : > { %v10595_v9 = vpop.permute.xlu1 %5190  ;;  %v10597_v0 = vpop.permute.xlu0 %5080 }
0x1156   : > { %v10602_v23 = vpop.permute.xlu1 %5120  ;;  %v10604_v41 = vpop.permute.xlu0 %8549 }
0x1157   : > { %v11914_v29 = vunpack.i.l.bf16 %v10604_v41 }
0x1159   : > { %v5087_v15 = vsel %vm12206_vm8, %v8507_v33, %v11914_v29  ;;  %vm10636_vm8 = vmpackc.low %vm10519_vm1, %vm12147_vm4  ;;  %v12232_v29 = vmov 0 }
0x115a   : > { %v7552_v59 = vpack.c.bf16 %v5087_v15, %v10267_v27  ;;  %v10629_v43 = vpop.permute.xlu1 %8554  ;;  %v10631_v13 = vpop.permute.xlu0 %8559  ;;  %v12214_v39 = vsel %vm10636_vm8, 4294967295, %v12213_v39 }
0x115b   : > { %12215 = vst [vmem:[#allocation58_spill] sm:$0xff] %v12214_v39  ;;  %v11913_v33 = vunpack.i.h.bf16 %v10629_v43  ;;  %v8556_v46 = vunpack.i.l.bf16 %v10629_v43  ;;  %v11910_v16 = vunpack.i.h.bf16 %v10631_v13  ;;  %v8561_v25 = vunpack.i.l.bf16 %v10631_v13 }
0x115c   : > { %7553 = vmatprep.subr.msk.bf16.mxu1 %vm10614_vm5, %v7552_v59  ;;  %vm10663_vm5 = vmpackc.low %vm12147_vm4, %vm10618_vm3 }
0x115d   : > { %v4886_v22 = vsel %vm12216_vm10, %v8497_v11, %v8556_v46  ;;  %v4887_v15 = vsel %vm12217_vm11, %v8556_v46, %v11913_v33  ;;  %v4950_v6 = vsel %vm12218_vm6, %v8502_v20, %v8561_v25  ;;  %v4951_v5 = vsel %vm12219_vm0, %v8561_v25, %v11910_v16  ;;  %7556 = vmatpush1.bf16.msk.msra.mxu1 %vm10636_vm8, %v7555_v40  ;;  %vm10676_vm0 = vmpackc.low %vm12147_vm4, %vm10622_vm15 }
0x115e   : > { %v12221_v30 = vsel %vm10663_vm5, 4294967295, %v12220_v30  ;;  %vm12222_vm11 = vcmask 777216   ;;  %v7566_v4 = vpack.c.bf16 %v4951_v5, %v4887_v15  ;;  %v7569_v59 = vpack.c.bf16 %v4950_v6, %v4886_v22  ;;  %v10669_v20 = vpop.permute.xlu1 %8564  ;;  %v10671_v46 = vpop.permute.xlu0 %8569 }
0x115f   : > { %v5202_v11 = vsel %vm12222_vm11, %v8547_v8, %v10595_v9  ;;  %vm12225_vm6 = vmmov %vm12222_vm11  ;;  %vm12226_vm10 = vcmask 793600   ;;  %vm12227_vm11 = vcmask 785408   ;;  %v8566_v6 = vunpack.i.l.bf16 %v10669_v20 }
0x1160   : > { %v5201_v25 = vsel %vm12225_vm6, %v8546_v36, %v8547_v8  ;;  %v5127_v16 = vsel %vm12226_vm10, %v8512_v12, %v8532_v52  ;;  %v5168_v5 = vsel %vm12227_vm11, %v8517_v34, %v8537_v50  ;;  %v8571_v22 = vunpack.i.l.bf16 %v10671_v46  ;;  %7567 = vmatprep.subr.msk.bf16.mxu0 %vm10663_vm5, %v7566_v4  ;;  %vm12230_vm6 = vmmov %vm12226_vm10 }
0x1161   : > { %v8552_v15 = vunpack.i.h.bf16 %v10604_v41  ;;  %vm10692_vm8 = vcmp.lt.s32.totalorder %v4801_v44, 31  ;;  %v12228_v33 = vmov 0  ;;  %v5218_v24 = vsel %vm10515_vm7, %v5202_v11, 0.0  ;;  %vm12231_vm10 = vmmov %vm12227_vm11  ;;  %7570 = vmatpush1.bf16.msk.msra.mxu0 %vm10676_vm0, %v7569_v59 }
0x1162   : > { %v12229_v33 = vsel %vm10692_vm8, 4294967295, %v12228_v33  ;;  %v5128_v19 = vsel %vm12230_vm6, %v8532_v52, %v8566_v6  ;;  %v5169_v12 = vsel %vm12231_vm10, %v8537_v50, %v8571_v22  ;;  %v5217_v34 = vsel %vm10519_vm1, %v5201_v25, 0.0  ;;  %v10704_v4 = vpop.permute.xlu1 %8574  ;;  %v10706_v44 = vpop.permute.xlu0 %8579 }
0x1163   : > { %v7561_v36 = vpack.c.bf16 %v5168_v5, %v5127_v16  ;;  %v7558_v8 = vpack.c.bf16 %v5169_v12, %v5128_v19  ;;  %vm10708_vm11 = vcmp.lt.s32.totalorder %v4794_v17, 31  ;;  %v10713_v52 = vadd.s32 896, %v9473_v7 }
0x1164   : > { %v12233_v29 = vsel %vm10708_vm11, 4294967295, %v12232_v29  ;;  %v11929_v50 = vunpack.i.h.bf16 %v10704_v4  ;;  %v8576_v11 = vunpack.i.l.bf16 %v10704_v4  ;;  %v8581_v16 = vunpack.i.l.bf16 %v10706_v44 }
0x1165   : > { %v5258_v25 = vpack.c.bf16 %v5218_v24, %v5218_v24  ;;  %vm12234_vm6 = vcmask 1039360   ;;  %7559 = vmatprep.subr.msk.bf16.mxu1 %vm10479_vm2, %v7558_v8  ;;  %v5257_v17 = vpack.c.bf16 %v5217_v34, %v5217_v34  ;;  %v10724_v19 = vadd.s32 768, %v9473_v7 }
0x1166   : > { %v5089_v5 = vsel %vm12234_vm6, %v8552_v15, %v10597_v0  ;;  %vm12235_vm10 = vcmask 252928   ;;  %vm12237_vm1 = vcmask 7168   ;;  %v12238_v56 = vunpack.i.h.bf16 %v10706_v44  ;;  %7562 = vmatpush1.bf16.msk.msra.mxu1 %vm10491_vm12, %v7561_v36 }
0x1167   : > { %v4983_v12 = vsel %vm12235_vm10, %v8522_v60, %v8576_v11  ;;  %vm12236_vm7 = vmmov %vm12235_vm10  ;;  %v5047_v24 = vsel %vm12237_vm1, %v8527_v61, %v8581_v16  ;;  %v12240_v7 = vmov 0  ;;  %v8567_v49 = vunpack.i.h.bf16 %v10669_v20  ;;  %v10749_v61 = vpop.permute.xlu0 %5161 }
0x1168   : > { %v4984_v59 = vsel %vm12236_vm7, %v8576_v11, %v11929_v50  ;;  %vm12239_vm6 = vmmov %vm12237_vm1  ;;  %v7575_v60 = vpack.c.bf16 %v5047_v24, %v4983_v12  ;;  %vm12242_vm1 = vcmask 1043456   ;;  %v12243_v34 = vmov 0 }
0x1169   : > { %v5048_v8 = vsel %vm12239_vm6, %v8581_v16, %v12238_v56  ;;  %vm10744_vm10 = vmpackc.low %vm10618_vm3, %vm10692_vm8  ;;  %7563 = vmatprep.subr.msk.bf16.mxu1 %vm12242_vm1, %v5258_v25  ;;  %v8585_v56 = vpop.permute.xlu1 %8584  ;;  %v4815_v21 = vand.u32 31, %v10713_v52  ;;  %v12245_v36 = vunpack.i.l.bf16 %v10604_v41  ;;  %vm12246_vm3 = vcmask 1039360  }
0x116a   : > { %v12241_v7 = vsel %vm10744_vm10, 4294967295, %v12240_v7  ;;  %v7572_v51 = vpack.c.bf16 %v5048_v8, %v4984_v59  ;;  %vm10756_vm7 = vmpackc.low %vm10622_vm15, %vm10708_vm11  ;;  %v8572_v11 = vunpack.i.h.bf16 %v10671_v46  ;;  %v12247_v59 = vmov 0 }
0x116b   : > { %v12244_v34 = vsel %vm10756_vm7, 4294967295, %v12243_v34  ;;  %v5088_v20 = vsel %vm12246_vm3, %v12245_v36, %v8552_v15  ;;  %vm10768_vm6 = vmpackc.low %vm10692_vm8, %vm12147_vm4  ;;  %v7578_v2 = vpack.c.bf16 %v5089_v5, %v10297_v1  ;;  %v4808_v41 = vand.u32 31, %v10724_v19  ;;  %v8590_v12 = vpop.permute.xlu0 %8589 }
0x116c   : > { %v12248_v59 = vsel %vm10768_vm6, 4294967295, %v12247_v59  ;;  %7573 = vmatprep.subr.msk.bf16.mxu0 %vm10744_vm10, %v7572_v51  ;;  %vm12249_vm15 = vmmov %vm12242_vm1  ;;  %vm12250_vm1 = vcmask 785408   ;;  %v8587_v46 = vunpack.i.h.bf16 %v8585_v56  ;;  %v8586_v16 = vunpack.i.l.bf16 %v8585_v56 }
0x116d   : > { %v5273_v52 = vsel %vm12249_vm15, %v5257_v17, 0  ;;  %v5171_v15 = vsel %vm12250_vm1, %v8572_v11, %v10749_v61  ;;  %7576 = vmatpush1.bf16.msk.msra.mxu0 %vm10756_vm7, %v7575_v60  ;;  %v7581_v25 = vpack.c.bf16 %v5088_v20, %v10293_v45  ;;  %vm12251_vm3 = vcmask 793600   ;;  %v8595_v17 = vpop.permute.xlu1 %8594  ;;  %vm10788_vm15 = vmpackc.low %vm10708_vm11, %vm12147_vm4 }
0x116e   : > { %5340 = vmatpush1.bf16.msra.mxu1 %v5273_v52  ;;  %v5129_v5 = vsel %vm12251_vm3, %v8566_v6, %v8567_v49  ;;  %7579 = vmatprep.subr.msk.bf16.mxu0 %vm10768_vm6, %v7578_v2  ;;  %v12252_v19 = vmov 0  ;;  %vm10792_vm1 = vcmp.ge.s32.totalorder %v4815_v21, 1  ;;  %vm12256_vm7 = vcmask 785408  }
0x116f   : > { %v12253_v19 = vsel %vm10788_vm15, 4294967295, %v12252_v19  ;;  %v5170_v8 = vsel %vm12256_vm7, %v8571_v22, %v8572_v11  ;;  %v5130_v6 = vsel %vm12251_vm3, %v8567_v49, %v10602_v23  ;;  %v8592_v51 = vunpack.i.h.bf16 %v8590_v12  ;;  %vm12262_vm7 = vmmov %vm12261_vm13 }
0x1170   : > { %v8591_v60 = vunpack.i.l.bf16 %v8590_v12  ;;  %v7584_v56 = vpack.c.bf16 %v5171_v15, %v5130_v6  ;;  %v8597_v36 = vunpack.i.h.bf16 %v8595_v17  ;;  %v8596_v20 = vunpack.i.l.bf16 %v8595_v17 }
0x1171   : > { %vm12257_vm6 = vcmask 588800   ;;  %vm10801_vm10 = vcmp.ge.s32.totalorder %v4808_v41, 1  ;;  %v12260_v52 = vunpack.i.h.bf16 %v10629_v43  ;;  %v4889_v22 = vsel %vm12262_vm7, %v8586_v16, %v8587_v46  ;;  %7582 = vmatpush1.bf16.msk.msra.mxu0 %vm10788_vm15, %v7581_v25  ;;  %v8605_v46 = vpop.permute.xlu1 %8604 }
0x1172   : > { %7564 = vmatmul.mubr.msk.bf16.vlgmr.msra.gmra.mrb[56].mxu1 %vm12257_vm6, %v10587_v54  ;;  %v12263_v49 = vunpack.i.h.bf16 %v10631_v13  ;;  %vm12264_vm3 = vcmask 261120   ;;  %vm10818_vm6 = vmpackc.low %vm12147_vm4, %vm10792_vm1  ;;  %v7587_v43 = vpack.c.bf16 %v5170_v8, %v5129_v5  ;;  %7585 = vmatprep.subr.msk.bf16.mxu0 %vm10663_vm5, %v7584_v56  ;;  %v8600_v13 = vpop.permute.xlu0 %8599  ;;  %v12271_v25 = vmov 0  }
0x1173   : > { %v4888_v50 = vsel %vm12261_vm13, %v12260_v52, %v8586_v16  ;;  %vm12265_vm14 = vmmov %vm12264_vm3  ;;  %vm10824_vm13 = vcmp.lt.s32.totalorder %v4815_v21, 31  ;;  %v12268_v16 = vmov 0  ;;  %5445 = vmatprep.mubr.bf16.mxu1 %v12271_v25  ;;  %v8607_v52 = vunpack.i.h.bf16 %v8605_v46 }
0x1174   : > { %v4952_v11 = vsel %vm12264_vm3, %v12263_v49, %v8591_v60  ;;  %v4953_v15 = vsel %vm12265_vm14, %v8591_v60, %v8592_v51  ;;  %v12269_v16 = vsel %vm10824_vm13, 4294967295, %v12268_v16  ;;  %v8602_v51 = vunpack.i.h.bf16 %v8600_v13  ;;  %vm10832_vm14 = vmpackc.low %vm12147_vm4, %vm10801_vm10 }
0x1175   : > { %v7592_v17 = vpack.c.bf16 %v4953_v15, %v4889_v22  ;;  %v7595_v6 = vpack.c.bf16 %v4952_v11, %v4888_v50  ;;  %12270 = vst [vmem:[#allocation59_spill] sm:$0xff] %v12269_v16  ;;  %v8601_v60 = vunpack.i.l.bf16 %v8600_v13  ;;  %v8606_v49 = vunpack.i.l.bf16 %v8605_v46  ;;  %7588 = vmatpush1.bf16.msk.msra.mxu0 %vm10676_vm0, %v7587_v43 }
0x1176   : > { %v12274_v5 = vunpack.i.h.bf16 %v10704_v4  ;;  %vm12275_vm7 = vcmask 252928   ;;  %vm10842_vm15 = vcmp.lt.s32.totalorder %v4808_v41, 31  ;;  %v12277_v56 = vmov 0 }
0x1177   : > { %vm12276_vm3 = vmmov %vm12275_vm7  ;;  %7593 = vmatprep.subr.msk.bf16.mxu1 %vm10818_vm6, %v7592_v17  ;;  %v12278_v56 = vsel %vm10842_vm15, 4294967295, %v12277_v56  ;;  %v12279_v22 = vunpack.i.h.bf16 %v10706_v44  ;;  %vm12280_vm5 = vcmask 7168   ;;  %vm12282_vm2 = vcmask 777216   ;;  %v5123_v17 = vpop.permute.xlu1 %5122 }
0x1178   : > { %v4985_v21 = vsel %vm12275_vm7, %v12274_v5, %v8596_v20  ;;  %v4986_v8 = vsel %vm12276_vm3, %v8596_v20, %v8597_v36  ;;  %vm12281_vm12 = vmmov %vm12280_vm5  ;;  %v5203_v4 = vsel %vm12282_vm2, %v10595_v9, %v8606_v49  ;;  %7596 = vmatpush1.bf16.msk.msra.mxu1 %vm10832_vm14, %v7595_v6  ;;  %v5083_v9 = vpop.permute.xlu0 %5082  ;;  %v12289_v5 = vmov 0 }
0x1179   : > { %v5049_v11 = vsel %vm12280_vm5, %v12279_v22, %v8601_v60  ;;  %v5050_v15 = vsel %vm12281_vm12, %v8601_v60, %v8602_v51  ;;  %vm12283_vm9 = vmmov %vm12282_vm2  ;;  %v5219_v43 = vsel %vm10708_vm11, %v5203_v4, 0.0  ;;  %vm12293_vm3 = vcmask 1043456  }
0x117a   : > { %v5204_v13 = vsel %vm12283_vm9, %v8606_v49, %v8607_v52  ;;  %vm10859_vm7 = vmpackc.low %vm10792_vm1, %vm10824_vm13  ;;  %v7598_v44 = vpack.c.bf16 %v5050_v15, %v4986_v8  ;;  %v7601_v36 = vpack.c.bf16 %v5049_v11, %v4985_v21  ;;  %vm12286_vm9 = vcmask 1039360  }
0x117b   : > { %v5220_v20 = vsel %vm10692_vm8, %v5204_v13, 0.0  ;;  %v5099_v46 = vsel %vm12286_vm9, %v5083_v9, 0.0  ;;  %vm10874_vm2 = vmpackc.low %vm10801_vm10, %vm10842_vm15  ;;  %v5259_v49 = vpack.c.bf16 %v5219_v43, %v5219_v43  ;;  %vm12292_vm10 = vcmask 793600   ;;  %v5197_v22 = vpop.permute.xlu1 %5196 }
0x117c   : > { %v7604_v60 = vpack.c.bf16 %v5099_v46, %v10303_v47  ;;  %7599 = vmatprep.subr.msk.bf16.mxu1 %vm10859_vm7, %v7598_v44  ;;  %v5260_v6 = vpack.c.bf16 %v5220_v20, %v5220_v20  ;;  %vm10884_vm12 = vmpackc.low %vm10824_vm13, %vm12147_vm4  ;;  %v5140_v21 = vsel %vm12292_vm10, %v5123_v17, 0.0  ;;  %v5164_v8 = vpop.permute.xlu0 %5163  ;;  %v5492_v15 = vpack.c.bf16 %v10265_v55, %v10265_v55 }
0x117d   : > { %v12290_v5 = vsel %vm10884_vm12, 4294967295, %v12289_v5  ;;  %vm12291_vm5 = vmmov %vm12286_vm9  ;;  %7602 = vmatpush1.bf16.msk.msra.mxu1 %vm10874_vm2, %v7601_v36  ;;  %v5491_v4 = vpack.c.bf16 %v10261_v62, %v10261_v62  ;;  %v7610_v13 = vpack.c.bf16 %v5164_v8, %v5140_v21  ;;  %vm12295_vm11 = vcmask 777216  }
0x117e   : > { %v5090_v2 = vsel %vm12291_vm5, %v10597_v0, %v5083_v9  ;;  %7589 = vmatprep.subr.msk.bf16.mxu0 %vm12293_vm3, %v5260_v6  ;;  %vm12294_vm9 = vmmov %vm12293_vm3  ;;  %v5205_v0 = vsel %vm12295_vm11, %v8607_v52, %v5197_v22  ;;  %7605 = vmatprep.subr.msk.bf16.mxu1 %vm10884_vm12, %v7604_v60  ;;  %v12297_v36 = vmov 0  ;;  %v12300_v62 = vmov 0 }
0x117f   : > { %v5279_v11 = vsel %vm12294_vm9, %v5259_v49, 0  ;;  %vm12296_vm5 = vmmov %vm12295_vm11  ;;  %v7607_v55 = vpack.c.bf16 %v5090_v2, %v10295_v63  ;;  %vm12299_vm11 = vcmask 785408   ;;  %v5221_v20 = vsel %vm10842_vm15, %v5205_v0, 0.0 }
0x1180   : > { %v5214_v44 = vsel %vm12296_vm5, %v5197_v22, 0.0  ;;  %5381 = vmatpush1.bf16.msra.mxu0 %v5279_v11  ;;  %vm10906_vm10 = vmpackc.low %vm10842_vm15, %vm12147_vm4  ;;  %vm12303_vm4 = vcmask 588800   ;;  %v5494_v43 = vpack.c.bf16 %v10267_v27, %v10267_v27  ;;  %v5261_v60 = vpack.c.bf16 %v5221_v20, %v5221_v20 }
0x1181   : > { %v12298_v36 = vsel %vm10906_vm10, 4294967295, %v12297_v36  ;;  %7617 = vmatprep.subr.msk.bf16.mxu0 %vm12293_vm3, %v5492_v15  ;;  %vm10915_vm9 = vmpackc.low %vm12299_vm11, %vm10792_vm1  ;;  %v5222_v9 = vsel %vm10824_vm13, %v5214_v44, 0.0  ;;  %7608 = vmatpush1.bf16.msk.msra.mxu1 %vm10906_vm10, %v7607_v55  ;;  %v5493_v27 = vpack.c.bf16 %v10263_v48, %v10263_v48  ;;  %v5496_v49 = vpack.c.bf16 %v10297_v1, %v10297_v1 }
0x1182   : > { %v12301_v62 = vsel %vm10915_vm9, 4294967295, %v12300_v62  ;;  %vm12302_vm5 = vmmov %vm12299_vm11  ;;  %7611 = vmatprep.subr.msk.bf16.mxu1 %vm10915_vm9, %v7610_v13  ;;  %v5262_v6 = vpack.c.bf16 %v5222_v9, %v5222_v9  ;;  %v5495_v2 = vpack.c.bf16 %v10293_v45, %v10293_v45  ;;  %v5497_v45 = vpack.c.bf16 %v10295_v63, %v10295_v63 }
0x1183   : > { %v5172_v52 = vsel %vm12302_vm5, %v10749_v61, %v5164_v8  ;;  %7590 = vmatmul.mubr.msk.bf16.vlgmr.msra.gmra.mrb[44].mxu0 %vm12303_vm4, %v10587_v54  ;;  %vm12305_vm1 = vmmov %vm12293_vm3  ;;  %vm12306_vm3 = vcmask 793600   ;;  %v5498_v8 = vpack.c.bf16 %v10303_v47, %v10303_v47  ;;  %vm12335_vm15 = vnez %v12159_v53 }
0x1184   : > { %v5503_v24 = vsel %vm12305_vm1, %v5491_v4, 0  ;;  %v5131_v61 = vsel %vm12306_vm3, %v10602_v23, %v5123_v17  ;;  %vm12307_vm11 = vmmov %vm12305_vm1  ;;  %5558 = vmatprep.mubr.bf16.mxu0 %v12271_v25  ;;  %v5488_v23 = vld [vmem:[%s12304_s10] sm:$0xf]  ;;  %vm12336_vm9 = vnez %v12162_v58 }
0x1185   : > { %5527 = vmatpush1.bf16.msra.mxu0 %v5503_v24  ;;  %v7613_v46 = vpack.c.bf16 %v5172_v52, %v5131_v61  ;;  %vm12308_vm5 = vmmov %vm12305_vm1 }
0x1186   : > { %7619 = vmatprep.subr.msk.bf16.mxu0 %vm12307_vm11, %v5494_v43  ;;  %vm12309_vm4 = vmmov %vm12305_vm1  ;;  %vm12310_vm1 = vcmask 64512  }
0x1187   : > { %7614 = vmatpush1.bf16.msk.msra.mxu1 %vm10832_vm14, %v7613_v46  ;;  %v5285_v17 = vsel %vm12309_vm4, %v5261_v60, 0  ;;  %vm12311_vm3 = vmmov %vm12309_vm4  ;;  %vm12314_vm4 = vcmask 588800   ;;  %v10969_v47 = vpop.permute.xlu0 %5456  ;;  %v10972_v11 = vpop.permute.xlu1 %5469 }
0x1188   : > { %7615 = vmatprep.subr.msk.bf16.mxu1 %vm12308_vm5, %v5262_v6  ;;  %v5509_v21 = vsel %vm12311_vm3, %v5493_v27, 0  ;;  %vm12312_vm11 = vmmov %vm12311_vm3  ;;  %v5521_v1 = vsel %vm12311_vm3, %v5497_v45, 0 }
0x1189   : > { %vm12313_vm5 = vmmov %vm12311_vm3 }
0x118a   : > { %vm12315_vm13 = vmmov %vm12311_vm3  ;;  %vm12329_vm3 = vnez %v12149_v28 }
0x118b   : > { %5422 = vmatpush1.bf16.msra.mxu1 %v5285_v17  ;;  %7618 = vmatmul.mubr.msk.bf16.vlgmr.msra.gmra.mrb[48].mxu0 %vm12310_vm1, %v5488_v23  ;;  %v5515_v48 = vsel %vm12315_vm13, %v5495_v2, 0  ;;  %vm12326_vm13 = vcmask 261120  }
0x118c   : > { %5568 = vmatpush1.bf16.msra.mxu0 %v5509_v21  ;;  %7621 = vmatprep.subr.msk.bf16.mxu1 %vm12312_vm11, %v5496_v49  ;;  %vm12316_vm11 = vmmov %vm12310_vm1 }
0x118d   : > { %7623 = vmatprep.subr.msk.bf16.mxu0 %vm12313_vm5, %v5498_v8  ;;  %5599 = vmatprep.mubr.bf16.mxu0 %v12271_v25  ;;  %vm12317_vm5 = vmmov %vm12310_vm1 }
0x118e   : > { %7616 = vmatmul.mubr.msk.bf16.vlgmr.msra.gmra.mrb[60].mxu1 %vm12314_vm4, %v10587_v54  ;;  %vm12327_vm4 = vcmask 269312  }
0x118f   : > { %5609 = vmatpush1.bf16.msra.mxu1 %v5515_v48  ;;  %5640 = vmatprep.mubr.bf16.mxu1 %v12271_v25 }
0x1193   : > { %7620 = vmatmul.mubr.msk.bf16.vlgmr.msra.gmra.mrb[52].mxu0 %vm12310_vm1, %v5488_v23  ;;  %vm12328_vm1 = vmmov %vm12327_vm4 }
0x1194   : > { %5650 = vmatpush1.bf16.msra.mxu0 %v5521_v1  ;;  %5681 = vmatprep.mubr.bf16.mxu0 %v12271_v25 }
0x1196   : > { %7622 = vmatmul.mubr.msk.bf16.vlgmr.msra.gmra.mrb[64].mxu1 %vm12316_vm11, %v5488_v23  ;;  %vm12330_vm11 = vcmask 7168  }
0x1197   : > { %6130 = vmatprep.mubr.bf16.mxu1 %v12271_v25 }
0x119b   : > { %7624 = vmatmul.mubr.msk.bf16.vlgmr.msra.gmra.mrb[56].mxu0 %vm12317_vm5, %v5488_v23  ;;  %vm12331_vm5 = vmmov %vm12330_vm11 }
0x119c   : > { %6171 = vmatprep.mubr.bf16.mxu0 %v12271_v25 }
0x120f   : > { %v5324_v63 = vpop.f32.mrb[40].mxu0 }
0x1210   : > { %v5459_v54 = vmul.f32 %v10969_v47, %v5324_v63  ;;  %v5326_v22 = vpop.f32.mrb[41].mxu0 }
0x1211   : > { %v5460_v15 = vmul.f32 %v10969_v47, %v5326_v22  ;;  %v5328_v4 = vpop.f32.mrb[42].mxu0 }
0x1212   : > { %v5472_v13 = vadd.f32 %v10972_v11, %v5459_v54  ;;  %v5329_v0 = vpop.f32.mrb[43].mxu0 }
0x1213   : > { %v5473_v44 = vadd.f32 %v10972_v11, %v5460_v15 }
0x1214   : > { %v10977_v55 = vmax.f32 %v5472_v13, 0.0 }
0x1215   : > { %v10979_v52 = vmax.f32 %v5473_v44, 0.0 }
0x1217   : > { %v8613_v20 = vpack.i.bf16 %v10979_v52, %v10977_v55 }
0x1219   : > { %8614 = vrot.lane.b32.xlu1 %v8613_v20, %s9120_s8  ;;  %8609 = vrot.lane.b32.xlu0 %v8613_v20, %s9121_s1 }
0x121d   : > { %8624 = vrot.lane.b32.xlu1 %v8613_v20, %s9098_s28  ;;  %8619 = vrot.lane.b32.xlu0 %v8613_v20, %s9122_s26 }
0x1221   : > { %8629 = vrot.lane.b32.xlu0 %v8613_v20, %s9125_s11 }
0x1245   : > { %v5365_v9 = vpop.f32.mrb[56].mxu1 }
0x1246   : > { %v5461_v24 = vmul.f32 %v10969_v47, %v5365_v9  ;;  %v5367_v43 = vpop.f32.mrb[57].mxu1 }
0x1247   : > { %v5462_v61 = vmul.f32 %v10969_v47, %v5367_v43  ;;  %v5369_v46 = vpop.f32.mrb[58].mxu1 }
0x1248   : > { %v5474_v60 = vadd.f32 %v10972_v11, %v5461_v24  ;;  %v5370_v6 = vpop.f32.mrb[59].mxu1 }
0x1249   : > { %v5475_v27 = vadd.f32 %v10972_v11, %v5462_v61 }
0x124a   : > { %v10992_v23 = vmax.f32 %v5474_v60, 0.0 }
0x124b   : > { %v10994_v17 = vmax.f32 %v5475_v27, 0.0 }
0x124c   : > { %v8643_v49 = vpack.i.bf16 %v10992_v23, %v10979_v52 }
0x124d   : > { %v8648_v2 = vpack.i.bf16 %v10994_v17, %v10977_v55  ;;  %v8653_v45 = vpack.i.bf16 %v10994_v17, %v10992_v23 }
0x124e   : > { %8644 = vrot.lane.b32.xlu1 %v8643_v49, %s9124_s5  ;;  %8634 = vrot.lane.b32.xlu0 %v8643_v49, %s12070_s3 }
0x1252   : > { %8639 = vrot.lane.b32.xlu0 %v8643_v49, %s9123_s23  ;;  %8649 = vrot.lane.b32.xlu1 %v8648_v2, %s12070_s3 }
0x1256   : > { %v5406_v21 = vpop.f32.mrb[44].mxu0  ;;  %8654 = vrot.lane.b32.xlu0 %v8653_v45, %s9121_s1  ;;  %8659 = vrot.lane.b32.xlu1 %v8653_v45, %s9120_s8 }
0x1257   : > { %v5463_v8 = vmul.f32 %v10969_v47, %v5406_v21  ;;  %v5408_v48 = vpop.f32.mrb[45].mxu0 }
0x1258   : > { %v5464_v1 = vmul.f32 %v10969_v47, %v5408_v48  ;;  %v5410_v63 = vpop.f32.mrb[46].mxu0 }
0x1259   : > { %v5411_v54 = vpop.f32.mrb[47].mxu0  ;;  %v5476_v22 = vadd.f32 %v10972_v11, %v5463_v8  ;;  %v5489_v63 = vld [vmem:[%s12318_s2] sm:$0xff] }
0x125a   : > { %v5477_v15 = vadd.f32 %v10972_v11, %v5464_v1  ;;  %8664 = vrot.lane.b32.xlu0 %v8648_v2, %s9123_s23  ;;  %8669 = vrot.lane.b32.xlu1 %v8648_v2, %s9124_s5 }
0x125b   : > { %v11014_v4 = vmax.f32 %v5476_v22, 0.0 }
0x125c   : > { %v11016_v13 = vmax.f32 %v5477_v15, 0.0 }
0x125e   : > { %8674 = vrot.lane.b32.xlu0 %v8653_v45, %s9122_s26  ;;  %8679 = vrot.lane.b32.xlu1 %v8653_v45, %s9098_s28  ;;  %v8688_v20 = vpack.i.bf16 %v11016_v13, %v11014_v4  ;;  %v11054_v49 = vpop.f32.mrb[48].mxu0 }
0x125f   : > { %v11056_v2 = vpop.f32.mrb[49].mxu0 }
0x1260   : > { %v5564_v21 = vpop.f32.mrb[50].mxu0 }
0x1261   : > { %v5447_v0 = vpop.f32.mrb[60].mxu1  ;;  %v5565_v8 = vpop.f32.mrb[51].mxu0 }
0x1262   : > { %v5449_v44 = vpop.f32.mrb[61].mxu1  ;;  %8689 = vrot.lane.b32.xlu0 %v8688_v20, %s12070_s3  ;;  %8684 = vrot.lane.b32.xlu1 %v8653_v45, %s9125_s11  ;;  %v5465_v43 = vmul.f32 %v10969_v47, %v5447_v0 }
0x1263   : > { %v5451_v9 = vpop.f32.mrb[62].mxu1  ;;  %v5466_v46 = vmul.f32 %v10969_v47, %v5449_v44 }
0x1264   : > { %v5452_v24 = vpop.f32.mrb[63].mxu1  ;;  %v5478_v61 = vadd.f32 %v10972_v11, %v5465_v43  ;;  %v5717_v43 = vld [vmem:[%s9371_s6] sm:$0xff] }
0x1265   : > { %v5479_v6 = vadd.f32 %v10972_v11, %v5466_v46  ;;  %v5490_v24 = vld [vmem:[%s12319_s18] sm:$0xff] }
0x1266   : > { %8699 = vrot.lane.b32.xlu0 %v8688_v20, %s9120_s8  ;;  %5999 = vrot.lane.b32.xlu1 %v11014_v4, %s9125_s11  ;;  %v11034_v60 = vmax.f32 %v5478_v61, 0.0  ;;  %v11061_v48 = vpop.f32.mrb[52].mxu0 }
0x1267   : > { %v11040_v27 = vmax.f32 %v5479_v6, 0.0  ;;  %12320 = vst [vmem:[#allocation60_spill] sm:$0xff] %v11061_v48  ;;  %v11063_v45 = vpop.f32.mrb[53].mxu0  ;;  %v5718_v6 = vld [vmem:[%s9376_s27] sm:$0xff] }
0x1268   : > { %v8738_v11 = vpack.i.bf16 %v11034_v60, %v11016_v13  ;;  %12321 = vst [vmem:[#allocation61_spill] sm:$0xff] %v11063_v45  ;;  %v5605_v1 = vpop.f32.mrb[54].mxu0 }
0x1269   : > { %v8728_v47 = vpack.i.bf16 %v11040_v27, %v11034_v60  ;;  %v5606_v54 = vpop.f32.mrb[55].mxu0  ;;  %v11070_v22 = vpop.f32.mrb[64].mxu1 }
0x126a   : > { %8709 = vrot.lane.b32.xlu0 %v8688_v20, %s9124_s5  ;;  %8694 = vrot.lane.b32.xlu1 %v8688_v20, %s9121_s1  ;;  %12322 = vst [vmem:[#allocation62_spill] sm:$0xff] %v11070_v22  ;;  %v11076_v44 = vpop.f32.mrb[65].mxu1 }
0x126b   : > { %12325 = vst [vmem:[#allocation65_spill] sm:$0xff] %v11076_v44 }
0x126e   : > { %8719 = vrot.lane.b32.xlu0 %v8688_v20, %s9098_s28  ;;  %8704 = vrot.lane.b32.xlu1 %v8688_v20, %s9123_s23  ;;  %v11072_v15 = vpop.f32.mrb[56].mxu0 }
0x126f   : > { %12323 = vst [vmem:[#allocation63_spill] sm:$0xff] %v11072_v15  ;;  %v11074_v0 = vpop.f32.mrb[57].mxu0 }
0x1270   : > { %12324 = vst [vmem:[#allocation64_spill] sm:$0xff] %v11074_v0  ;;  %v5687_v9 = vpop.f32.mrb[58].mxu0 }
0x1271   : > { %v5688_v46 = vpop.f32.mrb[59].mxu0 }
0x1272   : > { %8714 = vrot.lane.b32.xlu1 %v8688_v20, %s9122_s26  ;;  %5891 = vrot.lane.b32.xlu0 %v11034_v60, %s12070_s3  ;;  %v5646_v20 = vpop.f32.mrb[66].mxu1 }
0x1273   : > { %v5647_v61 = vpop.f32.mrb[67].mxu1 }
0x1276   : > { %5931 = vrot.lane.b32.xlu1 %v11034_v60, %s9123_s23  ;;  %5971 = vrot.lane.b32.xlu0 %v11034_v60, %s9124_s5 }
0x127a   : > { %8729 = vrot.lane.b32.xlu0 %v8728_v47, %s9120_s8  ;;  %8724 = vrot.lane.b32.xlu1 %v8728_v47, %s9121_s1 }
0x127e   : > { %8744 = vrot.lane.b32.xlu0 %v8728_v47, %s9098_s28  ;;  %8734 = vrot.lane.b32.xlu1 %v8728_v47, %s9122_s26 }
0x1282   : > { %5893 = vrot.lane.b32.xlu0 %v11040_v27, %s12070_s3  ;;  %8739 = vrot.lane.b32.xlu1 %v8738_v11, %s9125_s11 }
0x1286   : > { %5973 = vrot.lane.b32.xlu0 %v11040_v27, %s9124_s5  ;;  %5933 = vrot.lane.b32.xlu1 %v11040_v27, %s9123_s23 }
0x128a   : > { %5692 = vperm.xlu0 %8156, %v5489_v63   ;;  %6005 = vrot.lane.b32.xlu1 %v11040_v27, %s9125_s11 }
0x128b   : > { %v8615_v47 = vpop.permute.xlu1 %8614  ;;  %v8610_v11 = vpop.permute.xlu0 %8609 }
0x128c   : > { %v8617_v21 = vunpack.i.h.bf16 %v8615_v47  ;;  %v8616_v8 = vunpack.i.l.bf16 %v8615_v47  ;;  %v8612_v1 = vunpack.i.h.bf16 %v8610_v11  ;;  %v8611_v54 = vunpack.i.l.bf16 %v8610_v11 }
0x128e   : > { %5705 = vperm.xlu0 %8156, %v5490_v24   ;;  %6264 = vperm.xlu1 %8157, %v5717_v43   ;;  %v5783_v63 = vsel %vm12326_vm13, %v8616_v8, %v8617_v21  ;;  %v5743_v0 = vsel %vm12327_vm4, %v8611_v54, %v8612_v1  ;;  %v5758_v20 = vsel %vm12328_vm1, 0.0, %v8611_v54  ;;  %vm12332_vm13 = vcmask 252928  }
0x128f   : > { %v7626_v9 = vpack.c.bf16 %v5783_v63, %v5743_v0  ;;  %v7630_v15 = vpack.c.bf16 %v8616_v8, %v5758_v20  ;;  %v11086_v61 = vpop.permute.xlu1 %8624  ;;  %v11088_v24 = vpop.permute.xlu0 %8619  ;;  %vm12333_vm4 = vmmov %vm12332_vm13  ;;  %vm12334_vm1 = vnez %v12154_v35 }
0x1290   : > { %v11950_v43 = vunpack.i.h.bf16 %v11086_v61  ;;  %v8626_v46 = vunpack.i.l.bf16 %v11086_v61  ;;  %v11951_v47 = vunpack.i.h.bf16 %v11088_v24 }
0x1291   : > { %7627 = vmatprep.subr.msk.bf16.mxu1 %vm12329_vm3, %v7626_v9 }
0x1292   : > { %6277 = vperm.xlu1 %8157, %v5718_v6   ;;  %v8621_v6 = vunpack.i.l.bf16 %v11088_v24  ;;  %v5855_v0 = vsel %vm12330_vm11, %v8626_v46, %v11950_v43  ;;  %v5870_v11 = vsel %vm12331_vm5, 0.0, %v8626_v46  ;;  %7631 = vmatpush1.bf16.msk.msra.mxu1 %vm12334_vm1, %v7630_v15  ;;  %vm12337_vm11 = vcmask 1039360  }
0x1293   : > { %v11110_v9 = vpop.permute.xlu0 %8629  ;;  %vm12338_vm5 = vnez %v12166_v3 }
0x1294   : > { %v5815_v8 = vsel %vm12332_vm13, %v8621_v6, %v11951_v47  ;;  %v5830_v54 = vsel %vm12333_vm4, 0.0, %v8621_v6  ;;  %vm12339_vm13 = vcmask 785408   ;;  %vm12340_vm4 = vcmask 793600  }
0x1295   : > { %v7633_v63 = vpack.c.bf16 %v5855_v0, %v5815_v8  ;;  %v7636_v20 = vpack.c.bf16 %v5870_v11, %v5830_v54 }
0x1297   : > { %7634 = vmatprep.subr.msk.bf16.mxu1 %vm12335_vm15, %v7633_v63  ;;  %vm12356_vm15 = vcmask 7168  }
0x1298   : > { %7637 = vmatpush1.bf16.msk.msra.mxu1 %vm12336_vm9, %v7636_v20  ;;  %vm12357_vm1 = vmmov %vm12356_vm15 }
0x12c0   : > { %v11112_v46 = vpop.permute.xlu1 %8644  ;;  %v11114_v43 = vpop.permute.xlu0 %8634 }
0x12c1   : > { %v11955_v47 = vunpack.i.h.bf16 %v11114_v43  ;;  %v8636_v6 = vunpack.i.l.bf16 %v11114_v43  ;;  %v11957_v15 = vunpack.i.h.bf16 %v11112_v46  ;;  %v8646_v0 = vunpack.i.l.bf16 %v11112_v46 }
0x12c3   : > { %v5896_v11 = vsel %vm12337_vm11, %v8636_v6, %v11955_v47  ;;  %v5976_v35 = vsel %vm12339_vm13, %v8646_v0, %v11957_v15  ;;  %vm12341_vm13 = vnez %v12173_v42 }
0x12c4   : > { %v7639_v8 = vpack.c.bf16 %v5896_v11, %v10979_v52  ;;  %v11124_v54 = vpop.permute.xlu0 %8639  ;;  %v8650_v63 = vpop.permute.xlu1 %8649 }
0x12c5   : > { %v11958_v20 = vunpack.i.h.bf16 %v11124_v54  ;;  %v8641_v58 = vunpack.i.l.bf16 %v11124_v54  ;;  %v8651_v53 = vunpack.i.l.bf16 %v8650_v63 }
0x12c6   : > { %7640 = vmatprep.subr.msk.bf16.mxu1 %vm12338_vm5, %v7639_v8  ;;  %vm12344_vm5 = vcmask 261120  }
0x12c7   : > { %v5936_v47 = vsel %vm12340_vm4, %v8641_v58, %v11958_v20  ;;  %v5895_v52 = vsel %vm12337_vm11, %v8651_v53, %v8636_v6  ;;  %vm12342_vm4 = vcmask 269312   ;;  %vm12345_vm9 = vmmov %vm12344_vm5  ;;  %v8632_v6 = vunpack.i.h.bf16 %v11110_v9 }
0x12c8   : > { %v7645_v11 = vpack.c.bf16 %v5976_v35, %v5936_v47  ;;  %v7642_v44 = vpack.c.bf16 %v5895_v52, %v10977_v55  ;;  %v11138_v22 = vpop.permute.xlu0 %8654  ;;  %v11140_v45 = vpop.permute.xlu1 %8659  ;;  %vm12343_vm11 = vmmov %vm12342_vm4  ;;  %v8631_v52 = vunpack.i.l.bf16 %v11110_v9 }
0x12c9   : > { %v11960_v3 = vunpack.i.h.bf16 %v11138_v22  ;;  %v8656_v8 = vunpack.i.l.bf16 %v11138_v22  ;;  %v11961_v48 = vunpack.i.h.bf16 %v11140_v45  ;;  %v8661_v15 = vunpack.i.l.bf16 %v11140_v45 }
0x12ca   : > { %7643 = vmatpush1.bf16.msk.msra.mxu1 %vm12341_vm13, %v7642_v44  ;;  %vm12350_vm13 = vcmask 777216  }
0x12cb   : > { %v5744_v53 = vsel %vm12342_vm4, %v8612_v1, %v8656_v8  ;;  %v5745_v35 = vsel %vm12343_vm11, %v8656_v8, %v11960_v3  ;;  %v5784_v55 = vsel %vm12344_vm5, %v8617_v21, %v8661_v15  ;;  %v5785_v47 = vsel %vm12345_vm9, %v8661_v15, %v11961_v48  ;;  %7646 = vmatprep.subr.msk.bf16.mxu1 %vm12329_vm3, %v7645_v11 }
0x12cc   : > { %v7653_v44 = vpack.c.bf16 %v5785_v47, %v5745_v35  ;;  %v7656_v20 = vpack.c.bf16 %v5784_v55, %v5744_v53  ;;  %v11160_v1 = vpop.permute.xlu0 %8664  ;;  %v11162_v42 = vpop.permute.xlu1 %8669  ;;  %vm12346_vm5 = vnez %v12179_v26  ;;  %vm12347_vm9 = vcmask 793600  }
0x12cd   : > { %v8666_v8 = vunpack.i.l.bf16 %v11160_v1  ;;  %v8671_v21 = vunpack.i.l.bf16 %v11162_v42  ;;  %vm12348_vm4 = vcmask 785408   ;;  %vm12349_vm11 = vnez %v12181_v32 }
0x12ce   : > { %7654 = vmatprep.subr.msk.bf16.mxu0 %vm12346_vm5, %v7653_v44  ;;  %v6007_v9 = vsel %vm12350_vm13, %v8631_v52, %v8632_v6  ;;  %vm12353_vm13 = vcmask 252928   ;;  %vm12364_vm3 = vnez %v12195_v37 }
0x12cf   : > { %v5935_v15 = vsel %vm12347_vm9, %v8666_v8, %v8641_v58  ;;  %v5975_v11 = vsel %vm12348_vm4, %v8671_v21, %v8646_v0  ;;  %7657 = vmatpush1.bf16.msk.msra.mxu0 %vm12349_vm11, %v7656_v20  ;;  %v8652_v8 = vunpack.i.h.bf16 %v8650_v63  ;;  %vm12351_vm9 = vnez %v12199_v14  ;;  %vm12354_vm4 = vmmov %vm12353_vm13 }
0x12d0   : > { %v7648_v53 = vpack.c.bf16 %v5975_v11, %v5935_v15  ;;  %v11173_v35 = vpop.permute.xlu0 %8674  ;;  %v11175_v55 = vpop.permute.xlu1 %8679  ;;  %v12352_v0 = vunpack.i.h.bf16 %v11088_v24  ;;  %v12355_v21 = vunpack.i.h.bf16 %v11086_v61 }
0x12d1   : > { %v11969_v47 = vunpack.i.h.bf16 %v11173_v35  ;;  %v8676_v3 = vunpack.i.l.bf16 %v11173_v35  ;;  %v11970_v44 = vunpack.i.h.bf16 %v11175_v55  ;;  %v8681_v58 = vunpack.i.l.bf16 %v11175_v55 }
0x12d2   : > { %7649 = vmatpush1.bf16.msk.msra.mxu1 %vm12351_vm9, %v7648_v53  ;;  %vm12358_vm9 = vnez %v12152_v31 }
0x12d3   : > { %v5816_v20 = vsel %vm12353_vm13, %v12352_v0, %v8676_v3  ;;  %v5817_v52 = vsel %vm12354_vm4, %v8676_v3, %v11969_v47  ;;  %v5856_v15 = vsel %vm12356_vm15, %v12355_v21, %v8681_v58  ;;  %v5857_v11 = vsel %vm12357_vm1, %v8681_v58, %v11970_v44 }
0x12d4   : > { %v7659_v63 = vpack.c.bf16 %v5857_v11, %v5817_v52  ;;  %v7662_v48 = vpack.c.bf16 %v5856_v15, %v5816_v20  ;;  %v11195_v14 = vpop.permute.xlu0 %8689  ;;  %v8685_v53 = vpop.permute.xlu1 %8684  ;;  %v6023_v24 = vsel %vm12358_vm9, %v6007_v9, 0.0  ;;  %v12359_v3 = vunpack.i.h.bf16 %v11114_v43 }
0x12d5   : > { %v11966_v0 = vunpack.i.l.bf16 %v11195_v14  ;;  %v8686_v28 = vunpack.i.l.bf16 %v8685_v53  ;;  %vm12360_vm13 = vcmask 1039360   ;;  %vm12361_vm15 = vnez %v12193_v38 }
0x12d6   : > { %v5897_v61 = vsel %vm12360_vm13, %v12359_v3, %v8652_v8  ;;  %7660 = vmatprep.subr.msk.bf16.mxu0 %vm12361_vm15, %v7659_v63  ;;  %vm12362_vm1 = vmmov %vm12360_vm13  ;;  %vm12363_vm4 = vcmask 777216   ;;  %v6063_v9 = vpack.c.bf16 %v6023_v24, %v6023_v24  ;;  %vm12365_vm9 = vnez %v12145_v10 }
0x12d7   : > { %v5898_v58 = vsel %vm12362_vm1, %v8652_v8, %v11966_v0  ;;  %v6008_v20 = vsel %vm12363_vm4, %v8632_v6, %v8686_v28  ;;  %7663 = vmatpush1.bf16.msk.msra.mxu0 %vm12364_vm3, %v7662_v48  ;;  %v7668_v11 = vpack.c.bf16 %v5897_v61, %v10992_v23  ;;  %v8687_v8 = vunpack.i.h.bf16 %v8685_v53  ;;  %v11232_v23 = vld [vmem:[%s12366_s13] sm:$0xf] }
0x12d8   : > { %v7665_v52 = vpack.c.bf16 %v5898_v58, %v10994_v17  ;;  %v6024_v43 = vsel %vm12365_vm9, %v6008_v20, 0.0  ;;  %v11214_v21 = vpop.permute.xlu0 %8699  ;;  %v11216_v15 = vpop.permute.xlu1 %5999  ;;  %vm12367_vm13 = vnez %v12208_v18  ;;  %vm12368_vm1 = vcmask 1043456  }
0x12d9   : > { %v6064_v63 = vpack.c.bf16 %v6024_v43, %v6024_v43  ;;  %v8701_v6 = vunpack.i.l.bf16 %v11214_v21  ;;  %v11967_v48 = vunpack.i.h.bf16 %v11214_v21  ;;  %vm12369_vm4 = vnez %v12214_v39  ;;  %vm12370_vm3 = vmmov %vm12368_vm1 }
0x12da   : > { %7666 = vmatprep.subr.msk.bf16.mxu0 %vm12367_vm13, %v7665_v52  ;;  %v6075_v17 = vsel %vm12370_vm3, %v6063_v9, 0  ;;  %v8667_v58 = vunpack.i.h.bf16 %v11160_v1  ;;  %v8672_v20 = vunpack.i.h.bf16 %v11162_v42  ;;  %v12372_v43 = vunpack.i.h.bf16 %v11140_v45 }
0x12db   : > { %7650 = vmatprep.subr.msk.bf16.mxu1 %vm12368_vm1, %v6064_v63  ;;  %7669 = vmatpush1.bf16.msk.msra.mxu0 %vm12369_vm4, %v7668_v11  ;;  %vm12371_vm1 = vcmask 777216   ;;  %vm12373_vm3 = vcmask 261120   ;;  %vm12376_vm13 = vcmask 269312   ;;  %vm12379_vm9 = vcmask 777216  }
0x12dc   : > { %v11227_v24 = vpop.permute.xlu0 %8709  ;;  %v11229_v3 = vpop.permute.xlu1 %8694  ;;  %6107 = vmatpush1.bf16.msra.mxu1 %v6075_v17  ;;  %v6009_v52 = vsel %vm12371_vm1, %v8686_v28, %v8687_v8  ;;  %v5786_v9 = vsel %vm12373_vm3, %v12372_v43, %v8701_v6  ;;  %vm12374_vm4 = vmmov %vm12373_vm3  ;;  %v12375_v17 = vunpack.i.h.bf16 %v11138_v22  ;;  %vm12378_vm1 = vcmask 588800  }
0x12dd   : > { %v11968_v53 = vunpack.i.h.bf16 %v11229_v3  ;;  %v8696_v61 = vunpack.i.l.bf16 %v11229_v3  ;;  %v5787_v11 = vsel %vm12374_vm4, %v8701_v6, %v11967_v48  ;;  %v8711_v63 = vunpack.i.l.bf16 %v11227_v24  ;;  %vm12377_vm15 = vmmov %vm12376_vm13 }
0x12de   : > { %v6010_v28 = vsel %vm12379_vm9, %v8687_v8, %v11216_v15  ;;  %vm12384_vm9 = vnez %v12221_v30  ;;  %vm12385_vm4 = vnez %v12187_v57  ;;  %v12386_v8 = vld [vmem:[#allocation56_spill] sm:$0xff] }
0x12df   : > { %v5746_v0 = vsel %vm12376_vm13, %v12375_v17, %v8696_v61  ;;  %v5747_v42 = vsel %vm12377_vm15, %v8696_v61, %v11968_v53  ;;  %7651 = vmatmul.mubr.msk.bf16.vlgmr.msra.gmra.mrb[68].mxu1 %vm12378_vm1, %v11232_v23  ;;  %v12380_v17 = vunpack.i.h.bf16 %v11124_v54  ;;  %vm12381_vm13 = vcmask 793600  }
0x12e0   : > { %v7679_v45 = vpack.c.bf16 %v5787_v11, %v5747_v42  ;;  %v7682_v1 = vpack.c.bf16 %v5786_v9, %v5746_v0  ;;  %v11256_v43 = vpop.permute.xlu0 %8719  ;;  %v8705_v6 = vpop.permute.xlu1 %8704  ;;  %6212 = vmatprep.mubr.bf16.mxu1 %v12271_v25  ;;  %v12382_v61 = vunpack.i.h.bf16 %v11112_v46  ;;  %vm12383_vm15 = vcmask 785408  }
0x12e1   : > { %v8706_v22 = vunpack.i.l.bf16 %v8705_v6  ;;  %v5937_v48 = vsel %vm12381_vm13, %v12380_v17, %v8667_v58  ;;  %v8721_v47 = vunpack.i.l.bf16 %v11256_v43  ;;  %v6025_v0 = vsel %vm12385_vm4, %v6009_v52, 0.0  ;;  %vm12388_vm1 = vmmov %vm12383_vm15 }
0x12e2   : > { %v5977_v53 = vsel %vm12383_vm15, %v12382_v61, %v8672_v20  ;;  %7680 = vmatprep.subr.msk.bf16.mxu1 %vm12384_vm9, %v7679_v45  ;;  %vm12387_vm3 = vnez %v12386_v8  ;;  %v5978_v11 = vsel %vm12388_vm1, %v8672_v20, %v8711_v63  ;;  %v8692_v52 = vunpack.i.h.bf16 %v11195_v14 }
0x12e3   : > { %v6026_v9 = vsel %vm12387_vm3, %v6010_v28, 0.0  ;;  %v5938_v42 = vsel %vm12381_vm13, %v8667_v58, %v8706_v22  ;;  %7683 = vmatpush1.bf16.msk.msra.mxu1 %vm10676_vm0, %v7682_v1  ;;  %v7674_v45 = vpack.c.bf16 %v5977_v53, %v5937_v48  ;;  %v12389_v54 = vunpack.i.h.bf16 %v11175_v55 }
0x12e4   : > { %v7671_v46 = vpack.c.bf16 %v5978_v11, %v5938_v42  ;;  %v11277_v17 = vpop.permute.xlu1 %8714  ;;  %v11279_v61 = vpop.permute.xlu0 %5891  ;;  %v6066_v20 = vpack.c.bf16 %v6026_v9, %v6026_v9  ;;  %vm12390_vm15 = vcmask 7168   ;;  %v6065_v1 = vpack.c.bf16 %v6025_v0, %v6025_v0 }
0x12e5   : > { %v8717_v44 = vunpack.i.h.bf16 %v11277_v17  ;;  %v8716_v28 = vunpack.i.l.bf16 %v11277_v17  ;;  %v5858_v58 = vsel %vm12390_vm15, %v12389_v54, %v8721_v47  ;;  %v12391_v11 = vunpack.i.h.bf16 %v11256_v43  ;;  %vm12392_vm1 = vmmov %vm12390_vm15 }
0x12e6   : > { %7672 = vmatprep.subr.msk.bf16.mxu0 %vm12346_vm5, %v7671_v46  ;;  %v12393_v48 = vunpack.i.h.bf16 %v11173_v35  ;;  %vm12394_vm13 = vcmask 252928   ;;  %vm12396_vm4 = vcmask 1039360   ;;  %v8707_v55 = vunpack.i.h.bf16 %v8705_v6 }
0x12e7   : > { %v5859_v42 = vsel %vm12392_vm1, %v8721_v47, %v12391_v11  ;;  %vm12395_vm3 = vmmov %vm12394_vm13  ;;  %v5900_v9 = vsel %vm12396_vm4, %v8692_v52, %v11279_v61  ;;  %7675 = vmatpush1.bf16.msk.msra.mxu0 %vm12349_vm11, %v7674_v45  ;;  %vm12397_vm15 = vcmask 1043456   ;;  %v12398_v35 = vunpack.i.l.bf16 %v11195_v14 }
0x12e8   : > { %v5818_v53 = vsel %vm12394_vm13, %v12393_v48, %v8716_v28  ;;  %v5819_v39 = vsel %vm12395_vm3, %v8716_v28, %v8717_v44  ;;  %7676 = vmatprep.subr.msk.bf16.mxu0 %vm12397_vm15, %v6066_v20  ;;  %v11301_v0 = vpop.permute.xlu1 %5931  ;;  %v11303_v47 = vpop.permute.xlu0 %5971  ;;  %vm12399_vm1 = vmmov %vm12396_vm4  ;;  %v8712_v28 = vunpack.i.h.bf16 %v11227_v24  ;;  %v7691_v11 = vpack.c.bf16 %v5900_v9, %v11016_v13 }
0x12e9   : > { %v7685_v54 = vpack.c.bf16 %v5859_v42, %v5819_v39  ;;  %v7688_v46 = vpack.c.bf16 %v5858_v58, %v5818_v53  ;;  %v5899_v17 = vsel %vm12399_vm1, %v12398_v35, %v8692_v52  ;;  %vm12400_vm4 = vnez %v12241_v7  ;;  %vm12401_vm3 = vmmov %vm12397_vm15 }
0x12ea   : > { %v6081_v39 = vsel %vm12401_vm3, %v6065_v1, 0  ;;  %vm12402_vm13 = vcmask 793600   ;;  %vm12403_vm15 = vcmask 785408   ;;  %vm12404_vm11 = vnez %v12244_v34 }
0x12eb   : > { %7686 = vmatprep.subr.msk.bf16.mxu1 %vm12400_vm4, %v7685_v54  ;;  %v5940_v6 = vsel %vm12402_vm13, %v8707_v55, %v11301_v0  ;;  %v5980_v45 = vsel %vm12403_vm15, %v8712_v28, %v11303_v47  ;;  %6148 = vmatpush1.bf16.msra.mxu0 %v6081_v39  ;;  %v7694_v14 = vpack.c.bf16 %v5899_v17, %v11014_v4  ;;  %vm12405_vm1 = vmmov %vm12402_vm13  ;;  %vm12408_vm13 = vcmask 588800  }
0x12ec   : > { %7689 = vmatpush1.bf16.msk.msra.mxu1 %vm12404_vm11, %v7688_v46  ;;  %v5939_v24 = vsel %vm12405_vm1, %v8706_v22, %v8707_v55  ;;  %vm12406_vm5 = vnez %v12248_v59  ;;  %v8730_v13 = vpop.permute.xlu0 %8729  ;;  %v8725_v52 = vpop.permute.xlu1 %8724  ;;  %vm12407_vm3 = vmmov %vm12403_vm15  ;;  %v7697_v53 = vpack.c.bf16 %v5980_v45, %v5940_v6  ;;  %v12409_v9 = vunpack.i.h.bf16 %v11214_v21 }
0x12ed   : > { %7692 = vmatprep.subr.msk.bf16.mxu1 %vm12406_vm5, %v7691_v11  ;;  %v8732_v20 = vunpack.i.h.bf16 %v8730_v13  ;;  %v8731_v58 = vunpack.i.l.bf16 %v8730_v13  ;;  %v8727_v1 = vunpack.i.h.bf16 %v8725_v52  ;;  %v8726_v42 = vunpack.i.l.bf16 %v8725_v52 }
0x12ee   : > { %v5979_v48 = vsel %vm12407_vm3, %v8711_v63, %v8712_v28  ;;  %7677 = vmatmul.mubr.msk.bf16.vlgmr.msra.gmra.mrb[60].mxu0 %vm12408_vm13, %v11232_v23  ;;  %vm12410_vm15 = vcmask 261120   ;;  %v12412_v55 = vunpack.i.h.bf16 %v11229_v3  ;;  %vm12413_vm5 = vcmask 269312  }
0x12ef   : > { %v5788_v4 = vsel %vm12410_vm15, %v12409_v9, %v8731_v58  ;;  %vm12411_vm1 = vmmov %vm12410_vm15  ;;  %vm12415_vm4 = vnez %v12253_v19  ;;  %v7700_v63 = vpack.c.bf16 %v5979_v48, %v5939_v24  ;;  %6253 = vmatprep.mubr.bf16.mxu0 %v12271_v25  ;;  %v12416_v45 = vunpack.i.h.bf16 %v11256_v43 }
0x12f0   : > { %v5789_v22 = vsel %vm12411_vm1, %v8731_v58, %v8732_v20  ;;  %v5748_v54 = vsel %vm12413_vm5, %v12412_v55, %v8726_v42  ;;  %vm12414_vm11 = vmmov %vm12413_vm5  ;;  %7695 = vmatpush1.bf16.msk.msra.mxu1 %vm12415_vm4, %v7694_v14  ;;  %v8745_v21 = vpop.permute.xlu0 %8744  ;;  %v8735_v28 = vpop.permute.xlu1 %8734  ;;  %vm12417_vm5 = vcmask 7168   ;;  %vm12419_vm3 = vcmask 252928  }
0x12f1   : > { %v5749_v46 = vsel %vm12414_vm11, %v8726_v42, %v8727_v1  ;;  %v7708_v17 = vpack.c.bf16 %v5788_v4, %v5748_v54  ;;  %7698 = vmatprep.subr.msk.bf16.mxu1 %vm12384_vm9, %v7697_v53  ;;  %v8747_v11 = vunpack.i.h.bf16 %v8745_v21  ;;  %v8746_v39 = vunpack.i.l.bf16 %v8745_v21  ;;  %vm12418_vm11 = vmmov %vm12417_vm5 }
0x12f2   : > { %v7705_v35 = vpack.c.bf16 %v5789_v22, %v5749_v46  ;;  %v8737_v3 = vunpack.i.h.bf16 %v8735_v28  ;;  %v8736_v6 = vunpack.i.l.bf16 %v8735_v28  ;;  %vm12420_vm13 = vmmov %vm12419_vm3  ;;  %vm12421_vm15 = vcmask 1039360  }
0x12f3   : > { %v5860_v14 = vsel %vm12417_vm5, %v12416_v45, %v8746_v39  ;;  %v5861_v24 = vsel %vm12418_vm11, %v8746_v39, %v8747_v11  ;;  %vm12422_vm1 = vmmov %vm12421_vm15  ;;  %vm12423_vm5 = vcmask 777216  }
0x12f4   : > { %7706 = vmatprep.subr.msk.bf16.mxu0 %vm10818_vm6, %v7705_v35  ;;  %v5820_v13 = vsel %vm12419_vm3, %v8717_v44, %v8736_v6  ;;  %v5821_v52 = vsel %vm12420_vm13, %v8736_v6, %v8737_v3  ;;  %7701 = vmatpush1.bf16.msk.msra.mxu1 %vm10676_vm0, %v7700_v63  ;;  %v5894_v1 = vpop.permute.xlu0 %5893  ;;  %v8740_v42 = vpop.permute.xlu1 %8739  ;;  %vm12424_vm11 = vmmov %vm12423_vm5  ;;  %vm12425_vm3 = vnez %v12233_v29  ;;  %vm12426_vm13 = vcmask 793600  }
0x12f5   : > { %v7711_v20 = vpack.c.bf16 %v5861_v24, %v5821_v52  ;;  %v7714_v58 = vpack.c.bf16 %v5860_v14, %v5820_v13  ;;  %7709 = vmatpush1.bf16.msk.msra.mxu0 %vm10832_vm14, %v7708_v17  ;;  %v5910_v43 = vsel %vm12421_vm15, %v5894_v1, 0.0  ;;  %v8742_v48 = vunpack.i.h.bf16 %v8740_v42 }
0x12f6   : > { %v8741_v53 = vunpack.i.l.bf16 %v8740_v42  ;;  %v7717_v9 = vpack.c.bf16 %v5910_v43, %v11040_v27  ;;  %v5901_v44 = vsel %vm12422_vm1, %v11279_v61, %v5894_v1  ;;  %vm12427_vm15 = vcmask 785408   ;;  %vm12428_vm1 = vmmov %vm12426_vm13 }
0x12f7   : > { %7712 = vmatprep.subr.msk.bf16.mxu0 %vm10859_vm7, %v7711_v20 }
0x12f8   : > { %v6011_v4 = vsel %vm12423_vm5, %v11216_v15, %v8741_v53  ;;  %v6012_v22 = vsel %vm12424_vm11, %v8741_v53, %v8742_v48  ;;  %v5974_v54 = vpop.permute.xlu0 %5973  ;;  %v5934_v46 = vpop.permute.xlu1 %5933  ;;  %v7720_v15 = vpack.c.bf16 %v5901_v44, %v11034_v60  ;;  %vm12429_vm5 = vcmask 1043456  }
0x12f9   : > { %v6028_v55 = vsel %vm10692_vm8, %v6012_v22, 0.0  ;;  %7715 = vmatpush1.bf16.msk.msra.mxu0 %vm10874_vm2, %v7714_v58  ;;  %v6027_v27 = vsel %vm12425_vm3, %v6011_v4, 0.0  ;;  %v5950_v63 = vsel %vm12426_vm13, %v5934_v46, 0.0  ;;  %v5981_v21 = vsel %vm12427_vm15, %v11303_v47, %v5974_v54  ;;  %vm12430_vm11 = vmmov %vm12429_vm5 }
0x12fa   : > { %7718 = vmatprep.subr.msk.bf16.mxu0 %vm10884_vm12, %v7717_v9  ;;  %v6068_v61 = vpack.c.bf16 %v6028_v55, %v6028_v55  ;;  %v7723_v35 = vpack.c.bf16 %v5974_v54, %v5950_v63  ;;  %v6067_v17 = vpack.c.bf16 %v6027_v27, %v6027_v27  ;;  %v5941_v28 = vsel %vm12428_vm1, %v11301_v0, %v5934_v46 }
0x12fb   : > { %vm12431_vm13 = vcmask 777216   ;;  %vm12433_vm8 = vnez %v12301_v62  ;;  %v7726_v47 = vpack.c.bf16 %v5981_v21, %v5941_v28  ;;  %vm12434_vm15 = vnez %v12278_v56  ;;  %v12441_v28 = vld [vmem:[#allocation61_spill] sm:$0xff] }
0x12fc   : > { %7702 = vmatprep.subr.msk.bf16.mxu1 %vm12429_vm5, %v6068_v61  ;;  %v6006_v11 = vpop.permute.xlu1 %6005  ;;  %v6087_v39 = vsel %vm12430_vm11, %v6067_v17, 0  ;;  %vm12432_vm3 = vmmov %vm12431_vm13  ;;  %vm12435_vm1 = vnez %v12269_v16  ;;  %vm12436_vm5 = vcmask 588800   ;;  %vm12477_vm12 = vnez %v12145_v10 }
0x12fd   : > { %7721 = vmatpush1.bf16.msk.msra.mxu0 %vm10906_vm10, %v7720_v15  ;;  %v6013_v3 = vsel %vm12431_vm13, %v8742_v48, %v6006_v11  ;;  %v6022_v60 = vsel %vm12432_vm3, %v6006_v11, 0.0  ;;  %6189 = vmatpush1.bf16.msra.mxu1 %v6087_v39  ;;  %vm12437_vm3 = vmmov %vm12430_vm11  ;;  %v12440_v15 = vld [vmem:[#allocation60_spill] sm:$0xff]  ;;  %vm12474_vm10 = vnez %v12152_v31 }
0x12fe   : > { %7724 = vmatprep.subr.msk.bf16.mxu0 %vm12433_vm8, %v7723_v35  ;;  %v6029_v0 = vsel %vm12434_vm15, %v6013_v3, 0.0  ;;  %v6030_v6 = vsel %vm12435_vm1, %v6022_v60, 0.0  ;;  %vm12438_vm11 = vmmov %vm12437_vm3  ;;  %vm12464_vm8 = vcmask 777216  }
0x12ff   : > { %v6069_v45 = vpack.c.bf16 %v6029_v0, %v6029_v0  ;;  %v6070_v14 = vpack.c.bf16 %v6030_v6, %v6030_v6  ;;  %vm12439_vm13 = vmmov %vm12436_vm5 }
0x1300   : > { %7703 = vmatmul.mubr.msk.bf16.vlgmr.msra.gmra.mrb[72].mxu1 %vm12436_vm5, %v11232_v23  ;;  %vm12446_vm5 = vcmask 269312  }
0x1301   : > { %7727 = vmatpush1.bf16.msk.msra.mxu0 %vm10832_vm14, %v7726_v47  ;;  %v6093_v24 = vsel %vm12438_vm11, %v6069_v45, 0  ;;  %6716 = vmatprep.mubr.bf16.mxu1 %v12271_v25  ;;  %vm12448_vm11 = vmmov %vm12446_vm5 }
0x1302   : > { %7728 = vmatprep.subr.msk.bf16.mxu0 %vm12437_vm3, %v6070_v14  ;;  %vm12447_vm3 = vcmask 261120  }
0x1305   : > { %6230 = vmatpush1.bf16.msra.mxu0 %v6093_v24 }
0x1308   : > { %7729 = vmatmul.mubr.msk.bf16.vlgmr.msra.gmra.mrb[64].mxu0 %vm12439_vm13, %v11232_v23 }
0x1309   : > { %6757 = vmatprep.mubr.bf16.mxu0 %v12271_v25  ;;  %v11396_v13 = vpop.permute.xlu0 %5692 }
0x130a   : > { %v5695_v1 = vmul.f32 %v11396_v13, %v11054_v49  ;;  %v5696_v23 = vmul.f32 %v11396_v13, %v11056_v2  ;;  %v5697_v35 = vmul.f32 %v11396_v13, %v12440_v15  ;;  %v5698_v11 = vmul.f32 %v11396_v13, %v12441_v28 }
0x130d   : > { %v11398_v52 = vpop.permute.xlu1 %6264  ;;  %v11400_v20 = vpop.permute.xlu0 %5705 }
0x130e   : > { %v5708_v44 = vadd.f32 %v11400_v20, %v5695_v1  ;;  %v5709_v55 = vadd.f32 %v11400_v20, %v5696_v23  ;;  %v5710_v60 = vadd.f32 %v11400_v20, %v5697_v35  ;;  %v5711_v6 = vadd.f32 %v11400_v20, %v5698_v11 }
0x1311   : > { %v11405_v48 = vpop.permute.xlu1 %6277 }
0x13b2   : > { %v6132_v58 = vpop.f32.mrb[68].mxu1 }
0x13b3   : > { %v6267_v42 = vmul.f32 %v11398_v52, %v6132_v58  ;;  %v6134_v43 = vpop.f32.mrb[69].mxu1 }
0x13b4   : > { %v6268_v53 = vmul.f32 %v11398_v52, %v6134_v43  ;;  %v6136_v9 = vpop.f32.mrb[70].mxu1 }
0x13b5   : > { %v6280_v4 = vadd.f32 %v11405_v48, %v6267_v42  ;;  %v6137_v22 = vpop.f32.mrb[71].mxu1 }
0x13b6   : > { %v6281_v49 = vadd.f32 %v11405_v48, %v6268_v53  ;;  %v12442_v53 = vld [vmem:[#allocation62_spill] sm:$0xff]  ;;  %v12443_v22 = vld [vmem:[#allocation65_spill] sm:$0xff] }
0x13b7   : > { %v6288_v54 = vadd.f32 %v6280_v4, %v5708_v44  ;;  %v5699_v9 = vmul.f32 %v11396_v13, %v12442_v53 }
0x13b8   : > { %v6289_v46 = vadd.f32 %v6281_v49, %v5709_v55  ;;  %v5700_v55 = vmul.f32 %v11396_v13, %v12443_v22 }
0x13b9   : > { %v11414_v27 = vmax.f32 %v6288_v54, 0.0 }
0x13ba   : > { %v11416_v63 = vmax.f32 %v6289_v46, 0.0  ;;  %v5712_v46 = vadd.f32 %v11400_v20, %v5699_v9  ;;  %v5713_v15 = vadd.f32 %v11400_v20, %v5700_v55 }
0x13bb   : > { %6505 = vrot.lane.b32.xlu1 %v11414_v27, %s9123_s23  ;;  %6465 = vrot.lane.b32.xlu0 %v11414_v27, %s12070_s3 }
0x13bc   : > { %v8768_v2 = vpack.i.bf16 %v11416_v63, %v11414_v27 }
0x13bf   : > { %6545 = vrot.lane.b32.xlu0 %v11414_v27, %s9124_s5  ;;  %8769 = vrot.lane.b32.xlu1 %v8768_v2, %s9125_s11 }
0x13c1   : > { %v6173_v61 = vpop.f32.mrb[60].mxu0 }
0x13c2   : > { %v6269_v17 = vmul.f32 %v11398_v52, %v6173_v61  ;;  %v6175_v21 = vpop.f32.mrb[61].mxu0 }
0x13c3   : > { %v6270_v39 = vmul.f32 %v11398_v52, %v6175_v21  ;;  %v6177_v3 = vpop.f32.mrb[62].mxu0  ;;  %8749 = vrot.lane.b32.xlu0 %v8768_v2, %s9121_s1 }
0x13c4   : > { %v6282_v47 = vadd.f32 %v11405_v48, %v6269_v17  ;;  %v6178_v0 = vpop.f32.mrb[63].mxu0 }
0x13c5   : > { %v6283_v45 = vadd.f32 %v11405_v48, %v6270_v39  ;;  %v12444_v39 = vld [vmem:[#allocation63_spill] sm:$0xff]  ;;  %v12445_v0 = vld [vmem:[#allocation64_spill] sm:$0xff] }
0x13c6   : > { %v6290_v14 = vadd.f32 %v6282_v47, %v5710_v60  ;;  %v5701_v3 = vmul.f32 %v11396_v13, %v12444_v39 }
0x13c7   : > { %v6291_v24 = vadd.f32 %v6283_v45, %v5711_v6  ;;  %8754 = vrot.lane.b32.xlu0 %v8768_v2, %s9120_s8  ;;  %v5702_v6 = vmul.f32 %v11396_v13, %v12445_v0 }
0x13c8   : > { %v11439_v58 = vmax.f32 %v6290_v14, 0.0 }
0x13c9   : > { %v11445_v42 = vmax.f32 %v6291_v24, 0.0  ;;  %v5715_v9 = vadd.f32 %v11400_v20, %v5702_v6 }
0x13ca   : > { %v8778_v1 = vpack.i.bf16 %v11439_v58, %v11416_v63 }
0x13cb   : > { %8759 = vrot.lane.b32.xlu0 %v8768_v2, %s9122_s26  ;;  %v8788_v43 = vpack.i.bf16 %v11445_v42, %v11439_v58 }
0x13cc   : > { %8779 = vrot.lane.b32.xlu1 %v8778_v1, %s9123_s23 }
0x13cf   : > { %8764 = vrot.lane.b32.xlu0 %v8768_v2, %s9098_s28 }
0x13d0   : > { %8784 = vrot.lane.b32.xlu1 %v8778_v1, %s9124_s5 }
0x13d3   : > { %v6214_v23 = vpop.f32.mrb[72].mxu1  ;;  %8774 = vrot.lane.b32.xlu0 %v8778_v1, %s12070_s3  ;;  %v5714_v1 = vadd.f32 %v11400_v20, %v5701_v3 }
0x13d4   : > { %v6271_v44 = vmul.f32 %v11398_v52, %v6214_v23  ;;  %v6216_v4 = vpop.f32.mrb[73].mxu1  ;;  %8789 = vrot.lane.b32.xlu1 %v8788_v43, %s9121_s1 }
0x13d5   : > { %v6272_v49 = vmul.f32 %v11398_v52, %v6216_v4  ;;  %v6218_v54 = vpop.f32.mrb[74].mxu1 }
0x13d6   : > { %v6284_v2 = vadd.f32 %v11405_v48, %v6271_v44  ;;  %v6219_v61 = vpop.f32.mrb[75].mxu1 }
0x13d7   : > { %v6285_v35 = vadd.f32 %v11405_v48, %v6272_v49  ;;  %8809 = vrot.lane.b32.xlu0 %v8788_v43, %s9125_s11 }
0x13d8   : > { %v6292_v17 = vadd.f32 %v6284_v2, %v5712_v46  ;;  %8794 = vrot.lane.b32.xlu1 %v8788_v43, %s9120_s8 }
0x13d9   : > { %v6293_v21 = vadd.f32 %v6285_v35, %v5713_v15 }
0x13da   : > { %v11465_v28 = vmax.f32 %v6292_v17, 0.0 }
0x13db   : > { %v6255_v11 = vpop.f32.mrb[64].mxu0  ;;  %v11481_v4 = vmax.f32 %v6293_v21, 0.0 }
0x13dc   : > { %v6273_v60 = vmul.f32 %v11398_v52, %v6255_v11  ;;  %v6257_v47 = vpop.f32.mrb[65].mxu0  ;;  %8799 = vrot.lane.b32.xlu1 %v8788_v43, %s9122_s26  ;;  %v8818_v14 = vpack.i.bf16 %v11465_v28, %v11445_v42 }
0x13dd   : > { %v6274_v45 = vmul.f32 %v11398_v52, %v6257_v47  ;;  %v6259_v24 = vpop.f32.mrb[66].mxu0  ;;  %v8828_v22 = vpack.i.bf16 %v11481_v4, %v11465_v28 }
0x13de   : > { %v6286_v23 = vadd.f32 %v11405_v48, %v6273_v60  ;;  %v6260_v53 = vpop.f32.mrb[67].mxu0  ;;  %8819 = vrot.lane.b32.xlu0 %v8818_v14, %s9123_s23 }
0x13df   : > { %v6287_v44 = vadd.f32 %v11405_v48, %v6274_v45 }
0x13e0   : > { %v6294_v13 = vadd.f32 %v6286_v23, %v5714_v1  ;;  %8804 = vrot.lane.b32.xlu1 %v8788_v43, %s9098_s28  ;;  %v12449_v1 = vld [vmem:[#allocation50_spill] sm:$0xff]  ;;  %v12451_v23 = vld [vmem:[#allocation51_spill] sm:$0xff] }
0x13e1   : > { %v6295_v52 = vadd.f32 %v6287_v44, %v5715_v9  ;;  %vm12450_vm13 = vnez %v12449_v1  ;;  %vm12452_vm1 = vnez %v12451_v23 }
0x13e2   : > { %8824 = vrot.lane.b32.xlu0 %v8818_v14, %s9124_s5  ;;  %v11488_v55 = vmax.f32 %v6294_v13, 0.0 }
0x13e3   : > { %v11490_v20 = vmax.f32 %v6295_v52, 0.0 }
0x13e4   : > { %8814 = vrot.lane.b32.xlu1 %v8818_v14, %s12070_s3  ;;  %v8848_v43 = vpack.i.bf16 %v11488_v55, %v11481_v4 }
0x13e5   : > { %v8863_v48 = vpack.i.bf16 %v11490_v20, %v11488_v55 }
0x13e6   : > { %8829 = vrot.lane.b32.xlu0 %v8828_v22, %s9121_s1 }
0x13e8   : > { %6585 = vrot.lane.b32.xlu1 %v11465_v28, %s9125_s11 }
0x13ea   : > { %8834 = vrot.lane.b32.xlu0 %v8828_v22, %s9120_s8 }
0x13ec   : > { %8864 = vrot.lane.b32.xlu1 %v8863_v48, %s9121_s1 }
0x13ee   : > { %8839 = vrot.lane.b32.xlu0 %v8828_v22, %s9122_s26 }
0x13f0   : > { %8869 = vrot.lane.b32.xlu1 %v8863_v48, %s9120_s8  ;;  %s7841_s8 = sshll.u32 %s9409_s0, 7  ;;  %s9127_s0 = smov [#allocation5]  }
0x13f1   : > { %s8977_s10 = sshll.u32 %s9127_s0, 4  ;;  %s8978_s10 = int_to_ptr.vmem [resolvable:$false] %s8977_s10 }
0x13f2   : > { %8844 = vrot.lane.b32.xlu0 %v8828_v22, %s9098_s28  ;;  %s8979_s2 = scalar_lea.vmem %s8978_s10, 256 }
0x13f4   : > { %8874 = vrot.lane.b32.xlu1 %v8863_v48, %s9122_s26 }
0x13f6   : > { %8849 = vrot.lane.b32.xlu0 %v8848_v43, %s12070_s3 }
0x13f8   : > { %8879 = vrot.lane.b32.xlu1 %v8863_v48, %s9098_s28 }
0x13fa   : > { %8854 = vrot.lane.b32.xlu0 %v8848_v43, %s9123_s23 }
0x13fc   : > { %6479 = vrot.lane.b32.xlu1 %v11490_v20, %s12070_s3  ;;  %s1496_s3 = sand.u32 1, %s9031_s16  }
0x13fd   : > { %s7057_s28 = sshll.u32 %s1496_s3, 3 }
0x13fe   : > { %8859 = vrot.lane.b32.xlu0 %v8848_v43, %s9124_s5  ;;  %s1498_s1 = scalar_lea.vmem [#allocation5], %s7057_s28 }
0x13ff   : > { %s6930_s26 = sshll.u32 %s1498_s1, 4  ;;  %s11803_s26 = int_to_ptr.vmem [resolvable:$true] %s6930_s26 }
0x1400   : > { %6519 = vrot.lane.b32.xlu1 %v11490_v20, %s9123_s23  ;;  %s11801_s23 = scalar_lea.hbm %s9386_s12, %s7841_s8  ;;  %p8980_p2 = scmp.lt.s32.totalorder %s11803_s26, %s8978_s10 }
0x1402   : > { %8884 = vrot.lane.b32.xlu0 %v8848_v43, %s9125_s11 }
0x1404   : > { %6559 = vrot.lane.b32.xlu1 %v11490_v20, %s9124_s5  ;;  %s6916_s5 = scalar_lea.sflag [#allocation4], %s1496_s3 }
0x1408   : > { %6591 = vrot.lane.b32.xlu1 %v11490_v20, %s9125_s11  ;;  %s8973_s11 = scalar_lea.vmem %s11803_s26, 128 }
0x1409   : > { %p8974_p6 = scmp.ne.s32.totalorder %s11803_s26, %s8973_s11  ;;  %p8981_p3 = scmp.lt.s32.totalorder %s8979_s2, %s8973_s11 }
0x140b   : > { %p8975_p10 = pnand %p8974_p6, %p12562_p9  ;;  %p8982_p4 = por %p8981_p3, %p8980_p2 }
0x140d   : > { %p8976_p12 = pneg %p8975_p10 }
0x140f   : > { %p8983_p7 = pnand %p8982_p4, %p8976_p12 }
0x142d   : > { %v6466_v49 = vpop.permute.xlu0 %6465  ;;  %v6506_v46 = vpop.permute.xlu1 %6505 }
0x1431   : > { %v6546_v54 = vpop.permute.xlu0 %6545  ;;  %v8770_v17 = vpop.permute.xlu1 %8769 }
0x1435   : > { %v8750_v2 = vpop.permute.xlu0 %8749 }
0x1436   : > { %v8752_v61 = vunpack.i.h.bf16 %v8750_v2  ;;  %v8751_v15 = vunpack.i.l.bf16 %v8750_v2 }
0x1438   : > { %v6329_v39 = vsel %vm12446_vm5, %v8751_v15, %v8752_v61  ;;  %v6344_v60 = vsel %vm12448_vm11, 0.0, %v8751_v15  ;;  %vm12453_vm5 = vcmask 252928   ;;  %vm12455_vm11 = vcmask 7168  }
0x1439   : > { %v11518_v35 = vpop.permute.xlu0 %8754  ;;  %vm12456_vm15 = vmmov %vm12455_vm11 }
0x143a   : > { %v8757_v21 = vunpack.i.h.bf16 %v11518_v35  ;;  %v8756_v11 = vunpack.i.l.bf16 %v11518_v35  ;;  %v8772_v35 = vunpack.i.h.bf16 %v8770_v17 }
0x143c   : > { %v6369_v3 = vsel %vm12447_vm3, %v8756_v11, %v8757_v21  ;;  %v7735_v6 = vpack.c.bf16 %v8756_v11, %v6344_v60  ;;  %vm12454_vm3 = vmmov %vm12453_vm5  ;;  %v8771_v11 = vunpack.i.l.bf16 %v8770_v17 }
0x143d   : > { %v7731_v47 = vpack.c.bf16 %v6369_v3, %v6329_v39  ;;  %v11525_v0 = vpop.permute.xlu0 %8759 }
0x143e   : > { %v11527_v45 = vpop.permute.xlu1 %8779  ;;  %v11976_v14 = vunpack.i.h.bf16 %v11525_v0  ;;  %v8761_v24 = vunpack.i.l.bf16 %v11525_v0 }
0x143f   : > { %7732 = vmatprep.subr.msk.bf16.mxu1 %vm12450_vm13, %v7731_v47  ;;  %v12472_v47 = vld [vmem:[#allocation55_spill] sm:$0xff] }
0x1440   : > { %7736 = vmatpush1.bf16.msk.msra.mxu1 %vm12452_vm1, %v7735_v6  ;;  %v6401_v52 = vsel %vm12453_vm5, %v8761_v24, %v11976_v14  ;;  %v6416_v22 = vsel %vm12454_vm3, 0.0, %v8761_v24  ;;  %v8781_v6 = vunpack.i.l.bf16 %v11527_v45  ;;  %vm12459_vm1 = vcmask 785408  }
0x1441   : > { %v11535_v53 = vpop.permute.xlu0 %8764  ;;  %vm12460_vm5 = vcmask 1039360   ;;  %v6593_v14 = vsel %vm12464_vm8, %v8771_v11, %v8772_v35 }
0x1442   : > { %v11975_v9 = vunpack.i.h.bf16 %v11535_v53  ;;  %v8766_v44 = vunpack.i.l.bf16 %v11535_v53  ;;  %v11539_v13 = vpop.permute.xlu1 %8784  ;;  %vm12461_vm3 = vmmov %vm12460_vm5 }
0x1443   : > { %v11977_v2 = vunpack.i.h.bf16 %v11539_v13  ;;  %v8786_v15 = vunpack.i.l.bf16 %v11539_v13 }
0x1444   : > { %v6441_v48 = vsel %vm12455_vm11, %v8766_v44, %v11975_v9  ;;  %v6456_v43 = vsel %vm12456_vm15, 0.0, %v8766_v44  ;;  %v12457_v44 = vld [vmem:[#allocation52_spill] sm:$0xff] }
0x1445   : > { %v7738_v39 = vpack.c.bf16 %v6441_v48, %v6401_v52  ;;  %v7741_v3 = vpack.c.bf16 %v6456_v43, %v6416_v22  ;;  %v11551_v60 = vpop.permute.xlu0 %8774  ;;  %vm12458_vm15 = vnez %v12457_v44  ;;  %v6562_v17 = vsel %vm12459_vm1, %v8786_v15, %v11977_v2  ;;  %v12462_v43 = vld [vmem:[#allocation53_spill] sm:$0xff] }
0x1446   : > { %v11979_v24 = vunpack.i.h.bf16 %v11551_v60  ;;  %v8776_v23 = vunpack.i.l.bf16 %v11551_v60  ;;  %v11557_v9 = vpop.permute.xlu1 %8789  ;;  %vm12463_vm11 = vnez %v12462_v43 }
0x1447   : > { %7739 = vmatprep.subr.msk.bf16.mxu1 %vm12458_vm15, %v7738_v39  ;;  %v8791_v48 = vunpack.i.l.bf16 %v11557_v9  ;;  %vm12466_vm15 = vcmask 793600  }
0x1448   : > { %v6481_v52 = vsel %vm12460_vm5, %v6466_v49, %v8776_v23  ;;  %v6482_v22 = vsel %vm12461_vm3, %v8776_v23, %v11979_v24  ;;  %7742 = vmatpush1.bf16.msk.msra.mxu1 %vm12463_vm11, %v7741_v3  ;;  %v12465_v49 = vunpack.i.h.bf16 %v11527_v45  ;;  %v6561_v3 = vsel %vm12459_vm1, %v6546_v54, %v8786_v15  ;;  %vm12469_vm5 = vmmov %vm12466_vm15 }
0x1449   : > { %v7744_v44 = vpack.c.bf16 %v6482_v22, %v11416_v63  ;;  %v7747_v39 = vpack.c.bf16 %v6481_v52, %v11414_v27  ;;  %v11575_v2 = vpop.permute.xlu0 %8809  ;;  %v12467_v27 = vld [vmem:[#allocation54_spill] sm:$0xff]  ;;  %v6521_v52 = vsel %vm12469_vm5, %v6506_v46, %v8781_v6  ;;  %vm12470_vm3 = vcmask 269312  }
0x144a   : > { %v6522_v16 = vsel %vm12466_vm15, %v8781_v6, %v12465_v49  ;;  %v8811_v23 = vunpack.i.l.bf16 %v11575_v2  ;;  %v11581_v24 = vpop.permute.xlu1 %8794  ;;  %vm12468_vm8 = vnez %v12467_v27  ;;  %v6330_v22 = vsel %vm12470_vm3, %v8752_v61, %v8791_v48  ;;  %vm12476_vm1 = vmmov %vm12470_vm3 }
0x144b   : > { %v7750_v43 = vpack.c.bf16 %v6562_v17, %v6522_v16  ;;  %v8797_v11 = vunpack.i.h.bf16 %v11581_v24  ;;  %v8796_v63 = vunpack.i.l.bf16 %v11581_v24  ;;  %7745 = vmatprep.subr.msk.bf16.mxu1 %vm12468_vm8, %v7744_v44  ;;  %vm12471_vm11 = vcmask 777216  }
0x144c   : > { %v6594_v49 = vsel %vm12471_vm11, %v8772_v35, %v8811_v23  ;;  %vm12473_vm15 = vnez %v12472_v47  ;;  %v6609_v54 = vsel %vm12474_vm10, %v6593_v14, 0.0  ;;  %v12475_v16 = vunpack.i.h.bf16 %v11557_v9 }
0x144d   : > { %7748 = vmatpush1.bf16.msk.msra.mxu1 %vm12473_vm15, %v7747_v39  ;;  %v6610_v17 = vsel %vm12477_vm12, %v6594_v49, 0.0  ;;  %vm12478_vm8 = vcmask 261120   ;;  %v7753_v61 = vpack.c.bf16 %v6561_v3, %v6521_v52  ;;  %v6649_v6 = vpack.c.bf16 %v6609_v54, %v6609_v54  ;;  %v12480_v39 = vld [vmem:[#allocation57_spill] sm:$0xff] }
0x144e   : > { %v6331_v15 = vsel %vm12476_vm1, %v8791_v48, %v12475_v16  ;;  %v6370_v44 = vsel %vm12478_vm8, %v8757_v21, %v8796_v63  ;;  %vm12479_vm5 = vmmov %vm12478_vm8  ;;  %7751 = vmatprep.subr.msk.bf16.mxu1 %vm12450_vm13, %v7750_v43  ;;  %v11606_v14 = vpop.permute.xlu1 %8799  ;;  %v6650_v47 = vpack.c.bf16 %v6610_v17, %v6610_v17  ;;  %vm12481_vm12 = vnez %v12480_v39 }
0x144f   : > { %v6371_v46 = vsel %vm12479_vm5, %v8796_v63, %v8797_v11  ;;  %v7761_v31 = vpack.c.bf16 %v6370_v44, %v6330_v22  ;;  %v8802_v48 = vunpack.i.h.bf16 %v11606_v14  ;;  %v8801_v10 = vunpack.i.l.bf16 %v11606_v14 }
0x1450   : > { %v7758_v35 = vpack.c.bf16 %v6371_v46, %v6331_v15  ;;  %v11610_v21 = vpop.permute.xlu0 %8819  ;;  %vm12482_vm10 = vnez %v12179_v26  ;;  %vm12483_vm13 = vcmask 1043456   ;;  %vm12484_vm3 = vnez %v12181_v32 }
0x1451   : > { %7754 = vmatpush1.bf16.msk.msra.mxu1 %vm12481_vm12, %v7753_v61  ;;  %v8812_v1 = vunpack.i.h.bf16 %v11575_v2  ;;  %vm12485_vm11 = vmmov %vm12483_vm13  ;;  %v12486_v52 = vunpack.i.h.bf16 %v11525_v0  ;;  %vm12487_vm15 = vcmask 252928   ;;  %v11634_v2 = vld [vmem:[%s9381_s4] sm:$0x1]  ;;  %v12489_v16 = vunpack.i.h.bf16 %v11535_v53 }
0x1452   : > { %7759 = vmatprep.subr.msk.bf16.mxu0 %vm12482_vm10, %v7758_v35  ;;  %7755 = vmatprep.subr.msk.bf16.mxu1 %vm12483_vm13, %v6650_v47  ;;  %v11620_v3 = vpop.permute.xlu1 %8804  ;;  %v6661_v27 = vsel %vm12485_vm11, %v6649_v6, 0  ;;  %vm12488_vm1 = vmmov %vm12487_vm15  ;;  %vm12490_vm8 = vcmask 7168   ;;  %vm12492_vm12 = vcmask 777216   ;;  %v8822_v47 = vunpack.i.h.bf16 %v11610_v21 }
0x1453   : > { %7762 = vmatpush1.bf16.msk.msra.mxu0 %vm12484_vm3, %v7761_v31  ;;  %v8807_v43 = vunpack.i.h.bf16 %v11620_v3  ;;  %v8806_v63 = vunpack.i.l.bf16 %v11620_v3  ;;  %v6402_v22 = vsel %vm12487_vm15, %v12486_v52, %v8801_v10  ;;  %v6403_v49 = vsel %vm12488_vm1, %v8801_v10, %v8802_v48  ;;  %vm12491_vm5 = vmmov %vm12490_vm8 }
0x1454   : > { %v11631_v54 = vpop.permute.xlu0 %8824  ;;  %v6595_v46 = vsel %vm12492_vm12, %v8811_v23, %v8812_v1  ;;  %v8821_v53 = vunpack.i.l.bf16 %v11610_v21  ;;  %vm12493_vm13 = vcmask 588800   ;;  %vm12494_vm11 = vnez %v12193_v38 }
0x1455   : > { %6693 = vmatpush1.bf16.msra.mxu1 %v6661_v27  ;;  %v6442_v15 = vsel %vm12490_vm8, %v12489_v16, %v8806_v63  ;;  %v6443_v17 = vsel %vm12491_vm5, %v8806_v63, %v8807_v43  ;;  %v8827_v0 = vunpack.i.h.bf16 %v11631_v54  ;;  %v8826_v44 = vunpack.i.l.bf16 %v11631_v54 }
0x1456   : > { %v7764_v61 = vpack.c.bf16 %v6443_v17, %v6403_v49  ;;  %v7767_v35 = vpack.c.bf16 %v6442_v15, %v6402_v22  ;;  %v11645_v31 = vpop.permute.xlu1 %8814  ;;  %vm12495_vm15 = vcmask 785408   ;;  %v12496_v63 = vunpack.i.h.bf16 %v11551_v60 }
0x1457   : > { %v8817_v6 = vunpack.i.h.bf16 %v11645_v31  ;;  %v8816_v10 = vunpack.i.l.bf16 %v11645_v31  ;;  %v6564_v23 = vsel %vm12495_vm15, %v8826_v44, %v8827_v0  ;;  %vm12497_vm1 = vcmask 1039360  }
0x1458   : > { %7756 = vmatmul.mubr.msk.bf16.vlgmr.msra.gmra.mrb[76].mxu1 %vm12493_vm13, %v11634_v2  ;;  %v8830_v39 = vpop.permute.xlu0 %8829  ;;  %7765 = vmatprep.subr.msk.bf16.mxu0 %vm12494_vm11, %v7764_v61  ;;  %vm12498_vm8 = vmmov %vm12497_vm1  ;;  %vm12499_vm5 = vnez %v12195_v37  ;;  %vm12500_vm12 = vnez %v12187_v57  ;;  %vm12501_vm13 = vcmask 793600   ;;  %v12502_v17 = vunpack.i.h.bf16 %v11539_v13 }
0x1459   : > { %6798 = vmatprep.mubr.bf16.mxu1 %v12271_v25  ;;  %v6483_v27 = vsel %vm12497_vm1, %v12496_v63, %v8816_v10  ;;  %v6484_v52 = vsel %vm12498_vm8, %v8816_v10, %v8817_v6  ;;  %7768 = vmatpush1.bf16.msk.msra.mxu0 %vm12499_vm5, %v7767_v35  ;;  %v8831_v49 = vunpack.i.l.bf16 %v8830_v39  ;;  %v6611_v15 = vsel %vm12500_vm12, %v6595_v46, 0.0  ;;  %vm12503_vm11 = vmmov %vm12495_vm15 }
0x145a   : > { %v7770_v38 = vpack.c.bf16 %v6484_v52, %v11445_v42  ;;  %v7773_v22 = vpack.c.bf16 %v6483_v27, %v11439_v58  ;;  %v11669_v16 = vpop.permute.xlu1 %6585  ;;  %v6524_v60 = vsel %vm12501_vm13, %v8821_v53, %v8822_v47  ;;  %v6563_v61 = vsel %vm12503_vm11, %v12502_v17, %v8826_v44  ;;  %vm12508_vm5 = vmmov %vm12501_vm13  ;;  %v12509_v27 = vld [vmem:[#allocation58_spill] sm:$0xff] }
0x145b   : > { %v8832_v37 = vunpack.i.h.bf16 %v8830_v39  ;;  %vm12504_vm15 = vcmask 777216   ;;  %v7776_v35 = vpack.c.bf16 %v6564_v23, %v6524_v60  ;;  %vm12505_vm1 = vnez %v12386_v8 }
0x145c   : > { %v6596_v42 = vsel %vm12504_vm15, %v8812_v1, %v11669_v16  ;;  %v8835_v10 = vpop.permute.xlu0 %8834  ;;  %vm12506_vm8 = vnez %v12208_v18  ;;  %v12507_v57 = vunpack.i.h.bf16 %v11527_v45  ;;  %vm12510_vm12 = vnez %v12509_v27 }
0x145d   : > { %v6612_v58 = vsel %vm12505_vm1, %v6596_v42, 0.0  ;;  %7771 = vmatprep.subr.msk.bf16.mxu0 %vm12506_vm8, %v7770_v38  ;;  %v8837_v63 = vunpack.i.h.bf16 %v8835_v10  ;;  %v8836_v13 = vunpack.i.l.bf16 %v8835_v10  ;;  %v12511_v1 = vunpack.i.h.bf16 %v11557_v9 }
0x145e   : > { %v6523_v46 = vsel %vm12508_vm5, %v12507_v57, %v8821_v53  ;;  %7774 = vmatpush1.bf16.msk.msra.mxu0 %vm12510_vm12, %v7773_v22  ;;  %vm12512_vm13 = vcmask 269312   ;;  %v8865_v8 = vpop.permute.xlu1 %8864  ;;  %v6651_v18 = vpack.c.bf16 %v6611_v15, %v6611_v15  ;;  %v6652_v45 = vpack.c.bf16 %v6612_v58, %v6612_v58 }
0x145f   : > { %v7779_v44 = vpack.c.bf16 %v6563_v61, %v6523_v46  ;;  %v6332_v39 = vsel %vm12512_vm13, %v12511_v1, %v8831_v49  ;;  %7777 = vmatprep.subr.msk.bf16.mxu0 %vm12482_vm10, %v7776_v35  ;;  %vm12513_vm11 = vmmov %vm12512_vm13  ;;  %vm12514_vm15 = vcmask 261120   ;;  %v8867_v60 = vunpack.i.h.bf16 %v8865_v8 }
0x1460   : > { %v6333_v23 = vsel %vm12513_vm11, %v8831_v49, %v8832_v37  ;;  %v6372_v53 = vsel %vm12514_vm15, %v8797_v11, %v8836_v13  ;;  %vm12515_vm1 = vmmov %vm12514_vm15  ;;  %v8866_v9 = vunpack.i.l.bf16 %v8865_v8  ;;  %v8840_v17 = vpop.permute.xlu0 %8839  ;;  %vm12516_vm10 = vcmask 1043456  }
0x1461   : > { %v6373_v52 = vsel %vm12515_vm1, %v8836_v13, %v8837_v63  ;;  %v7787_v22 = vpack.c.bf16 %v6372_v53, %v6332_v39  ;;  %v8842_v49 = vunpack.i.h.bf16 %v8840_v17  ;;  %v8841_v24 = vunpack.i.l.bf16 %v8840_v17  ;;  %vm12517_vm8 = vmmov %vm12513_vm11 }
0x1462   : > { %v7784_v38 = vpack.c.bf16 %v6373_v52, %v6333_v23  ;;  %7780 = vmatpush1.bf16.msk.msra.mxu0 %vm12484_vm3, %v7779_v44  ;;  %v8870_v26 = vpop.permute.xlu1 %8869  ;;  %v6334_v61 = vsel %vm12517_vm8, %v8832_v37, %v8866_v9  ;;  %vm12518_vm5 = vmmov %vm12517_vm8  ;;  %vm12522_vm11 = vcmask 252928   ;;  %vm12526_vm8 = vcmask 588800  }
0x1463   : > { %7781 = vmatprep.subr.msk.bf16.mxu0 %vm12516_vm10, %v6652_v45  ;;  %v8872_v15 = vunpack.i.h.bf16 %v8870_v26  ;;  %v8871_v11 = vunpack.i.l.bf16 %v8870_v26  ;;  %v6335_v42 = vsel %vm12518_vm5, %v8866_v9, %v8867_v60  ;;  %vm12519_vm12 = vmmov %vm12516_vm10  ;;  %v6404_v1 = vsel %vm12522_vm11, %v8802_v48, %v8841_v24 }
0x1464   : > { %7785 = vmatprep.subr.msk.bf16.mxu1 %vm12384_vm9, %v7784_v38  ;;  %v8845_v35 = vpop.permute.xlu0 %8844  ;;  %v6667_v32 = vsel %vm12519_vm12, %v6651_v18, 0  ;;  %vm12520_vm3 = vmmov %vm12515_vm1  ;;  %vm12527_vm5 = vnez %v12241_v7  ;;  %vm12528_vm12 = vcmask 1039360  }
0x1465   : > { %7788 = vmatpush1.bf16.msk.msra.mxu1 %vm10676_vm0, %v7787_v22  ;;  %v6374_v58 = vsel %vm12520_vm3, %v8837_v63, %v8871_v11  ;;  %vm12521_vm13 = vmmov %vm12515_vm1  ;;  %v8847_v57 = vunpack.i.h.bf16 %v8845_v35  ;;  %v8846_v46 = vunpack.i.l.bf16 %v8845_v35  ;;  %vm12524_vm1 = vcmask 7168  }
0x1466   : > { %v6375_v10 = vsel %vm12521_vm13, %v8871_v11, %v8872_v15  ;;  %6734 = vmatpush1.bf16.msra.mxu0 %v6667_v32  ;;  %v7813_v27 = vpack.c.bf16 %v6374_v58, %v6334_v61  ;;  %v8875_v44 = vpop.permute.xlu1 %8874  ;;  %vm12523_vm15 = vmmov %vm12522_vm11  ;;  %vm12530_vm3 = vnez %v12244_v34 }
0x1467   : > { %v7810_v13 = vpack.c.bf16 %v6375_v10, %v6335_v42  ;;  %v6405_v37 = vsel %vm12523_vm15, %v8841_v24, %v8842_v49  ;;  %v6444_v39 = vsel %vm12524_vm1, %v8807_v43, %v8846_v46  ;;  %vm12525_vm10 = vmmov %vm12524_vm1  ;;  %v8877_v14 = vunpack.i.h.bf16 %v8875_v44 }
0x1468   : > { %v6445_v63 = vsel %vm12525_vm10, %v8846_v46, %v8847_v57  ;;  %v7793_v18 = vpack.c.bf16 %v6444_v39, %v6404_v1  ;;  %v8850_v23 = vpop.permute.xlu0 %8849  ;;  %v8876_v45 = vunpack.i.l.bf16 %v8875_v44  ;;  %vm12531_vm13 = vmmov %vm12522_vm11  ;;  %vm12533_vm10 = vnez %v12248_v59  ;;  %v12555_v39 = vld [vmem:[#allocation59_spill] sm:$0xff] }
0x1469   : > { %v7790_v8 = vpack.c.bf16 %v6445_v63, %v6405_v37  ;;  %7811 = vmatprep.subr.msk.bf16.mxu0 %vm10818_vm6, %v7810_v13  ;;  %7782 = vmatmul.mubr.msk.bf16.vlgmr.msra.gmra.mrb[68].mxu0 %vm12526_vm8, %v11634_v2  ;;  %v8852_v48 = vunpack.i.h.bf16 %v8850_v23  ;;  %v8851_v53 = vunpack.i.l.bf16 %v8850_v23  ;;  %vm12529_vm6 = vmmov %vm12528_vm12 }
0x146a   : > { %7814 = vmatpush1.bf16.msk.msra.mxu0 %vm10832_vm14, %v7813_v27  ;;  %6839 = vmatprep.mubr.bf16.mxu0 %v12271_v25  ;;  %v8880_v3 = vpop.permute.xlu1 %8879  ;;  %v6406_v7 = vsel %vm12531_vm13, %v8842_v49, %v8876_v45  ;;  %v6407_v9 = vsel %vm12522_vm11, %v8876_v45, %v8877_v14  ;;  %vm12532_vm15 = vmmov %vm12524_vm1 }
0x146b   : > { %7791 = vmatprep.subr.msk.bf16.mxu1 %vm12527_vm5, %v7790_v8  ;;  %v6485_v12 = vsel %vm12528_vm12, %v8817_v6, %v8851_v53  ;;  %v6486_v43 = vsel %vm12529_vm6, %v8851_v53, %v8852_v48  ;;  %v8882_v52 = vunpack.i.h.bf16 %v8880_v3  ;;  %v8881_v38 = vunpack.i.l.bf16 %v8880_v3  ;;  %vm12534_vm8 = vmmov %vm12529_vm6 }
0x146c   : > { %7794 = vmatpush1.bf16.msk.msra.mxu1 %vm12530_vm3, %v7793_v18  ;;  %v7796_v22 = vpack.c.bf16 %v6486_v43, %v11481_v4  ;;  %v7799_v60 = vpack.c.bf16 %v6485_v12, %v11465_v28  ;;  %v8855_v25 = vpop.permute.xlu0 %8854  ;;  %vm12535_vm5 = vmmov %vm12529_vm6  ;;  %vm12536_vm12 = vcmask 793600   ;;  %v9126_v12 = vmov 1966171168  }
0x146d   : > { %v6446_v31 = vsel %vm12532_vm15, %v8847_v57, %v8881_v38  ;;  %v6447_v6 = vsel %vm12524_vm1, %v8881_v38, %v8882_v52  ;;  %v8856_v24 = vunpack.i.l.bf16 %v8855_v25  ;;  %v8857_v15 = vunpack.i.h.bf16 %v8855_v25  ;;  %vm12538_vm6 = vmmov %vm12536_vm12 }
0x146e   : > { %v7816_v17 = vpack.c.bf16 %v6447_v6, %v6407_v9  ;;  %v7819_v26 = vpack.c.bf16 %v6446_v31, %v6406_v7  ;;  %7797 = vmatprep.subr.msk.bf16.mxu1 %vm12533_vm10, %v7796_v22  ;;  %v6480_v34 = vpop.permute.xlu1 %6479  ;;  %vm12542_vm13 = vmmov %vm12538_vm6  ;;  %vm12544_vm15 = vcmask 777216   ;;  %v6869_v43 = vunpack.c.l.s4 %v9126_v12 }
0x146f   : > { %v6496_v4 = vsel %vm12534_vm8, %v6480_v34, 0.0  ;;  %v6487_v28 = vsel %vm12535_vm5, %v8852_v48, %v6480_v34  ;;  %v6525_v59 = vsel %vm12536_vm12, %v8822_v47, %v8856_v24  ;;  %v6526_v19 = vsel %vm12538_vm6, %v8856_v24, %v8857_v15  ;;  %vm12543_vm11 = vmmov %vm12538_vm6 }
0x1470   : > { %7800 = vmatpush1.bf16.msk.msra.mxu1 %vm12415_vm4, %v7799_v60  ;;  %v7822_v49 = vpack.c.bf16 %v6496_v4, %v11490_v20  ;;  %v8860_v11 = vpop.permute.xlu0 %8859  ;;  %7817 = vmatprep.subr.msk.bf16.mxu0 %vm10859_vm7, %v7816_v17  ;;  %vm12537_vm4 = vnez %v12290_v5  ;;  %v7825_v20 = vpack.c.bf16 %v6487_v28, %v11488_v55  ;;  %vm12539_vm7 = vcmask 785408   ;;  %vm12545_vm1 = vmmov %vm12544_vm15 }
0x1471   : > { %v8862_v61 = vunpack.i.h.bf16 %v8860_v11  ;;  %v8861_v42 = vunpack.i.l.bf16 %v8860_v11  ;;  %7820 = vmatpush1.bf16.msk.msra.mxu0 %vm10874_vm2, %v7819_v26  ;;  %vm12540_vm3 = vmmov %vm12539_vm7  ;;  %vm12541_vm2 = vnez %v12298_v36  ;;  %vm12547_vm8 = vnez %v12229_v33 }
0x1472   : > { %v6520_v35 = vpop.permute.xlu1 %6519  ;;  %7823 = vmatprep.subr.msk.bf16.mxu0 %vm12537_vm4, %v7822_v49  ;;  %vm12546_vm10 = vmmov %vm12540_vm3  ;;  %vm12548_vm5 = vnez %v12233_v29  ;;  %v6870_v60 = vunpack.c.0.s8 %v6869_v43  ;;  %v12561_v25 = vlaneseq }
0x1473   : > { %v6565_v41 = vsel %vm12539_vm7, %v8827_v0, %v8861_v42  ;;  %v6566_v32 = vsel %vm12540_vm3, %v8861_v42, %v8862_v61  ;;  %v6527_v5 = vsel %vm12542_vm13, %v8857_v15, %v6520_v35  ;;  %v6536_v47 = vsel %vm12543_vm11, %v6520_v35, 0.0  ;;  %vm12550_vm12 = vmmov %vm12545_vm1 }
0x1474   : > { %v7802_v51 = vpack.c.bf16 %v6566_v32, %v6526_v19  ;;  %v7805_v58 = vpack.c.bf16 %v6565_v41, %v6525_v59  ;;  %v8885_v10 = vpop.permute.xlu0 %8884  ;;  %vm12551_vm4 = vmmov %vm12545_vm1  ;;  %vm12554_vm7 = vnez %v12278_v56  ;;  %vm12556_vm3 = vnez %v12555_v39 }
0x1475   : > { %v8887_v21 = vunpack.i.h.bf16 %v8885_v10  ;;  %v8886_v57 = vunpack.i.l.bf16 %v8885_v10  ;;  %7826 = vmatpush1.bf16.msk.msra.mxu0 %vm12541_vm2, %v7825_v20 }
0x1476   : > { %7803 = vmatprep.subr.msk.bf16.mxu1 %vm12384_vm9, %v7802_v51  ;;  %v6560_v55 = vpop.permute.xlu1 %6559  ;;  %vm12549_vm9 = vnez %v12301_v62 }
0x1477   : > { %v6597_v54 = vsel %vm12544_vm15, %v11669_v16, %v8886_v57  ;;  %v6598_v0 = vsel %vm12545_vm1, %v8886_v57, %v8887_v21  ;;  %v6567_v46 = vsel %vm12546_vm10, %v8862_v61, %v6560_v55  ;;  %v7828_v13 = vpack.c.bf16 %v6560_v55, %v6536_v47  ;;  %7806 = vmatpush1.bf16.msk.msra.mxu1 %vm10676_vm0, %v7805_v58 }
0x1478   : > { %v6614_v36 = vsel %vm12547_vm8, %v6598_v0, 0.0  ;;  %v7831_v27 = vpack.c.bf16 %v6567_v46, %v6527_v5  ;;  %v6613_v30 = vsel %vm12548_vm5, %v6597_v54, 0.0  ;;  %vm12552_vm0 = vcmask 1043456  }
0x1479   : > { %v6654_v44 = vpack.c.bf16 %v6614_v36, %v6614_v36  ;;  %7829 = vmatprep.subr.msk.bf16.mxu0 %vm12549_vm9, %v7828_v13  ;;  %v6653_v16 = vpack.c.bf16 %v6613_v30, %v6613_v30  ;;  %vm12553_vm6 = vmmov %vm12552_vm0 }
0x147a   : > { %v6592_v1 = vpop.permute.xlu1 %6591  ;;  %7832 = vmatpush1.bf16.msk.msra.mxu0 %vm10832_vm14, %v7831_v27  ;;  %vm12557_vm2 = vmmov %vm12552_vm0  ;;  %vm12558_vm14 = vcmask 588800  }
0x147b   : > { %v6599_v37 = vsel %vm12550_vm12, %v8887_v21, %v6592_v1  ;;  %v6608_v40 = vsel %vm12551_vm4, %v6592_v1, 0.0  ;;  %7807 = vmatprep.subr.msk.bf16.mxu1 %vm12552_vm0, %v6654_v44  ;;  %v6673_v33 = vsel %vm12553_vm6, %v6653_v16, 0  ;;  %vm12559_vm13 = vmmov %vm12552_vm0 }
0x147c   : > { %v6615_v29 = vsel %vm12554_vm7, %v6599_v37, 0.0  ;;  %v6616_v62 = vsel %vm12556_vm3, %v6608_v40, 0.0  ;;  %6775 = vmatpush1.bf16.msra.mxu1 %v6673_v33  ;;  %vm12560_vm11 = vmmov %vm12558_vm14 }
0x147d   : > { %v6655_v63 = vpack.c.bf16 %v6615_v29, %v6615_v29  ;;  %v6656_v8 = vpack.c.bf16 %v6616_v62, %v6616_v62 }
0x147f   : > { %7833 = vmatprep.subr.msk.bf16.mxu0 %vm12557_vm2, %v6656_v8  ;;  %7808 = vmatmul.mubr.msk.bf16.vlgmr.msra.gmra.mrb[80].mxu1 %vm12558_vm14, %v11634_v2  ;;  %v6679_v50 = vsel %vm12559_vm13, %v6655_v63, 0 }
0x1480   : > { %6816 = vmatpush1.bf16.msra.mxu0 %v6679_v50 }
0x1483   : > { %7834 = vmatmul.mubr.msk.bf16.vlgmr.msra.gmra.mrb[72].mxu0 %vm12560_vm11, %v11634_v2  ;;  %v6872_v2 = vshrl.u32 %v12561_v25, 7 }
0x1485   : > { %v6873_v7 = vsub.s32 %v6870_v60, %v6872_v2 }
0x152b   : > { %v6718_v18 = vpop.f32.mrb[76].mxu1 }
0x152c   : > { %8929 = vtanh.f32 %v6718_v18  ;;  %v6720_v56 = vpop.f32.mrb[77].mxu1 }
0x152d   : > { %8931 = vtanh.f32 %v6720_v56  ;;  %v6722_v23 = vpop.f32.mrb[78].mxu1 }
0x152e   : > { %v6723_v14 = vpop.f32.mrb[79].mxu1 }
0x1536   : > { %v8930_v45 = vpop.eup %8929 }
0x1537   : > { %v8932_v48 = vpop.eup %8931 }
0x1538   : > { %v6864_v53 = vcombine.low %v8930_v45, %v8932_v48 }
0x153a   : > { %v6874_v6 = vrot.slane %v6864_v53, %v6873_v7 }
0x153c   : > { %v6759_v3 = vpop.f32.mrb[68].mxu0 }
0x153d   : > { %8933 = vtanh.f32 %v6759_v3  ;;  %v6761_v52 = vpop.f32.mrb[69].mxu0 }
0x153e   : > { %8935 = vtanh.f32 %v6761_v52  ;;  %v6763_v38 = vpop.f32.mrb[70].mxu0 }
0x153f   : > { %v6764_v22 = vpop.f32.mrb[71].mxu0 }
0x1547   : > { %v8934_v9 = vpop.eup %8933 }
0x1548   : > { %v8936_v31 = vpop.eup %8935 }
0x1549   : > { %v6865_v17 = vcombine.low %v8934_v9, %v8936_v31 }
0x154b   : > { %v6881_v26 = vrot.slane %v6865_v17, %v6873_v7 }
0x154d   : > { %v6896_v24 = vcombine.low %v6874_v6, %v6881_v26 }
0x154f   : > { %v6904_v21 = vrot.slane %v6896_v24, %v6873_v7 }
0x1552   : > { %v6800_v34 = vpop.f32.mrb[80].mxu1 }
0x1553   : > { %8937 = vtanh.f32 %v6800_v34  ;;  %v6802_v15 = vpop.f32.mrb[81].mxu1 }
0x1554   : > { %8939 = vtanh.f32 %v6802_v15  ;;  %v6804_v4 = vpop.f32.mrb[82].mxu1 }
0x1555   : > { %v6805_v28 = vpop.f32.mrb[83].mxu1 }
0x1556   : > { %v6841_v49 = vpop.f32.mrb[72].mxu0 }
0x1557   : > { %8941 = vtanh.f32 %v6841_v49  ;;  %v6843_v11 = vpop.f32.mrb[73].mxu0 }
0x1558   : > { %8943 = vtanh.f32 %v6843_v11  ;;  %v6845_v61 = vpop.f32.mrb[74].mxu0 }
0x1559   : > { %v6846_v42 = vpop.f32.mrb[75].mxu0 }
0x155d   : > { %v8938_v59 = vpop.eup %8937 }
0x155e   : > { %v8940_v35 = vpop.eup %8939 }
0x155f   : > { %v6866_v19 = vcombine.low %v8938_v59, %v8940_v35 }
0x1561   : > { %v8942_v20 = vpop.eup %8941  ;;  %v6888_v32 = vrot.slane %v6866_v19, %v6873_v7 }
0x1562   : > { %v8944_v41 = vpop.eup %8943 }
0x1563   : > { %v6867_v51 = vcombine.low %v8942_v20, %v8944_v41 }
0x1565   : > { %v6895_v58 = vrot.slane %v6867_v51, %v6873_v7 }
0x1567   : > { %v6897_v10 = vcombine.low %v6888_v32, %v6895_v58 }
0x1569   : > { %v6911_v57 = vrot.slane %v6897_v10, %v6873_v7 }
0x156b   : > { %v6912_v5 = vcombine.low %v6904_v21, %v6911_v57 }
0x156d   : > { %6914 = vst [vmem:[%s1498_s1] sm:$0xff] %v6912_v5 }
0x156e   : > { %8986 = shalt.err (!%p8983_p7)
}
0x156f   : > { %s8987_s18 = scalar_lea.hbm %s11801_s23, 128  ;;  %s8991_s13 = scalar_lea.hbm %s9386_s12, 256 }
0x1570   : > { %p8988_p8 = scmp.ne.s32.totalorder %s11801_s23, %s8987_s18  ;;  %p8992_p1 = scmp.lt.u32.totalorder %s11801_s23, %s9386_s12 }
0x1571   : > { %p8993_p0 = scmp.lt.u32.totalorder %s8991_s13, %s8987_s18  ;;  %p8995_p6 = scmp.lt.u32.totalorder %s8987_s18, %s11801_s23 }
0x1572   : > { %p8989_p11 = pnand %p8988_p8, %p12562_p9 }
0x1573   : > { %p8994_p5 = por %p8993_p0, %p8992_p1 }
0x1574   : > { %p8990_p13 = pneg %p8989_p11 }
0x1575   : > { %p8996_p10 = por %p8995_p6, %p8994_p5 }
0x1577   : > { %p8997_p12 = pnand %p8996_p10, %p8990_p13 }
0x1579   : > { %9000 = shalt.err (!%p8997_p12)
}
0x157a   : > { %8025 = dma.vmem_to_hbm [thread:$0]  (%p12562_p9), %s11803_s26, 128, %s11801_s23, %s6916_s5  }
0x157b PF: > { %s12563_s3 = sld [smem:[#allocation49_spill]]  ;;  %p8037_p2 = scmp.ge.s32.totalorder %s9039_s22, 2 }
0x157c   : > { %s6942_s28 = sand.u32 1, %s9027_s15  }
0x157d   : > { %s6943_s8 = scalar_lea.sflag [#allocation4], %s6942_s28 }
0x1581   : > { %p12564_p3 = scmp.ne.s32.totalorder %s12563_s3, 0 }
0x1583   : > { %p8032_p4 = pnand %p8037_p2, %p12564_p3 }
0x1585   : > { %9022 = dma.done.wait (!%p8032_p4), %s6943_s8, 128  }
0x1586   : > { %9024 = vsyncadd (!%p8032_p4), %s6943_s8, 4294967168  ;;  %s12565_s22 = sld [smem:[#allocation47_spill]]  ;;  %s12566_s1 = sld [smem:[#allocation46_spill]] }
0x1587   : > { %s12567_s18 = sld [smem:[#allocation48_spill]]  ;;  %s12568_s15 = smov %s9031_s16 }
0x158c   : > { %p112_p7 = scmp.ge.s32.totalorder %s12565_s22, 4   ;;  %s12569_s16 = smov %s12566_s1 }
0x158e   :  { %114 = sbr.rel (!%p112_p7) target bundleno = 107 (0x6b), region = 310 }
0x1595   :  { %6948 = vsyncpa [#allocation3], 1 }
0x1596   :  { %6950 = vsyncpa [#allocation3 + $0x1], 1 }
0x1597   :  { %6951 = vsyncpa [#allocation4], 1 }
0x1598   :  { %6953 = vsyncpa [#allocation4 + $0x1], 1 }

</bundles_post_ra>
